<compile_context>
chip_gen: v5e
topology: v5e:2x2
jax: 0.10.0
libtpu: 0.0.40
codegen_flags: <defaults>
</compile_context>

<pallas_src>
import functools

import numpy as np
import jax
import jax.numpy as jnp
from jax.experimental import pallas as pl
from jax.experimental.pallas import tpu as pltpu

NEG_SLOPE = 0.01                    # nn.LeakyReLU default negative_slope
COMPUTE_DTYPE = jnp.bfloat16        # MXU operand dtype (f32 accumulation)

K, STRIDE, PAD = 5, 2, 2
FC_HIDDEN = 1024
HIDDEN_TILE = 256                   # fc1/fc2 hidden-axis tile (grid dimension)
LANE = 128


def _conv_out_len(lin):
    return (lin + 2 * PAD - K) // STRIDE + 1


def _leaky(x):
    return jnp.where(x >= 0, x, NEG_SLOPE * x)


# ----------------------------------------------------------------------------
# In-kernel conv layer: stride-2/pad-2/k=5 Conv1d + LeakyReLU via im2col.
# act: (Lin, B, Cin) f32  ->  (Lout, B, Cout) f32
# ----------------------------------------------------------------------------
def _conv_layer(act, w_ref, b_ref):
    lin, b, cin = act.shape
    cout = w_ref.shape[-1]
    lout = _conv_out_len(lin)

    zrow = jnp.zeros((1, b, cin), act.dtype)
    if lin % 2:                       # make position axis even; the extra zero row
        act = jnp.concatenate([act, zrow], axis=0)    # is the first right-side pad
    pairs = act.reshape(lout, 2, b, cin)              # free: leading-dim split
    ev, od = pairs[:, 0], pairs[:, 1]                 # input positions 2l / 2l+1

    taps = [
        jnp.concatenate([zrow, ev[:lout - 1]], axis=0),   # input position 2l-2
        jnp.concatenate([zrow, od[:lout - 1]], axis=0),   # input position 2l-1
        ev,                                               # input position 2l
        od,                                               # input position 2l+1
        jnp.concatenate([ev[1:], zrow], axis=0),          # input position 2l+2
    ]
    slab = jnp.concatenate(taps, axis=-1)                 # (Lout, B, K*Cin)
    slab = slab.reshape(lout * b, K * cin).astype(COMPUTE_DTYPE)

    z = jnp.dot(slab, w_ref[...], preferred_element_type=jnp.float32)
    z = _leaky(z + b_ref[...])                            # (Lout*B, Cout) f32
    return z.reshape(lout, b, cout)


# ----------------------------------------------------------------------------
# Fused kernel.  Grid axis j tiles the fc hidden dimension.
#   j == 0      : run the whole conv stack once -> persistent VMEM activation.
#   every j     : h_tile = act @ fc1w_tile (+bias, LeakyReLU); y += h_tile @ fc2w_tile
#   last j      : add fc2 bias and store the (lane-dense) output.
# ----------------------------------------------------------------------------
def _nn1_kernel(x_ref, w1, w2, w3, w4, b1, b2, b3, b4,
                fc1w_ref, fc1b_ref, fc2w_ref, fc2b_ref,
                o_ref, act_scr, y_acc, *, out_len):
    j = pl.program_id(0)

    @pl.when(j == 0)
    def _():
        act = x_ref[...]                              # (L0, B, Cin) f32
        act = _conv_layer(act, w1, b1)                # (L1, B,  64)
        act = _conv_layer(act, w2, b2)                # (L2, B, 128)
        act = _conv_layer(act, w3, b3)                # (L3, B, 256)
        act = _conv_layer(act, w4, b4)                # (out_len, B, 512)
        # torch's NCL channel-major flatten is folded into fc1_w's row order,
        # so positions are simply laid out along lanes: (B, out_len*512).
        for l in range(out_len):
            act_scr[:, l * 512:(l + 1) * 512] = act[l].astype(COMPUTE_DTYPE)
        y_acc[...] = jnp.zeros_like(y_acc)

    # fc1 hidden tile (+ LeakyReLU) and fc2 partial accumulation (f32).
    h = jnp.dot(act_scr[...], fc1w_ref[...], preferred_element_type=jnp.float32)
    h = _leaky(h + fc1b_ref[...]).astype(COMPUTE_DTYPE)
    y_acc[...] += jnp.dot(h, fc2w_ref[...], preferred_element_type=jnp.float32)

    @pl.when(j == pl.num_programs(0) - 1)
    def _():
        o_ref[...] = (y_acc[...] + fc2b_ref[...]).astype(o_ref.dtype)


# ----------------------------------------------------------------------------
# Host-side parameter construction (torch layouts -> kernel layouts, once).
# ----------------------------------------------------------------------------
def init_params(key, input_length, num_col=4):
    output_length = (input_length - 1) // 16 + 1
    lane_out = -(-input_length // LANE) * LANE

    conv_dims = [(num_col, 64), (64, 128), (128, 256), (256, 512)]
    params = {"conv_w": [], "conv_b": []}
    lin = input_length
    for cin, cout in conv_dims:
        key, kw, kb = jax.random.split(key, 3)
        fan_in = cin * K
        w_torch = jax.random.normal(kw, (cout, cin, K), jnp.float32) / np.sqrt(fan_in)
        b_torch = jax.random.normal(kb, (cout,), jnp.float32) * 0.01
        # kernel layout: (K*Cin, Cout), rows ordered (tap, cin) to match the slab.
        params["conv_w"].append(
            jnp.transpose(w_torch, (2, 1, 0)).reshape(K * cin, cout).astype(COMPUTE_DTYPE))
        params["conv_b"].append(b_torch.reshape(1, cout))
        lin = _conv_out_len(lin)
    assert lin == output_length, (lin, output_length)

    fc_in = output_length * 512
    key, k1, k2, k3, k4 = jax.random.split(key, 5)
    fc1_w_torch = jax.random.normal(k1, (FC_HIDDEN, fc_in), jnp.float32) / np.sqrt(fc_in)
    fc1_b_torch = jax.random.normal(k2, (FC_HIDDEN,), jnp.float32) * 0.01
    fc2_w_torch = jax.random.normal(k3, (input_length, FC_HIDDEN), jnp.float32) / np.sqrt(FC_HIDDEN)
    fc2_b_torch = jax.random.normal(k4, (input_length,), jnp.float32) * 0.01

    # Fold torch's channel-major .view(-1, out_len*512) into fc1_w row order:
    #   fc1w_kernel[l*512 + c, k] = fc1_w_torch[k, c*output_length + l]
    params["fc1_w"] = (jnp.transpose(
        fc1_w_torch.reshape(FC_HIDDEN, 512, output_length), (2, 1, 0))
        .reshape(fc_in, FC_HIDDEN).astype(COMPUTE_DTYPE))
    params["fc1_b"] = fc1_b_torch.reshape(1, FC_HIDDEN)

    # fc2 transposed and lane-padded to a multiple of 128 (lane-dense stores).
    fc2_w = jnp.zeros((FC_HIDDEN, lane_out), jnp.float32)
    fc2_w = fc2_w.at[:, :input_length].set(fc2_w_torch.T)
    fc2_b = jnp.zeros((1, lane_out), jnp.float32).at[0, :input_length].set(fc2_b_torch)
    params["fc2_w"] = fc2_w.astype(COMPUTE_DTYPE)
    params["fc2_b"] = fc2_b
    return params


def _block_vmem_bytes(shape, dtype):
    """Bytes of one block once resident in VMEM (last two dims tile-padded)."""
    itemsize = np.dtype(dtype).itemsize
    sub = {4: 8, 2: 16, 1: 32}[itemsize]
    s = list(shape) if len(shape) >= 2 else [1] + list(shape)
    s[-1] = -(-s[-1] // LANE) * LANE
    s[-2] = -(-s[-2] // sub) * sub
    return int(np.prod(s)) * itemsize


# ----------------------------------------------------------------------------
# Forward pass (mirrors NN1.forward), single pallas_call with a hidden-axis grid.
# ----------------------------------------------------------------------------
@jax.jit
def nn1_forward(params, x):
    """x: (B, num_col, L) float32 -> (B, L) float32."""
    B, C, L = x.shape
    out_len = (L - 1) // 16 + 1
    flat = out_len * 512
    lane_out = -(-L // LANE) * LANE
    tn = HIDDEN_TILE
    n_tiles = FC_HIDDEN // tn

    x3d = jnp.transpose(x, (2, 0, 1))                    # (L, B, C), tiny one-off op

    const_ops = [x3d, *params["conv_w"], *params["conv_b"]]
    const_specs = [pl.BlockSpec(op.shape, (lambda j, n=op.ndim: (0,) * n))
                   for op in const_ops]
    fc_specs = [
        pl.BlockSpec((flat, tn), lambda j: (0, j)),       # fc1_w hidden tile
        pl.BlockSpec((1, tn), lambda j: (0, j)),          # fc1_b hidden tile
        pl.BlockSpec((tn, lane_out), lambda j: (j, 0)),   # fc2_w hidden tile
        pl.BlockSpec((1, lane_out), lambda j: (0, 0)),    # fc2_b (constant block)
    ]
    operands = const_ops + [params["fc1_w"], params["fc1_b"],
                            params["fc2_w"], params["fc2_b"]]
    in_specs = const_specs + fc_specs

    # Minimal-but-safe VMEM budget: double-buffered blocks + scratch + headroom.
    vmem_bytes = sum(2 * _block_vmem_bytes(s.block_shape, op.dtype)
                     for op, s in zip(operands, in_specs))
    vmem_bytes += 2 * _block_vmem_bytes((B, lane_out), jnp.float32)     # output block
    vmem_bytes += _block_vmem_bytes((B, flat), COMPUTE_DTYPE)           # act scratch
    vmem_bytes += _block_vmem_bytes((B, lane_out), jnp.float32)         # y accumulator
    vmem_bytes += 8 * 1024 * 1024                                       # compiler headroom

    # Cost hint so XLA can schedule around the (otherwise opaque) custom call.
    flops = 0
    lin, cin = L, C
    for cout in (64, 128, 256, 512):
        lout = _conv_out_len(lin)
        flops += 2 * lout * B * (K * cin) * cout
        lin, cin = lout, cout
    flops += 2 * B * flat * FC_HIDDEN + 2 * B * FC_HIDDEN * lane_out
    bytes_accessed = sum(int(np.prod(op.shape)) * op.dtype.itemsize for op in operands)
    bytes_accessed += B * lane_out * 4

    kernel = functools.partial(_nn1_kernel, out_len=out_len)
    out = pl.pallas_call(
        kernel,
        out_shape=jax.ShapeDtypeStruct((B, lane_out), jnp.float32),
        grid=(n_tiles,),
        in_specs=in_specs,
        out_specs=pl.BlockSpec((B, lane_out), lambda j: (0, 0)),
        scratch_shapes=[pltpu.VMEM((B, flat), COMPUTE_DTYPE),    # flattened conv acts
                        pltpu.VMEM((B, lane_out), jnp.float32)], # fc2 accumulator
        compiler_params=pltpu.CompilerParams(
            dimension_semantics=("arbitrary",),   # hidden axis is a reduction into y
            vmem_limit_bytes=int(vmem_bytes),
        ),
        cost_estimate=pl.CostEstimate(flops=int(flops), transcendentals=0,
                                      bytes_accessed=int(bytes_accessed)),
    )(*operands)
    return out[:, :L]


# ----------------------------------------------------------------------------
# Pure-JAX reference (same folded param layouts) for a correctness check.
# ----------------------------------------------------------------------------
def nn1_reference(params, x):
    B, C, L = x.shape
    act = jnp.transpose(x, (2, 0, 1))                     # (L, B, C)
    for w, b in zip(params["conv_w"], params["conv_b"]):
        lin, _, cin = act.shape
        lout = _conv_out_len(lin)
        padded = jnp.pad(act, ((PAD, PAD), (0, 0), (0, 0)))
        idx = STRIDE * jnp.arange(lout)[:, None] + jnp.arange(K)[None, :]
        patches = padded[idx]                             # (lout, K, B, cin)
        slab = jnp.transpose(patches, (0, 2, 1, 3)).reshape(lout, B, K * cin)
        z = jnp.einsum("lbk,kc->lbc", slab.astype(jnp.float32),
                       w.astype(jnp.float32)) + b
        act = jnp.where(z >= 0, z, NEG_SLOPE * z)
    flat = jnp.transpose(act, (1, 0, 2)).reshape(B, -1)
    h = flat @ params["fc1_w"].astype(jnp.float32) + params["fc1_b"]
    h = jnp.where(h >= 0, h, NEG_SLOPE * h)
    y = h @ params["fc2_w"].astype(jnp.float32) + params["fc2_b"]
    return y[:, :L]


if __name__ == "__main__":
    input_length = 64
    num_col = 4
    batch = 2

    key = jax.random.PRNGKey(0)
    key, kx = jax.random.split(key)
    x = jax.random.normal(kx, (batch, num_col, input_length), jnp.float32)
    params = init_params(key, input_length, num_col=num_col)

    out = jax.block_until_ready(nn1_forward(params, x))
    assert out.shape == (batch, input_length), out.shape
    assert out.dtype == jnp.float32
    assert bool(jnp.all(jnp.isfinite(out)))

    ref = jax.block_until_ready(nn1_reference(params, x))
    np.testing.assert_allclose(np.asarray(out), np.asarray(ref), rtol=5e-2, atol=5e-2)

    print("KERNEL_OK")
</pallas_src>

<mosaic_0001>
module attributes {stable_mosaic.version = 11 : i64} {
  func.func @_nn1_kernel(%arg0: i32, %arg1: memref<64x2x4xf32, #tpu.memory_space<vmem>>, %arg2: memref<20x64xbf16, #tpu.memory_space<vmem>>, %arg3: memref<320x128xbf16, #tpu.memory_space<vmem>>, %arg4: memref<640x256xbf16, #tpu.memory_space<vmem>>, %arg5: memref<1280x512xbf16, #tpu.memory_space<vmem>>, %arg6: memref<1x64xf32, #tpu.memory_space<vmem>>, %arg7: memref<1x128xf32, #tpu.memory_space<vmem>>, %arg8: memref<1x256xf32, #tpu.memory_space<vmem>>, %arg9: memref<1x512xf32, #tpu.memory_space<vmem>>, %arg10: memref<2048x256xbf16, #tpu.memory_space<vmem>>, %arg11: memref<1x256xf32, #tpu.memory_space<vmem>>, %arg12: memref<256x128xbf16, #tpu.memory_space<vmem>>, %arg13: memref<1x128xf32, #tpu.memory_space<vmem>>, %arg14: memref<2x128xf32, #tpu.memory_space<vmem>>, %arg15: memref<2x2048xbf16, #tpu.memory_space<vmem>>, %arg16: memref<2x128xf32, #tpu.memory_space<vmem>>) attributes {dimension_semantics = [#tpu.dimension_semantics<arbitrary>], iteration_bounds = array<i64: 4>, scalar_prefetch = 0 : i64, scratch_operands = 2 : i64, tpu.core_type = #tpu.core_type<tc>, window_params = [{pipeline_mode = #tpu.pipeline_mode<synchronous>, transform_indices = @transform_0, window_bounds = array<i64: 64, 2, 4>}, {pipeline_mode = #tpu.pipeline_mode<synchronous>, transform_indices = @transform_1, window_bounds = array<i64: 20, 64>}, {pipeline_mode = #tpu.pipeline_mode<synchronous>, transform_indices = @transform_2, window_bounds = array<i64: 320, 128>}, {pipeline_mode = #tpu.pipeline_mode<synchronous>, transform_indices = @transform_3, window_bounds = array<i64: 640, 256>}, {pipeline_mode = #tpu.pipeline_mode<synchronous>, transform_indices = @transform_4, window_bounds = array<i64: 1280, 512>}, {pipeline_mode = #tpu.pipeline_mode<synchronous>, transform_indices = @transform_5, window_bounds = array<i64: 1, 64>}, {pipeline_mode = #tpu.pipeline_mode<synchronous>, transform_indices = @transform_6, window_bounds = array<i64: 1, 128>}, {pipeline_mode = #tpu.pipeline_mode<synchronous>, transform_indices = @transform_7, window_bounds = array<i64: 1, 256>}, {pipeline_mode = #tpu.pipeline_mode<synchronous>, transform_indices = @transform_8, window_bounds = array<i64: 1, 512>}, {transform_indices = @transform_9, window_bounds = array<i64: 2048, 256>}, {transform_indices = @transform_10, window_bounds = array<i64: 1, 256>}, {transform_indices = @transform_11, window_bounds = array<i64: 256, 128>}, {pipeline_mode = #tpu.pipeline_mode<synchronous>, transform_indices = @transform_12, window_bounds = array<i64: 1, 128>}, {pipeline_mode = #tpu.pipeline_mode<synchronous>, transform_indices = @transform_13, window_bounds = array<i64: 2, 128>}]} {
    %c0_i32 = arith.constant 0 : i32
    %0 = arith.cmpi eq, %arg0, %c0_i32 : i32
    %1 = arith.extui %0 : i1 to i32
    %c0_i32_0 = arith.constant 0 : i32
    %2 = arith.cmpi ne, %1, %c0_i32_0 : i32
    scf.if %2 {
      %c0_16 = arith.constant 0 : index
      %c0_17 = arith.constant 0 : index
      %c0_18 = arith.constant 0 : index
      %23 = vector.load %arg1[%c0_16, %c0_17, %c0_18] : memref<64x2x4xf32, #tpu.memory_space<vmem>>, vector<64x2x4xf32>
      %cst_19 = arith.constant 0.000000e+00 : f32
      %24 = vector.broadcast %cst_19 : f32 to vector<1x2x4xf32>
      %25 = vector.shape_cast %23 : vector<64x2x4xf32> to vector<32x2x2x4xf32>
      %26 = vector.extract_strided_slice %25 {offsets = [0, 0, 0, 0], sizes = [32, 1, 2, 4], strides = [1, 1, 1, 1]} : vector<32x2x2x4xf32> to vector<32x1x2x4xf32>
      %27 = vector.shape_cast %26 : vector<32x1x2x4xf32> to vector<32x2x4xf32>
      %28 = vector.extract_strided_slice %25 {offsets = [0, 1, 0, 0], sizes = [32, 1, 2, 4], strides = [1, 1, 1, 1]} : vector<32x2x2x4xf32> to vector<32x1x2x4xf32>
      %29 = vector.shape_cast %28 : vector<32x1x2x4xf32> to vector<32x2x4xf32>
      %30 = vector.extract_strided_slice %27 {offsets = [0, 0, 0], sizes = [31, 2, 4], strides = [1, 1, 1]} : vector<32x2x4xf32> to vector<31x2x4xf32>
      %31 = tpu.concatenate %24, %30 in 0 : vector<1x2x4xf32>, vector<31x2x4xf32> -> vector<32x2x4xf32>
      %32 = vector.extract_strided_slice %29 {offsets = [0, 0, 0], sizes = [31, 2, 4], strides = [1, 1, 1]} : vector<32x2x4xf32> to vector<31x2x4xf32>
      %33 = tpu.concatenate %24, %32 in 0 : vector<1x2x4xf32>, vector<31x2x4xf32> -> vector<32x2x4xf32>
      %34 = vector.extract_strided_slice %27 {offsets = [1, 0, 0], sizes = [31, 2, 4], strides = [1, 1, 1]} : vector<32x2x4xf32> to vector<31x2x4xf32>
      %35 = tpu.concatenate %34, %24 in 0 : vector<31x2x4xf32>, vector<1x2x4xf32> -> vector<32x2x4xf32>
      %36 = tpu.concatenate %31, %33, %27, %29, %35 in 2 : vector<32x2x4xf32>, vector<32x2x4xf32>, vector<32x2x4xf32>, vector<32x2x4xf32>, vector<32x2x4xf32> -> vector<32x2x20xf32>
      %37 = vector.shape_cast %36 : vector<32x2x20xf32> to vector<64x20xf32>
      %38 = arith.truncf %37 : vector<64x20xf32> to vector<64x20xbf16>
      %c0_20 = arith.constant 0 : index
      %c0_21 = arith.constant 0 : index
      %39 = vector.load %arg2[%c0_20, %c0_21] : memref<20x64xbf16, #tpu.memory_space<vmem>>, vector<20x64xbf16>
      %cst_22 = arith.constant dense<0.000000e+00> : vector<64x64xf32>
      %40 = tpu.matmul %38, %39, %cst_22 {dimension_numbers = #tpu.dot_dimension_numbers<[1], [0], [0], [1], [0, 0, 1, 1], [], []>} : vector<64x20xbf16>, vector<20x64xbf16>, vector<64x64xf32> -> vector<64x64xf32>
      %c0_23 = arith.constant 0 : index
      %c0_24 = arith.constant 0 : index
      %41 = vector.load %arg6[%c0_23, %c0_24] : memref<1x64xf32, #tpu.memory_space<vmem>>, vector<1x64xf32>
      %42 = vector.broadcast %41 : vector<1x64xf32> to vector<64x64xf32>
      %43 = arith.addf %40, %42 : vector<64x64xf32>
      %cst_25 = arith.constant 0.000000e+00 : f32
      %44 = vector.broadcast %cst_25 : f32 to vector<64x64xf32>
      %45 = arith.cmpf oge, %43, %44 : vector<64x64xf32>
      %cst_26 = arith.constant 0.00999999977 : f32
      %46 = vector.broadcast %cst_26 : f32 to vector<64x64xf32>
      %47 = arith.mulf %46, %43 : vector<64x64xf32>
      %48 = arith.select %45, %43, %47 : vector<64x64xi1>, vector<64x64xf32>
      %49 = vector.shape_cast %48 : vector<64x64xf32> to vector<32x2x64xf32>
      %cst_27 = arith.constant 0.000000e+00 : f32
      %50 = vector.broadcast %cst_27 : f32 to vector<1x2x64xf32>
      %51 = vector.shape_cast %49 : vector<32x2x64xf32> to vector<16x2x2x64xf32>
      %52 = vector.extract_strided_slice %51 {offsets = [0, 0, 0, 0], sizes = [16, 1, 2, 64], strides = [1, 1, 1, 1]} : vector<16x2x2x64xf32> to vector<16x1x2x64xf32>
      %53 = vector.shape_cast %52 : vector<16x1x2x64xf32> to vector<16x2x64xf32>
      %54 = vector.extract_strided_slice %51 {offsets = [0, 1, 0, 0], sizes = [16, 1, 2, 64], strides = [1, 1, 1, 1]} : vector<16x2x2x64xf32> to vector<16x1x2x64xf32>
      %55 = vector.shape_cast %54 : vector<16x1x2x64xf32> to vector<16x2x64xf32>
      %56 = vector.extract_strided_slice %53 {offsets = [0, 0, 0], sizes = [15, 2, 64], strides = [1, 1, 1]} : vector<16x2x64xf32> to vector<15x2x64xf32>
      %57 = tpu.concatenate %50, %56 in 0 : vector<1x2x64xf32>, vector<15x2x64xf32> -> vector<16x2x64xf32>
      %58 = vector.extract_strided_slice %55 {offsets = [0, 0, 0], sizes = [15, 2, 64], strides = [1, 1, 1]} : vector<16x2x64xf32> to vector<15x2x64xf32>
      %59 = tpu.concatenate %50, %58 in 0 : vector<1x2x64xf32>, vector<15x2x64xf32> -> vector<16x2x64xf32>
      %60 = vector.extract_strided_slice %53 {offsets = [1, 0, 0], sizes = [15, 2, 64], strides = [1, 1, 1]} : vector<16x2x64xf32> to vector<15x2x64xf32>
      %61 = tpu.concatenate %60, %50 in 0 : vector<15x2x64xf32>, vector<1x2x64xf32> -> vector<16x2x64xf32>
      %62 = tpu.concatenate %57, %59, %53, %55, %61 in 2 : vector<16x2x64xf32>, vector<16x2x64xf32>, vector<16x2x64xf32>, vector<16x2x64xf32>, vector<16x2x64xf32> -> vector<16x2x320xf32>
      %63 = vector.shape_cast %62 : vector<16x2x320xf32> to vector<32x320xf32>
      %64 = arith.truncf %63 : vector<32x320xf32> to vector<32x320xbf16>
      %c0_28 = arith.constant 0 : index
      %c0_29 = arith.constant 0 : index
      %65 = vector.load %arg3[%c0_28, %c0_29] : memref<320x128xbf16, #tpu.memory_space<vmem>>, vector<320x128xbf16>
      %cst_30 = arith.constant dense<0.000000e+00> : vector<32x128xf32>
      %66 = tpu.matmul %64, %65, %cst_30 {dimension_numbers = #tpu.dot_dimension_numbers<[1], [0], [0], [1], [0, 0, 1, 1], [], []>} : vector<32x320xbf16>, vector<320x128xbf16>, vector<32x128xf32> -> vector<32x128xf32>
      %c0_31 = arith.constant 0 : index
      %c0_32 = arith.constant 0 : index
      %67 = vector.load %arg7[%c0_31, %c0_32] : memref<1x128xf32, #tpu.memory_space<vmem>>, vector<1x128xf32>
      %68 = vector.broadcast %67 : vector<1x128xf32> to vector<32x128xf32>
      %69 = arith.addf %66, %68 : vector<32x128xf32>
      %cst_33 = arith.constant 0.000000e+00 : f32
      %70 = vector.broadcast %cst_33 : f32 to vector<32x128xf32>
      %71 = arith.cmpf oge, %69, %70 : vector<32x128xf32>
      %cst_34 = arith.constant 0.00999999977 : f32
      %72 = vector.broadcast %cst_34 : f32 to vector<32x128xf32>
      %73 = arith.mulf %72, %69 : vector<32x128xf32>
      %74 = arith.select %71, %69, %73 : vector<32x128xi1>, vector<32x128xf32>
      %75 = vector.shape_cast %74 : vector<32x128xf32> to vector<16x2x128xf32>
      %cst_35 = arith.constant 0.000000e+00 : f32
      %76 = vector.broadcast %cst_35 : f32 to vector<1x2x128xf32>
      %77 = vector.shape_cast %75 : vector<16x2x128xf32> to vector<8x2x2x128xf32>
      %78 = vector.extract_strided_slice %77 {offsets = [0, 0, 0, 0], sizes = [8, 1, 2, 128], strides = [1, 1, 1, 1]} : vector<8x2x2x128xf32> to vector<8x1x2x128xf32>
      %79 = vector.shape_cast %78 : vector<8x1x2x128xf32> to vector<8x2x128xf32>
      %80 = vector.extract_strided_slice %77 {offsets = [0, 1, 0, 0], sizes = [8, 1, 2, 128], strides = [1, 1, 1, 1]} : vector<8x2x2x128xf32> to vector<8x1x2x128xf32>
      %81 = vector.shape_cast %80 : vector<8x1x2x128xf32> to vector<8x2x128xf32>
      %82 = vector.extract_strided_slice %79 {offsets = [0, 0, 0], sizes = [7, 2, 128], strides = [1, 1, 1]} : vector<8x2x128xf32> to vector<7x2x128xf32>
      %83 = tpu.concatenate %76, %82 in 0 : vector<1x2x128xf32>, vector<7x2x128xf32> -> vector<8x2x128xf32>
      %84 = vector.extract_strided_slice %81 {offsets = [0, 0, 0], sizes = [7, 2, 128], strides = [1, 1, 1]} : vector<8x2x128xf32> to vector<7x2x128xf32>
      %85 = tpu.concatenate %76, %84 in 0 : vector<1x2x128xf32>, vector<7x2x128xf32> -> vector<8x2x128xf32>
      %86 = vector.extract_strided_slice %79 {offsets = [1, 0, 0], sizes = [7, 2, 128], strides = [1, 1, 1]} : vector<8x2x128xf32> to vector<7x2x128xf32>
      %87 = tpu.concatenate %86, %76 in 0 : vector<7x2x128xf32>, vector<1x2x128xf32> -> vector<8x2x128xf32>
      %88 = tpu.concatenate %83, %85, %79, %81, %87 in 2 : vector<8x2x128xf32>, vector<8x2x128xf32>, vector<8x2x128xf32>, vector<8x2x128xf32>, vector<8x2x128xf32> -> vector<8x2x640xf32>
      %89 = vector.shape_cast %88 : vector<8x2x640xf32> to vector<16x640xf32>
      %90 = arith.truncf %89 : vector<16x640xf32> to vector<16x640xbf16>
      %c0_36 = arith.constant 0 : index
      %c0_37 = arith.constant 0 : index
      %91 = vector.load %arg4[%c0_36, %c0_37] : memref<640x256xbf16, #tpu.memory_space<vmem>>, vector<640x256xbf16>
      %cst_38 = arith.constant dense<0.000000e+00> : vector<16x256xf32>
      %92 = tpu.matmul %90, %91, %cst_38 {dimension_numbers = #tpu.dot_dimension_numbers<[1], [0], [0], [1], [0, 0, 1, 1], [], []>} : vector<16x640xbf16>, vector<640x256xbf16>, vector<16x256xf32> -> vector<16x256xf32>
      %c0_39 = arith.constant 0 : index
      %c0_40 = arith.constant 0 : index
      %93 = vector.load %arg8[%c0_39, %c0_40] : memref<1x256xf32, #tpu.memory_space<vmem>>, vector<1x256xf32>
      %94 = vector.broadcast %93 : vector<1x256xf32> to vector<16x256xf32>
      %95 = arith.addf %92, %94 : vector<16x256xf32>
      %cst_41 = arith.constant 0.000000e+00 : f32
      %96 = vector.broadcast %cst_41 : f32 to vector<16x256xf32>
      %97 = arith.cmpf oge, %95, %96 : vector<16x256xf32>
      %cst_42 = arith.constant 0.00999999977 : f32
      %98 = vector.broadcast %cst_42 : f32 to vector<16x256xf32>
      %99 = arith.mulf %98, %95 : vector<16x256xf32>
      %100 = arith.select %97, %95, %99 : vector<16x256xi1>, vector<16x256xf32>
      %101 = vector.shape_cast %100 : vector<16x256xf32> to vector<8x2x256xf32>
      %cst_43 = arith.constant 0.000000e+00 : f32
      %102 = vector.broadcast %cst_43 : f32 to vector<1x2x256xf32>
      %103 = vector.shape_cast %101 : vector<8x2x256xf32> to vector<4x2x2x256xf32>
      %104 = vector.extract_strided_slice %103 {offsets = [0, 0, 0, 0], sizes = [4, 1, 2, 256], strides = [1, 1, 1, 1]} : vector<4x2x2x256xf32> to vector<4x1x2x256xf32>
      %105 = vector.shape_cast %104 : vector<4x1x2x256xf32> to vector<4x2x256xf32>
      %106 = vector.extract_strided_slice %103 {offsets = [0, 1, 0, 0], sizes = [4, 1, 2, 256], strides = [1, 1, 1, 1]} : vector<4x2x2x256xf32> to vector<4x1x2x256xf32>
      %107 = vector.shape_cast %106 : vector<4x1x2x256xf32> to vector<4x2x256xf32>
      %108 = vector.extract_strided_slice %105 {offsets = [0, 0, 0], sizes = [3, 2, 256], strides = [1, 1, 1]} : vector<4x2x256xf32> to vector<3x2x256xf32>
      %109 = tpu.concatenate %102, %108 in 0 : vector<1x2x256xf32>, vector<3x2x256xf32> -> vector<4x2x256xf32>
      %110 = vector.extract_strided_slice %107 {offsets = [0, 0, 0], sizes = [3, 2, 256], strides = [1, 1, 1]} : vector<4x2x256xf32> to vector<3x2x256xf32>
      %111 = tpu.concatenate %102, %110 in 0 : vector<1x2x256xf32>, vector<3x2x256xf32> -> vector<4x2x256xf32>
      %112 = vector.extract_strided_slice %105 {offsets = [1, 0, 0], sizes = [3, 2, 256], strides = [1, 1, 1]} : vector<4x2x256xf32> to vector<3x2x256xf32>
      %113 = tpu.concatenate %112, %102 in 0 : vector<3x2x256xf32>, vector<1x2x256xf32> -> vector<4x2x256xf32>
      %114 = tpu.concatenate %109, %111, %105, %107, %113 in 2 : vector<4x2x256xf32>, vector<4x2x256xf32>, vector<4x2x256xf32>, vector<4x2x256xf32>, vector<4x2x256xf32> -> vector<4x2x1280xf32>
      %115 = vector.shape_cast %114 : vector<4x2x1280xf32> to vector<8x1280xf32>
      %116 = arith.truncf %115 : vector<8x1280xf32> to vector<8x1280xbf16>
      %c0_44 = arith.constant 0 : index
      %c0_45 = arith.constant 0 : index
      %117 = vector.load %arg5[%c0_44, %c0_45] : memref<1280x512xbf16, #tpu.memory_space<vmem>>, vector<1280x512xbf16>
      %cst_46 = arith.constant dense<0.000000e+00> : vector<8x512xf32>
      %118 = tpu.matmul %116, %117, %cst_46 {dimension_numbers = #tpu.dot_dimension_numbers<[1], [0], [0], [1], [0, 0, 1, 1], [], []>} : vector<8x1280xbf16>, vector<1280x512xbf16>, vector<8x512xf32> -> vector<8x512xf32>
      %c0_47 = arith.constant 0 : index
      %c0_48 = arith.constant 0 : index
      %119 = vector.load %arg9[%c0_47, %c0_48] : memref<1x512xf32, #tpu.memory_space<vmem>>, vector<1x512xf32>
      %120 = vector.broadcast %119 : vector<1x512xf32> to vector<8x512xf32>
      %121 = arith.addf %118, %120 : vector<8x512xf32>
      %cst_49 = arith.constant 0.000000e+00 : f32
      %122 = vector.broadcast %cst_49 : f32 to vector<8x512xf32>
      %123 = arith.cmpf oge, %121, %122 : vector<8x512xf32>
      %cst_50 = arith.constant 0.00999999977 : f32
      %124 = vector.broadcast %cst_50 : f32 to vector<8x512xf32>
      %125 = arith.mulf %124, %121 : vector<8x512xf32>
      %126 = arith.select %123, %121, %125 : vector<8x512xi1>, vector<8x512xf32>
      %127 = vector.shape_cast %126 : vector<8x512xf32> to vector<4x2x512xf32>
      %128 = vector.extract_strided_slice %127 {offsets = [0, 0, 0], sizes = [1, 2, 512], strides = [1, 1, 1]} : vector<4x2x512xf32> to vector<1x2x512xf32>
      %129 = vector.shape_cast %128 : vector<1x2x512xf32> to vector<2x512xf32>
      %130 = arith.truncf %129 : vector<2x512xf32> to vector<2x512xbf16>
      %c0_51 = arith.constant 0 : index
      %c0_52 = arith.constant 0 : index
      %131 = vector.load %arg15[%c0_51, %c0_52] : memref<2x2048xbf16, #tpu.memory_space<vmem>>, vector<2x512xbf16>
      tpu.vector_store %arg15[%c0_51, %c0_52], %130 {strides = array<i32>} : memref<2x2048xbf16, #tpu.memory_space<vmem>>, vector<2x512xbf16>,
      %132 = vector.extract_strided_slice %127 {offsets = [1, 0, 0], sizes = [1, 2, 512], strides = [1, 1, 1]} : vector<4x2x512xf32> to vector<1x2x512xf32>
      %133 = vector.shape_cast %132 : vector<1x2x512xf32> to vector<2x512xf32>
      %134 = arith.truncf %133 : vector<2x512xf32> to vector<2x512xbf16>
      %c0_53 = arith.constant 0 : index
      %c512 = arith.constant 512 : index
      %135 = vector.load %arg15[%c0_53, %c512] : memref<2x2048xbf16, #tpu.memory_space<vmem>>, vector<2x512xbf16>
      tpu.vector_store %arg15[%c0_53, %c512], %134 {strides = array<i32>} : memref<2x2048xbf16, #tpu.memory_space<vmem>>, vector<2x512xbf16>,
      %136 = vector.extract_strided_slice %127 {offsets = [2, 0, 0], sizes = [1, 2, 512], strides = [1, 1, 1]} : vector<4x2x512xf32> to vector<1x2x512xf32>
      %137 = vector.shape_cast %136 : vector<1x2x512xf32> to vector<2x512xf32>
      %138 = arith.truncf %137 : vector<2x512xf32> to vector<2x512xbf16>
      %c0_54 = arith.constant 0 : index
      %c1024 = arith.constant 1024 : index
      %139 = vector.load %arg15[%c0_54, %c1024] : memref<2x2048xbf16, #tpu.memory_space<vmem>>, vector<2x512xbf16>
      tpu.vector_store %arg15[%c0_54, %c1024], %138 {strides = array<i32>} : memref<2x2048xbf16, #tpu.memory_space<vmem>>, vector<2x512xbf16>,
      %140 = vector.extract_strided_slice %127 {offsets = [3, 0, 0], sizes = [1, 2, 512], strides = [1, 1, 1]} : vector<4x2x512xf32> to vector<1x2x512xf32>
      %141 = vector.shape_cast %140 : vector<1x2x512xf32> to vector<2x512xf32>
      %142 = arith.truncf %141 : vector<2x512xf32> to vector<2x512xbf16>
      %c0_55 = arith.constant 0 : index
      %c1536 = arith.constant 1536 : index
      %143 = vector.load %arg15[%c0_55, %c1536] : memref<2x2048xbf16, #tpu.memory_space<vmem>>, vector<2x512xbf16>
      tpu.vector_store %arg15[%c0_55, %c1536], %142 {strides = array<i32>} : memref<2x2048xbf16, #tpu.memory_space<vmem>>, vector<2x512xbf16>,
      %cst_56 = arith.constant 0.000000e+00 : f32
      %144 = vector.broadcast %cst_56 : f32 to vector<2x128xf32>
      %c0_57 = arith.constant 0 : index
      %c0_58 = arith.constant 0 : index
      %145 = vector.load %arg16[%c0_57, %c0_58] : memref<2x128xf32, #tpu.memory_space<vmem>>, vector<2x128xf32>
      tpu.vector_store %arg16[%c0_57, %c0_58], %144 {strides = array<i32>} : memref<2x128xf32, #tpu.memory_space<vmem>>, vector<2x128xf32>,
    } else {
    }
    %c0 = arith.constant 0 : index
    %c0_1 = arith.constant 0 : index
    %3 = vector.load %arg15[%c0, %c0_1] : memref<2x2048xbf16, #tpu.memory_space<vmem>>, vector<2x2048xbf16>
    %c0_2 = arith.constant 0 : index
    %c0_3 = arith.constant 0 : index
    %4 = vector.load %arg10[%c0_2, %c0_3] : memref<2048x256xbf16, #tpu.memory_space<vmem>>, vector<2048x256xbf16>
    %cst = arith.constant dense<0.000000e+00> : vector<2x256xf32>
    %5 = tpu.matmul %3, %4, %cst {dimension_numbers = #tpu.dot_dimension_numbers<[1], [0], [0], [1], [0, 0, 1, 1], [], []>} : vector<2x2048xbf16>, vector<2048x256xbf16>, vector<2x256xf32> -> vector<2x256xf32>
    %c0_4 = arith.constant 0 : index
    %c0_5 = arith.constant 0 : index
    %6 = vector.load %arg11[%c0_4, %c0_5] : memref<1x256xf32, #tpu.memory_space<vmem>>, vector<1x256xf32>
    %7 = vector.broadcast %6 : vector<1x256xf32> to vector<2x256xf32>
    %8 = arith.addf %5, %7 : vector<2x256xf32>
    %cst_6 = arith.constant 0.000000e+00 : f32
    %9 = vector.broadcast %cst_6 : f32 to vector<2x256xf32>
    %10 = arith.cmpf oge, %8, %9 : vector<2x256xf32>
    %cst_7 = arith.constant 0.00999999977 : f32
    %11 = vector.broadcast %cst_7 : f32 to vector<2x256xf32>
    %12 = arith.mulf %11, %8 : vector<2x256xf32>
    %13 = arith.select %10, %8, %12 : vector<2x256xi1>, vector<2x256xf32>
    %14 = arith.truncf %13 : vector<2x256xf32> to vector<2x256xbf16>
    %c0_8 = arith.constant 0 : index
    %c0_9 = arith.constant 0 : index
    %15 = vector.load %arg16[%c0_8, %c0_9] : memref<2x128xf32, #tpu.memory_space<vmem>>, vector<2x128xf32>
    %c0_10 = arith.constant 0 : index
    %c0_11 = arith.constant 0 : index
    %16 = vector.load %arg12[%c0_10, %c0_11] : memref<256x128xbf16, #tpu.memory_space<vmem>>, vector<256x128xbf16>
    %cst_12 = arith.constant dense<0.000000e+00> : vector<2x128xf32>
    %17 = tpu.matmul %14, %16, %cst_12 {dimension_numbers = #tpu.dot_dimension_numbers<[1], [0], [0], [1], [0, 0, 1, 1], [], []>} : vector<2x256xbf16>, vector<256x128xbf16>, vector<2x128xf32> -> vector<2x128xf32>
    %18 = arith.addf %15, %17 : vector<2x128xf32>
    %c0_13 = arith.constant 0 : index
    %c0_14 = arith.constant 0 : index
    %19 = vector.load %arg16[%c0_13, %c0_14] : memref<2x128xf32, #tpu.memory_space<vmem>>, vector<2x128xf32>
    tpu.vector_store %arg16[%c0_13, %c0_14], %18 {strides = array<i32>} : memref<2x128xf32, #tpu.memory_space<vmem>>, vector<2x128xf32>,
    %c3_i32 = arith.constant 3 : i32
    %20 = arith.cmpi eq, %arg0, %c3_i32 : i32
    %21 = arith.extui %20 : i1 to i32
    %c0_i32_15 = arith.constant 0 : i32
    %22 = arith.cmpi ne, %21, %c0_i32_15 : i32
    scf.if %22 {
      %c0_16 = arith.constant 0 : index
      %c0_17 = arith.constant 0 : index
      %23 = vector.load %arg16[%c0_16, %c0_17] : memref<2x128xf32, #tpu.memory_space<vmem>>, vector<2x128xf32>
      %c0_18 = arith.constant 0 : index
      %c0_19 = arith.constant 0 : index
      %24 = vector.load %arg13[%c0_18, %c0_19] : memref<1x128xf32, #tpu.memory_space<vmem>>, vector<1x128xf32>
      %25 = vector.broadcast %24 : vector<1x128xf32> to vector<2x128xf32>
      %26 = arith.addf %23, %25 : vector<2x128xf32>
      %c0_20 = arith.constant 0 : index
      %c0_21 = arith.constant 0 : index
      %27 = vector.load %arg14[%c0_20, %c0_21] : memref<2x128xf32, #tpu.memory_space<vmem>>, vector<2x128xf32>
      tpu.vector_store %arg14[%c0_20, %c0_21], %26 {strides = array<i32>} : memref<2x128xf32, #tpu.memory_space<vmem>>, vector<2x128xf32>,
    } else {
    }
    return
  }
  func.func @transform_0(%arg0: i32) -> (i32, i32, i32) {
    %c0_i32 = arith.constant 0 : i32
    %c0_i32_0 = arith.constant 0 : i32
    %c0_i32_1 = arith.constant 0 : i32
    %c0_i32_2 = arith.constant 0 : i32
    return %c0_i32, %c0_i32_0, %c0_i32_1 : i32, i32, i32
  }
  func.func @transform_1(%arg0: i32) -> (i32, i32) {
    %c0_i32 = arith.constant 0 : i32
    %c0_i32_0 = arith.constant 0 : i32
    %c0_i32_1 = arith.constant 0 : i32
    return %c0_i32, %c0_i32_0 : i32, i32
  }
  func.func @transform_2(%arg0: i32) -> (i32, i32) {
    %c0_i32 = arith.constant 0 : i32
    %c0_i32_0 = arith.constant 0 : i32
    %c0_i32_1 = arith.constant 0 : i32
    return %c0_i32, %c0_i32_0 : i32, i32
  }
  func.func @transform_3(%arg0: i32) -> (i32, i32) {
    %c0_i32 = arith.constant 0 : i32
    %c0_i32_0 = arith.constant 0 : i32
    %c0_i32_1 = arith.constant 0 : i32
    return %c0_i32, %c0_i32_0 : i32, i32
  }
  func.func @transform_4(%arg0: i32) -> (i32, i32) {
    %c0_i32 = arith.constant 0 : i32
    %c0_i32_0 = arith.constant 0 : i32
    %c0_i32_1 = arith.constant 0 : i32
    return %c0_i32, %c0_i32_0 : i32, i32
  }
  func.func @transform_5(%arg0: i32) -> (i32, i32) {
    %c0_i32 = arith.constant 0 : i32
    %c0_i32_0 = arith.constant 0 : i32
    %c0_i32_1 = arith.constant 0 : i32
    return %c0_i32, %c0_i32_0 : i32, i32
  }
  func.func @transform_6(%arg0: i32) -> (i32, i32) {
    %c0_i32 = arith.constant 0 : i32
    %c0_i32_0 = arith.constant 0 : i32
    %c0_i32_1 = arith.constant 0 : i32
    return %c0_i32, %c0_i32_0 : i32, i32
  }
  func.func @transform_7(%arg0: i32) -> (i32, i32) {
    %c0_i32 = arith.constant 0 : i32
    %c0_i32_0 = arith.constant 0 : i32
    %c0_i32_1 = arith.constant 0 : i32
    return %c0_i32, %c0_i32_0 : i32, i32
  }
  func.func @transform_8(%arg0: i32) -> (i32, i32) {
    %c0_i32 = arith.constant 0 : i32
    %c0_i32_0 = arith.constant 0 : i32
    %c0_i32_1 = arith.constant 0 : i32
    return %c0_i32, %c0_i32_0 : i32, i32
  }
  func.func @transform_9(%arg0: i32) -> (i32, i32) {
    %c0_i32 = arith.constant 0 : i32
    %c0_i32_0 = arith.constant 0 : i32
    return %c0_i32, %arg0 : i32, i32
  }
  func.func @transform_10(%arg0: i32) -> (i32, i32) {
    %c0_i32 = arith.constant 0 : i32
    %c0_i32_0 = arith.constant 0 : i32
    return %c0_i32, %arg0 : i32, i32
  }
  func.func @transform_11(%arg0: i32) -> (i32, i32) {
    %c0_i32 = arith.constant 0 : i32
    %c0_i32_0 = arith.constant 0 : i32
    return %arg0, %c0_i32 : i32, i32
  }
  func.func @transform_12(%arg0: i32) -> (i32, i32) {
    %c0_i32 = arith.constant 0 : i32
    %c0_i32_0 = arith.constant 0 : i32
    %c0_i32_1 = arith.constant 0 : i32
    return %c0_i32, %c0_i32_0 : i32, i32
  }
  func.func @transform_13(%arg0: i32) -> (i32, i32) {
    %c0_i32 = arith.constant 0 : i32
    %c0_i32_0 = arith.constant 0 : i32
    %c0_i32_1 = arith.constant 0 : i32
    return %c0_i32, %c0_i32_0 : i32, i32
  }
}

</mosaic_0001>

<bundles_post_ra>
// kernel: nn1_forward.1
= control target key start
LH: loop header
LB: loop body
LE: loop exit
PB: predicated region body
PF: predicated region fallthrough
CT: control target
= control target key end

     0   :  { %s14370_s0 = inlined_call_operand.vmem [shape: f32[64,2,4], index: 0, kind: input, shape index: {}]   ;;  %s14371_s1 = inlined_call_operand.hbm [shape: bf16[20,64], index: 1, kind: input, shape index: {}]   ;;  %s14372_s2 = inlined_call_operand.hbm [shape: bf16[320,128], index: 2, kind: input, shape index: {}]   ;;  %s14373_s3 = inlined_call_operand.hbm [shape: bf16[640,256], index: 3, kind: input, shape index: {}]   ;;  %s14374_s4 = inlined_call_operand.hbm [shape: bf16[1280,512], index: 4, kind: input, shape index: {}]   ;;  %s14375_s5 = inlined_call_operand.hbm [shape: f32[1,64], index: 5, kind: input, shape index: {}]   ;;  %s14376_s6 = inlined_call_operand.hbm [shape: f32[1,128], index: 6, kind: input, shape index: {}]   ;;  %s14377_s7 = inlined_call_operand.hbm [shape: f32[1,256], index: 7, kind: input, shape index: {}]   ;;  %s14378_s8 = inlined_call_operand.hbm [shape: f32[1,512], index: 8, kind: input, shape index: {}]   ;;  %s14379_s9 = inlined_call_operand.hbm [shape: bf16[2048,1024], index: 9, kind: input, shape index: {}]   ;;  %s14380_s10 = inlined_call_operand.hbm [shape: f32[1,1024], index: 10, kind: input, shape index: {}]   ;;  %s14381_s11 = inlined_call_operand.hbm [shape: bf16[1024,128], index: 11, kind: input, shape index: {}]   ;;  %s14382_s12 = inlined_call_operand.hbm [shape: f32[1,128], index: 12, kind: input, shape index: {}]   ;;  %s14383_s13 = inlined_call_operand.hbm [shape: f32[2,128], index: 13, kind: output, shape index: {}]  }
   0x1   :  { %14393 = sst [smem:[#allocation36_spill]] %s14370_s0 }
   0x2   :  { %14394 = sst [smem:[#allocation37_spill]] %s14371_s1 }
   0x3   :  { %14395 = sst [smem:[#allocation38_spill]] %s14372_s2 }
   0x4   :  { %14396 = sst [smem:[#allocation39_spill]] %s14373_s3 }
   0x5   :  { %14397 = sst [smem:[#allocation40_spill]] %s14374_s4 }
   0x6   :  { %14398 = sst [smem:[#allocation41_spill]] %s14383_s13 }
   0x7   :  { %18 = vsyncpa [#allocation5], 0 }
   0x8   :  { %19 = vsyncpa [#allocation8], 0 }
   0x9   :  { %20 = vsyncpa [#allocation11], 0 }
   0xa   :  { %21 = vsyncpa [#allocation14], 0 }
   0xb   :  { %22 = vsyncpa [#allocation17], 0 }
   0xc   :  { %23 = vsyncpa [#allocation6], 0  ;;  %s12178_s25 = smov 0   ;;  %s12180_s26 = smov 0  }
   0xd   :  { %s12182_s27 = smov 0   ;;  %s12184_s28 = smov 0  }
   0xe LB: > { %14399 = sst [smem:[#allocation31_spill]] %s12075_s26  ;;  %s12202_s15 = sadd.s32 4294967295, %s12083_s28   ;;  %s12083_s28 = sphi %s12184_s28, %s14419_s28   ;;  %s12079_s27 = sphi %s12182_s27, %s14422_s27   ;;  %s12075_s26 = sphi %s12180_s26, %s14421_s26   ;;  %s12071_s25 = sphi %s12178_s25, %s14420_s25  }
   0xf   : > { %14400 = sst [smem:[#allocation32_spill]] %s12079_s27  ;;  %p7949_p0 = scmp.ge.s32.totalorder %s12083_s28, 1 }
  0x10   : > { %s14401_s1 = sld [smem:[#allocation37_spill]]  ;;  %p239_p1 = scmp.eq.s32.totalorder %s12202_s15, 0 }
  0x11   : > { %p343_p2 = scmp.lt.s32.totalorder %s12083_s28, 5  ;;  %p7950_p3 = scmp.ne.s32.totalorder %s12202_s15, 0 }
  0x12   : > { %s12085_s17 = smov [#allocation4]   ;;  %s14403_s2 = sld [smem:[#allocation38_spill]] }
  0x13   : > { %p12208_p4 = pnand %p7949_p0, %p343_p2  ;;  %s359_s18 = sshll.u32 %s12085_s17, 4  ;;  %s360_s18 = int_to_ptr.vmem [resolvable:$true] %s359_s18 }
  0x14   : > { %s12086_s23 = smov [#allocation7]   ;;  %s14384_s29 = smov 64  }
  0x15   : > { %p11507_p5 = pneg %p12208_p4  ;;  %s373_s24 = sshll.u32 %s12086_s23, 4  ;;  %s374_s24 = int_to_ptr.vmem [resolvable:$true] %s373_s24 }
  0x16   : > { %s357_s14 = sshll.u32 %s14401_s1, 4  ;;  %s14385_s30 = smov 4   ;;  %s358_s14 = int_to_ptr.hbm [resolvable:$true] %s357_s14 }
  0x17   : > { %p12219_p6 = pnand %p11507_p5, %p239_p1  ;;  %s12234_s17 = sadd.s32 1, %s12083_s28  }
  0x18   : > { %s371_s21 = sshll.u32 %s14403_s2, 4  ;;  %14405 = sst [smem:[#allocation33_spill]] %s12234_s17  ;;  %s372_s21 = int_to_ptr.hbm [resolvable:$true] %s371_s21 }
  0x19   : > { %11510 = dma.hbm_to_vmem [thread:$0]  (!%p12219_p6), %s358_s14, 192, %s360_s18, [#allocation5], %s14384_s29, %s14384_s29, %s14385_s30  }
  0x1a   : > { %11513 = dma.hbm_to_vmem [thread:$0]  (!%p12219_p6), %s372_s21, 2560, %s374_s24, [#allocation8], %s14384_s29, %s14384_s29, %s14385_s30  }
  0x1b   : > { %s225_s19 = sadd.s32 1, %s12079_s27  ;;  %s222_s20 = ssub.s32 %s12083_s28, %s12234_s17 }
  0x1c   : > { %p232_p7 = scmp.ne.s32.totalorder %s12079_s27, %s12075_s26  ;;  %p223_p8 = scmp.eq.s32.totalorder %s222_s20, 0 }
  0x1d   : > { %p233_p9 = scmp.eq.s32.totalorder %s12083_s28, 0  ;;  %p238_p10 = scmp.ne.s32.totalorder %s12075_s26, %s12071_s25 }
  0x1e   : > { %s12245_s23 = scalar_select %p223_p8, %s12079_s27, %s225_s19  }
  0x1f   : > { %p12247_p11 = por %p233_p9, %p232_p7  ;;  %p12253_p12 = por %p239_p1, %p238_p10 }
  0x20   : > { %14406 = sst [smem:[#allocation34_spill]] %s12245_s23  ;;  %p11554_p13 = scmp.lt.s32.totalorder %s12083_s28, 4 }
  0x21   : > { %s14408_s18 = scalar_select %p12253_p12, 1, 0 }
  0x22   : > { %s475_s21 = sand.u32 1, %s12083_s28   ;;  %s12260_s24 = sand.u32 1, %s12079_s27  }
  0x23   : > { %14409 = sst [smem:[#allocation35_spill]] %s14408_s18  ;;  %s7960_s20 = sshll.u32 %s12260_s24, 11 }
  0x24   : > { %s10766_s29 = sshll.u32 %s12083_s28, 3  ;;  %s479_s1 = scalar_lea.vmem [#allocation18], %s7960_s20 }
  0x25   : > { %s484_s30 = scalar_lea.hbm %s14379_s9, %s10766_s29  ;;  %s487_s2 = sshll.u32 %s479_s1, 4  ;;  %s488_s2 = int_to_ptr.vmem [resolvable:$true] %s487_s2 }
  0x26   : > { %s485_s23 = sshll.u32 %s484_s30, 4  ;;  %p12269_p0 = pnand %p11554_p13, %p12247_p11  ;;  %s486_s23 = int_to_ptr.hbm [resolvable:$true] %s485_s23 }
  0x27   : > { %s14411_s3 = sld [smem:[#allocation39_spill]]  ;;  %s12276_s18 = scalar_lea.sflag [#allocation5], %s475_s21 }
  0x28   : > { %s11693_s29 = sshra.s32 %s486_s23, 4  ;;  %p11697_p5 = pneg %p12269_p0  ;;  %s11694_s29 = int_to_ptr.hbm [resolvable:$true] %s11693_s29 }
  0x29   : > { %s11695_s1 = scalar_lea.hbm %s11694_s29, 2048  ;;  %s11700_s13 = scalar_lea.hbm %s14379_s9, 8192 }
  0x2a   : > { %p11696_p2 = scmp.ne.s32.totalorder %s11694_s29, %s11695_s1  ;;  %p11701_p9 = scmp.lt.s32.totalorder %s11694_s29, %s14379_s9 }
  0x2b   : > { %p11702_p10 = scmp.lt.s32.totalorder %s11700_s13, %s11695_s1 }
  0x2c   : > { %p11698_p7 = pnand %p11697_p5, %p11696_p2 }
  0x2d   : > { %s385_s0 = sshll.u32 %s14411_s3, 4  ;;  %p11703_p11 = por %p11702_p10, %p11701_p9  ;;  %s386_s0 = int_to_ptr.hbm [resolvable:$true] %s385_s0 }
  0x2e   : > { %p11699_p8 = pneg %p11698_p7 }
  0x30   : > { %p11704_p13 = pnand %p11703_p11, %p11699_p8 }
  0x32   : > { %11707 = shalt.err (!%p11704_p13)
}
  0x33   : > { %s12089_s21 = smov 512   ;;  %s12090_s25 = smov 128  }
  0x34   : > { %s12091_s19 = smov 8   ;;  %s14412_s4 = sld [smem:[#allocation40_spill]] }
  0x35   : > { %11538 = dma.hbm_to_vmem [thread:$0]  (!%p12269_p0), %s486_s23, 32768, %s488_s2, %s12276_s18, %s12089_s21, %s12090_s25, %s12091_s19  }
  0x36   : > { %s12092_s26 = smov [#allocation9]   ;;  %s12093_s1 = smov [#allocation10]  }
  0x37   : > { %s387_s29 = sshll.u32 %s12092_s26, 4  ;;  %s401_s13 = sshll.u32 %s12093_s1, 4  ;;  %s388_s29 = int_to_ptr.vmem [resolvable:$true] %s387_s29  ;;  %s402_s13 = int_to_ptr.vmem [resolvable:$true] %s401_s13 }
  0x38   : > { %11516 = dma.hbm_to_vmem [thread:$0]  (!%p12219_p6), %s386_s0, 10240, %s388_s29, [#allocation8], %s12090_s25, %s12090_s25, %s12091_s19  }
  0x39   : > { %s12094_s27 = smov 256   ;;  %s12095_s20 = smov 16  }
  0x3a   : > { %s399_s14 = sshll.u32 %s14412_s4, 4  ;;  %s426_s3 = sshll.u32 %s14376_s6, 4  ;;  %s400_s14 = int_to_ptr.hbm [resolvable:$true] %s399_s14  ;;  %s427_s3 = int_to_ptr.hbm [resolvable:$true] %s426_s3 }
  0x3b   : > { %11519 = dma.hbm_to_vmem [thread:$0]  (!%p12219_p6), %s400_s14, 40960, %s402_s13, [#allocation11], %s12094_s27, %s12094_s27, %s12095_s20  }
  0x3c   : > { %s12096_s21 = smov [#allocation13]   ;;  %s7963_s30 = sshll.u32 %s12260_s24, 1 }
  0x3d   : > { %s428_s26 = sshll.u32 %s12096_s21, 4  ;;  %s7964_s0 = sshll.u32 %s12083_s28, 1  ;;  %s429_s26 = int_to_ptr.vmem [resolvable:$true] %s428_s26 }
  0x3e   : > { %11525 = dma.hbm_to_vmem [thread:$0]  (!%p12219_p6), %s427_s3, 16, %s429_s26, [#allocation14]  }
  0x3f   : > { %s505_s29 = scalar_lea.hbm %s14380_s10, %s7964_s0  ;;  %s501_s1 = scalar_lea.vmem [#allocation19], %s7963_s30 }
  0x40   : > { %s509_s4 = sshll.u32 %s501_s1, 4  ;;  %s507_s14 = sshll.u32 %s505_s29, 4  ;;  %s510_s4 = int_to_ptr.vmem [resolvable:$true] %s509_s4  ;;  %s508_s14 = int_to_ptr.hbm [resolvable:$true] %s507_s14 }
  0x41   : > { %s414_s20 = sshll.u32 %s14375_s5, 4  ;;  %s11813_s2 = sshra.s32 %s508_s14, 4  ;;  %s11814_s2 = int_to_ptr.hbm [resolvable:$true] %s11813_s2  ;;  %s415_s20 = int_to_ptr.hbm [resolvable:$true] %s414_s20 }
  0x42   : > { %s11815_s23 = scalar_lea.hbm %s11814_s2, 2  ;;  %s11820_s26 = scalar_lea.hbm %s14380_s10, 8 }
  0x43   : > { %p11816_p2 = scmp.ne.s32.totalorder %s11814_s2, %s11815_s23  ;;  %p11821_p9 = scmp.lt.s32.totalorder %s11814_s2, %s14380_s10 }
  0x44   : > { %p11822_p10 = scmp.lt.s32.totalorder %s11820_s26, %s11815_s23 }
  0x45   : > { %p11818_p7 = pnand %p11816_p2, %p11697_p5 }
  0x46   : > { %p11823_p11 = por %p11822_p10, %p11821_p9 }
  0x47   : > { %p11819_p8 = pneg %p11818_p7 }
  0x49   : > { %p11824_p13 = pnand %p11823_p11, %p11819_p8 }
  0x4b   : > { %11827 = shalt.err (!%p11824_p13)
}
  0x4c   : > { %11541 = dma.hbm_to_vmem [thread:$0]  (!%p12269_p0), %s508_s14, 32, %s510_s4, %s12276_s18  }
  0x4d   : > { %s12097_s25 = smov [#allocation12]   ;;  %s438_s13 = sshll.u32 %s14377_s7, 4  ;;  %s439_s13 = int_to_ptr.hbm [resolvable:$true] %s438_s13 }
  0x4e   : > { %s416_s19 = sshll.u32 %s12097_s25, 4  ;;  %s450_s23 = sshll.u32 %s14378_s8, 4  ;;  %s417_s19 = int_to_ptr.vmem [resolvable:$true] %s416_s19  ;;  %s451_s23 = int_to_ptr.hbm [resolvable:$true] %s450_s23 }
  0x4f   : > { %11522 = dma.hbm_to_vmem [thread:$0]  (!%p12219_p6), %s415_s20, 16, %s417_s19, [#allocation11]  }
  0x50   : > { %s12098_s3 = smov [#allocation15]   ;;  %s12099_s14 = smov [#allocation16]  }
  0x51   : > { %s440_s4 = sshll.u32 %s12098_s3, 4  ;;  %s452_s21 = sshll.u32 %s12099_s14, 4  ;;  %s441_s4 = int_to_ptr.vmem [resolvable:$true] %s440_s4  ;;  %s453_s21 = int_to_ptr.vmem [resolvable:$true] %s452_s21 }
  0x52   : > { %11528 = dma.hbm_to_vmem [thread:$0]  (!%p12219_p6), %s439_s13, 32, %s441_s4, [#allocation14]  }
  0x53   : > { %s462_s0 = sshll.u32 %s14382_s12, 4  ;;  %s7965_s20 = sshll.u32 %s12260_s24, 7  ;;  %s463_s0 = int_to_ptr.hbm [resolvable:$true] %s462_s0 }
  0x54   : > { %11531 = dma.hbm_to_vmem [thread:$0]  (!%p12219_p6), %s451_s23, 64, %s453_s21, [#allocation17]  }
  0x55   : > { %s12100_s25 = smov [#allocation21]   ;;  %s10767_s29 = sshll.u32 %s12083_s28, 7 }
  0x56   : > { %s464_s19 = sshll.u32 %s12100_s25, 4  ;;  %s525_s27 = scalar_lea.hbm %s14381_s11, %s10767_s29  ;;  %s465_s19 = int_to_ptr.vmem [resolvable:$true] %s464_s19 }
  0x57   : > { %11534 = dma.hbm_to_vmem [thread:$0]  (!%p12219_p6), %s463_s0, 16, %s465_s19, [#allocation8]  }
  0x58   : > { %s520_s2 = scalar_lea.vmem [#allocation20], %s7965_s20  ;;  %s526_s4 = sshll.u32 %s525_s27, 4  ;;  %s527_s4 = int_to_ptr.hbm [resolvable:$true] %s526_s4 }
  0x59   : > { %s528_s3 = sshll.u32 %s520_s2, 4  ;;  %s11963_s14 = sshra.s32 %s527_s4, 4  ;;  %s529_s3 = int_to_ptr.vmem [resolvable:$true] %s528_s3  ;;  %s11964_s14 = int_to_ptr.hbm [resolvable:$true] %s11963_s14 }
  0x5a   : > { %s11965_s23 = scalar_lea.hbm %s11964_s14, 128  ;;  %s11970_s24 = scalar_lea.hbm %s14381_s11, 512 }
  0x5b   : > { %p11966_p2 = scmp.ne.s32.totalorder %s11964_s14, %s11965_s23  ;;  %p11971_p6 = scmp.lt.s32.totalorder %s11964_s14, %s14381_s11 }
  0x5c   : > { %p11972_p9 = scmp.lt.s32.totalorder %s11970_s24, %s11965_s23 }
  0x5d   : > { %p11968_p7 = pnand %p11966_p2, %p11697_p5 }
  0x5e   : > { %p11973_p10 = por %p11972_p9, %p11971_p6 }
  0x5f   : > { %p11969_p8 = pneg %p11968_p7 }
  0x61   : > { %p11974_p11 = pnand %p11973_p10, %p11969_p8 }
  0x63   : > { %11977 = shalt.err (!%p11974_p11)
}
  0x64   : > { %s14413_s30 = smov 4   ;;  %s14414_s0 = smov 64  }
  0x65   : > { %11544 = dma.hbm_to_vmem [thread:$0]  (!%p12269_p0), %s527_s4, 2048, %s529_s3, %s12276_s18, %s14414_s0, %s14414_s0, %s14413_s30  }
  0x66   : > { %540 = sbr.rel (%p12208_p4) target bundleno = 2332 (0x91c), region = 72 }
  0x6b   : > { %12038 = dma.done.wait (%p239_p1), [#allocation5], 192  }
  0x6c   : > { %12040 = vsyncadd (%p239_p1), [#allocation5], 4294967104 }
  0x6d   : > { %12042 = dma.done.wait (%p239_p1), [#allocation8], 12800  }
  0x6e   : > { %12044 = vsyncadd (%p239_p1), [#allocation8], 4294954496 }
  0x6f   : > { %12046 = dma.done.wait (%p239_p1), [#allocation11], 40976  }
  0x70   : > { %12048 = vsyncadd (%p239_p1), [#allocation11], 4294926320 }
  0x71   : > { %12050 = dma.done.wait (%p239_p1), [#allocation14], 48  }
  0x72   : > { %12052 = vsyncadd (%p239_p1), [#allocation14], 4294967248 }
  0x73   : > { %12054 = dma.done.wait (%p239_p1), [#allocation17], 64  }
  0x74   : > { %12056 = vsyncadd (%p239_p1), [#allocation17], 4294967232  ;;  %s14415_s16 = sld [smem:[#allocation31_spill]]  ;;  %s582_s18 = sand.u32 1, %s12202_s15  }
  0x75   : > { %s583_s19 = scalar_lea.sflag [#allocation5], %s582_s18 }
  0x7a   : > { %s584_s20 = sand.u32 1, %s14415_s16  }
  0x7b   : > { %s7977_s25 = sshll.u32 %s584_s20, 11 }
  0x7c   : > { %s12385_s29 = scalar_lea.vmem [#allocation18], %s7977_s25 }
  0x7d   : > { %12058 = dma.done.wait (%p12253_p12), %s583_s19, 34848  }
  0x7e   : > { %12060 = vsyncadd (%p12253_p12), %s583_s19, 4294932448  ;;  %s7978_s1 = sshll.u32 %s584_s20, 1  ;;  %s7979_s13 = sshll.u32 %s584_s20, 7 }
  0x7f   : > { %s12391_s27 = scalar_lea.vmem [#allocation19], %s7978_s1  ;;  %s12393_s2 = scalar_lea.vmem [#allocation20], %s7979_s13 }
  0x80   : > { %12062 = dma.done.wait (%p239_p1), [#allocation8], 16  }
  0x81   : > { %12064 = vsyncadd (%p239_p1), [#allocation8], 4294967280  ;;  %667 = sbr.rel (%p7950_p3) target bundleno = 1779 (0x6f3), region = 124  ;;  %s14417_s14 = sld [smem:[#allocation36_spill]] (!%p7950_p3) }
  0x82   : > { %s12102_s23 = smov (!%p7950_p3), 4   ;;  %s12103_s13 = smov (!%p7950_p3), 8  }
  0x83   : > { %s12104_s19 = smov (!%p7950_p3), 12   ;;  %s12105_s4 = smov (!%p7950_p3), 16  }
  0x86   : > { %v12101_v1 = vmov 0.0   ;;  %vm1181_vm0 = vcmask 31744   ;;  %vm1214_vm1 = vcmask 64512   ;;  %vm1280_vm2 = vcmask 130048   ;;  %v1406_v58 = vld [vmem:[#allocation4 + $0x8] sm:$0x3] }
  0x87   : > { %v671_v0 = vld [vmem:[%s14417_s14 + $0x6] sm:$0x3]  ;;  %764 = vrot.lane.b32.xlu0 %v12101_v1, %s12102_s23  ;;  %5591 = vst [vmem:[#allocation3] sm:$0x3] %v12101_v1  ;;  %v675_v2 = vld [vmem:[%s14417_s14 + $0xe] sm:$0x3]  ;;  %v1416_v61 = vunpack.c.l.b16 %v1406_v58 }
  0x88   : > { %768 = vrot.lane.b32.xlu1 %v671_v0, %s12102_s23  ;;  %772 = vrot.lane.b32.xlu2 %v675_v2, %s12102_s23  ;;  %v673_v3 = vld [vmem:[%s14417_s14 + $0xa] sm:$0x3]  ;;  %v669_v4 = vld [vmem:[%s14417_s14 + $0x2] sm:$0x3]  ;;  %vm1247_vm3 = vcmask 97280   ;;  %vm1433_vm4 = vcmask 1041408  }
  0x89   : > { %v677_v5 = vld [vmem:[%s14417_s14 + $0x12] sm:$0x3]  ;;  %v681_v6 = vld [vmem:[%s14417_s14 + $0x1a] sm:$0x3]  ;;  %v679_v7 = vld [vmem:[%s14417_s14 + $0x16] sm:$0x3] }
  0x8a   : > { %v12433_v8 = vld [vmem:[%s14417_s14] sm:$0x3]  ;;  %v12442_v9 = vld [vmem:[%s14417_s14 + $0x8] sm:$0x3]  ;;  %v12447_v10 = vld [vmem:[%s14417_s14 + $0x4] sm:$0x3] }
  0x8b   : > { %v12452_v11 = vld [vmem:[%s14417_s14 + $0xc] sm:$0x3]  ;;  %v12463_v12 = vld [vmem:[%s14417_s14 + $0x14] sm:$0x3]  ;;  %v12468_v13 = vld [vmem:[%s14417_s14 + $0x10] sm:$0x3] }
  0x8c   : > { %v12473_v14 = vld [vmem:[%s14417_s14 + $0x18] sm:$0x3]  ;;  %v12484_v15 = vld [vmem:[%s14417_s14 + $0x1c] sm:$0x3]  ;;  %v683_v16 = vld [vmem:[%s14417_s14 + $0x1e] sm:$0x3] }
  0x8d   : > { %v12514_v17 = vld [vmem:[%s14417_s14 + $0x20] sm:$0x3]  ;;  %v687_v18 = vld [vmem:[%s14417_s14 + $0x26] sm:$0x3]  ;;  %v685_v19 = vld [vmem:[%s14417_s14 + $0x22] sm:$0x3] }
  0x8e   : > { %v689_v20 = vld [vmem:[%s14417_s14 + $0x2a] sm:$0x3]  ;;  %v693_v22 = vld [vmem:[%s14417_s14 + $0x32] sm:$0x3]  ;;  %v691_v23 = vld [vmem:[%s14417_s14 + $0x2e] sm:$0x3] }
  0x8f   : > { %766 = vrot.lane.b32.xlu0 %v669_v4, %s12102_s23  ;;  %v695_v24 = vld [vmem:[%s14417_s14 + $0x36] sm:$0x3]  ;;  %v697_v26 = vld [vmem:[%s14417_s14 + $0x3a] sm:$0x3]  ;;  %v12555_v27 = vld [vmem:[%s14417_s14 + $0x24] sm:$0x3] }
  0x90   : > { %770 = vrot.lane.b32.xlu1 %v673_v3, %s12102_s23  ;;  %774 = vrot.lane.b32.xlu2 %v677_v5, %s12102_s23  ;;  %v12567_v29 = vld [vmem:[%s14417_s14 + $0x2c] sm:$0x3]  ;;  %v12572_v30 = vld [vmem:[%s14417_s14 + $0x28] sm:$0x3]  ;;  %vm1420_vm5 = vcmask 162816   ;;  %vm1659_vm13 = vcmask 523264  }
  0x91   : > { %v12577_v31 = vld [vmem:[%s14417_s14 + $0x30] sm:$0x3]  ;;  %v12592_v35 = vld [vmem:[%s14417_s14 + $0x38] sm:$0x3]  ;;  %v12597_v36 = vld [vmem:[%s14417_s14 + $0x34] sm:$0x3] }
  0x92   : > { %v12602_v37 = vld [vmem:[%s14417_s14 + $0x3c] sm:$0x3]  ;;  %v699_v47 = vld [vmem:[%s14417_s14 + $0x3e] sm:$0x3]  ;;  %v12663_v63 = vld [vmem:[%s14417_s14 + $0x40] sm:$0x3] }
  0x93   : > { %vm1750_vm15 = vcmask 1043456  }
  0x97   : > { %776 = vrot.lane.b32.xlu0 %v679_v7, %s12102_s23 }
  0x98   : > { %778 = vrot.lane.b32.xlu1 %v681_v6, %s12102_s23  ;;  %892 = vrot.lane.b32.xlu2 %v12433_v8, %s12103_s13 }
  0x9f   : > { %894 = vrot.lane.b32.xlu0 %v12447_v10, %s12103_s13 }
  0xa0   : > { %896 = vrot.lane.b32.xlu1 %v12442_v9, %s12103_s13  ;;  %898 = vrot.lane.b32.xlu2 %v12452_v11, %s12103_s13 }
  0xa7   : > { %900 = vrot.lane.b32.xlu0 %v12468_v13, %s12103_s13 }
  0xa8   : > { %902 = vrot.lane.b32.xlu1 %v12463_v12, %s12103_s13  ;;  %904 = vrot.lane.b32.xlu2 %v12473_v14, %s12103_s13 }
  0xaf   : > { %906 = vrot.lane.b32.xlu0 %v12484_v15, %s12103_s13 }
  0xb0   : > { %989 = vrot.lane.b32.xlu1 %v669_v4, %s12104_s19  ;;  %991 = vrot.lane.b32.xlu2 %v671_v0, %s12104_s19  ;;  %v1418_v0 = vpack.c.b16 %v1416_v61, %v1416_v61 }
  0xb7   : > { %993 = vrot.lane.b32.xlu0 %v673_v3, %s12104_s19  ;;  %v1435_v3 = vsel %vm1433_vm4, %v1418_v0, 0 }
  0xb8   : > { %995 = vrot.lane.b32.xlu1 %v675_v2, %s12104_s19  ;;  %997 = vrot.lane.b32.xlu2 %v677_v5, %s12104_s19  ;;  %v12668_v2 = vld [vmem:[%s14417_s14 + $0x42] sm:$0x3] }
  0xb9   : > { %1443 = vmatpush.bf16.msra.mxu0 %v1435_v3  ;;  %v12801_v3 = vld [vmem:[%s14417_s14 + $0x54] sm:$0x3] }
  0xbf   : > { %999 = vrot.lane.b32.xlu0 %v679_v7, %s12104_s19 }
  0xc0   : > { %1001 = vrot.lane.b32.xlu1 %v681_v6, %s12104_s19  ;;  %1003 = vrot.lane.b32.xlu2 %v683_v16, %s12104_s19 }
  0xc7   : > { %1085 = vrot.lane.b32.xlu0 %v12447_v10, %s12105_s4 }
  0xc8   : > { %1087 = vrot.lane.b32.xlu1 %v12442_v9, %s12105_s4  ;;  %1089 = vrot.lane.b32.xlu2 %v12452_v11, %s12105_s4 }
  0xcf   : > { %1091 = vrot.lane.b32.xlu0 %v12468_v13, %s12105_s4 }
  0xd0   : > { %1093 = vrot.lane.b32.xlu1 %v12463_v12, %s12105_s4  ;;  %1095 = vrot.lane.b32.xlu2 %v12473_v14, %s12105_s4 }
  0xd7   : > { %1097 = vrot.lane.b32.xlu0 %v12484_v15, %s12105_s4 }
  0xd8   : > { %1099 = vrot.lane.b32.xlu1 %v12514_v17, %s12105_s4  ;;  %780 = vrot.lane.b32.xlu2 %v683_v16, %s12102_s23 }
  0xdf   : > { %782 = vrot.lane.b32.xlu0 %v685_v19, %s12102_s23 }
  0xe0   : > { %784 = vrot.lane.b32.xlu1 %v687_v18, %s12102_s23  ;;  %786 = vrot.lane.b32.xlu2 %v689_v20, %s12102_s23 }
  0xe2   : > { %v12533_v21 = vpop.permute.xlu2 %772 }
  0xe7   : > { %788 = vrot.lane.b32.xlu0 %v691_v23, %s12102_s23 }
  0xe8   : > { %790 = vrot.lane.b32.xlu1 %v693_v22, %s12102_s23  ;;  %792 = vrot.lane.b32.xlu2 %v695_v24, %s12102_s23 }
  0xea   : > { %v12547_v25 = vpop.permute.xlu2 %774 }
  0xeb   : > { %v1187_v4 = vsel %vm1181_vm0, %v12468_v13, %v12547_v25  ;;  %v12687_v13 = vld [vmem:[%s14417_s14 + $0x4a] sm:$0x3] }
  0xef   : > { %794 = vrot.lane.b32.xlu0 %v697_v26, %s12102_s23 }
  0xf0   : > { %908 = vrot.lane.b32.xlu1 %v12514_v17, %s12103_s13  ;;  %910 = vrot.lane.b32.xlu2 %v12555_v27, %s12103_s13 }
  0xf2   : > { %v12562_v28 = vpop.permute.xlu2 %892 }
  0xf7   : > { %912 = vrot.lane.b32.xlu0 %v12572_v30, %s12103_s13 }
  0xf8   : > { %914 = vrot.lane.b32.xlu1 %v12567_v29, %s12103_s13  ;;  %916 = vrot.lane.b32.xlu2 %v12577_v31, %s12103_s13 }
  0xf9   : > { %v12585_v32 = vpop.permute.xlu0 %764 }
  0xfa   : > { %v769_v33 = vpop.permute.xlu1 %768  ;;  %v12587_v34 = vpop.permute.xlu2 %898 }
  0xfb   : > { %v1184_v54 = vsel %vm1181_vm0, %v12447_v10, %v769_v33  ;;  %v10768_v10 = vld [vmem:[#allocation4] sm:$0xff] }
  0xfc   : > { %1444 = vmatpush.bf16.msra.mxu0 %v10768_v10 }
  0xff   : > { %918 = vrot.lane.b32.xlu0 %v12597_v36, %s12103_s13 }
 0x100   : > { %920 = vrot.lane.b32.xlu1 %v12592_v35, %s12103_s13  ;;  %922 = vrot.lane.b32.xlu2 %v12602_v37, %s12103_s13 }
 0x101   : > { %v12612_v39 = vpop.permute.xlu0 %766 }
 0x102   : > { %v12610_v38 = vpop.permute.xlu1 %770  ;;  %v12614_v40 = vpop.permute.xlu2 %904 }
 0x107   : > { %1005 = vrot.lane.b32.xlu0 %v685_v19, %s12104_s19 }
 0x108   : > { %1007 = vrot.lane.b32.xlu1 %v687_v18, %s12104_s19  ;;  %1009 = vrot.lane.b32.xlu2 %v689_v20, %s12104_s19  ;;  %v12692_v20 = vld [vmem:[%s14417_s14 + $0x46] sm:$0x3] }
 0x109   : > { %v12621_v42 = vpop.permute.xlu0 %776 }
 0x10a   : > { %v12619_v41 = vpop.permute.xlu1 %778  ;;  %v12623_v43 = vpop.permute.xlu2 %991 }
 0x10f   : > { %1011 = vrot.lane.b32.xlu0 %v691_v23, %s12104_s19  ;;  %v1183_v23 = vsel %vm1181_vm0, %v12433_v8, %v12612_v39 }
 0x110   : > { %1013 = vrot.lane.b32.xlu1 %v693_v22, %s12104_s19  ;;  %1015 = vrot.lane.b32.xlu2 %v695_v24, %s12104_s19  ;;  %v1182_v22 = vsel %vm1181_vm0, 0.0, %v12585_v32  ;;  %v12702_v24 = vld [vmem:[%s14417_s14 + $0x4e] sm:$0x3] }
 0x111   : > { %v895_v45 = vpop.permute.xlu0 %894 }
 0x112   : > { %v897_v44 = vpop.permute.xlu1 %896  ;;  %v12628_v46 = vpop.permute.xlu2 %997  ;;  %v1216_v25 = vsel %vm1214_vm1, %v1183_v23, %v895_v45 }
 0x113   : > { %v1217_v55 = vsel %vm1214_vm1, %v1184_v54, %v897_v44  ;;  %v1249_v8 = vsel %vm1247_vm3, %v1216_v25, %v12623_v43  ;;  %v12728_v43 = vld [vmem:[%s14417_s14 + $0x52] sm:$0x3] }
 0x117   : > { %1017 = vrot.lane.b32.xlu0 %v697_v26, %s12104_s19  ;;  %v1215_v26 = vsel %vm1214_vm1, %v1182_v22, %v12562_v28  ;;  %v12723_v28 = vld [vmem:[%s14417_s14 + $0x56] sm:$0x3]  ;;  %v12823_v22 = vld [vmem:[%s14417_s14 + $0x58] sm:$0x3] }
 0x118   : > { %1019 = vrot.lane.b32.xlu1 %v699_v47, %s12104_s19  ;;  %1101 = vrot.lane.b32.xlu2 %v12555_v27, %s12105_s4 }
 0x119   : > { %v12637_v49 = vpop.permute.xlu0 %900 }
 0x11a   : > { %v903_v48 = vpop.permute.xlu1 %902  ;;  %v12639_v50 = vpop.permute.xlu2 %1003 }
 0x11b   : > { %v1220_v5 = vsel %vm1214_vm1, %v1187_v4, %v903_v48  ;;  %v1186_v48 = vsel %vm1181_vm0, %v12452_v11, %v12533_v21 }
 0x11c   : > { %v1219_v54 = vsel %vm1214_vm1, %v1186_v48, %v12637_v49 }
 0x11f   : > { %1103 = vrot.lane.b32.xlu0 %v12572_v30, %s12105_s4 }
 0x120   : > { %1105 = vrot.lane.b32.xlu1 %v12567_v29, %s12105_s4  ;;  %1107 = vrot.lane.b32.xlu2 %v12577_v31, %s12105_s4 }
 0x121   : > { %v12647_v52 = vpop.permute.xlu0 %906 }
 0x122   : > { %v990_v51 = vpop.permute.xlu1 %989  ;;  %v1090_v53 = vpop.permute.xlu2 %1089 }
 0x123   : > { %v1248_v32 = vsel %vm1247_vm3, %v1215_v26, %v990_v51  ;;  %v1185_v51 = vsel %vm1181_vm0, %v12442_v9, %v12610_v38  ;;  %v1252_v9 = vsel %vm1247_vm3, %v1219_v54, %v12628_v46  ;;  %v1189_v46 = vsel %vm1181_vm0, %v12473_v14, %v12619_v41 }
 0x124   : > { %v1218_v11 = vsel %vm1214_vm1, %v1185_v51, %v12587_v34  ;;  %v12758_v34 = vld [vmem:[%s14417_s14 + $0x44] sm:$0x3] }
 0x127   : > { %1109 = vrot.lane.b32.xlu0 %v12597_v36, %s12105_s4 }
 0x128   : > { %1111 = vrot.lane.b32.xlu1 %v12592_v35, %s12105_s4  ;;  %1113 = vrot.lane.b32.xlu2 %v12602_v37, %s12105_s4 }
 0x129   : > { %v994_v57 = vpop.permute.xlu0 %993 }
 0x12a   : > { %v996_v56 = vpop.permute.xlu1 %995  ;;  %v1250_v59 = vsel %vm1247_vm3, %v1217_v55, %v994_v57  ;;  %v1096_v60 = vpop.permute.xlu2 %1095 }
 0x12b   : > { %v1283_v62 = vsel %vm1280_vm2, %v1250_v59, %v1090_v53  ;;  %v713_v53 = vld [vmem:[%s14417_s14 + $0x5a] sm:$0x3]  ;;  %v1251_v21 = vsel %vm1247_vm3, %v1218_v11, %v996_v56  ;;  %v1188_v56 = vsel %vm1181_vm0, %v12463_v12, %v12621_v42  ;;  %v12769_v59 = vld [vmem:[%s14417_s14 + $0x48] sm:$0x3] }
 0x12c   : > { %1349 = vst [vmem:[#allocation1 + $0x2] ss:$4 sm:$0xff] %v1283_v62  ;;  %v1221_v14 = vsel %vm1214_vm1, %v1188_v56, %v12614_v40  ;;  %v12791_v40 = vld [vmem:[%s14417_s14 + $0x50] sm:$0x3] }
 0x12f   : > { %1115 = vrot.lane.b32.xlu0 %v12663_v63, %s12105_s4 }
 0x130   : > { %796 = vrot.lane.b32.xlu1 %v699_v47, %s12102_s23  ;;  %798 = vrot.lane.b32.xlu2 %v12668_v2, %s12102_s23 }
 0x131   : > { %v1000_v7 = vpop.permute.xlu0 %999 }
 0x132   : > { %v1002_v6 = vpop.permute.xlu1 %1001  ;;  %v1253_v16 = vsel %vm1247_vm3, %v1220_v5, %v1000_v7  ;;  %v12681_v18 = vpop.permute.xlu2 %780 }
 0x133   : > { %v1286_v19 = vsel %vm1280_vm2, %v1253_v16, %v1096_v60  ;;  %v1222_v60 = vsel %vm1214_vm1, %v1189_v46, %v12647_v52  ;;  %v1254_v41 = vsel %vm1247_vm3, %v1221_v14, %v1002_v6  ;;  %v12893_v46 = vld [vmem:[%s14417_s14 + $0x62] sm:$0x3] }
 0x134   : > { %1355 = vst [vmem:[#allocation1 + $0x21] ss:$4 sm:$0xff] %v1286_v19  ;;  %v1255_v12 = vsel %vm1247_vm3, %v1222_v60, %v12639_v50  ;;  %v12796_v50 = vld [vmem:[%s14417_s14 + $0x4c] sm:$0x3]  ;;  %v12818_v19 = vld [vmem:[%s14417_s14 + $0x5c] sm:$0x3] }
 0x137   : > { %800 = vrot.lane.b32.xlu0 %v12692_v20, %s12102_s23 }
 0x138   : > { %802 = vrot.lane.b32.xlu1 %v12687_v13, %s12102_s23  ;;  %804 = vrot.lane.b32.xlu2 %v12702_v24, %s12102_s23 }
 0x139   : > { %v1086_v39 = vpop.permute.xlu0 %1085 }
 0x13a   : > { %v1088_v33 = vpop.permute.xlu1 %1087  ;;  %v1281_v45 = vsel %vm1280_vm2, %v1248_v32, %v1086_v39  ;;  %v12718_v47 = vpop.permute.xlu2 %786 }
 0x13b   : > { %v1282_v44 = vsel %vm1280_vm2, %v1249_v8, %v1088_v33  ;;  %1345 = vst [vmem:[#allocation1] ss:$4 sm:$0xff] %v1281_v45 }
 0x13c   : > { %1347 = vst [vmem:[#allocation1 + $0x1] ss:$4 sm:$0xff] %v1282_v44 }
 0x13f   : > { %806 = vrot.lane.b32.xlu0 %v12728_v43, %s12102_s23 }
 0x140   : > { %808 = vrot.lane.b32.xlu1 %v12723_v28, %s12102_s23  ;;  %810 = vrot.lane.b32.xlu2 %v713_v53, %s12102_s23 }
 0x141   : > { %v1092_v55 = vpop.permute.xlu0 %1091 }
 0x142   : > { %v1094_v38 = vpop.permute.xlu1 %1093  ;;  %v1284_v57 = vsel %vm1280_vm2, %v1251_v21, %v1092_v55  ;;  %v12753_v58 = vpop.permute.xlu2 %792 }
 0x143   : > { %v1285_v49 = vsel %vm1280_vm2, %v1252_v9, %v1094_v38  ;;  %1351 = vst [vmem:[#allocation1 + $0x3] ss:$4 sm:$0xff] %v1284_v57  ;;  %v12876_v9 = vld [vmem:[%s14417_s14 + $0x60] sm:$0x3] }
 0x144   : > { %1353 = vst [vmem:[#allocation1 + $0x20] ss:$4 sm:$0xff] %v1285_v49 }
 0x147   : > { %924 = vrot.lane.b32.xlu0 %v12663_v63, %s12103_s13 }
 0x148   : > { %926 = vrot.lane.b32.xlu1 %v12758_v34, %s12103_s13  ;;  %928 = vrot.lane.b32.xlu2 %v12769_v59, %s12103_s13 }
 0x149   : > { %v1098_v61 = vpop.permute.xlu0 %1097 }
 0x14a   : > { %v1100_v42 = vpop.permute.xlu1 %1099  ;;  %v1287_v62 = vsel %vm1280_vm2, %v1254_v41, %v1098_v61  ;;  %v12786_v0 = vpop.permute.xlu2 %910  ;;  %v1360_v7 = vld.sshfl [vmem:[#allocation1] sm:$0xff pattern:$0x73625140]  ;;  %v12916_v61 = vld [vmem:[%s14417_s14 + $0x6e] sm:$0x3] }
 0x14b   : > { %v1288_v52 = vsel %vm1280_vm2, %v1255_v12, %v1100_v42  ;;  %1357 = vst [vmem:[#allocation1 + $0x22] ss:$4 sm:$0xff] %v1287_v62  ;;  %v12932_v62 = vld [vmem:[%s14417_s14 + $0x72] sm:$0x3] }
 0x14c   : > { %1359 = vst [vmem:[#allocation1 + $0x23] ss:$4 sm:$0xff] %v1288_v52 }
 0x14f   : > { %930 = vrot.lane.b32.xlu0 %v12796_v50, %s12103_s13 }
 0x150   : > { %932 = vrot.lane.b32.xlu1 %v12791_v40, %s12103_s13  ;;  %934 = vrot.lane.b32.xlu2 %v12801_v3, %s12103_s13 }
 0x151   : > { %v12811_v5 = vpop.permute.xlu0 %782 }
 0x152   : > { %v12809_v4 = vpop.permute.xlu1 %784  ;;  %v12813_v6 = vpop.permute.xlu2 %916  ;;  %v1191_v52 = vsel %vm1181_vm0, %v12514_v17, %v12811_v5 }
 0x153   : > { %v1361_v10 = vld.sshfl [vmem:[#allocation1 + $0x20] sm:$0xff pattern:$0x73625140] }
 0x154   : > { %v1400_v16 = vpack.c.bf16 %v1361_v10, %v1360_v7 }
 0x156   : > { %7986 = vmatmul.msk.bf16.vlgmr.msra.gmra.mxu0 %vm1420_vm5, %v1400_v16 }
 0x157   : > { %936 = vrot.lane.b32.xlu0 %v12823_v22, %s12103_s13 }
 0x158   : > { %938 = vrot.lane.b32.xlu1 %v12818_v19, %s12103_s13  ;;  %1021 = vrot.lane.b32.xlu2 %v12668_v2, %s12104_s19 }
 0x159   : > { %v12834_v25 = vpop.permute.xlu0 %788 }
 0x15a   : > { %v12832_v23 = vpop.permute.xlu1 %790  ;;  %v12836_v26 = vpop.permute.xlu2 %922 }
 0x15f   : > { %1023 = vrot.lane.b32.xlu0 %v12692_v20, %s12104_s19  ;;  %v715_v20 = vld [vmem:[%s14417_s14 + $0x5e] sm:$0x3] }
 0x160   : > { %1025 = vrot.lane.b32.xlu1 %v12687_v13, %s12104_s19  ;;  %1027 = vrot.lane.b32.xlu2 %v12702_v24, %s12104_s19 }
 0x161   : > { %v12844_v32 = vpop.permute.xlu0 %794 }
 0x162   : > { %v909_v8 = vpop.permute.xlu1 %908  ;;  %v1010_v33 = vpop.permute.xlu2 %1009 }
 0x167   : > { %1029 = vrot.lane.b32.xlu0 %v12728_v43, %s12104_s19 }
 0x168   : > { %1031 = vrot.lane.b32.xlu1 %v12723_v28, %s12104_s19  ;;  %1033 = vrot.lane.b32.xlu2 %v713_v53, %s12104_s19  ;;  %v1190_v28 = vsel %vm1181_vm0, %v12484_v15, %v12681_v18  ;;  %v1193_v15 = vsel %vm1181_vm0, %v12572_v30, %v12718_v47  ;;  %v12898_v30 = vld [vmem:[%s14417_s14 + $0x66] sm:$0x3]  ;;  %v1196_v47 = vsel %vm1181_vm0, %v12597_v36, %v12753_v58  ;;  %v12921_v36 = vld [vmem:[%s14417_s14 + $0x6a] sm:$0x3] }
 0x169   : > { %v913_v13 = vpop.permute.xlu0 %912  ;;  %v1223_v43 = vsel %vm1214_vm1, %v1190_v28, %v909_v8  ;;  %v1192_v58 = vsel %vm1181_vm0, %v12555_v27, %v12809_v4  ;;  %v1224_v27 = vsel %vm1214_vm1, %v1191_v52, %v12786_v0  ;;  %v729_v0 = vld [vmem:[%s14417_s14 + $0x7a] sm:$0x3] }
 0x16a   : > { %v915_v2 = vpop.permute.xlu1 %914  ;;  %v12851_v39 = vpop.permute.xlu2 %1015  ;;  %v1225_v7 = vsel %vm1214_vm1, %v1192_v58, %v913_v13  ;;  %v1195_v13 = vsel %vm1181_vm0, %v12577_v31, %v12832_v23 }
 0x16b   : > { %v1226_v18 = vsel %vm1214_vm1, %v1193_v15, %v915_v2  ;;  %v1258_v17 = vsel %vm1247_vm3, %v1225_v7, %v1010_v33  ;;  %v727_v33 = vld [vmem:[%s14417_s14 + $0x76] sm:$0x3] }
 0x16f   : > { %1035 = vrot.lane.b32.xlu0 %v715_v20, %s12104_s19 }
 0x170   : > { %1117 = vrot.lane.b32.xlu1 %v12758_v34, %s12105_s4  ;;  %1119 = vrot.lane.b32.xlu2 %v12769_v59, %s12105_s4 }
 0x171   : > { %v919_v44 = vpop.permute.xlu0 %918 }
 0x172   : > { %v921_v24 = vpop.permute.xlu1 %920  ;;  %v1102_v45 = vpop.permute.xlu2 %1101 }
 0x173   : > { %v1229_v56 = vsel %vm1214_vm1, %v1196_v47, %v921_v24  ;;  %v1228_v24 = vsel %vm1214_vm1, %v1195_v13, %v919_v44 }
 0x174   : > { %v1261_v28 = vsel %vm1247_vm3, %v1228_v24, %v12851_v39  ;;  %v12983_v39 = vld [vmem:[%s14417_s14 + $0x64] sm:$0x3] }
 0x177   : > { %1121 = vrot.lane.b32.xlu0 %v12796_v50, %s12105_s4 }
 0x178   : > { %1123 = vrot.lane.b32.xlu1 %v12791_v40, %s12105_s4  ;;  %1125 = vrot.lane.b32.xlu2 %v12801_v3, %s12105_s4 }
 0x179   : > { %v1006_v51 = vpop.permute.xlu0 %1005 }
 0x17a   : > { %v1008_v48 = vpop.permute.xlu1 %1007  ;;  %v1256_v53 = vsel %vm1247_vm3, %v1223_v43, %v1006_v51  ;;  %v1108_v54 = vpop.permute.xlu2 %1107  ;;  %v12991_v51 = vld [vmem:[%s14417_s14 + $0x6c] sm:$0x3] }
 0x17b   : > { %v1289_v11 = vsel %vm1280_vm2, %v1256_v53, %v1102_v45  ;;  %v1257_v4 = vsel %vm1247_vm3, %v1224_v27, %v1008_v48  ;;  %v1197_v48 = vsel %vm1181_vm0, %v12592_v35, %v12844_v32 }
 0x17c   : > { %1362 = vst [vmem:[#allocation1] ss:$4 sm:$0xff] %v1289_v11  ;;  %v1230_v53 = vsel %vm1214_vm1, %v1197_v48, %v12836_v26  ;;  %v13015_v26 = vld [vmem:[%s14417_s14 + $0x70] sm:$0x3] }
 0x17f   : > { %1127 = vrot.lane.b32.xlu0 %v12823_v22, %s12105_s4 }
 0x180   : > { %1129 = vrot.lane.b32.xlu1 %v12818_v19, %s12105_s4  ;;  %1131 = vrot.lane.b32.xlu2 %v12876_v9, %s12105_s4 }
 0x181   : > { %v1012_v38 = vpop.permute.xlu0 %1011 }
 0x182   : > { %v1014_v21 = vpop.permute.xlu1 %1013  ;;  %v1259_v55 = vsel %vm1247_vm3, %v1226_v18, %v1012_v38  ;;  %v1114_v49 = vpop.permute.xlu2 %1113  ;;  %v13010_v18 = vld [vmem:[%s14417_s14 + $0x74] sm:$0x3] }
 0x183   : > { %v1292_v57 = vsel %vm1280_vm2, %v1259_v55, %v1108_v54 }
 0x184   : > { %1365 = vst [vmem:[#allocation1 + $0x3] ss:$4 sm:$0xff] %v1292_v57 }
 0x187   : > { %812 = vrot.lane.b32.xlu0 %v715_v20, %s12102_s23  ;;  %v1194_v20 = vsel %vm1181_vm0, %v12567_v29, %v12834_v25 }
 0x188   : > { %814 = vrot.lane.b32.xlu1 %v12893_v46, %s12102_s23  ;;  %816 = vrot.lane.b32.xlu2 %v12898_v30, %s12102_s23  ;;  %v1227_v45 = vsel %vm1214_vm1, %v1194_v20, %v12813_v6  ;;  %v12978_v6 = vld [vmem:[%s14417_s14 + $0x68] sm:$0x3] }
 0x189   : > { %v1018_v14 = vpop.permute.xlu0 %1017  ;;  %v1260_v31 = vsel %vm1247_vm3, %v1227_v45, %v1014_v21  ;;  %v13020_v21 = vld [vmem:[%s14417_s14 + $0x78] sm:$0x3] }
 0x18a   : > { %v1020_v60 = vpop.permute.xlu1 %1019  ;;  %v1262_v12 = vsel %vm1247_vm3, %v1229_v56, %v1018_v14  ;;  %v12910_v41 = vpop.permute.xlu2 %798 }
 0x18b   : > { %v1295_v42 = vsel %vm1280_vm2, %v1262_v12, %v1114_v49  ;;  %v1263_v54 = vsel %vm1247_vm3, %v1230_v53, %v1020_v60  ;;  %v730_v60 = vld [vmem:[%s14417_s14 + $0x7c] sm:$0x3] }
 0x18c   : > { %1368 = vst [vmem:[#allocation1 + $0x22] ss:$4 sm:$0xff] %v1295_v42 }
 0x18f   : > { %818 = vrot.lane.b32.xlu0 %v12921_v36, %s12102_s23 }
 0x190   : > { %820 = vrot.lane.b32.xlu1 %v12916_v61, %s12102_s23  ;;  %822 = vrot.lane.b32.xlu2 %v12932_v62, %s12102_s23 }
 0x191   : > { %v1104_v10 = vpop.permute.xlu0 %1103 }
 0x192   : > { %v1106_v5 = vpop.permute.xlu1 %1105  ;;  %v1290_v8 = vsel %vm1280_vm2, %v1257_v4, %v1104_v10  ;;  %v12947_v2 = vpop.permute.xlu2 %804  ;;  %v1199_v4 = vsel %vm1181_vm0, %v12663_v63, %v12910_v41 }
 0x193   : > { %v1291_v16 = vsel %vm1280_vm2, %v1258_v17, %v1106_v5  ;;  %1363 = vst [vmem:[#allocation1 + $0x1] ss:$4 sm:$0xff] %v1290_v8  ;;  %v1202_v63 = vsel %vm1181_vm0, %v12796_v50, %v12947_v2 }
 0x194   : > { %1364 = vst [vmem:[#allocation1 + $0x2] ss:$4 sm:$0xff] %v1291_v16 }
 0x197   : > { %824 = vrot.lane.b32.xlu0 %v727_v33, %s12102_s23 }
 0x198   : > { %826 = vrot.lane.b32.xlu1 %v729_v0, %s12102_s23  ;;  %940 = vrot.lane.b32.xlu2 %v12876_v9, %s12103_s13 }
 0x199   : > { %v1110_v43 = vpop.permute.xlu0 %1109 }
 0x19a   : > { %v1112_v23 = vpop.permute.xlu1 %1111  ;;  %v1293_v25 = vsel %vm1280_vm2, %v1260_v31, %v1110_v43  ;;  %v12973_v44 = vpop.permute.xlu2 %810 }
 0x19b   : > { %v1294_v29 = vsel %vm1280_vm2, %v1261_v28, %v1112_v23  ;;  %1366 = vst [vmem:[#allocation1 + $0x20] ss:$4 sm:$0xff] %v1293_v25  ;;  %v1370_v49 = vld.sshfl [vmem:[#allocation1] sm:$0xff pattern:$0x73625140]  ;;  %v1205_v50 = vsel %vm1181_vm0, %v12823_v22, %v12973_v44 }
 0x19c   : > { %1367 = vst [vmem:[#allocation1 + $0x21] ss:$4 sm:$0xff] %v1294_v29 }
 0x19f   : > { %942 = vrot.lane.b32.xlu0 %v12983_v39, %s12103_s13 }
 0x1a0   : > { %944 = vrot.lane.b32.xlu1 %v12978_v6, %s12103_s13  ;;  %946 = vrot.lane.b32.xlu2 %v12991_v51, %s12103_s13 }
 0x1a1   : > { %v1116_v32 = vpop.permute.xlu0 %1115 }
 0x1a2   : > { %v13002_v35 = vpop.permute.xlu1 %796  ;;  %v1296_v11 = vsel %vm1280_vm2, %v1263_v54, %v1116_v32  ;;  %v13005_v15 = vpop.permute.xlu2 %928 }
 0x1a3   : > { %1369 = vst [vmem:[#allocation1 + $0x23] ss:$4 sm:$0xff] %v1296_v11  ;;  %v1198_v31 = vsel %vm1181_vm0, %v12602_v37, %v13002_v35 }
 0x1a7   : > { %948 = vrot.lane.b32.xlu0 %v13015_v26, %s12103_s13 }
 0x1a8   : > { %950 = vrot.lane.b32.xlu1 %v13010_v18, %s12103_s13  ;;  %952 = vrot.lane.b32.xlu2 %v13020_v21, %s12103_s13 }
 0x1a9   : > { %v13030_v55 = vpop.permute.xlu0 %800 }
 0x1aa   : > { %v13028_v38 = vpop.permute.xlu1 %802  ;;  %v1371_v57 = vld.sshfl [vmem:[#allocation1 + $0x20] sm:$0xff pattern:$0x73625140]  ;;  %v13032_v47 = vpop.permute.xlu2 %934  ;;  %v1200_v22 = vsel %vm1181_vm0, %v12758_v34, %v13030_v55 }
 0x1ab   : > { %v1401_v56 = vpack.c.bf16 %v1371_v57, %v1370_v49  ;;  %v1201_v35 = vsel %vm1181_vm0, %v12769_v59, %v13028_v38  ;;  %v1233_v32 = vsel %vm1214_vm1, %v1200_v22, %v13005_v15 }
 0x1ad   : > { %7987 = vmatmul.msk.bf16.gmra.mxu0 %vm1420_vm5, %v1401_v56 }
 0x1af   : > { %954 = vrot.lane.b32.xlu0 %v730_v60, %s12103_s13 }
 0x1b0   : > { %1037 = vrot.lane.b32.xlu1 %v12893_v46, %s12104_s19  ;;  %1039 = vrot.lane.b32.xlu2 %v12898_v30, %s12104_s19  ;;  %v731_v30 = vld [vmem:[%s14417_s14 + $0x7e] sm:$0x3] }
 0x1b1   : > { %v13045_v12 = vpop.permute.xlu0 %806 }
 0x1b2   : > { %v13043_v14 = vpop.permute.xlu1 %808  ;;  %v1022_v42 = vpop.permute.xlu2 %1021  ;;  %v1203_v15 = vsel %vm1181_vm0, %v12791_v40, %v13045_v12 }
 0x1b3   : > { %v1204_v34 = vsel %vm1181_vm0, %v12801_v3, %v13043_v14  ;;  %v1236_v55 = vsel %vm1214_vm1, %v1203_v15, %v13032_v47 }
 0x1b7   : > { %1041 = vrot.lane.b32.xlu0 %v12921_v36, %s12104_s19 }
 0x1b8   : > { %1043 = vrot.lane.b32.xlu1 %v12916_v61, %s12104_s19  ;;  %1045 = vrot.lane.b32.xlu2 %v12932_v62, %s12104_s19 }
 0x1b9   : > { %v925_v58 = vpop.permute.xlu0 %924 }
 0x1ba   : > { %v927_v46 = vpop.permute.xlu1 %926  ;;  %v1028_v52 = vpop.permute.xlu2 %1027  ;;  %v1231_v23 = vsel %vm1214_vm1, %v1198_v31, %v925_v58 }
 0x1bb   : > { %v1232_v5 = vsel %vm1214_vm1, %v1199_v4, %v927_v46  ;;  %v1264_v2 = vsel %vm1247_vm3, %v1231_v23, %v1022_v42 }
 0x1bf   : > { %1047 = vrot.lane.b32.xlu0 %v727_v33, %s12104_s19 }
 0x1c0   : > { %1049 = vrot.lane.b32.xlu1 %v729_v0, %s12104_s19  ;;  %1051 = vrot.lane.b32.xlu2 %v731_v30, %s12104_s19  ;;  %s12106_s19 = smov 64  }
 0x1c1   : > { %v931_v7 = vpop.permute.xlu0 %930 }
 0x1c2   : > { %v933_v61 = vpop.permute.xlu1 %932  ;;  %v1034_v27 = vpop.permute.xlu2 %1033  ;;  %v1234_v44 = vsel %vm1214_vm1, %v1201_v35, %v931_v7 }
 0x1c3   : > { %v1235_v41 = vsel %vm1214_vm1, %v1202_v63, %v933_v61  ;;  %v1267_v11 = vsel %vm1247_vm3, %v1234_v44, %v1028_v52 }
 0x1c7   : > { %1133 = vrot.lane.b32.xlu0 %v12983_v39, %s12105_s4 }
 0x1c8   : > { %1135 = vrot.lane.b32.xlu1 %v12978_v6, %s12105_s4  ;;  %1137 = vrot.lane.b32.xlu2 %v12991_v51, %s12105_s4 }
 0x1c9   : > { %v937_v62 = vpop.permute.xlu0 %936 }
 0x1ca   : > { %v939_v36 = vpop.permute.xlu1 %938  ;;  %v1120_v17 = vpop.permute.xlu2 %1119  ;;  %v1237_v38 = vsel %vm1214_vm1, %v1204_v34, %v937_v62 }
 0x1cb   : > { %v1238_v43 = vsel %vm1214_vm1, %v1205_v50, %v939_v36  ;;  %v1270_v46 = vsel %vm1247_vm3, %v1237_v38, %v1034_v27 }
 0x1cf   : > { %1139 = vrot.lane.b32.xlu0 %v13015_v26, %s12105_s4 }
 0x1d0   : > { %1141 = vrot.lane.b32.xlu1 %v13010_v18, %s12105_s4  ;;  %1143 = vrot.lane.b32.xlu2 %v13020_v21, %s12105_s4 }
 0x1d1   : > { %v1024_v16 = vpop.permute.xlu0 %1023 }
 0x1d2   : > { %v1026_v10 = vpop.permute.xlu1 %1025  ;;  %v1265_v8 = vsel %vm1247_vm3, %v1232_v5, %v1024_v16  ;;  %v1126_v0 = vpop.permute.xlu2 %1125 }
 0x1d3   : > { %v1298_v33 = vsel %vm1280_vm2, %v1265_v8, %v1120_v17  ;;  %v1266_v49 = vsel %vm1247_vm3, %v1233_v32, %v1026_v10  ;;  %v1446_v32 = vpop.f32.mrf.mxu0 }
 0x1d4   : > { %1373 = vst [vmem:[#allocation1 + $0x1] ss:$4 sm:$0xff] %v1298_v33 }
 0x1d7   : > { %1145 = vrot.lane.b32.xlu0 %v730_v60, %s12105_s4 }
 0x1d8   : > { %1147 = vrot.lane.b32.xlu1 %v12101_v1, %s12105_s4 }
 0x1d9   : > { %v1030_v20 = vpop.permute.xlu0 %1029 }
 0x1da   : > { %v1032_v13 = vpop.permute.xlu1 %1031  ;;  %v1268_v24 = vsel %vm1247_vm3, %v1235_v41, %v1030_v20  ;;  %v1132_v45 = vpop.permute.xlu2 %1131 }
 0x1db   : > { %v1301_v28 = vsel %vm1280_vm2, %v1268_v24, %v1126_v0  ;;  %v1269_v58 = vsel %vm1247_vm3, %v1236_v55, %v1032_v13 }
 0x1dc   : > { %1376 = vst [vmem:[#allocation1 + $0x20] ss:$4 sm:$0xff] %v1301_v28 }
 0x1e1   : > { %v1036_v25 = vpop.permute.xlu0 %1035 }
 0x1e2   : > { %v1118_v29 = vpop.permute.xlu1 %1117  ;;  %v1271_v53 = vsel %vm1247_vm3, %v1238_v43, %v1036_v25  ;;  %v817_v54 = vpop.permute.xlu2 %816 }
 0x1e3   : > { %v1297_v48 = vsel %vm1280_vm2, %v1264_v2, %v1118_v29  ;;  %v1304_v37 = vsel %vm1280_vm2, %v1271_v53, %v1132_v45  ;;  %v1208_v28 = vsel %vm1181_vm0, %v12983_v39, %v817_v54 }
 0x1e4   : > { %1372 = vst [vmem:[#allocation1] ss:$4 sm:$0xff] %v1297_v48 }
 0x1e5   : > { %1379 = vst [vmem:[#allocation1 + $0x23] ss:$4 sm:$0xff] %v1304_v37 }
 0x1e9   : > { %v1122_v56 = vpop.permute.xlu0 %1121 }
 0x1ea   : > { %v1124_v57 = vpop.permute.xlu1 %1123  ;;  %v1299_v42 = vsel %vm1280_vm2, %v1266_v49, %v1122_v56  ;;  %v823_v59 = vpop.permute.xlu2 %822 }
 0x1eb   : > { %v1300_v60 = vsel %vm1280_vm2, %v1267_v11, %v1124_v57  ;;  %1374 = vst [vmem:[#allocation1 + $0x2] ss:$4 sm:$0xff] %v1299_v42  ;;  %v1211_v29 = vsel %vm1181_vm0, %v13015_v26, %v823_v59  ;;  %v13147_v59 = vld [vmem:[#allocation12] ss:$0 sm:$0xff] }
 0x1ec   : > { %1375 = vst [vmem:[#allocation1 + $0x3] ss:$4 sm:$0xff] %v1300_v60  ;;  %v1447_v15 = vadd.f32 %v13147_v59, %v1446_v32 }
 0x1ee   : > { %vm1466_vm6 = vcmp.ge.f32.partialorder %v1447_v15, 0.0 }
 0x1f1   : > { %v1128_v30 = vpop.permute.xlu0 %1127 }
 0x1f2   : > { %v1130_v52 = vpop.permute.xlu1 %1129  ;;  %v1302_v7 = vsel %vm1280_vm2, %v1269_v58, %v1128_v30  ;;  %v941_v3 = vpop.permute.xlu2 %940 }
 0x1f3   : > { %v1303_v61 = vsel %vm1280_vm2, %v1270_v46, %v1130_v52  ;;  %1377 = vst [vmem:[#allocation1 + $0x21] ss:$4 sm:$0xff] %v1302_v7  ;;  %v1380_v36 = vld.sshfl [vmem:[#allocation1] sm:$0xff pattern:$0x73625140]  ;;  %v1448_v30 = vpop.f32.mrf.mxu0 }
 0x1f4   : > { %1378 = vst [vmem:[#allocation1 + $0x22] ss:$4 sm:$0xff] %v1303_v61  ;;  %v1474_v7 = vmul.f32 0.01, %v1447_v15 }
 0x1f9   : > { %v813_v40 = vpop.permute.xlu0 %812 }
 0x1fa   : > { %v815_v14 = vpop.permute.xlu1 %814  ;;  %v947_v12 = vpop.permute.xlu2 %946  ;;  %v1206_v22 = vsel %vm1181_vm0, %v12818_v19, %v813_v40 }
 0x1fb   : > { %v1381_v62 = vld.sshfl [vmem:[#allocation1 + $0x20] sm:$0xff pattern:$0x73625140]  ;;  %v1207_v54 = vsel %vm1181_vm0, %v12876_v9, %v815_v14  ;;  %v1239_v26 = vsel %vm1214_vm1, %v1206_v22, %v941_v3  ;;  %v1449_v14 = vadd.f32 %v13147_v59, %v1448_v30 }
 0x1fc   : > { %v1402_v17 = vpack.c.bf16 %v1381_v62, %v1380_v36 }
 0x1fd   : > { %vm1467_vm7 = vcmp.ge.f32.partialorder %v1449_v14, 0.0 }
 0x1fe   : > { %7988 = vmatmul.msk.bf16.gmra.mxu0 %vm1420_vm5, %v1402_v17 }
 0x201   : > { %v819_v27 = vpop.permute.xlu0 %818 }
 0x202   : > { %v821_v47 = vpop.permute.xlu1 %820  ;;  %v13125_v4 = vpop.permute.xlu2 %952  ;;  %v1209_v9 = vsel %vm1181_vm0, %v12978_v6, %v819_v27 }
 0x203   : > { %v1210_v19 = vsel %vm1181_vm0, %v12991_v51, %v821_v47  ;;  %v1242_v38 = vsel %vm1214_vm1, %v1209_v9, %v947_v12  ;;  %v13166_v12 = vsel %vm1466_vm6, %v1447_v15, %v1474_v7 }
 0x209   : > { %v825_v10 = vpop.permute.xlu0 %824 }
 0x20a   : > { %v827_v5 = vpop.permute.xlu1 %826  ;;  %v1040_v16 = vpop.permute.xlu2 %1039  ;;  %v1212_v3 = vsel %vm1181_vm0, %v13010_v18, %v825_v10 }
 0x20b   : > { %v1213_v6 = vsel %vm1181_vm0, %v13020_v21, %v827_v5  ;;  %v1245_v36 = vsel %vm1214_vm1, %v1212_v3, %v13125_v4  ;;  %v1498_v21 = vrot.slane %v13166_v12, 2  ;;  %v1475_v5 = vmul.f32 0.01, %v1449_v14  ;;  %v10783_v3 = vld [vmem:[#allocation7 + $0x70] sm:$0xff] }
 0x20c   : > { %vm2111_vm0 = vcmask 1045508  }
 0x20d   : > { %v13175_v4 = vsel %vm1467_vm7, %v1449_v14, %v1475_v5  ;;  %v10774_v14 = vld [vmem:[#allocation7 + $0x28] sm:$0xff]  ;;  %v10772_v5 = vld [vmem:[#allocation7 + $0x18] sm:$0xff] }
 0x211   : > { %v943_v0 = vpop.permute.xlu0 %942 }
 0x212   : > { %v945_v8 = vpop.permute.xlu1 %944  ;;  %v1046_v33 = vpop.permute.xlu2 %1045  ;;  %v1240_v44 = vsel %vm1214_vm1, %v1207_v54, %v943_v0 }
 0x213   : > { %v1241_v31 = vsel %vm1214_vm1, %v1208_v28, %v945_v8  ;;  %v1273_v11 = vsel %vm1247_vm3, %v1240_v44, %v1040_v16 }
 0x219   : > { %v949_v41 = vpop.permute.xlu0 %948 }
 0x21a   : > { %v951_v63 = vpop.permute.xlu1 %950  ;;  %v1052_v13 = vpop.permute.xlu2 %1051  ;;  %v1243_v34 = vsel %vm1214_vm1, %v1210_v19, %v949_v41 }
 0x21b   : > { %v1244_v48 = vsel %vm1214_vm1, %v1211_v29, %v951_v63  ;;  %v1276_v55 = vsel %vm1247_vm3, %v1243_v34, %v1046_v33  ;;  %v1501_v33 = vrot.slane %v13175_v4, 2  ;;  %v1500_v63 = vrot.slane %v13166_v12, 6 }
 0x221   : > { %v955_v24 = vpop.permute.xlu0 %954 }
 0x222   : > { %v1038_v20 = vpop.permute.xlu1 %1037  ;;  %v1138_v45 = vpop.permute.xlu2 %1137  ;;  %v1246_v40 = vsel %vm1214_vm1, %v1213_v6, %v955_v24  ;;  %v10775_v6 = vld [vmem:[#allocation7 + $0x30] sm:$0xff] }
 0x223   : > { %v1272_v49 = vsel %vm1247_vm3, %v1239_v26, %v1038_v20  ;;  %v1279_v62 = vsel %vm1247_vm3, %v1246_v40, %v1052_v13  ;;  %v10782_v40 = vld [vmem:[#allocation7 + $0x68] sm:$0xff] }
 0x229   : > { %v1042_v50 = vpop.permute.xlu0 %1041 }
 0x22a   : > { %v1044_v23 = vpop.permute.xlu1 %1043  ;;  %v1274_v2 = vsel %vm1247_vm3, %v1241_v31, %v1042_v50  ;;  %v1144_v25 = vpop.permute.xlu2 %1143  ;;  %v1503_v50 = vrot.slane %v13175_v4, 6 }
 0x22b   : > { %v1307_v43 = vsel %vm1280_vm2, %v1274_v2, %v1138_v45  ;;  %v1275_v46 = vsel %vm1247_vm3, %v1242_v38, %v1044_v23  ;;  %v1451_v16 = vpop.f32.mrf.mxu0 }
 0x22c   : > { %1384 = vst [vmem:[#allocation1 + $0x2] ss:$4 sm:$0xff] %v1307_v43  ;;  %v1452_v0 = vadd.f32 %v13147_v59, %v1451_v16  ;;  %v10780_v16 = vld [vmem:[#allocation7 + $0x58] sm:$0xff] }
 0x22e   : > { %v1476_v41 = vmul.f32 0.01, %v1452_v0  ;;  %vm1468_vm8 = vcmp.ge.f32.partialorder %v1452_v0, 0.0 }
 0x230   : > { %v13181_v28 = vsel %vm1468_vm8, %v1452_v0, %v1476_v41  ;;  %v10771_v41 = vld [vmem:[#allocation7 + $0x10] sm:$0xff]  ;;  %vm2828_vm8 = vcmask 1043458  }
 0x231   : > { %v1048_v37 = vpop.permute.xlu0 %1047  ;;  %v1504_v23 = vrot.slane %v13181_v28, 2 }
 0x232   : > { %v1050_v53 = vpop.permute.xlu1 %1049  ;;  %v1277_v35 = vsel %vm1247_vm3, %v1244_v48, %v1048_v37 }
 0x233   : > { %v1310_v39 = vsel %vm1280_vm2, %v1277_v35, %v1144_v25  ;;  %v1278_v17 = vsel %vm1247_vm3, %v1245_v36, %v1050_v53  ;;  %v1453_v20 = vpop.f32.mrf.mxu0  ;;  %v1506_v53 = vrot.slane %v13181_v28, 6 }
 0x234   : > { %1387 = vst [vmem:[#allocation1 + $0x21] ss:$4 sm:$0xff] %v1310_v39  ;;  %v1454_v31 = vadd.f32 %v13147_v59, %v1453_v20  ;;  %v10787_v20 = vld [vmem:[#allocation7 + $0x90] sm:$0xff] }
 0x236   : > { %v1477_v2 = vmul.f32 0.01, %v1454_v31  ;;  %vm1469_vm9 = vcmp.ge.f32.partialorder %v1454_v31, 0.0 }
 0x238   : > { %v13189_v25 = vsel %vm1469_vm9, %v1454_v31, %v1477_v2  ;;  %vm2833_vm9 = vcmask 1045504  }
 0x239   : > { %v1134_v56 = vpop.permute.xlu0 %1133  ;;  %v1507_v48 = vrot.slane %v13189_v25, 2  ;;  %v1509_v39 = vrot.slane %v13189_v25, 6 }
 0x23a   : > { %v1136_v57 = vpop.permute.xlu1 %1135  ;;  %v1305_v42 = vsel %vm1280_vm2, %v1272_v49, %v1134_v56 }
 0x23b   : > { %v1306_v60 = vsel %vm1280_vm2, %v1273_v11, %v1136_v57  ;;  %1382 = vst [vmem:[#allocation1] ss:$4 sm:$0xff] %v1305_v42 }
 0x23c   : > { %1383 = vst [vmem:[#allocation1 + $0x1] ss:$4 sm:$0xff] %v1306_v60 }
 0x241   : > { %v1140_v52 = vpop.permute.xlu0 %1139 }
 0x242   : > { %v1142_v58 = vpop.permute.xlu1 %1141  ;;  %v1308_v51 = vsel %vm1280_vm2, %v1275_v46, %v1140_v52 }
 0x243   : > { %v1309_v61 = vsel %vm1280_vm2, %v1276_v55, %v1142_v58  ;;  %1385 = vst [vmem:[#allocation1 + $0x3] ss:$4 sm:$0xff] %v1308_v51  ;;  %v10784_v51 = vld [vmem:[#allocation7 + $0x78] sm:$0xff] }
 0x244   : > { %1386 = vst [vmem:[#allocation1 + $0x20] ss:$4 sm:$0xff] %v1309_v61  ;;  %v10776_v61 = vld [vmem:[#allocation7 + $0x38] sm:$0xff]  ;;  %2024 = vmatpush.bf16.msra.mxu2 %v10784_v51 }
 0x245   : > { %2005 = vmatpush.bf16.msra.mxu1 %v10776_v61  ;;  %v13275_v61 = vrot.slane %v13189_v25, 4 }
 0x248   : > { %2025 = vmatpush.bf16.msra.mxu2 %v10783_v3 }
 0x249   : > { %v1146_v27 = vpop.permute.xlu0 %1145  ;;  %2006 = vmatpush.bf16.msra.mxu1 %v10775_v6 }
 0x24a   : > { %v1148_v47 = vpop.permute.xlu1 %1147  ;;  %v1311_v10 = vsel %vm1280_vm2, %v1278_v17, %v1146_v27  ;;  %v1390_v8 = vld.sshfl [vmem:[#allocation1] sm:$0xff pattern:$0x73625140] }
 0x24b   : > { %v1312_v18 = vsel %vm1280_vm2, %v1279_v62, %v1148_v47  ;;  %1578 = vst [vmem:[#allocation1] ss:$4 sm:$0xff] %v1498_v21  ;;  %v10773_v62 = vld [vmem:[#allocation7 + $0x20] sm:$0xff] }
 0x24c   : > { %1389 = vst [vmem:[#allocation1 + $0x23] ss:$4 sm:$0xff] %v1312_v18  ;;  %2026 = vmatpush.bf16.msra.mxu2 %v10782_v40  ;;  %v10781_v17 = vld [vmem:[#allocation7 + $0x60] sm:$0xff]  ;;  %v10788_v18 = vld [vmem:[#allocation7 + $0x98] sm:$0xff] }
 0x24d   : > { %1388 = vst [vmem:[#allocation1 + $0x22] ss:$4 sm:$0xff] %v1311_v10  ;;  %2007 = vmatpush.bf16.msra.mxu1 %v10774_v14  ;;  %2047 = vmatpush.bf16.msra.mxu3 %v10788_v18 }
 0x250   : > { %2027 = vmatpush.bf16.msra.mxu2 %v10781_v17 }
 0x251   : > { %2008 = vmatpush.bf16.msra.mxu1 %v10773_v62  ;;  %2048 = vmatpush.bf16.msra.mxu3 %v10787_v20 }
 0x252   : > { %v1579_v13 = vld.sshfl [vmem:[#allocation1] sm:$0xff pattern:$0x73625140] }
 0x253   : > { %1583 = vst [vmem:[#allocation1] ss:$4 sm:$0xff] %v1501_v33  ;;  %1611 = vrot.lane.b32.xlu2 %v1579_v13, %s12106_s19  ;;  %v10779_v13 = vld [vmem:[#allocation7 + $0x50] sm:$0xff] }
 0x254   : > { %v1391_v24 = vld.sshfl [vmem:[#allocation1 + $0x20] sm:$0xff pattern:$0x73625140]  ;;  %2028 = vmatpush.bf16.msra.mxu2 %v10780_v16 }
 0x255   : > { %1581 = vst [vmem:[#allocation1 + $0x20] ss:$4 sm:$0xff] %v1500_v63  ;;  %v1403_v45 = vpack.c.bf16 %v1391_v24, %v1390_v8  ;;  %2009 = vmatpush.bf16.msra.mxu1 %v10772_v5 }
 0x257   : > { %7989 = vmatmul.msk.bf16.gmra.mxu0 %vm1420_vm5, %v1403_v45 }
 0x258   : > { %2029 = vmatpush.bf16.msra.mxu2 %v10779_v13 }
 0x259   : > { %2010 = vmatpush.bf16.msra.mxu1 %v10771_v41 }
 0x25a   : > { %v1584_v43 = vld.sshfl [vmem:[#allocation1] sm:$0xff pattern:$0x73625140] }
 0x25b   : > { %1587 = vst [vmem:[#allocation1] ss:$4 sm:$0xff] %v1504_v23  ;;  %1615 = vrot.lane.b32.xlu1 %v1584_v43, %s12106_s19 }
 0x25c   : > { %v1582_v29 = vld.sshfl [vmem:[#allocation1 + $0x20] sm:$0xff pattern:$0x73625140] }
 0x25d   : > { %1585 = vst [vmem:[#allocation1 + $0x20] ss:$4 sm:$0xff] %v1503_v50  ;;  %1613 = vrot.lane.b32.xlu0 %v1582_v29, %s12106_s19  ;;  %v10770_v29 = vld [vmem:[#allocation7 + $0x8] sm:$0xff] }
 0x25e   : > { %2011 = vmatpush.bf16.msra.mxu1 %v10770_v29 }
 0x262   : > { %v1588_v37 = vld.sshfl [vmem:[#allocation1] sm:$0xff pattern:$0x73625140] }
 0x263   : > { %1591 = vst [vmem:[#allocation1] ss:$4 sm:$0xff] %v1507_v48 }
 0x264   : > { %v1586_v35 = vld.sshfl [vmem:[#allocation1 + $0x20] sm:$0xff pattern:$0x73625140] }
 0x265   : > { %1589 = vst [vmem:[#allocation1 + $0x20] ss:$4 sm:$0xff] %v1506_v53  ;;  %1617 = vrot.lane.b32.xlu2 %v1586_v35, %s12106_s19  ;;  %1619 = vrot.lane.b32.xlu0 %v1588_v37, %s12106_s19 }
 0x26a   : > { %v1592_v54 = vld.sshfl [vmem:[#allocation1] sm:$0xff pattern:$0x73625140] }
 0x26c   : > { %v1590_v22 = vld.sshfl [vmem:[#allocation1 + $0x20] sm:$0xff pattern:$0x73625140] }
 0x26d   : > { %1593 = vst [vmem:[#allocation1 + $0x20] ss:$4 sm:$0xff] %v1509_v39  ;;  %1621 = vrot.lane.b32.xlu1 %v1590_v22, %s12106_s19  ;;  %1623 = vrot.lane.b32.xlu2 %v1592_v54, %s12106_s19 }
 0x274   : > { %v1594_v44 = vld.sshfl [vmem:[#allocation1 + $0x20] sm:$0xff pattern:$0x73625140] }
 0x275   : > { %1530 = vrot.lane.b32.xlu1 %v12101_v1, %s12106_s19  ;;  %1625 = vrot.lane.b32.xlu0 %v1594_v44, %s12106_s19 }
 0x276   : > { %1532 = vrot.lane.b32.xlu2 %v1498_v21, %s12106_s19 }
 0x27b   : > { %v1456_v32 = vpop.f32.mrf.mxu0 }
 0x27c   : > { %v1457_v26 = vadd.f32 %v13147_v59, %v1456_v32 }
 0x27d   : > { %1536 = vrot.lane.b32.xlu1 %v1501_v33, %s12106_s19  ;;  %1534 = vrot.lane.b32.xlu0 %v1500_v63, %s12106_s19 }
 0x27e   : > { %vm1470_vm10 = vcmp.ge.f32.partialorder %v1457_v26, 0.0  ;;  %v1478_v11 = vmul.f32 0.01, %v1457_v26  ;;  %1538 = vrot.lane.b32.xlu2 %v1503_v50, %s12106_s19 }
 0x280   : > { %v13208_v49 = vsel %vm1470_vm10, %v1457_v26, %v1478_v11  ;;  %v10769_v26 = vld [vmem:[#allocation7] sm:$0xff] }
 0x281   : > { %v1510_v57 = vrot.slane %v13208_v49, 2  ;;  %v1512_v56 = vrot.slane %v13208_v49, 6  ;;  %v10777_v11 = vld [vmem:[#allocation7 + $0x40] sm:$0xff]  ;;  %2012 = vmatpush.bf16.msra.mxu1 %v10769_v26 }
 0x283   : > { %1595 = vst [vmem:[#allocation1] ss:$4 sm:$0xff] %v1510_v57  ;;  %v1458_v60 = vpop.f32.mrf.mxu0 }
 0x284   : > { %1597 = vst [vmem:[#allocation1 + $0x20] ss:$4 sm:$0xff] %v1512_v56  ;;  %v1459_v42 = vadd.f32 %v13147_v59, %v1458_v60 }
 0x285   : > { %1542 = vrot.lane.b32.xlu1 %v1506_v53, %s12106_s19  ;;  %1540 = vrot.lane.b32.xlu0 %v1504_v23, %s12106_s19  ;;  %v13253_v23 = vrot.slane %v13166_v12, 4  ;;  %v10786_v53 = vld [vmem:[#allocation7 + $0x88] sm:$0xff] }
 0x286   : > { %vm1471_vm11 = vcmp.ge.f32.partialorder %v1459_v42, 0.0  ;;  %v1479_v19 = vmul.f32 0.01, %v1459_v42  ;;  %1544 = vrot.lane.b32.xlu2 %v1507_v48, %s12106_s19  ;;  %v10778_v48 = vld [vmem:[#allocation7 + $0x48] sm:$0xff]  ;;  %2049 = vmatpush.bf16.msra.mxu3 %v10786_v53 }
 0x287   : > { %2030 = vmatpush.bf16.msra.mxu2 %v10778_v48 }
 0x288   : > { %v13220_v9 = vsel %vm1471_vm11, %v1459_v42, %v1479_v19  ;;  %v10785_v19 = vld [vmem:[#allocation7 + $0x80] sm:$0xff] }
 0x289   : > { %v1513_v34 = vrot.slane %v13220_v9, 2  ;;  %v1515_v15 = vrot.slane %v13220_v9, 6 }
 0x28a   : > { %v1596_v38 = vld.sshfl [vmem:[#allocation1] sm:$0xff pattern:$0x73625140]  ;;  %2050 = vmatpush.bf16.msra.mxu3 %v10785_v19 }
 0x28b   : > { %v1598_v55 = vld.sshfl [vmem:[#allocation1 + $0x20] sm:$0xff pattern:$0x73625140]  ;;  %1599 = vst [vmem:[#allocation1] ss:$4 sm:$0xff] %v1513_v34  ;;  %2031 = vmatpush.bf16.msra.mxu2 %v10777_v11 }
 0x28c   : > { %1601 = vst [vmem:[#allocation1 + $0x20] ss:$4 sm:$0xff] %v1515_v15 }
 0x28d   : > { %1629 = vrot.lane.b32.xlu1 %v1598_v55, %s12106_s19  ;;  %1627 = vrot.lane.b32.xlu0 %v1596_v38, %s12106_s19  ;;  %v1505_v55 = vrot.slane %v13181_v28, 4 }
 0x292   : > { %v1600_v46 = vld.sshfl [vmem:[#allocation1] sm:$0xff pattern:$0x73625140] }
 0x293   : > { %v1602_v58 = vld.sshfl [vmem:[#allocation1 + $0x20] sm:$0xff pattern:$0x73625140]  ;;  %1631 = vrot.lane.b32.xlu2 %v1600_v46, %s12106_s19  ;;  %v1502_v46 = vrot.slane %v13175_v4, 4 }
 0x295   : > { %1633 = vrot.lane.b32.xlu0 %v1602_v58, %s12106_s19  ;;  %v1728_v53 = vrot.slane %v1502_v46, 4 }
 0x2ad   : > { %v13232_v52 = vpop.permute.xlu2 %1611 }
 0x2ae   : > { %v1676_v60 = vsel %vm1659_vm13, %v13166_v12, %v13232_v52 }
 0x2af   : > { %v1724_v52 = vrot.slane %v1676_v60, 6 }
 0x2bf   : > { %v13234_v30 = vpop.permute.xlu2 %1617 }
 0x2c0   : > { %v1679_v18 = vsel %vm1659_vm13, %v1502_v46, %v13234_v30 }
 0x2c1   : > { %v1729_v30 = vrot.slane %v1679_v18, 6 }
 0x2c7   : > { %v13236_v7 = vpop.permute.xlu2 %1623 }
 0x2cd   : > { %v13241_v10 = vpop.permute.xlu1 %1615 }
 0x2cf   : > { %v1614_v27 = vpop.permute.xlu0 %1613 }
 0x2d0   : > { %v13238_v36 = vpop.permute.xlu2 %1532  ;;  %v1677_v37 = vsel %vm1659_vm13, %v13253_v23, %v1614_v27  ;;  %v1725_v27 = vrot.slane %v13253_v23, 4 }
 0x2d1   : > { %v1726_v44 = vrot.slane %v1677_v37, 6  ;;  %v1661_v51 = vsel %vm1659_vm13, %v13166_v12, %v13238_v36  ;;  %v13289_v12 = vrot.slane %v13208_v49, 4  ;;  %v1731_v36 = vrot.slane %v1505_v55, 4 }
 0x2d3   : > { %v1752_v14 = vsel %vm1433_vm4, %v1661_v51, %v1726_v44 }
 0x2d4   : > { %v1461_v47 = vpop.f32.mrf.mxu0 }
 0x2d5   : > { %v1462_v21 = vadd.f32 %v13147_v59, %v1461_v47 }
 0x2d7   : > { %vm1472_vm12 = vcmp.ge.f32.partialorder %v1462_v21, 0.0  ;;  %v1480_v8 = vmul.f32 0.01, %v1462_v21  ;;  %v1620_v50 = vpop.permute.xlu0 %1619 }
 0x2d8   : > { %v1539_v24 = vpop.permute.xlu2 %1538 }
 0x2d9   : > { %v13243_v0 = vsel %vm1472_vm12, %v1462_v21, %v1480_v8  ;;  %v1664_v40 = vsel %vm1659_vm13, %v1502_v46, %v1539_v24  ;;  %v1753_v8 = vsel %vm1750_vm15, %v1752_v14, %v1502_v46  ;;  %v1678_v24 = vsel %vm1659_vm13, %v13175_v4, %v13241_v10 }
 0x2da   : > { %v1516_v33 = vrot.slane %v13243_v0, 2  ;;  %v1518_v63 = vrot.slane %v13243_v0, 6 }
 0x2dc   : > { %1603 = vst [vmem:[#allocation1] ss:$4 sm:$0xff] %v1516_v33  ;;  %v1463_v45 = vpop.f32.mrf.mxu0 }
 0x2dd   : > { %1605 = vst [vmem:[#allocation1 + $0x20] ss:$4 sm:$0xff] %v1518_v63  ;;  %v1464_v31 = vadd.f32 %v13147_v59, %v1463_v45  ;;  %v1680_v59 = vsel %vm1659_vm13, %v13181_v28, %v1620_v50 }
 0x2de   : > { %v1730_v38 = vrot.slane %v1680_v59, 6 }
 0x2df   : > { %vm1473_vm14 = vcmp.ge.f32.partialorder %v1464_v31, 0.0  ;;  %v1481_v2 = vmul.f32 0.01, %v1464_v31  ;;  %v13255_v43 = vpop.permute.xlu1 %1621 }
 0x2e0   : > { %v1545_v58 = vpop.permute.xlu2 %1544  ;;  %v1758_v47 = vsel %vm1433_vm4, %v1664_v40, %v1730_v38 }
 0x2e1   : > { %v13259_v35 = vsel %vm1473_vm14, %v1464_v31, %v1481_v2  ;;  %v1667_v16 = vsel %vm1659_vm13, %v13189_v25, %v1545_v58  ;;  %v1759_v45 = vsel %vm1750_vm15, %v1758_v47, %v1731_v36  ;;  %v1727_v2 = vrot.slane %v1678_v24, 6 }
 0x2e2   : > { %v1519_v54 = vrot.slane %v13259_v35, 2  ;;  %v1521_v22 = vrot.slane %v13259_v35, 6  ;;  %v2090_v24 = vrot.slane %v12101_v1, 6 }
 0x2e3   : > { %v1604_v32 = vld.sshfl [vmem:[#allocation1] sm:$0xff pattern:$0x73625140] }
 0x2e4   : > { %v1606_v42 = vld.sshfl [vmem:[#allocation1 + $0x20] sm:$0xff pattern:$0x73625140]  ;;  %1607 = vst [vmem:[#allocation1] ss:$4 sm:$0xff] %v1519_v54  ;;  %1635 = vrot.lane.b32.xlu1 %v1604_v32, %s12106_s19  ;;  %v1682_v32 = vsel %vm1659_vm13, %v13189_v25, %v13236_v7  ;;  %v1734_v7 = vrot.slane %v13275_v61, 4 }
 0x2e5   : > { %1609 = vst [vmem:[#allocation1 + $0x20] ss:$4 sm:$0xff] %v1521_v22  ;;  %1637 = vrot.lane.b32.xlu2 %v1606_v42, %s12106_s19 }
 0x2e7   : > { %v1531_v6 = vpop.permute.xlu1 %1530  ;;  %v1626_v3 = vpop.permute.xlu0 %1625 }
 0x2e8   : > { %v1660_v62 = vsel %vm1659_vm13, 0.0, %v1531_v6  ;;  %v1683_v17 = vsel %vm1659_vm13, %v13275_v61, %v1626_v3 }
 0x2e9   : > { %v1749_v21 = vsel %vm1433_vm4, %v1660_v62, %v1724_v52  ;;  %v1735_v5 = vrot.slane %v1683_v17, 6  ;;  %v1737_v62 = vrot.slane %v13289_v12, 4 }
 0x2ea   : > { %v1751_v13 = vsel %vm1750_vm15, %v1749_v21, %v1725_v27  ;;  %v1514_v27 = vrot.slane %v13220_v9, 4 }
 0x2eb   : > { %v1608_v41 = vld.sshfl [vmem:[#allocation1] sm:$0xff pattern:$0x73625140]  ;;  %v1764_v20 = vsel %vm1433_vm4, %v1667_v16, %v1735_v5 }
 0x2ec   : > { %v1610_v31 = vld.sshfl [vmem:[#allocation1 + $0x20] sm:$0xff pattern:$0x73625140]  ;;  %1784 = vst [vmem:[#allocation1 + $0x1] ss:$4 sm:$0xff] %v1753_v8  ;;  %v1765_v50 = vsel %vm1750_vm15, %v1764_v20, %v13289_v12  ;;  %1639 = vrot.lane.b32.xlu0 %v1608_v41, %s12106_s19  ;;  %v1517_v8 = vrot.slane %v13243_v0, 4 }
 0x2ed   : > { %1790 = vst [vmem:[#allocation1 + $0x20] ss:$4 sm:$0xff] %v1759_v45  ;;  %1546 = vrot.lane.b32.xlu2 %v1509_v39, %s12106_s19  ;;  %1641 = vrot.lane.b32.xlu1 %v1610_v31, %s12106_s19  ;;  %v1748_v20 = vrot.slane %v12101_v1, 4  ;;  %v2902_v45 = vrot.slane %v12101_v1, 2 }
 0x2ee   : > { %1782 = vst [vmem:[#allocation1] ss:$4 sm:$0xff] %v1751_v13 }
 0x2ef   : > { %1796 = vst [vmem:[#allocation1 + $0x23] ss:$4 sm:$0xff] %v1765_v50  ;;  %v1537_v10 = vpop.permute.xlu1 %1536  ;;  %v1535_v29 = vpop.permute.xlu0 %1534  ;;  %v13371_v50 = vsel %vm1433_vm4, 0.0, %v2090_v24  ;;  %v8195_v24 = vld [vmem:[#allocation9 + $0xf0] sm:$0xf] }
 0x2f0   : > { %v1663_v48 = vsel %vm1659_vm13, %v13175_v4, %v1537_v10  ;;  %v1662_v37 = vsel %vm1659_vm13, %v13253_v23, %v1535_v29  ;;  %v1681_v4 = vsel %vm1659_vm13, %v1505_v55, %v13255_v43  ;;  %v1733_v23 = vrot.slane %v1682_v32, 6 }
 0x2f1   : > { %v1756_v59 = vsel %vm1433_vm4, %v1663_v48, %v1729_v30  ;;  %v1754_v22 = vsel %vm1433_vm4, %v1662_v37, %v1727_v2  ;;  %v1732_v26 = vrot.slane %v1681_v4, 6  ;;  %v2928_v30 = vsel %vm2111_vm0, %v1748_v20, %v2902_v45 }
 0x2f2   : > { %v1757_v39 = vsel %vm1750_vm15, %v1756_v59, %v1505_v55  ;;  %v1755_v44 = vsel %vm1750_vm15, %v1754_v22, %v1728_v53  ;;  %v13376_v2 = vsel %vm1750_vm15, %v13371_v50, %v2928_v30  ;;  %v1520_v10 = vrot.slane %v13259_v35, 4 }
 0x2f3   : > { %1788 = vst [vmem:[#allocation1 + $0x3] ss:$4 sm:$0xff] %v1757_v39 }
 0x2f4   : > { %1786 = vst [vmem:[#allocation1 + $0x2] ss:$4 sm:$0xff] %v1755_v44  ;;  %1548 = vrot.lane.b32.xlu0 %v1510_v57, %s12106_s19  ;;  %v1746_v39 = vrot.slane %v1520_v10, 4 }
 0x2f5   : > { %1552 = vrot.lane.b32.xlu2 %v1513_v34, %s12106_s19  ;;  %1550 = vrot.lane.b32.xlu1 %v1512_v56, %s12106_s19 }
 0x2f7   : > { %v1543_v11 = vpop.permute.xlu1 %1542  ;;  %v1541_v25 = vpop.permute.xlu0 %1540 }
 0x2f8   : > { %v1666_v43 = vsel %vm1659_vm13, %v1505_v55, %v1543_v11  ;;  %v1665_v60 = vsel %vm1659_vm13, %v13181_v28, %v1541_v25 }
 0x2f9   : > { %v1762_v57 = vsel %vm1433_vm4, %v1666_v43, %v1733_v23  ;;  %v1760_v42 = vsel %vm1433_vm4, %v1665_v60, %v1732_v26  ;;  %v1740_v60 = vrot.slane %v1514_v27, 4 }
 0x2fa   : > { %v1763_v34 = vsel %vm1750_vm15, %v1762_v57, %v1734_v7  ;;  %v1761_v56 = vsel %vm1750_vm15, %v1760_v42, %v13275_v61 }
 0x2fb   : > { %1794 = vst [vmem:[#allocation1 + $0x22] ss:$4 sm:$0xff] %v1763_v34  ;;  %v1797_v28 = vld.sshfl [vmem:[#allocation1] sm:$0xff pattern:$0x73625140] }
 0x2fc   : > { %1554 = vrot.lane.b32.xlu0 %v1515_v15, %s12106_s19  ;;  %1792 = vst [vmem:[#allocation1 + $0x21] ss:$4 sm:$0xff] %v1761_v56  ;;  %v1798_v19 = vld.sshfl [vmem:[#allocation1 + $0x8] sm:$0xff pattern:$0x73625140] }
 0x2fd   : > { %1558 = vrot.lane.b32.xlu2 %v1518_v63, %s12106_s19  ;;  %1556 = vrot.lane.b32.xlu1 %v1516_v33, %s12106_s19  ;;  %v1799_v46 = vld.sshfl [vmem:[#allocation1 + $0x10] sm:$0xff pattern:$0x73625140]  ;;  %v1632_v63 = vpop.permute.xlu2 %1631 }
 0x2fe   : > { %v1686_v23 = vsel %vm1659_vm13, %v13220_v9, %v1632_v63 }
 0x2ff   : > { %v1628_v6 = vpop.permute.xlu0 %1627  ;;  %v1630_v36 = vpop.permute.xlu1 %1629  ;;  %v1739_v25 = vrot.slane %v1686_v23, 6  ;;  %v10800_v23 = vld [vmem:[#allocation9 + $0x54] sm:$0xf0] }
 0x300   : > { %v1684_v3 = vsel %vm1659_vm13, %v13208_v49, %v1628_v6  ;;  %v1685_v32 = vsel %vm1659_vm13, %v13289_v12, %v1630_v36 }
 0x301   : > { %v1736_v14 = vrot.slane %v1684_v3, 6  ;;  %v1738_v26 = vrot.slane %v1685_v32, 6  ;;  %v8115_v32 = vld [vmem:[#allocation9 + $0x50] sm:$0xf] }
 0x303   : > { %v1800_v38 = vld.sshfl [vmem:[#allocation1 + $0x20] sm:$0xff pattern:$0x73625140]  ;;  %v1801_v55 = vld.sshfl [vmem:[#allocation1 + $0x28] sm:$0xff pattern:$0x73625140] }
 0x304   : > { %1560 = vrot.lane.b32.xlu0 %v1519_v54, %s12106_s19  ;;  %v1802_v58 = vld.sshfl [vmem:[#allocation1 + $0x30] sm:$0xff pattern:$0x73625140]  ;;  %v1829_v15 = vpack.c.bf16 %v1800_v38, %v1797_v28  ;;  %v1830_v52 = vpack.c.bf16 %v1801_v55, %v1798_v19 }
 0x305   : > { %v1831_v51 = vpack.c.bf16 %v1802_v58, %v1799_v46 }
 0x306   : > { %2013 = vmatmul.bf16.vlgmr.msra.gmra.mxu1 %v1829_v15  ;;  %2032 = vmatmul.bf16.vlgmr.msra.gmra.mxu2 %v1830_v52 }
 0x307   : > { %8070 = vmatmul.msk.bf16.vlgmr.msra.gmra.mxu3 %vm1659_vm13, %v1831_v51  ;;  %v1634_v17 = vpop.permute.xlu0 %1633 }
 0x308   : > { %v1687_v5 = vsel %vm1659_vm13, %v1514_v27, %v1634_v17 }
 0x309   : > { %v1741_v16 = vrot.slane %v1687_v5, 6 }
 0x33f   : > { %v1638_v33 = vpop.permute.xlu2 %1637 }
 0x340   : > { %v1689_v19 = vsel %vm1659_vm13, %v1517_v8, %v1638_v33 }
 0x341   : > { %v1744_v55 = vrot.slane %v1689_v19, 6  ;;  %v8171_v19 = vld [vmem:[#allocation9 + $0xc0] sm:$0xf] }
 0x347   : > { %v1547_v40 = vpop.permute.xlu2 %1546 }
 0x348   : > { %v1668_v54 = vsel %vm1659_vm13, %v13275_v61, %v1547_v40 }
 0x349   : > { %v1766_v47 = vsel %vm1433_vm4, %v1668_v54, %v1736_v14 }
 0x34a   : > { %v1767_v21 = vsel %vm1750_vm15, %v1766_v47, %v1737_v62 }
 0x34b   : > { %1803 = vst [vmem:[#allocation1] ss:$4 sm:$0xff] %v1767_v21 }
 0x34f   : > { %v1553_v18 = vpop.permute.xlu2 %1552 }
 0x350   : > { %v1671_v41 = vsel %vm1659_vm13, %v13220_v9, %v1553_v18 }
 0x351   : > { %v1772_v61 = vsel %vm1433_vm4, %v1671_v41, %v1741_v16  ;;  %v13411_v41 = vld [vmem:[#allocation13] ss:$0 sm:$0xff] }
 0x352   : > { %v1773_v13 = vsel %vm1750_vm15, %v1772_v61, %v1517_v8 }
 0x353   : > { %1806 = vst [vmem:[#allocation1 + $0x3] ss:$4 sm:$0xff] %v1773_v13  ;;  %v8131_v13 = vld [vmem:[#allocation9 + $0x70] sm:$0xf] }
 0x356   : > { %v1636_v31 = vpop.permute.xlu1 %1635 }
 0x357   : > { %v1559_v29 = vpop.permute.xlu2 %1558  ;;  %v1688_v28 = vsel %vm1659_vm13, %v13243_v0, %v1636_v31 }
 0x358   : > { %v1674_v22 = vsel %vm1659_vm13, %v1517_v8, %v1559_v29  ;;  %v8123_v29 = vld [vmem:[#allocation9 + $0x60] sm:$0xf] }
 0x35e   : > { %v1640_v48 = vpop.permute.xlu0 %1639 }
 0x35f   : > { %v1642_v53 = vpop.permute.xlu1 %1641  ;;  %v1690_v37 = vsel %vm1659_vm13, %v13259_v35, %v1640_v48  ;;  %v10802_v48 = vld [vmem:[#allocation9 + $0x64] sm:$0xf0] }
 0x360   : > { %v1745_v59 = vrot.slane %v1690_v37, 6  ;;  %v1691_v33 = vsel %vm1659_vm13, %v1520_v10, %v1642_v53  ;;  %v8187_v37 = vld [vmem:[#allocation9 + $0xe0] sm:$0xf] }
 0x361   : > { %v1747_v3 = vrot.slane %v1691_v33, 6 }
 0x362   : > { %v1778_v44 = vsel %vm1433_vm4, %v1674_v22, %v1745_v59  ;;  %v10818_v59 = vld [vmem:[#allocation9 + $0xe4] sm:$0xf0] }
 0x363   : > { %v1779_v4 = vsel %vm1750_vm15, %v1778_v44, %v1746_v39  ;;  %v8124_v44 = vor.u32 %v10802_v48, %v8123_v29 }
 0x364   : > { %1809 = vst [vmem:[#allocation1 + $0x22] ss:$4 sm:$0xff] %v1779_v4  ;;  %v8188_v4 = vor.u32 %v10818_v59, %v8187_v37 }
 0x366   : > { %v1549_v11 = vpop.permute.xlu0 %1548 }
 0x367   : > { %v1551_v7 = vpop.permute.xlu1 %1550  ;;  %v1669_v43 = vsel %vm1659_vm13, %v13208_v49, %v1549_v11  ;;  %v1742_v49 = vrot.slane %v1688_v28, 6  ;;  %v10816_v11 = vld [vmem:[#allocation9 + $0xd4] sm:$0xf0]  ;;  %v10798_v28 = vld [vmem:[#allocation9 + $0x44] sm:$0xf0] }
 0x368   : > { %v1670_v57 = vsel %vm1659_vm13, %v13289_v12, %v1551_v7  ;;  %v1768_v42 = vsel %vm1433_vm4, %v1669_v43, %v1738_v26  ;;  %v1743_v12 = vrot.slane %v1517_v8, 4  ;;  %v8179_v26 = vld [vmem:[#allocation9 + $0xd0] sm:$0xf]  ;;  %v8107_v43 = vld [vmem:[#allocation9 + $0x40] sm:$0xf] }
 0x369   : > { %v1770_v34 = vsel %vm1433_vm4, %v1670_v57, %v1739_v25  ;;  %v1769_v56 = vsel %vm1750_vm15, %v1768_v42, %v1514_v27  ;;  %v10836_v57 = vld [vmem:[#allocation9 + $0x174] sm:$0xf0]  ;;  %v8323_v42 = vld [vmem:[#allocation9 + $0x1f0] sm:$0xf] }
 0x36a   : > { %v1771_v9 = vsel %vm1750_vm15, %v1770_v34, %v1740_v60  ;;  %1804 = vst [vmem:[#allocation1 + $0x1] ss:$4 sm:$0xff] %v1769_v56  ;;  %v8259_v60 = vld [vmem:[#allocation9 + $0x170] sm:$0xf]  ;;  %v8116_v56 = vor.u32 %v10800_v23, %v8115_v32 }
 0x36b   : > { %1805 = vst [vmem:[#allocation1 + $0x2] ss:$4 sm:$0xff] %v1771_v9  ;;  %v8180_v9 = vor.u32 %v10816_v11, %v8179_v26 }
 0x36e   : > { %v1555_v38 = vpop.permute.xlu0 %1554 }
 0x36f   : > { %v1557_v46 = vpop.permute.xlu1 %1556  ;;  %v1672_v58 = vsel %vm1659_vm13, %v1514_v27, %v1555_v38  ;;  %v10852_v38 = vld [vmem:[#allocation9 + $0x1f4] sm:$0xf0] }
 0x370   : > { %v1673_v15 = vsel %vm1659_vm13, %v13243_v0, %v1557_v46  ;;  %v1774_v52 = vsel %vm1433_vm4, %v1672_v58, %v1742_v49  ;;  %v8260_v49 = vor.u32 %v10836_v57, %v8259_v60  ;;  %v10794_v60 = vld [vmem:[#allocation9 + $0x24] sm:$0xf0]  ;;  %v8155_v57 = vld [vmem:[#allocation9 + $0xa0] sm:$0xf] }
 0x371   : > { %v1776_v51 = vsel %vm1433_vm4, %v1673_v15, %v1744_v55  ;;  %v1775_v63 = vsel %vm1750_vm15, %v1774_v52, %v1743_v12  ;;  %v10814_v15 = vld [vmem:[#allocation9 + $0xc4] sm:$0xf0]  ;;  %v8324_v52 = vor.u32 %v10852_v38, %v8323_v42  ;;  %v10848_v38 = vld [vmem:[#allocation9 + $0x1d4] sm:$0xf0] }
 0x372   : > { %v1777_v6 = vsel %vm1750_vm15, %v1776_v51, %v1520_v10  ;;  %1807 = vst [vmem:[#allocation1 + $0x20] ss:$4 sm:$0xff] %v1775_v63  ;;  %v1811_v54 = vld.sshfl [vmem:[#allocation1] sm:$0xff pattern:$0x73625140]  ;;  %2697 = vmatpush.bf16.msrb.mxu2 %v8260_v49 }
 0x373   : > { %1808 = vst [vmem:[#allocation1 + $0x21] ss:$4 sm:$0xff] %v1777_v6  ;;  %v1812_v17 = vld.sshfl [vmem:[#allocation1 + $0x8] sm:$0xff pattern:$0x73625140]  ;;  %2711 = vmatpush.bf16.msrb.mxu0 %v8324_v52 }
 0x374   : > { %v1813_v21 = vld.sshfl [vmem:[#allocation1 + $0x10] sm:$0xff pattern:$0x73625140]  ;;  %v10820_v10 = vld [vmem:[#allocation9 + $0xf4] sm:$0xf0] }
 0x375   : > { %v8196_v53 = vor.u32 %v10820_v10, %v8195_v24  ;;  %v8251_v63 = vld [vmem:[#allocation9 + $0x160] sm:$0xf]  ;;  %v10834_v6 = vld [vmem:[#allocation9 + $0x164] sm:$0xf0]  ;;  %v10812_v24 = vld [vmem:[#allocation9 + $0xb4] sm:$0xf0] }
 0x376   : > { %v1561_v14 = vpop.permute.xlu0 %1560  ;;  %v8307_v49 = vld [vmem:[#allocation9 + $0x1d0] sm:$0xf] }
 0x377   : > { %v1675_v40 = vsel %vm1659_vm13, %v13259_v35, %v1561_v14  ;;  %2683 = vmatpush.bf16.msrb.mxu1 %v8196_v53 }
 0x378   : > { %v1780_v62 = vsel %vm1433_vm4, %v1675_v40, %v1747_v3 }
 0x379   : > { %v1781_v0 = vsel %vm1750_vm15, %v1780_v62, %v1748_v20  ;;  %v10804_v20 = vld [vmem:[#allocation9 + $0x74] sm:$0xf0] }
 0x37a   : > { %1810 = vst [vmem:[#allocation1 + $0x23] ss:$4 sm:$0xff] %v1781_v0  ;;  %v8132_v30 = vor.u32 %v10804_v20, %v8131_v13  ;;  %v8163_v20 = vld [vmem:[#allocation9 + $0xb0] sm:$0xf] }
 0x37b   : > { %2684 = vmatpush.bf16.msrb.mxu1 %v8188_v4  ;;  %v8164_v10 = vor.u32 %v10812_v24, %v8163_v20  ;;  %v8133_v20 = vld [vmem:[#allocation9 + $0x78] sm:$0xf0] }
 0x37c   : > { %2669 = vmatpush.bf16.msrb.mxu3 %v8132_v30 }
 0x37f   : > { %2685 = vmatpush.bf16.msrb.mxu1 %v8180_v9  ;;  %v10832_v9 = vld [vmem:[#allocation9 + $0x154] sm:$0xf0] }
 0x380   : > { %2670 = vmatpush.bf16.msrb.mxu3 %v8124_v44 }
 0x381   : > { %v1814_v47 = vld.sshfl [vmem:[#allocation1 + $0x20] sm:$0xff pattern:$0x73625140]  ;;  %v1815_v27 = vld.sshfl [vmem:[#allocation1 + $0x28] sm:$0xff pattern:$0x73625140] }
 0x382   : > { %v1816_v5 = vld.sshfl [vmem:[#allocation1 + $0x30] sm:$0xff pattern:$0x73625140]  ;;  %v1832_v36 = vpack.c.bf16 %v1814_v47, %v1811_v54  ;;  %v1833_v16 = vpack.c.bf16 %v1815_v27, %v1812_v17  ;;  %v8108_v54 = vor.u32 %v10798_v28, %v8107_v43  ;;  %v8172_v17 = vor.u32 %v10814_v15, %v8171_v19  ;;  %v8315_v27 = vld [vmem:[#allocation9 + $0x1e0] sm:$0xf] }
 0x383   : > { %v1834_v18 = vpack.c.bf16 %v1816_v5, %v1813_v21  ;;  %v2014_v8 = vpop.f32.mrf.mxu1  ;;  %v8252_v47 = vor.u32 %v10834_v6, %v8251_v63  ;;  %v10850_v21 = vld [vmem:[#allocation9 + $0x1e4] sm:$0xf0]  ;;  %v8091_v43 = vld [vmem:[#allocation9 + $0x20] sm:$0xf]  ;;  %v10808_v15 = vld [vmem:[#allocation9 + $0x94] sm:$0xf0] }
 0x384   : > { %2018 = vmatmul.bf16.gmra.mxu1 %v1832_v36  ;;  %2037 = vmatmul.bf16.gmra.mxu2 %v1833_v16  ;;  %v2015_v35 = vadd.f32 %v13411_v41, %v2014_v8  ;;  %v10796_v8 = vld [vmem:[#allocation9 + $0x34] sm:$0xf0]  ;;  %v8092_v42 = vor.u32 %v10794_v60, %v8091_v43  ;;  %v8235_v63 = vld [vmem:[#allocation9 + $0x140] sm:$0xf]  ;;  %v10830_v6 = vld [vmem:[#allocation9 + $0x144] sm:$0xf0] }
 0x385   : > { %8071 = vmatmul.msk.bf16.gmra.mxu3 %vm1659_vm13, %v1834_v18  ;;  %v8099_v18 = vld [vmem:[#allocation9 + $0x30] sm:$0xf]  ;;  %2698 = vmatpush.bf16.msrb.mxu2 %v8252_v47  ;;  %v10806_v47 = vld [vmem:[#allocation9 + $0x84] sm:$0xf0]  ;;  %v10864_v43 = vld [vmem:[#allocation9 + $0x254] sm:$0xf0] }
 0x386   : > { %2671 = vmatpush.bf16.msrb.mxu3 %v8116_v56  ;;  %2686 = vmatpush.bf16.msrb.mxu1 %v8172_v17  ;;  %v8243_v56 = vld [vmem:[#allocation9 + $0x150] sm:$0xf] }
 0x387   : > { %v8244_v19 = vor.u32 %v10832_v9, %v8243_v56  ;;  %v8203_v9 = vld [vmem:[#allocation9 + $0x100] sm:$0xf] }
 0x389   : > { %v2033_v61 = vpop.f32.mrf.mxu2  ;;  %2699 = vmatpush.bf16.msrb.mxu2 %v8244_v19  ;;  %v8267_v19 = vld [vmem:[#allocation9 + $0x180] sm:$0xf] }
 0x38a   : > { %v2034_v45 = vadd.f32 %v2033_v61, %v2015_v35  ;;  %v2052_v31 = vpop.f32.mrf.mxu3  ;;  %v8316_v35 = vor.u32 %v10850_v21, %v8315_v27  ;;  %2672 = vmatpush.bf16.msrb.mxu3 %v8108_v54  ;;  %2687 = vmatpush.bf16.msrb.mxu1 %v8164_v10  ;;  %v8139_v54 = vld [vmem:[#allocation9 + $0x80] sm:$0xf]  ;;  %v8227_v27 = vld [vmem:[#allocation9 + $0x130] sm:$0xf]  ;;  %v10828_v21 = vld [vmem:[#allocation9 + $0x134] sm:$0xf0] }
 0x38b   : > { %v2016_v39 = vpop.f32.mrf.mxu1  ;;  %v8283_v10 = vld [vmem:[#allocation9 + $0x1a0] sm:$0xf] }
 0x38c   : > { %v2053_v22 = vadd.f32 %v2052_v31, %v2034_v45  ;;  %v2017_v7 = vadd.f32 %v13411_v41, %v2016_v39  ;;  %2712 = vmatpush.bf16.msrb.mxu0 %v8316_v35  ;;  %v8100_v31 = vor.u32 %v10796_v8, %v8099_v18  ;;  %v10844_v18 = vld [vmem:[#allocation9 + $0x1b4] sm:$0xf0]  ;;  %v8387_v8 = vld [vmem:[#allocation9 + $0x270] sm:$0xf] }
 0x38e   : > { %vm2062_vm1 = vcmp.ge.f32.partialorder %v2053_v22, 0.0  ;;  %v2066_v25 = vmul.f32 0.01, %v2053_v22  ;;  %2673 = vmatpush.bf16.msrb.mxu3 %v8100_v31  ;;  %v8219_v31 = vld [vmem:[#allocation9 + $0x120] sm:$0xf] }
 0x390   : > { %v2070_v34 = vsel %vm2062_vm1, %v2053_v22, %v2066_v25 }
 0x391   : > { %v2078_v55 = vrot.slane %v2070_v34, 2  ;;  %v2079_v46 = vrot.slane %v2070_v34, 4  ;;  %v2080_v12 = vrot.slane %v2070_v34, 6  ;;  %v2035_v58 = vpop.f32.mrf.mxu2 }
 0x392   : > { %v2036_v51 = vadd.f32 %v2035_v58, %v2017_v7  ;;  %v2054_v62 = vpop.f32.mrf.mxu3  ;;  %2674 = vmatpush.bf16.msrb.mxu3 %v8092_v42  ;;  %v8147_v58 = vld [vmem:[#allocation9 + $0x90] sm:$0xf]  ;;  %v10799_v42 = vld [vmem:[#allocation9 + $0x54] sm:$0xf] }
 0x393   : > { %v2091_v33 = vrot.slane %v2078_v55, 2  ;;  %v2092_v3 = vrot.slane %v2078_v55, 6  ;;  %v2093_v14 = vrot.slane %v2079_v46, 4  ;;  %v2094_v40 = vrot.slane %v2080_v12, 2  ;;  %2143 = vst [vmem:[#allocation1 + $0x20] ss:$4 sm:$0xff] %v2079_v46 }
 0x394   : > { %v2055_v0 = vadd.f32 %v2054_v62, %v2036_v51  ;;  %v2095_v29 = vrot.slane %v2080_v12, 6  ;;  %v8083_v55 = vld [vmem:[#allocation9 + $0x10] sm:$0xf]  ;;  %v10792_v12 = vld [vmem:[#allocation9 + $0x14] sm:$0xf0]  ;;  %v8148_v51 = vor.u32 %v10808_v15, %v8147_v58 }
 0x395   : > { %v2112_v5 = vsel %vm2111_vm0, %v2079_v46, %v2091_v33  ;;  %v2114_v36 = vsel %vm1433_vm4, %v2070_v34, %v2092_v3  ;;  %v2115_v16 = vsel %vm2111_vm0, %v2093_v14, %v2094_v40  ;;  %v10810_v34 = vld [vmem:[#allocation9 + $0xa4] sm:$0xf0]  ;;  %v8084_v52 = vor.u32 %v10792_v12, %v8083_v55  ;;  %v8299_v33 = vld [vmem:[#allocation9 + $0x1c0] sm:$0xf]  ;;  %v10797_v15 = vld [vmem:[#allocation9 + $0x44] sm:$0xf] }
 0x396   : > { %v2113_v61 = vsel %vm1750_vm15, %v13371_v50, %v2112_v5  ;;  %v2116_v13 = vsel %vm1750_vm15, %v2114_v36, %v2115_v16  ;;  %vm2063_vm2 = vcmp.ge.f32.partialorder %v2055_v0, 0.0  ;;  %v2067_v45 = vmul.f32 0.01, %v2055_v0  ;;  %v10846_v14 = vld [vmem:[#allocation9 + $0x1c4] sm:$0xf0] }
 0x397   : > { %2135 = vst [vmem:[#allocation1] ss:$4 sm:$0xff] %v2113_v61  ;;  %v2117_v32 = vsel %vm1433_vm4, %v2079_v46, %v2095_v29  ;;  %v8156_v28 = vor.u32 %v10810_v34, %v8155_v57  ;;  %v8308_v46 = vor.u32 %v10848_v38, %v8307_v49  ;;  %2675 = vmatpush.bf16.msrb.mxu3 %v8084_v52  ;;  %v8075_v62 = vld [vmem:[#allocation9] sm:$0xf]  ;;  %v8291_v16 = vld [vmem:[#allocation9 + $0x1b0] sm:$0xf] }
 0x398   : > { %2137 = vst [vmem:[#allocation1 + $0x1] ss:$4 sm:$0xff] %v2116_v13  ;;  %v2071_v30 = vsel %vm2063_vm2, %v2055_v0, %v2067_v45  ;;  %v8236_v3 = vor.u32 %v10830_v6, %v8235_v63  ;;  %v8300_v40 = vor.u32 %v10846_v14, %v8299_v33  ;;  %v10790_v0 = vld [vmem:[#allocation9 + $0x4] sm:$0xf0]  ;;  %v8140_v5 = vor.u32 %v10806_v47, %v8139_v54  ;;  %v10868_v61 = vld [vmem:[#allocation9 + $0x274] sm:$0xf0] }
 0x399   : > { %v2081_v48 = vrot.slane %v2071_v30, 2  ;;  %v2082_v53 = vrot.slane %v2071_v30, 4  ;;  %v2083_v37 = vrot.slane %v2071_v30, 6  ;;  %2145 = vst [vmem:[#allocation1 + $0x21] ss:$4 sm:$0xff] %v2071_v30  ;;  %2688 = vmatpush.bf16.msrb.mxu1 %v8156_v28  ;;  %2713 = vmatpush.bf16.msrb.mxu0 %v8308_v46  ;;  %v8076_v17 = vor.u32 %v10790_v0, %v8075_v62 }
 0x39a   : > { %2700 = vmatpush.bf16.msrb.mxu2 %v8236_v3  ;;  %v8228_v36 = vor.u32 %v10828_v21, %v8227_v27  ;;  %v8292_v35 = vor.u32 %v10844_v18, %v8291_v16  ;;  %v10803_v13 = vld [vmem:[#allocation9 + $0x74] sm:$0xf]  ;;  %v8388_v24 = vor.u32 %v10868_v61, %v8387_v8  ;;  %v8117_v34 = vld [vmem:[#allocation9 + $0x58] sm:$0xf0]  ;;  %v10822_v28 = vld [vmem:[#allocation9 + $0x104] sm:$0xf0] }
 0x39b   : > { %v2096_v50 = vrot.slane %v2081_v48, 2  ;;  %v2097_v59 = vrot.slane %v2081_v48, 6  ;;  %v2098_v22 = vrot.slane %v2082_v53, 4  ;;  %v2099_v39 = vrot.slane %v2083_v37, 2  ;;  %2147 = vst [vmem:[#allocation1 + $0x22] ss:$4 sm:$0xff] %v2082_v53  ;;  %2676 = vmatpush.bf16.msrb.mxu3 %v8076_v17 }
 0x39c   : > { %v2100_v44 = vrot.slane %v2083_v37, 6  ;;  %v8136_v45 = vor.u32 %v10803_v13, %v8133_v20  ;;  %v10842_v48 = vld [vmem:[#allocation9 + $0x1a4] sm:$0xf0]  ;;  %v8120_v56 = vor.u32 %v10799_v42, %v8117_v34  ;;  %v8204_v49 = vor.u32 %v10822_v28, %v8203_v9  ;;  %v8363_v55 = vld [vmem:[#allocation9 + $0x240] sm:$0xf] }
 0x39d   : > { %v2118_v4 = vsel %vm2111_vm0, %v2082_v53, %v2096_v50  ;;  %v2120_v23 = vsel %vm1433_vm4, %v2071_v30, %v2097_v59  ;;  %v2121_v26 = vsel %vm2111_vm0, %v2098_v22, %v2099_v39  ;;  %2689 = vmatpush.bf16.msrb.mxu1 %v8148_v51  ;;  %2714 = vmatpush.bf16.msrb.mxu0 %v8300_v40  ;;  %v10826_v30 = vld [vmem:[#allocation9 + $0x124] sm:$0xf0]  ;;  %v10801_v22 = vld [vmem:[#allocation9 + $0x64] sm:$0xf]  ;;  %v8125_v39 = vld [vmem:[#allocation9 + $0x68] sm:$0xf0] }
 0x39e   : > { %v2119_v11 = vsel %vm1750_vm15, %v2117_v32, %v2118_v4  ;;  %v2122_v25 = vsel %vm1750_vm15, %v2120_v23, %v2121_v26  ;;  %v13429_v7 = vsel %vm1433_vm4, %v2082_v53, %v2100_v44  ;;  %2701 = vmatpush.bf16.msrb.mxu2 %v8228_v36  ;;  %v8220_v29 = vor.u32 %v10826_v30, %v8219_v31  ;;  %v8379_v53 = vld [vmem:[#allocation9 + $0x260] sm:$0xf]  ;;  %v10866_v37 = vld [vmem:[#allocation9 + $0x264] sm:$0xf0]  ;;  %v8211_v32 = vld [vmem:[#allocation9 + $0x110] sm:$0xf] }
 0x39f   : > { %2139 = vst [vmem:[#allocation1 + $0x2] ss:$4 sm:$0xff] %v2119_v11  ;;  %2725 = vmatpush.bf16.msra.mxu3 %v8388_v24  ;;  %v8284_v50 = vor.u32 %v10842_v48, %v8283_v10  ;;  %v8380_v59 = vor.u32 %v10866_v37, %v8379_v53  ;;  %v8128_v44 = vor.u32 %v10801_v22, %v8125_v39  ;;  %v10824_v4 = vld [vmem:[#allocation9 + $0x114] sm:$0xf0]  ;;  %v8275_v23 = vld [vmem:[#allocation9 + $0x190] sm:$0xf] }
 0x3a0   : > { %2141 = vst [vmem:[#allocation1 + $0x3] ss:$4 sm:$0xff] %v2122_v25  ;;  %v8212_v26 = vor.u32 %v10824_v4, %v8211_v32  ;;  %v10840_v11 = vld [vmem:[#allocation9 + $0x194] sm:$0xf0]  ;;  %v8371_v25 = vld [vmem:[#allocation9 + $0x250] sm:$0xf] }
 0x3a1   : > { %2690 = vmatpush.bf16.msrb.mxu1 %v8140_v5  ;;  %2715 = vmatpush.bf16.msrb.mxu0 %v8292_v35  ;;  %v8276_v60 = vor.u32 %v10840_v11, %v8275_v23  ;;  %v8372_v57 = vor.u32 %v10864_v43, %v8371_v25  ;;  %v10838_v38 = vld [vmem:[#allocation9 + $0x184] sm:$0xf0]  ;;  %v8109_v52 = vld [vmem:[#allocation9 + $0x48] sm:$0xf0]  ;;  %v10819_v51 = vld [vmem:[#allocation9 + $0xf4] sm:$0xf] }
 0x3a2   : > { %2702 = vmatpush.bf16.msrb.mxu2 %v8220_v29  ;;  %v10862_v46 = vld [vmem:[#allocation9 + $0x244] sm:$0xf0]  ;;  %v8268_v12 = vor.u32 %v10838_v38, %v8267_v19  ;;  %v8112_v63 = vor.u32 %v10797_v15, %v8109_v52  ;;  %v8197_v6 = vld [vmem:[#allocation9 + $0xf8] sm:$0xf0]  ;;  %v10835_v33 = vld [vmem:[#allocation9 + $0x174] sm:$0xf] }
 0x3a3   : > { %2726 = vmatpush.bf16.msra.mxu3 %v8380_v59  ;;  %v8364_v58 = vor.u32 %v10862_v46, %v8363_v55  ;;  %v8261_v3 = vld [vmem:[#allocation9 + $0x178] sm:$0xf0]  ;;  %v8200_v14 = vor.u32 %v10819_v51, %v8197_v6  ;;  %v8355_v62 = vld [vmem:[#allocation9 + $0x230] sm:$0xf]  ;;  %v10860_v0 = vld [vmem:[#allocation9 + $0x234] sm:$0xf0] }
 0x3a4   : > { %v8264_v40 = vor.u32 %v10835_v33, %v8261_v3  ;;  %v10795_v54 = vld [vmem:[#allocation9 + $0x34] sm:$0xf]  ;;  %v8356_v17 = vor.u32 %v10860_v0, %v8355_v62  ;;  %v8101_v47 = vld [vmem:[#allocation9 + $0x38] sm:$0xf0]  ;;  %v10817_v27 = vld [vmem:[#allocation9 + $0xe4] sm:$0xf] }
 0x3a5   : > { %2739 = vmatpush.bf16.msra.mxu1 %v8136_v45  ;;  %2716 = vmatpush.bf16.msrb.mxu0 %v8284_v50  ;;  %v8189_v21 = vld [vmem:[#allocation9 + $0xe8] sm:$0xf0]  ;;  %v8104_v5 = vor.u32 %v10795_v54, %v8101_v47  ;;  %v10833_v16 = vld [vmem:[#allocation9 + $0x164] sm:$0xf]  ;;  %v8347_v8 = vld [vmem:[#allocation9 + $0x220] sm:$0xf] }
 0x3a6   : > { %2703 = vmatpush.bf16.msrb.mxu2 %v8212_v26  ;;  %v8192_v36 = vor.u32 %v10817_v27, %v8189_v21  ;;  %v8253_v18 = vld [vmem:[#allocation9 + $0x168] sm:$0xf0]  ;;  %v10858_v61 = vld [vmem:[#allocation9 + $0x224] sm:$0xf0]  ;;  %v10793_v13 = vld [vmem:[#allocation9 + $0x24] sm:$0xf] }
 0x3a7   : > { %2727 = vmatpush.bf16.msra.mxu3 %v8372_v57  ;;  %v8256_v35 = vor.u32 %v10833_v16, %v8253_v18  ;;  %v8093_v20 = vld [vmem:[#allocation9 + $0x28] sm:$0xf0]  ;;  %v10815_v45 = vld [vmem:[#allocation9 + $0xd4] sm:$0xf]  ;;  %v8181_v31 = vld [vmem:[#allocation9 + $0xd8] sm:$0xf0]  ;;  %v8348_v10 = vor.u32 %v10858_v61, %v8347_v8 }
 0x3a8   : > { %v10831_v30 = vld [vmem:[#allocation9 + $0x154] sm:$0xf]  ;;  %v8096_v29 = vor.u32 %v10793_v13, %v8093_v20  ;;  %v8245_v48 = vld [vmem:[#allocation9 + $0x158] sm:$0xf0]  ;;  %v8339_v53 = vld [vmem:[#allocation9 + $0x210] sm:$0xf]  ;;  %v8184_v50 = vor.u32 %v10815_v45, %v8181_v31 }
 0x3a9   : > { %2740 = vmatpush.bf16.msra.mxu1 %v8128_v44  ;;  %2717 = vmatpush.bf16.msrb.mxu0 %v8276_v60  ;;  %v10856_v37 = vld [vmem:[#allocation9 + $0x214] sm:$0xf0]  ;;  %v8248_v59 = vor.u32 %v10831_v30, %v8245_v48  ;;  %v10791_v22 = vld [vmem:[#allocation9 + $0x14] sm:$0xf]  ;;  %v8085_v39 = vld [vmem:[#allocation9 + $0x18] sm:$0xf0] }
 0x3aa   : > { %2704 = vmatpush.bf16.msrb.mxu2 %v8204_v49  ;;  %v10813_v44 = vld [vmem:[#allocation9 + $0xc4] sm:$0xf]  ;;  %v8173_v32 = vld [vmem:[#allocation9 + $0xc8] sm:$0xf0]  ;;  %v8340_v11 = vor.u32 %v10856_v37, %v8339_v53  ;;  %v8088_v25 = vor.u32 %v10791_v22, %v8085_v39  ;;  %v10854_v9 = vld [vmem:[#allocation9 + $0x204] sm:$0xf0] }
 0x3ab   : > { %2728 = vmatpush.bf16.msra.mxu3 %v8364_v58  ;;  %v10829_v4 = vld [vmem:[#allocation9 + $0x144] sm:$0xf]  ;;  %v8237_v23 = vld [vmem:[#allocation9 + $0x148] sm:$0xf0]  ;;  %v8176_v60 = vor.u32 %v10813_v44, %v8173_v32  ;;  %v10811_v55 = vld [vmem:[#allocation9 + $0xb4] sm:$0xf] }
 0x3ac   : > { %v8240_v57 = vor.u32 %v10829_v4, %v8237_v23  ;;  %v10789_v28 = vld [vmem:[#allocation9 + $0x4] sm:$0xf]  ;;  %v8077_v38 = vld [vmem:[#allocation9 + $0x8] sm:$0xf0]  ;;  %v8165_v46 = vld [vmem:[#allocation9 + $0xb8] sm:$0xf0] }
 0x3ad   : > { %2741 = vmatpush.bf16.msra.mxu1 %v8120_v56  ;;  %2718 = vmatpush.bf16.msrb.mxu0 %v8268_v12  ;;  %v8331_v56 = vld [vmem:[#allocation9 + $0x200] sm:$0xf]  ;;  %v8080_v58 = vor.u32 %v10789_v28, %v8077_v38  ;;  %v8168_v15 = vor.u32 %v10811_v55, %v8165_v46  ;;  %v10827_v52 = vld [vmem:[#allocation9 + $0x134] sm:$0xf]  ;;  %v8229_v51 = vld [vmem:[#allocation9 + $0x138] sm:$0xf0] }
 0x3ae   : > { %2753 = vmatpush.bf16.msra.mxu2 %v8200_v14  ;;  %v8332_v49 = vor.u32 %v10854_v9, %v8331_v56  ;;  %v8232_v6 = vor.u32 %v10827_v52, %v8229_v51  ;;  %v10809_v33 = vld [vmem:[#allocation9 + $0xa4] sm:$0xf]  ;;  %v8221_v0 = vld [vmem:[#allocation9 + $0x128] sm:$0xf0]  ;;  %v10807_v45 = vld [vmem:[#allocation9 + $0x94] sm:$0xf] }
 0x3af   : > { %2729 = vmatpush.bf16.msra.mxu3 %v8356_v17  ;;  %v10825_v62 = vld [vmem:[#allocation9 + $0x124] sm:$0xf]  ;;  %v2150_v61 = vld.sshfl [vmem:[#allocation1] sm:$0xff pattern:$0x73625140]  ;;  %vm5478_vm2 = vcmask 1045506  }
 0x3b0   : > { %v2151_v13 = vld.sshfl [vmem:[#allocation1 + $0x8] sm:$0xff pattern:$0x73625140]  ;;  %v13433_v20 = vld.sshfl [vmem:[#allocation1 + $0x10] sm:$0xff pattern:$0x73625140] }
 0x3b1   : > { %2742 = vmatpush.bf16.msra.mxu1 %v8112_v63  ;;  %2767 = vmatpush.bf16.msra.mxu0 %v8264_v40  ;;  %v8157_v40 = vld [vmem:[#allocation9 + $0xa8] sm:$0xf0]  ;;  %v8149_v31 = vld [vmem:[#allocation9 + $0x98] sm:$0xf0]  ;;  %v10823_v48 = vld [vmem:[#allocation9 + $0x114] sm:$0xf] }
 0x3b2   : > { %2754 = vmatpush.bf16.msra.mxu2 %v8192_v36  ;;  %v8160_v21 = vor.u32 %v10809_v33, %v8157_v40  ;;  %v8224_v36 = vor.u32 %v10825_v62, %v8221_v0  ;;  %v8213_v53 = vld [vmem:[#allocation9 + $0x118] sm:$0xf0]  ;;  %v2153_v37 = vld.sshfl [vmem:[#allocation1 + $0x18] sm:$0xff pattern:$0x73625140]  ;;  %v8152_v39 = vor.u32 %v10807_v45, %v8149_v31 }
 0x3b3   : > { %2730 = vmatpush.bf16.msra.mxu3 %v8348_v10  ;;  %v8216_v44 = vor.u32 %v10823_v48, %v8213_v53  ;;  %v10805_v32 = vld [vmem:[#allocation9 + $0x84] sm:$0xf]  ;;  %v8141_v4 = vld [vmem:[#allocation9 + $0x88] sm:$0xf0]  ;;  %v8389_v52 = vld [vmem:[#allocation9 + $0x278] sm:$0xf0] }
 0x3b4   : > { %v8365_v45 = vld [vmem:[#allocation9 + $0x248] sm:$0xf0]  ;;  %v10859_v48 = vld [vmem:[#allocation9 + $0x234] sm:$0xf] }
 0x3b5   : > { %2743 = vmatpush.bf16.msra.mxu1 %v8104_v5  ;;  %2768 = vmatpush.bf16.msra.mxu0 %v8256_v35 }
 0x3b6   : > { %2755 = vmatpush.bf16.msra.mxu2 %v8184_v50 }
 0x3b7   : > { %2731 = vmatpush.bf16.msra.mxu3 %v8340_v11  ;;  %v10821_v11 = vld [vmem:[#allocation9 + $0x104] sm:$0xf] }
 0x3b9   : > { %2744 = vmatpush.bf16.msra.mxu1 %v8096_v29  ;;  %2769 = vmatpush.bf16.msra.mxu0 %v8248_v59 }
 0x3ba   : > { %2756 = vmatpush.bf16.msra.mxu2 %v8176_v60 }
 0x3bb   : > { %2732 = vmatpush.bf16.msra.mxu3 %v8332_v49 }
 0x3bd   : > { %2745 = vmatpush.bf16.msra.mxu1 %v8088_v25  ;;  %2770 = vmatpush.bf16.msra.mxu0 %v8240_v57  ;;  %v8205_v25 = vld [vmem:[#allocation9 + $0x108] sm:$0xf0] }
 0x3be   : > { %2757 = vmatpush.bf16.msra.mxu2 %v8168_v15  ;;  %v10867_v15 = vld [vmem:[#allocation9 + $0x274] sm:$0xf] }
 0x3bf   : > { %v8392_v0 = vor.u32 %v10867_v15, %v8389_v52  ;;  %v2263_v52 = vld [vmem:[#allocation15] sm:$0x3] }
 0x3c1   : > { %2746 = vmatpush.bf16.msra.mxu1 %v8080_v58  ;;  %2771 = vmatpush.bf16.msra.mxu0 %v8232_v6  ;;  %v8325_v58 = vld [vmem:[#allocation9 + $0x1f8] sm:$0xf0]  ;;  %v10849_v6 = vld [vmem:[#allocation9 + $0x1e4] sm:$0xf] }
 0x3c2   : > { %2758 = vmatpush.bf16.msra.mxu2 %v8160_v21  ;;  %v8381_v21 = vld [vmem:[#allocation9 + $0x268] sm:$0xf0] }
 0x3c5   : > { %2772 = vmatpush.bf16.msra.mxu0 %v8224_v36 }
 0x3c6   : > { %2759 = vmatpush.bf16.msra.mxu2 %v8152_v39  ;;  %v10841_v39 = vld [vmem:[#allocation9 + $0x1a4] sm:$0xf] }
 0x3c9   : > { %2773 = vmatpush.bf16.msra.mxu0 %v8216_v44  ;;  %v8285_v44 = vld [vmem:[#allocation9 + $0x1a8] sm:$0xf0] }
 0x401   : > { %v2019_v24 = vpop.f32.mrf.mxu1 }
 0x402   : > { %v2020_v26 = vadd.f32 %v13411_v41, %v2019_v24 }
 0x407   : > { %v2038_v43 = vpop.f32.mrf.mxu2 }
 0x408   : > { %v2039_v42 = vadd.f32 %v2038_v43, %v2020_v26  ;;  %v2057_v34 = vpop.f32.mrf.mxu3  ;;  %v8144_v26 = vor.u32 %v10805_v32, %v8141_v4  ;;  %v10857_v32 = vld [vmem:[#allocation9 + $0x224] sm:$0xf]  ;;  %v8349_v4 = vld [vmem:[#allocation9 + $0x228] sm:$0xf0] }
 0x409   : > { %v2021_v12 = vpop.f32.mrf.mxu1 }
 0x40a   : > { %v2058_v19 = vadd.f32 %v2057_v34, %v2039_v42  ;;  %v2022_v14 = vadd.f32 %v13411_v41, %v2021_v12  ;;  %2760 = vmatpush.bf16.msra.mxu2 %v8144_v26  ;;  %v10851_v12 = vld [vmem:[#allocation9 + $0x1f4] sm:$0xf]  ;;  %v8352_v26 = vor.u32 %v10857_v32, %v8349_v4 }
 0x40b   : > { %v8328_v62 = vor.u32 %v10851_v12, %v8325_v58 }
 0x40c   : > { %vm2064_vm3 = vcmp.ge.f32.partialorder %v2058_v19, 0.0  ;;  %v2068_v63 = vmul.f32 0.01, %v2058_v19 }
 0x40e   : > { %v2072_v3 = vsel %vm2064_vm3, %v2058_v19, %v2068_v63  ;;  %vm5509_vm3 = vcmask 1042434  }
 0x40f   : > { %v2084_v54 = vrot.slane %v2072_v3, 2  ;;  %v2085_v17 = vrot.slane %v2072_v3, 4  ;;  %v2086_v47 = vrot.slane %v2072_v3, 6  ;;  %2149 = vst [vmem:[#allocation1 + $0x23] ss:$4 sm:$0xff] %v2072_v3  ;;  %v2040_v27 = vpop.f32.mrf.mxu2 }
 0x410   : > { %v2041_v5 = vadd.f32 %v2040_v27, %v2022_v14  ;;  %v2059_v41 = vpop.f32.mrf.mxu3  ;;  %v10865_v27 = vld [vmem:[#allocation9 + $0x264] sm:$0xf] }
 0x411   : > { %v2101_v16 = vrot.slane %v2084_v54, 2  ;;  %v2102_v18 = vrot.slane %v2084_v54, 6  ;;  %v2103_v8 = vrot.slane %v2085_v17, 4  ;;  %v2104_v35 = vrot.slane %v2086_v47, 2 }
 0x412   : > { %v2060_v24 = vadd.f32 %v2059_v41, %v2041_v5  ;;  %v2105_v43 = vrot.slane %v2086_v47, 6  ;;  %v8317_v47 = vld [vmem:[#allocation9 + $0x1e8] sm:$0xf0]  ;;  %v8384_v36 = vor.u32 %v10865_v27, %v8381_v21 }
 0x413   : > { %v2124_v30 = vsel %vm2111_vm0, %v2085_v17, %v2101_v16  ;;  %v2126_v10 = vsel %vm1433_vm4, %v2072_v3, %v2102_v18  ;;  %v2127_v29 = vsel %vm2111_vm0, %v2103_v8, %v2104_v35  ;;  %v8320_v5 = vor.u32 %v10849_v6, %v8317_v47  ;;  %v10847_v16 = vld [vmem:[#allocation9 + $0x1d4] sm:$0xf]  ;;  %v8309_v18 = vld [vmem:[#allocation9 + $0x1d8] sm:$0xf0] }
 0x414   : > { %v2125_v50 = vsel %vm1750_vm15, %v13429_v7, %v2124_v30  ;;  %v2128_v59 = vsel %vm1750_vm15, %v2126_v10, %v2127_v29  ;;  %vm2065_vm5 = vcmp.ge.f32.partialorder %v2060_v24, 0.0  ;;  %v2069_v22 = vmul.f32 0.01, %v2060_v24  ;;  %v10863_v8 = vld [vmem:[#allocation9 + $0x254] sm:$0xf] }
 0x415   : > { %2155 = vst [vmem:[#allocation1] ss:$4 sm:$0xff] %v2125_v50  ;;  %v8208_v7 = vor.u32 %v10821_v11, %v8205_v25  ;;  %v2129_v28 = vsel %vm1433_vm4, %v2085_v17, %v2105_v43  ;;  %v8373_v35 = vld [vmem:[#allocation9 + $0x258] sm:$0xf0]  ;;  %v8312_v41 = vor.u32 %v10847_v16, %v8309_v18  ;;  %v10843_v10 = vld [vmem:[#allocation9 + $0x1b4] sm:$0xf] }
 0x416   : > { %2156 = vst [vmem:[#allocation1 + $0x1] ss:$4 sm:$0xff] %v2128_v59  ;;  %v2073_v23 = vsel %vm2065_vm5, %v2060_v24, %v2069_v22  ;;  %v13441_v42 = vld.sshfl [vmem:[#allocation1 + $0x20] sm:$0xff pattern:$0x73625140] }
 0x417   : > { %v2087_v60 = vrot.slane %v2073_v23, 2  ;;  %v2088_v57 = vrot.slane %v2073_v23, 4  ;;  %2159 = vst [vmem:[#allocation1 + $0x20] ss:$4 sm:$0xff] %v2085_v17  ;;  %2774 = vmatpush.bf16.msra.mxu0 %v8208_v7  ;;  %v10861_v24 = vld [vmem:[#allocation9 + $0x244] sm:$0xf] }
 0x418   : > { %2160 = vst [vmem:[#allocation1 + $0x21] ss:$4 sm:$0xff] %v2073_v23  ;;  %v8368_v30 = vor.u32 %v10861_v24, %v8365_v45  ;;  %v8293_v29 = vld [vmem:[#allocation9 + $0x1b8] sm:$0xf0]  ;;  %v10839_v11 = vld [vmem:[#allocation9 + $0x194] sm:$0xf] }
 0x419   : > { %v2106_v34 = vrot.slane %v2087_v60, 2  ;;  %v2107_v56 = vrot.slane %v2087_v60, 6  ;;  %v2108_v9 = vrot.slane %v2088_v57, 4  ;;  %2161 = vst [vmem:[#allocation1 + $0x22] ss:$4 sm:$0xff] %v2088_v57  ;;  %v8296_v59 = vor.u32 %v10843_v10, %v8293_v29 }
 0x41a   : > { %2162 = vst [vmem:[#allocation1 + $0x23] ss:$4 sm:$0xff] %v12101_v1  ;;  %v8277_v25 = vld [vmem:[#allocation9 + $0x198] sm:$0xf0]  ;;  %v10855_v43 = vld [vmem:[#allocation9 + $0x214] sm:$0xf] }
 0x41b   : > { %v2130_v19 = vsel %vm2111_vm0, %v2088_v57, %v2106_v34  ;;  %v2132_v49 = vsel %vm1433_vm4, %v2073_v23, %v2107_v56  ;;  %v2133_v38 = vsel %vm2111_vm0, %v2108_v9, %v2073_v23  ;;  %v8288_v23 = vor.u32 %v10841_v39, %v8285_v44  ;;  %v8341_v60 = vld [vmem:[#allocation9 + $0x218] sm:$0xf0]  ;;  %v8269_v34 = vld [vmem:[#allocation9 + $0x188] sm:$0xf0]  ;;  %v10853_v56 = vld [vmem:[#allocation9 + $0x204] sm:$0xf] }
 0x41c   : > { %v2131_v55 = vsel %vm1750_vm15, %v2129_v28, %v2130_v19  ;;  %v2134_v46 = vsel %vm1750_vm15, %v2132_v49, %v2133_v38  ;;  %v8280_v57 = vor.u32 %v10839_v11, %v8277_v25  ;;  %v8344_v7 = vor.u32 %v10855_v43, %v8341_v60  ;;  %v8333_v9 = vld [vmem:[#allocation9 + $0x208] sm:$0xf0]  ;;  %v10899_v11 = vld [vmem:[#allocation10 + $0xec] sm:$0xf0]  ;;  %v8635_v25 = vld [vmem:[#allocation10 + $0x1e0] sm:$0xf] }
 0x41d   : > { %2157 = vst [vmem:[#allocation1 + $0x2] ss:$4 sm:$0xff] %v2131_v55  ;;  %v8336_v19 = vor.u32 %v10853_v56, %v8333_v9  ;;  %v10963_v56 = vld [vmem:[#allocation10 + $0x2ec] sm:$0xf0] }
 0x41e   : > { %2158 = vst [vmem:[#allocation1 + $0x3] ss:$4 sm:$0xff] %v2134_v46 }
 0x421   : > { %v2167_v53 = vld.sshfl [vmem:[#allocation1 + $0x20] sm:$0xff pattern:$0x73625140] }
 0x422   : > { %v2182_v50 = vpack.c.bf16 %v2167_v53, %v13441_v42  ;;  %v10837_v42 = vld [vmem:[#allocation9 + $0x184] sm:$0xf] }
 0x423   : > { %v8272_v28 = vor.u32 %v10837_v42, %v8269_v34  ;;  %v10931_v42 = vld [vmem:[#allocation10 + $0x1ec] sm:$0xf0]  ;;  %v8763_v34 = vld [vmem:[#allocation10 + $0x2e0] sm:$0xf] }
 0x425   : > { %v2163_v51 = vld.sshfl [vmem:[#allocation1] sm:$0xff pattern:$0x73625140]  ;;  %v2164_v63 = vld.sshfl [vmem:[#allocation1 + $0x8] sm:$0xff pattern:$0x73625140] }
 0x426   : > { %v2178_v33 = vpack.c.bf16 %v2163_v51, %v2150_v61  ;;  %v2179_v3 = vpack.c.bf16 %v2164_v63, %v2151_v13  ;;  %v2165_v14 = vld.sshfl [vmem:[#allocation1 + $0x10] sm:$0xff pattern:$0x73625140]  ;;  %v2166_v40 = vld.sshfl [vmem:[#allocation1 + $0x18] sm:$0xff pattern:$0x73625140]  ;;  %v8376_v61 = vor.u32 %v10863_v8, %v8373_v35 }
 0x427   : > { %v2180_v54 = vpack.c.bf16 %v2165_v14, %v13433_v20  ;;  %v13451_v17 = vpack.c.bf16 %v2166_v40, %v2153_v37  ;;  %v10845_v13 = vld [vmem:[#allocation9 + $0x1c4] sm:$0xf]  ;;  %v8301_v20 = vld [vmem:[#allocation9 + $0x1c8] sm:$0xf0]  ;;  %v8357_v37 = vld [vmem:[#allocation9 + $0x238] sm:$0xf0] }
 0x428   : > { %2677 = vmatmul.bf16.vlgmr.msrb.gmra.mxu3 %v2178_v33  ;;  %2691 = vmatmul.bf16.vlgmr.msrb.gmra.mxu1 %v2179_v3  ;;  %v8304_v31 = vor.u32 %v10845_v13, %v8301_v20  ;;  %v8360_v22 = vor.u32 %v10859_v48, %v8357_v37  ;;  %v2265_v63 = vperm.slane %v2263_v52, 0  ;;  %v2266_v14 = vperm.slane %v2263_v52, 1  ;;  %v10927_v52 = vld [vmem:[#allocation10 + $0x1cc] sm:$0xf0] }
 0x429   : > { %2705 = vmatmul.bf16.vlgmr.msrb.gmra.mxu2 %v2180_v54  ;;  %2719 = vmatmul.bf16.vlgmr.msrb.gmra.mxu0 %v13451_v17 }
 0x42a   : > { %2781 = vmatpush.bf16.msrb.mxu3 %v8328_v62  ;;  %2795 = vmatpush.bf16.msrb.mxu1 %v8392_v0 }
 0x42e   : > { %2782 = vmatpush.bf16.msrb.mxu3 %v8320_v5  ;;  %2796 = vmatpush.bf16.msrb.mxu1 %v8384_v36 }
 0x432   : > { %2783 = vmatpush.bf16.msrb.mxu3 %v8312_v41  ;;  %2797 = vmatpush.bf16.msrb.mxu1 %v8376_v61 }
 0x436   : > { %2784 = vmatpush.bf16.msrb.mxu3 %v8304_v31  ;;  %2798 = vmatpush.bf16.msrb.mxu1 %v8368_v30 }
 0x438   : > { %2733 = vmatmul.bf16.vlgmr.msra.gmra.mxu3 %v2182_v50  ;;  %2747 = vmatmul.bf16.vlgmr.msra.gmra.mxu1 %v2178_v33 }
 0x439   : > { %2761 = vmatmul.bf16.vlgmr.msra.gmra.mxu2 %v2179_v3  ;;  %2775 = vmatmul.bf16.vlgmr.msra.gmra.mxu0 %v2180_v54 }
 0x43a   : > { %2785 = vmatpush.bf16.msrb.mxu3 %v8296_v59  ;;  %2799 = vmatpush.bf16.msrb.mxu1 %v8360_v22 }
 0x43e   : > { %2786 = vmatpush.bf16.msrb.mxu3 %v8288_v23  ;;  %2800 = vmatpush.bf16.msrb.mxu1 %v8352_v26  ;;  %v8507_v26 = vld [vmem:[#allocation10 + $0xe0] sm:$0xf] }
 0x442   : > { %2787 = vmatpush.bf16.msrb.mxu3 %v8280_v57  ;;  %2801 = vmatpush.bf16.msrb.mxu1 %v8344_v7  ;;  %v8508_v7 = vor.u32 %v10899_v11, %v8507_v26  ;;  %v10951_v11 = vld [vmem:[#allocation10 + $0x28c] sm:$0xf0] }
 0x444   : > { %4934 = vmatpush.bf16.msrb.mxu2 %v8508_v7 }
 0x446   : > { %2788 = vmatpush.bf16.msrb.mxu3 %v8272_v28  ;;  %2802 = vmatpush.bf16.msrb.mxu1 %v8336_v19  ;;  %v8636_v28 = vor.u32 %v10931_v42, %v8635_v25  ;;  %v8764_v19 = vor.u32 %v10963_v56, %v8763_v34  ;;  %v8843_v42 = vld [vmem:[#allocation10 + $0x380] sm:$0xf]  ;;  %v10983_v34 = vld [vmem:[#allocation10 + $0x38c] sm:$0xf0] }
 0x447   : > { %v8443_v56 = vld [vmem:[#allocation10 + $0x60] sm:$0xf] }
 0x448   : > { %4947 = vmatpush.bf16.msrb.mxu0 %v8636_v28  ;;  %v8844_v28 = vor.u32 %v10983_v34, %v8843_v42  ;;  %v10971_v34 = vld [vmem:[#allocation10 + $0x32c] sm:$0xf0] }
 0x449   : > { %2789 = vmatmul.bf16.vlgmr.msrb.gmra.mxu3 %v13451_v17  ;;  %2803 = vmatmul.bf16.vlgmr.msrb.gmra.mxu1 %v2182_v50 }
 0x44a   : > { %4960 = vmatpush.bf16.msra.mxu3 %v8764_v19 }
 0x4a5   : > { %v2692_v49 = vpop.f32.mrf.mxu1 }
 0x4a6   : > { %v2720_v58 = vpop.f32.mrf.mxu0 }
 0x4ab   : > { %v2678_v38 = vpop.f32.mrf.mxu3 }
 0x4ac   : > { %v2706_v55 = vpop.f32.mrf.mxu2  ;;  %v2679_v3 = vadd.f32 %v2678_v38, %v2265_v63  ;;  %v10995_v38 = vld [vmem:[#allocation10 + $0x3ec] sm:$0xf0] }
 0x4ad   : > { %v2694_v46 = vpop.f32.mrf.mxu1 }
 0x4ae   : > { %v2722_v33 = vpop.f32.mrf.mxu0  ;;  %v2693_v0 = vadd.f32 %v2692_v49, %v2679_v3  ;;  %v8891_v49 = vld [vmem:[#allocation10 + $0x3e0] sm:$0xf] }
 0x4af   : > { %v8747_v3 = vld [vmem:[#allocation10 + $0x2c0] sm:$0xf] }
 0x4b0   : > { %v2707_v27 = vadd.f32 %v2706_v55, %v2693_v0  ;;  %v8491_v55 = vld [vmem:[#allocation10 + $0xc0] sm:$0xf] }
 0x4b1   : > { %v8875_v0 = vld [vmem:[#allocation10 + $0x3c0] sm:$0xf] }
 0x4b2   : > { %v2721_v16 = vadd.f32 %v2720_v58, %v2707_v27  ;;  %v10895_v58 = vld [vmem:[#allocation10 + $0xcc] sm:$0xf0] }
 0x4b3   : > { %v2680_v12 = vpop.f32.mrf.mxu3 }
 0x4b4   : > { %v2708_v15 = vpop.f32.mrf.mxu2  ;;  %v2681_v17 = vadd.f32 %v2680_v12, %v2265_v63  ;;  %v8892_v12 = vor.u32 %v10995_v38, %v8891_v49  ;;  %v8571_v49 = vld [vmem:[#allocation10 + $0x160] sm:$0xf]  ;;  %v10915_v38 = vld [vmem:[#allocation10 + $0x16c] sm:$0xf0] }
 0x4b5   : > { %v2748_v51 = vpop.f32.mrf.mxu1 }
 0x4b6   : > { %v2749_v47 = vadd.f32 %v2748_v51, %v2266_v14  ;;  %v2776_v5 = vpop.f32.mrf.mxu0  ;;  %v2695_v36 = vadd.f32 %v2694_v46, %v2681_v17  ;;  %4973 = vmatpush.bf16.msra.mxu1 %v8892_v12  ;;  %v8572_v12 = vor.u32 %v10915_v38, %v8571_v49  ;;  %v8523_v38 = vld [vmem:[#allocation10 + $0x100] sm:$0xf] }
 0x4b8   : > { %v2709_v61 = vadd.f32 %v2708_v15, %v2695_v36  ;;  %v8619_v15 = vld [vmem:[#allocation10 + $0x1c0] sm:$0xf] }
 0x4ba   : > { %v2723_v10 = vadd.f32 %v2722_v33, %v2709_v61  ;;  %v8620_v33 = vor.u32 %v10927_v52, %v8619_v15  ;;  %v8603_v61 = vld [vmem:[#allocation10 + $0x1a0] sm:$0xf]  ;;  %v10979_v52 = vld [vmem:[#allocation10 + $0x36c] sm:$0xf0] }
 0x4bb   : > { %v2734_v6 = vpop.f32.mrf.mxu3  ;;  %v8827_v15 = vld [vmem:[#allocation10 + $0x360] sm:$0xf] }
 0x4bc   : > { %v2762_v40 = vpop.f32.mrf.mxu2  ;;  %v2735_v13 = vadd.f32 %v2734_v6, %v2721_v16  ;;  %v8492_v6 = vor.u32 %v10895_v58, %v8491_v55  ;;  %4948 = vmatpush.bf16.msrb.mxu0 %v8620_v33  ;;  %v8699_v55 = vld [vmem:[#allocation10 + $0x260] sm:$0xf]  ;;  %v10947_v58 = vld [vmem:[#allocation10 + $0x26c] sm:$0xf0]  ;;  %v8828_v33 = vor.u32 %v10979_v52, %v8827_v15 }
 0x4bd   : > { %v2750_v62 = vpop.f32.mrf.mxu1  ;;  %v2763_v21 = vadd.f32 %v2762_v40, %v2749_v47  ;;  %v8651_v15 = vld [vmem:[#allocation10 + $0x200] sm:$0xf] }
 0x4be   : > { %v2751_v20 = vadd.f32 %v2750_v62, %v2266_v14  ;;  %v2813_v30 = vmul.f32 0.01, %v2735_v13  ;;  %vm2809_vm7 = vcmp.ge.f32.partialorder %v2735_v13, 0.0  ;;  %v2778_v48 = vpop.f32.mrf.mxu0  ;;  %v10959_v14 = vld [vmem:[#allocation10 + $0x2cc] sm:$0xf0]  ;;  %4935 = vmatpush.bf16.msrb.mxu2 %v8492_v6  ;;  %v8700_v6 = vor.u32 %v10947_v58, %v8699_v55 }
 0x4bf   : > { %v2777_v8 = vadd.f32 %v2776_v5, %v2763_v21  ;;  %v8748_v62 = vor.u32 %v10959_v14, %v8747_v3  ;;  %v8427_v3 = vld [vmem:[#allocation10 + $0x40] sm:$0xf]  ;;  %v10879_v14 = vld [vmem:[#allocation10 + $0x4c] sm:$0xf0] }
 0x4c0   : > { %v2817_v39 = vsel %vm2809_vm7, %v2735_v13, %v2813_v30  ;;  %v10923_v13 = vld [vmem:[#allocation10 + $0x1ac] sm:$0xf0]  ;;  %v8859_v30 = vld [vmem:[#allocation10 + $0x3a0] sm:$0xf] }
 0x4c1   : > { %4961 = vmatpush.bf16.msra.mxu3 %v8748_v62  ;;  %v8555_v62 = vld [vmem:[#allocation10 + $0x140] sm:$0xf]  ;;  %v10903_v58 = vld [vmem:[#allocation10 + $0x10c] sm:$0xf0] }
 0x4c2   : > { %v8524_v52 = vor.u32 %v10903_v58, %v8523_v38  ;;  %v8987_v38 = vld [vmem:[#allocation10 + $0x4a0] sm:$0xf]  ;;  %v11019_v58 = vld [vmem:[#allocation10 + $0x4ac] sm:$0xf0] }
 0x4c3   : > { %v2736_v54 = vpop.f32.mrf.mxu3 }
 0x4c4   : > { %v2764_v18 = vpop.f32.mrf.mxu2  ;;  %v2737_v53 = vadd.f32 %v2736_v54, %v2723_v10  ;;  %v10991_v54 = vld [vmem:[#allocation10 + $0x3cc] sm:$0xf0] }
 0x4c5   : > { %v2765_v45 = vadd.f32 %v2764_v18, %v2751_v20  ;;  %v8876_v18 = vor.u32 %v10991_v54, %v8875_v0 }
 0x4c6   : > { %v2804_v35 = vpop.f32.mrf.mxu1  ;;  %vm2811_vm10 = vcmp.ge.f32.partialorder %v2737_v53, 0.0  ;;  %v2815_v43 = vmul.f32 0.01, %v2737_v53 }
 0x4c7   : > { %v2779_v50 = vadd.f32 %v2778_v48, %v2765_v45  ;;  %4974 = vmatpush.bf16.msra.mxu1 %v8876_v18  ;;  %v8731_v45 = vld [vmem:[#allocation10 + $0x2a0] sm:$0xf]  ;;  %v8428_v18 = vor.u32 %v10879_v14, %v8427_v3  ;;  %v10967_v3 = vld [vmem:[#allocation10 + $0x30c] sm:$0xf0] }
 0x4c8   : > { %v13470_v40 = vsel %vm2811_vm10, %v2737_v53, %v2815_v43  ;;  %v8459_v48 = vld [vmem:[#allocation10 + $0x80] sm:$0xf]  ;;  %v10887_v53 = vld [vmem:[#allocation10 + $0x8c] sm:$0xf0] }
 0x4cc   : > { %v2790_v41 = vpop.f32.mrf.mxu3 }
 0x4cd   : > { %v2791_v24 = vadd.f32 %v2790_v41, %v2777_v8  ;;  %v10891_v41 = vld [vmem:[#allocation10 + $0xac] sm:$0xf0] }
 0x4ce   : > { %v2806_v23 = vpop.f32.mrf.mxu1 }
 0x4cf   : > { %v2805_v31 = vadd.f32 %v2804_v35, %v2791_v24  ;;  %v8475_v35 = vld [vmem:[#allocation10 + $0xa0] sm:$0xf]  ;;  %v8604_v24 = vor.u32 %v10923_v13, %v8603_v61 }
 0x4d0   : > { %v8476_v20 = vor.u32 %v10891_v41, %v8475_v35  ;;  %v10911_v41 = vld [vmem:[#allocation10 + $0x14c] sm:$0xf0] }
 0x4d1   : > { %vm2810_vm6 = vcmp.ge.f32.partialorder %v2805_v31, 0.0  ;;  %v2814_v29 = vmul.f32 0.01, %v2805_v31  ;;  %4949 = vmatpush.bf16.msrb.mxu0 %v8604_v24  ;;  %v8683_v24 = vld [vmem:[#allocation10 + $0x240] sm:$0xf] }
 0x4d2   : > { %4936 = vmatpush.bf16.msrb.mxu2 %v8476_v20  ;;  %v8556_v20 = vor.u32 %v10911_v41, %v8555_v62  ;;  %v9147_v41 = vld [vmem:[#allocation10 + $0x5e0] sm:$0xf] }
 0x4d3   : > { %v2818_v37 = vsel %vm2810_vm6, %v2805_v31, %v2814_v29  ;;  %v10955_v31 = vld [vmem:[#allocation10 + $0x2ac] sm:$0xf0] }
 0x4d4   : > { %v2825_v59 = vrot.slane %v2818_v37, 6  ;;  %v2792_v22 = vpop.f32.mrf.mxu3  ;;  %v8732_v10 = vor.u32 %v10955_v31, %v8731_v45  ;;  %v10987_v29 = vld [vmem:[#allocation10 + $0x3ac] sm:$0xf0] }
 0x4d5   : > { %v2793_v44 = vadd.f32 %v2792_v22, %v2779_v50  ;;  %v8860_v37 = vor.u32 %v10987_v29, %v8859_v30  ;;  %v8460_v50 = vor.u32 %v10887_v53, %v8459_v48  ;;  %v10919_v22 = vld [vmem:[#allocation10 + $0x18c] sm:$0xf0]  ;;  %v8811_v30 = vld [vmem:[#allocation10 + $0x340] sm:$0xf] }
 0x4d6   : > { %v13457_v32 = vsel %vm1433_vm4, %v2817_v39, %v2825_v59  ;;  %v2831_v4 = vsel %vm2111_vm0, %v2817_v39, %v2825_v59  ;;  %v13465_v51 = vsel %vm2833_vm9, %v2825_v59, %v2817_v39  ;;  %v13473_v17 = vsel %vm2828_vm8, %v2817_v39, %v2825_v59  ;;  %v8587_v59 = vld [vmem:[#allocation10 + $0x180] sm:$0xf]  ;;  %4962 = vmatpush.bf16.msra.mxu3 %v8732_v10  ;;  %v10943_v45 = vld [vmem:[#allocation10 + $0x24c] sm:$0xf0] }
 0x4d7   : > { %v13460_v60 = vrot.slane %v2831_v4, 4  ;;  %2843 = vst [vmem:[#allocation1] ss:$4 sm:$0xff] %v13457_v32  ;;  %v2807_v57 = vadd.f32 %v2806_v23, %v2793_v44  ;;  %v2835_v5 = vrot.slane %v13465_v51, 6  ;;  %v2830_v8 = vrot.slane %v13473_v17, 2  ;;  %4975 = vmatpush.bf16.msra.mxu1 %v8860_v37  ;;  %4937 = vmatpush.bf16.msrb.mxu2 %v8460_v50 }
 0x4d8   : > { %v8715_v39 = vld [vmem:[#allocation10 + $0x280] sm:$0xf]  ;;  %v8588_v26 = vor.u32 %v10919_v22, %v8587_v59  ;;  %v8684_v31 = vor.u32 %v10943_v45, %v8683_v24  ;;  %v10975_v10 = vld [vmem:[#allocation10 + $0x34c] sm:$0xf0] }
 0x4d9   : > { %2847 = vst [vmem:[#allocation1 + $0x20] ss:$4 sm:$0xff] %v13460_v60  ;;  %vm2812_vm11 = vcmp.ge.f32.partialorder %v2807_v57, 0.0  ;;  %v2816_v9 = vmul.f32 0.01, %v2807_v57  ;;  %v8812_v48 = vor.u32 %v10975_v10, %v8811_v30 }
 0x4da   : > { %4950 = vmatpush.bf16.msrb.mxu0 %v8588_v26  ;;  %v8411_v29 = vld [vmem:[#allocation10 + $0x20] sm:$0xf]  ;;  %v10875_v53 = vld [vmem:[#allocation10 + $0x2c] sm:$0xf0] }
 0x4db   : > { %v2820_v46 = vsel %vm2812_vm11, %v2807_v57, %v2816_v9  ;;  %v8716_v57 = vor.u32 %v10951_v11, %v8715_v39  ;;  %v10883_v9 = vld [vmem:[#allocation10 + $0x6c] sm:$0xf0]  ;;  %4976 = vmatpush.bf16.msra.mxu1 %v8844_v28  ;;  %v8539_v37 = vld [vmem:[#allocation10 + $0x120] sm:$0xf]  ;;  %v8412_v22 = vor.u32 %v10875_v53, %v8411_v29 }
 0x4dc   : > { %v13467_v63 = vrot.slane %v2820_v46, 6  ;;  %v8444_v19 = vor.u32 %v10883_v9, %v8443_v56  ;;  %v10907_v50 = vld [vmem:[#allocation10 + $0x12c] sm:$0xf0]  ;;  %v8667_v26 = vld [vmem:[#allocation10 + $0x220] sm:$0xf] }
 0x4dd   : > { %4963 = vmatpush.bf16.msra.mxu3 %v8716_v57  ;;  %v8540_v39 = vor.u32 %v10907_v50, %v8539_v37  ;;  %v10939_v11 = vld [vmem:[#allocation10 + $0x22c] sm:$0xf0]  ;;  %v8795_v57 = vld [vmem:[#allocation10 + $0x320] sm:$0xf] }
 0x4de   : > { %v13475_v47 = vld.sshfl [vmem:[#allocation1] sm:$0xff pattern:$0x73625140]  ;;  %v13477_v27 = vld.sshfl [vmem:[#allocation1 + $0x8] sm:$0xff pattern:$0x73625140]  ;;  %v13482_v21 = vsel %vm1433_vm4, %v13470_v40, %v13467_v63  ;;  %v13496_v44 = vsel %vm2828_vm8, %v13470_v40, %v13467_v63  ;;  %v13513_v46 = vsel %vm2111_vm0, %v13470_v40, %v13467_v63  ;;  %4938 = vmatpush.bf16.msrb.mxu2 %v8444_v19  ;;  %4951 = vmatpush.bf16.msrb.mxu0 %v8572_v12 }
 0x4df   : > { %2850 = vst [vmem:[#allocation1] ss:$4 sm:$0xff] %v13482_v21  ;;  %v2838_v7 = vrot.slane %v13496_v44, 2  ;;  %v2840_v35 = vrot.slane %v13513_v46, 4  ;;  %4977 = vmatpush.bf16.msra.mxu1 %v8828_v33  ;;  %v13531_v59 = vsel %vm2833_vm9, %v13467_v63, %v13470_v40  ;;  %v8668_v42 = vor.u32 %v10939_v11, %v8667_v26  ;;  %v8395_v56 = vld [vmem:[#allocation10] sm:$0xf] }
 0x4e0   : > { %v13486_v36 = vld.sshfl [vmem:[#allocation1 + $0x20] sm:$0xff pattern:$0x73625140]  ;;  %v13488_v16 = vld.sshfl [vmem:[#allocation1 + $0x28] sm:$0xff pattern:$0x73625140]  ;;  %v8796_v49 = vor.u32 %v10971_v34, %v8795_v57 }
 0x4e1   : > { %2857 = vst [vmem:[#allocation1 + $0x20] ss:$4 sm:$0xff] %v2835_v5  ;;  %4964 = vmatpush.bf16.msra.mxu3 %v8700_v6  ;;  %v10871_v9 = vld [vmem:[#allocation10 + $0xc] sm:$0xf0]  ;;  %v2842_v40 = vrot.slane %v13531_v59, 6 }
 0x4e2   : > { %4939 = vmatpush.bf16.msrb.mxu2 %v8428_v18  ;;  %4952 = vmatpush.bf16.msrb.mxu0 %v8556_v20  ;;  %v8396_v63 = vor.u32 %v10871_v9, %v8395_v56  ;;  %v10935_v6 = vld [vmem:[#allocation10 + $0x20c] sm:$0xf0]  ;;  %v8779_v33 = vld [vmem:[#allocation10 + $0x300] sm:$0xf] }
 0x4e3   : > { %4978 = vmatpush.bf16.msra.mxu1 %v8812_v48  ;;  %v8652_v14 = vor.u32 %v10935_v6, %v8651_v15  ;;  %v8780_v62 = vor.u32 %v10967_v3, %v8779_v33  ;;  %v11027_v18 = vld [vmem:[#allocation10 + $0x4ec] sm:$0xf0]  ;;  %v9275_v45 = vld [vmem:[#allocation10 + $0x6e0] sm:$0xf] }
 0x4e4   : > { %v11059_v24 = vld [vmem:[#allocation10 + $0x5ec] sm:$0xf0]  ;;  %v9403_v30 = vld [vmem:[#allocation10 + $0x7e0] sm:$0xf] }
 0x4e5   : > { %4965 = vmatpush.bf16.msra.mxu3 %v8684_v31  ;;  %v11091_v31 = vld [vmem:[#allocation10 + $0x6ec] sm:$0xf0]  ;;  %v9148_v51 = vor.u32 %v11059_v24, %v9147_v41  ;;  %v9003_v29 = vld [vmem:[#allocation10 + $0x4c0] sm:$0xf] }
 0x4e6   : > { %v13498_v4 = vld.sshfl [vmem:[#allocation1] sm:$0xff pattern:$0x73625140]  ;;  %v13500_v23 = vld.sshfl [vmem:[#allocation1 + $0x8] sm:$0xff pattern:$0x73625140]  ;;  %4940 = vmatpush.bf16.msrb.mxu2 %v8412_v22  ;;  %4953 = vmatpush.bf16.msrb.mxu0 %v8540_v39 }
 0x4e7   : > { %2853 = vst [vmem:[#allocation1] ss:$4 sm:$0xff] %v2830_v8  ;;  %4979 = vmatpush.bf16.msra.mxu1 %v8796_v49  ;;  %v11123_v10 = vld [vmem:[#allocation10 + $0x7ec] sm:$0xf0]  ;;  %v9131_v59 = vld [vmem:[#allocation10 + $0x5c0] sm:$0xf] }
 0x4e8   : > { %v13504_v25 = vld.sshfl [vmem:[#allocation1 + $0x20] sm:$0xff pattern:$0x73625140]  ;;  %v13506_v43 = vld.sshfl [vmem:[#allocation1 + $0x28] sm:$0xff pattern:$0x73625140]  ;;  %v9404_v37 = vor.u32 %v11123_v10, %v9403_v30 }
 0x4e9   : > { %2867 = vst [vmem:[#allocation1 + $0x20] ss:$4 sm:$0xff] %v13460_v60  ;;  %4966 = vmatpush.bf16.msra.mxu3 %v8668_v42  ;;  %v11023_v50 = vld [vmem:[#allocation10 + $0x4cc] sm:$0xf0]  ;;  %v9259_v57 = vld [vmem:[#allocation10 + $0x6c0] sm:$0xf] }
 0x4ea   : > { %4941 = vmatpush.bf16.msrb.mxu2 %v8396_v63  ;;  %4954 = vmatpush.bf16.msrb.mxu0 %v8524_v52  ;;  %v9004_v26 = vor.u32 %v11023_v50, %v9003_v29  ;;  %v11055_v11 = vld [vmem:[#allocation10 + $0x5cc] sm:$0xf0]  ;;  %v9387_v56 = vld [vmem:[#allocation10 + $0x7c0] sm:$0xf]  ;;  %v8988_v52 = vor.u32 %v11019_v58, %v8987_v38  ;;  %v2916_v44 = vrot.slane %v13506_v43, 2 }
 0x4eb   : > { %4980 = vmatpush.bf16.msra.mxu1 %v8780_v62  ;;  %v9132_v42 = vor.u32 %v11055_v11, %v9131_v59  ;;  %v11087_v34 = vld [vmem:[#allocation10 + $0x6cc] sm:$0xf0]  ;;  %v9115_v15 = vld [vmem:[#allocation10 + $0x5a0] sm:$0xf] }
 0x4ec   : > { %v11119_v9 = vld [vmem:[#allocation10 + $0x7cc] sm:$0xf0]  ;;  %v9260_v49 = vor.u32 %v11087_v34, %v9259_v57  ;;  %v9243_v33 = vld [vmem:[#allocation10 + $0x6a0] sm:$0xf] }
 0x4ed   : > { %4967 = vmatpush.bf16.msra.mxu3 %v8652_v14  ;;  %v9388_v63 = vor.u32 %v11119_v9, %v9387_v56  ;;  %v11051_v6 = vld [vmem:[#allocation10 + $0x5ac] sm:$0xf0]  ;;  %v9371_v62 = vld [vmem:[#allocation10 + $0x7a0] sm:$0xf] }
 0x4ee   : > { %v13515_v0 = vld.sshfl [vmem:[#allocation1] sm:$0xff pattern:$0x73625140]  ;;  %v13517_v54 = vld.sshfl [vmem:[#allocation1 + $0x8] sm:$0xff pattern:$0x73625140]  ;;  %4999 = vmatpush.bf16.msra.mxu0 %v9148_v51 }
 0x4ef   : > { %2860 = vst [vmem:[#allocation1] ss:$4 sm:$0xff] %v2838_v7  ;;  %5025 = vmatpush.bf16.msrb.mxu1 %v9404_v37  ;;  %v11083_v3 = vld [vmem:[#allocation10 + $0x6ac] sm:$0xf0]  ;;  %v9227_v29 = vld [vmem:[#allocation10 + $0x680] sm:$0xf] }
 0x4f0   : > { %v13522_v61 = vld.sshfl [vmem:[#allocation1 + $0x20] sm:$0xff pattern:$0x73625140]  ;;  %v13524_v13 = vld.sshfl [vmem:[#allocation1 + $0x28] sm:$0xff pattern:$0x73625140]  ;;  %v9244_v14 = vor.u32 %v11083_v3, %v9243_v33 }
 0x4f1   : > { %2873 = vst [vmem:[#allocation1 + $0x20] ss:$4 sm:$0xff] %v2840_v35  ;;  %v11047_v10 = vld [vmem:[#allocation10 + $0x58c] sm:$0xf0]  ;;  %v9355_v59 = vld [vmem:[#allocation10 + $0x780] sm:$0xf] }
 0x4f2   : > { %5000 = vmatpush.bf16.msra.mxu0 %v9132_v42  ;;  %v11079_v50 = vld [vmem:[#allocation10 + $0x68c] sm:$0xf0]  ;;  %v8955_v11 = vld [vmem:[#allocation10 + $0x460] sm:$0xf] }
 0x4f3   : > { %5026 = vmatpush.bf16.msrb.mxu1 %v9388_v63  ;;  %v11111_v17 = vld [vmem:[#allocation10 + $0x78c] sm:$0xf0]  ;;  %v9083_v42 = vld [vmem:[#allocation10 + $0x560] sm:$0xf] }
 0x4f4   : > { %v11011_v57 = vld [vmem:[#allocation10 + $0x46c] sm:$0xf0]  ;;  %v9211_v9 = vld [vmem:[#allocation10 + $0x660] sm:$0xf] }
 0x4f5   : > { %v8956_v34 = vor.u32 %v11011_v57, %v8955_v11  ;;  %v11043_v56 = vld [vmem:[#allocation10 + $0x56c] sm:$0xf0]  ;;  %v9339_v38 = vld [vmem:[#allocation10 + $0x760] sm:$0xf] }
 0x4f6   : > { %v13533_v28 = vld.sshfl [vmem:[#allocation1] sm:$0xff pattern:$0x73625140]  ;;  %v13535_v19 = vld.sshfl [vmem:[#allocation1 + $0x8] sm:$0xff pattern:$0x73625140] }
 0x4f7   : > { %2863 = vst [vmem:[#allocation1] ss:$4 sm:$0xff] %v13457_v32  ;;  %v9019_v32 = vld [vmem:[#allocation10 + $0x4e0] sm:$0xf]  ;;  %v11107_v58 = vld [vmem:[#allocation10 + $0x76c] sm:$0xf0] }
 0x4f8   : > { %v13539_v55 = vld.sshfl [vmem:[#allocation1 + $0x20] sm:$0xff pattern:$0x73625140]  ;;  %v13541_v12 = vld.sshfl [vmem:[#allocation1 + $0x28] sm:$0xff pattern:$0x73625140]  ;;  %v9020_v20 = vor.u32 %v11027_v18, %v9019_v32 }
 0x4f9   : > { %2880 = vst [vmem:[#allocation1 + $0x20] ss:$4 sm:$0xff] %v2835_v5  ;;  %v9276_v5 = vor.u32 %v11091_v31, %v9275_v45  ;;  %v11115_v32 = vld [vmem:[#allocation10 + $0x7ac] sm:$0xf0]  ;;  %v8971_v18 = vld [vmem:[#allocation10 + $0x480] sm:$0xf] }
 0x4fa   : > { %4986 = vmatpush.bf16.msra.mxu2 %v9020_v20  ;;  %v9372_v24 = vor.u32 %v11115_v32, %v9371_v62  ;;  %v11015_v45 = vld [vmem:[#allocation10 + $0x48c] sm:$0xf0]  ;;  %v9099_v31 = vld [vmem:[#allocation10 + $0x580] sm:$0xf] }
 0x4fb   : > { %5012 = vmatpush.bf16.msrb.mxu3 %v9276_v5  ;;  %v8972_v30 = vor.u32 %v11015_v45, %v8971_v18  ;;  %v9100_v37 = vor.u32 %v11047_v10, %v9099_v31  ;;  %v9067_v33 = vld [vmem:[#allocation10 + $0x540] sm:$0xf]  ;;  %v11039_v3 = vld [vmem:[#allocation10 + $0x54c] sm:$0xf0] }
 0x4fc   : > { %5027 = vmatpush.bf16.msrb.mxu1 %v9372_v24  ;;  %v11071_v62 = vld [vmem:[#allocation10 + $0x64c] sm:$0xf0]  ;;  %v9323_v32 = vld [vmem:[#allocation10 + $0x740] sm:$0xf]  ;;  %v9068_v45 = vor.u32 %v11039_v3, %v9067_v33 }
 0x4fd   : > { %v9307_v57 = vld [vmem:[#allocation10 + $0x720] sm:$0xf] }
 0x4fe   : > { %v13545_v48 = vld.sshfl [vmem:[#allocation1] sm:$0xff pattern:$0x73625140]  ;;  %v13547_v53 = vld.sshfl [vmem:[#allocation1 + $0x8] sm:$0xff pattern:$0x73625140]  ;;  %4987 = vmatpush.bf16.msra.mxu2 %v9004_v26  ;;  %v9356_v26 = vor.u32 %v11111_v17, %v9355_v59 }
 0x4ff   : > { %2870 = vst [vmem:[#allocation1] ss:$4 sm:$0xff] %v13482_v21  ;;  %5013 = vmatpush.bf16.msrb.mxu3 %v9260_v49  ;;  %v11075_v49 = vld [vmem:[#allocation10 + $0x66c] sm:$0xf0] }
 0x500   : > { %v13550_v22 = vld.sshfl [vmem:[#allocation1 + $0x20] sm:$0xff pattern:$0x73625140]  ;;  %v13552_v39 = vld.sshfl [vmem:[#allocation1 + $0x28] sm:$0xff pattern:$0x73625140]  ;;  %5028 = vmatpush.bf16.msrb.mxu1 %v9356_v26  ;;  %v9212_v63 = vor.u32 %v11075_v49, %v9211_v9 }
 0x501   : > { %2886 = vst [vmem:[#allocation1 + $0x20] ss:$4 sm:$0xff] %v2842_v40  ;;  %v9116_v40 = vor.u32 %v11051_v6, %v9115_v15  ;;  %v8939_v15 = vld [vmem:[#allocation10 + $0x440] sm:$0xf]  ;;  %v11007_v6 = vld [vmem:[#allocation10 + $0x44c] sm:$0xf0] }
 0x502   : > { %4988 = vmatpush.bf16.msra.mxu2 %v8988_v52  ;;  %v9340_v52 = vor.u32 %v11107_v58, %v9339_v38  ;;  %v11035_v17 = vld [vmem:[#allocation10 + $0x52c] sm:$0xf0]  ;;  %v9035_v49 = vld [vmem:[#allocation10 + $0x500] sm:$0xf] }
 0x503   : > { %5001 = vmatpush.bf16.msra.mxu0 %v9116_v40  ;;  %5014 = vmatpush.bf16.msrb.mxu3 %v9244_v14  ;;  %v8940_v40 = vor.u32 %v11007_v6, %v8939_v15  ;;  %v9195_v14 = vld [vmem:[#allocation10 + $0x640] sm:$0xf]  ;;  %v11067_v26 = vld [vmem:[#allocation10 + $0x62c] sm:$0xf0] }
 0x504   : > { %5029 = vmatpush.bf16.msrb.mxu1 %v9340_v52  ;;  %v9196_v31 = vor.u32 %v11071_v62, %v9195_v14  ;;  %v10999_v9 = vld [vmem:[#allocation10 + $0x40c] sm:$0xf0]  ;;  %v9163_v38 = vld [vmem:[#allocation10 + $0x600] sm:$0xf] }
 0x505   : > { %v11063_v58 = vld [vmem:[#allocation10 + $0x60c] sm:$0xf0]  ;;  %v9291_v15 = vld [vmem:[#allocation10 + $0x700] sm:$0xf] }
 0x506   : > { %v13554_v41 = vld.sshfl [vmem:[#allocation1] sm:$0xff pattern:$0x73625140]  ;;  %v13556_v20 = vld.sshfl [vmem:[#allocation1 + $0x8] sm:$0xff pattern:$0x73625140]  ;;  %4989 = vmatpush.bf16.msra.mxu2 %v8972_v30 }
 0x507   : > { %2876 = vst [vmem:[#allocation1] ss:$4 sm:$0xff] %v2830_v8  ;;  %v9228_v8 = vor.u32 %v11079_v50, %v9227_v29  ;;  %5002 = vmatpush.bf16.msra.mxu0 %v9100_v37  ;;  %v11103_v30 = vld [vmem:[#allocation10 + $0x74c] sm:$0xf0]  ;;  %v8923_v29 = vld [vmem:[#allocation10 + $0x420] sm:$0xf] }
 0x508   : > { %v13560_v51 = vld.sshfl [vmem:[#allocation1 + $0x20] sm:$0xff pattern:$0x73625140]  ;;  %v13562_v5 = vld.sshfl [vmem:[#allocation1 + $0x28] sm:$0xff pattern:$0x73625140]  ;;  %v9324_v10 = vor.u32 %v11103_v30, %v9323_v32 }
 0x509   : > { %2893 = vst [vmem:[#allocation1 + $0x20] ss:$4 sm:$0xff] %v13482_v21  ;;  %5015 = vmatpush.bf16.msrb.mxu3 %v9228_v8  ;;  %v9084_v21 = vor.u32 %v11043_v56, %v9083_v42  ;;  %v11003_v37 = vld [vmem:[#allocation10 + $0x42c] sm:$0xf0]  ;;  %v9051_v50 = vld [vmem:[#allocation10 + $0x520] sm:$0xf] }
 0x50a   : > { %4990 = vmatpush.bf16.msra.mxu2 %v8956_v34  ;;  %v8924_v59 = vor.u32 %v11003_v37, %v8923_v29  ;;  %v9179_v8 = vld [vmem:[#allocation10 + $0x620] sm:$0xf]  ;;  %v9052_v11 = vor.u32 %v11035_v17, %v9051_v50  ;;  %v11099_v42 = vld [vmem:[#allocation10 + $0x72c] sm:$0xf0]  ;;  %5030 = vmatpush.bf16.msrb.mxu1 %v9324_v10  ;;  %v2911_v29 = vrot.slane %v13550_v22, 4  ;;  %v2912_v37 = vrot.slane %v13552_v39, 2 }
 0x50b   : > { %5003 = vmatpush.bf16.msra.mxu0 %v9084_v21  ;;  %v8907_v34 = vld [vmem:[#allocation10 + $0x400] sm:$0xf]  ;;  %v9308_v56 = vor.u32 %v11099_v42, %v9307_v57  ;;  %v11031_v21 = vld [vmem:[#allocation10 + $0x50c] sm:$0xf0]  ;;  %v2915_v50 = vrot.slane %v13504_v25, 4  ;;  %v2924_v39 = vrot.slane %v13541_v12, 6 }
 0x50c   : > { %v11095_v52 = vld [vmem:[#allocation10 + $0x70c] sm:$0xf0]  ;;  %v9036_v33 = vor.u32 %v11031_v21, %v9035_v49 }
 0x50d   : > { %5016 = vmatpush.bf16.msrb.mxu3 %v9212_v63  ;;  %v8908_v63 = vor.u32 %v10999_v9, %v8907_v34  ;;  %v9292_v14 = vor.u32 %v11095_v52, %v9291_v15  ;;  %v2907_v34 = vrot.slane %v13477_v27, 6  ;;  %v2942_v27 = vsel %vm2111_vm0, %v2915_v50, %v2916_v44  ;;  %v9659_v52 = vld [vmem:[#allocation10 + $0x9e0] sm:$0xf] }
 0x50e   : > { %4991 = vmatpush.bf16.msra.mxu2 %v8940_v40  ;;  %v2877_v6 = vld.sshfl [vmem:[#allocation1] sm:$0xff pattern:$0x73625140]  ;;  %v2878_v3 = vld.sshfl [vmem:[#allocation1 + $0x8] sm:$0xff pattern:$0x73625140]  ;;  %5031 = vmatpush.bf16.msrb.mxu1 %v9308_v56  ;;  %v9164_v40 = vor.u32 %v11063_v58, %v9163_v38 }
 0x50f   : > { %5004 = vmatpush.bf16.msra.mxu0 %v9068_v45  ;;  %2883 = vst [vmem:[#allocation1] ss:$4 sm:$0xff] %v2838_v7  ;;  %v2904_v45 = vrot.slane %v2877_v6, 4  ;;  %v2903_v7 = vrot.slane %v13547_v53, 6  ;;  %v9531_v58 = vld [vmem:[#allocation10 + $0x8e0] sm:$0xf] }
 0x510   : > { %v13565_v18 = vld.sshfl [vmem:[#allocation1 + $0x20] sm:$0xff pattern:$0x73625140]  ;;  %v13567_v24 = vld.sshfl [vmem:[#allocation1 + $0x28] sm:$0xff pattern:$0x73625140] }
 0x511   : > { %2899 = vst [vmem:[#allocation1 + $0x20] ss:$4 sm:$0xff] %v12101_v1  ;;  %5017 = vmatpush.bf16.msrb.mxu3 %v9196_v31  ;;  %v9180_v1 = vor.u32 %v11067_v26, %v9179_v8  ;;  %v2905_v31 = vrot.slane %v2878_v3, 2  ;;  %v2925_v8 = vrot.slane %v13560_v51, 4  ;;  %v2926_v26 = vrot.slane %v13562_v5, 2 }
 0x512   : > { %4992 = vmatpush.bf16.msra.mxu2 %v8924_v59  ;;  %5032 = vmatpush.bf16.msrb.mxu1 %v9292_v14  ;;  %v2917_v59 = vrot.slane %v13556_v20, 6  ;;  %v2908_v20 = vrot.slane %v13515_v0, 4  ;;  %v2909_v51 = vrot.slane %v13517_v54, 2  ;;  %v2930_v5 = vsel %vm1433_vm4, %v13545_v48, %v2903_v7  ;;  %v11187_v6 = vld [vmem:[#allocation10 + $0x9ec] sm:$0xf0] }
 0x513   : > { %5005 = vmatpush.bf16.msra.mxu0 %v9052_v11  ;;  %v2931_v25 = vsel %vm2111_vm0, %v2904_v45, %v2905_v31  ;;  %v2952_v12 = vsel %vm2111_vm0, %v2925_v8, %v2926_v26  ;;  %v2922_v0 = vrot.slane %v13533_v28, 4  ;;  %v2923_v54 = vrot.slane %v13535_v19, 2  ;;  %v8637_v14 = vld [vmem:[#allocation10 + $0x1f0] sm:$0xf0] }
 0x514   : > { %v2944_v57 = vsel %vm1433_vm4, %v13554_v41, %v2917_v59  ;;  %v2932_v42 = vsel %vm1750_vm15, %v2930_v5, %v2931_v25  ;;  %v2914_v41 = vrot.slane %v13488_v16, 6  ;;  %v2935_v56 = vsel %vm2111_vm0, %v2908_v20, %v2909_v51  ;;  %v10893_v25 = vld [vmem:[#allocation10 + $0xc4] sm:$0xf]  ;;  %v9499_v5 = vld [vmem:[#allocation10 + $0x8a0] sm:$0xf] }
 0x515   : > { %5018 = vmatpush.bf16.msrb.mxu3 %v9180_v1  ;;  %v2951_v1 = vsel %vm1433_vm4, %v13539_v55, %v2924_v39  ;;  %v2934_v28 = vsel %vm1433_vm4, %v13475_v47, %v2907_v34  ;;  %v2949_v19 = vsel %vm2111_vm0, %v2922_v0, %v2923_v54  ;;  %v2913_v47 = vrot.slane %v13567_v24, 6  ;;  %v9515_v24 = vld [vmem:[#allocation10 + $0x8c0] sm:$0xf]  ;;  %v8621_v39 = vld [vmem:[#allocation10 + $0x1d0] sm:$0xf0] }
 0x516   : > { %4993 = vmatpush.bf16.msra.mxu2 %v8908_v63  ;;  %v2884_v62 = vld.sshfl [vmem:[#allocation1] sm:$0xff pattern:$0x73625140]  ;;  %v2885_v32 = vld.sshfl [vmem:[#allocation1 + $0x8] sm:$0xff pattern:$0x73625140]  ;;  %v2953_v9 = vsel %vm1750_vm15, %v2951_v1, %v2952_v12  ;;  %v2941_v55 = vsel %vm1433_vm4, %v13486_v36, %v2914_v41 }
 0x517   : > { %5006 = vmatpush.bf16.msra.mxu0 %v9036_v33  ;;  %2889 = vst [vmem:[#allocation1] ss:$4 sm:$0xff] %v13460_v60  ;;  %v2918_v30 = vrot.slane %v2884_v62, 4  ;;  %v2919_v10 = vrot.slane %v2885_v32, 2  ;;  %v2910_v60 = vrot.slane %v13524_v13, 6  ;;  %v2938_v13 = vsel %vm2111_vm0, %v2911_v29, %v2912_v37 }
 0x518   : > { %v13579_v17 = vld.sshfl [vmem:[#allocation1 + $0x20] sm:$0xff pattern:$0x73625140]  ;;  %v13592_v53 = vld.sshfl [vmem:[#allocation1 + $0x28] sm:$0xff pattern:$0x73625140]  ;;  %v2943_v21 = vsel %vm1750_vm15, %v2941_v55, %v2942_v27  ;;  %v2940_v62 = vsel %vm1433_vm4, %v13565_v18, %v2913_v47 }
 0x519   : > { %5019 = vmatpush.bf16.msrb.mxu3 %v9164_v40  ;;  %v2945_v43 = vsel %vm2111_vm0, %v2918_v30, %v2919_v10  ;;  %v2937_v46 = vsel %vm1433_vm4, %v13522_v61, %v2910_v60  ;;  %2963 = vst [vmem:[#allocation1 + $0x20] ss:$4 sm:$0xff] %v2932_v42  ;;  %v2921_v61 = vrot.slane %v13500_v23, 6  ;;  %v2936_v23 = vsel %vm1750_vm15, %v2934_v28, %v2935_v56  ;;  %v11155_v36 = vld [vmem:[#allocation10 + $0x8ec] sm:$0xf0] }
 0x51a   : > { %v2939_v48 = vsel %vm1750_vm15, %v2937_v46, %v2938_v13  ;;  %2969 = vst [vmem:[#allocation1 + $0x23] ss:$4 sm:$0xff] %v2953_v9  ;;  %v10897_v33 = vld [vmem:[#allocation10 + $0xe4] sm:$0xf]  ;;  %v9532_v31 = vor.u32 %v11155_v36, %v9531_v58  ;;  %v11151_v30 = vld [vmem:[#allocation10 + $0x8cc] sm:$0xf0]  ;;  %v9660_v60 = vor.u32 %v11187_v6, %v9659_v52 }
 0x51b   : > { %2965 = vst [vmem:[#allocation1 + $0x21] ss:$4 sm:$0xff] %v2939_v48  ;;  %v2948_v63 = vsel %vm1433_vm4, %v13498_v4, %v2921_v61  ;;  %v10929_v40 = vld [vmem:[#allocation10 + $0x1e4] sm:$0xf]  ;;  %v2927_v4 = vrot.slane %v13592_v53, 6  ;;  %v9516_v20 = vor.u32 %v11151_v30, %v9515_v24 }
 0x51c   : > { %v2950_v38 = vsel %vm1750_vm15, %v2948_v63, %v2949_v19  ;;  %v9643_v10 = vld [vmem:[#allocation10 + $0x9c0] sm:$0xf]  ;;  %v11183_v29 = vld [vmem:[#allocation10 + $0x9cc] sm:$0xf0]  ;;  %v10889_v34 = vld [vmem:[#allocation10 + $0xa4] sm:$0xf] }
 0x51d   : > { %v2954_v13 = vsel %vm1433_vm4, %v13579_v17, %v2927_v4  ;;  %v9644_v51 = vor.u32 %v11183_v29, %v9643_v10  ;;  %v11179_v12 = vld [vmem:[#allocation10 + $0x9ac] sm:$0xf0]  ;;  %v8477_v0 = vld [vmem:[#allocation10 + $0xb0] sm:$0xf0]  ;;  %v10921_v54 = vld [vmem:[#allocation10 + $0x1a4] sm:$0xf] }
 0x51e   : > { %v13584_v11 = vld.sshfl [vmem:[#allocation1] sm:$0xff pattern:$0x73625140]  ;;  %v13586_v22 = vld.sshfl [vmem:[#allocation1 + $0x8] sm:$0xff pattern:$0x73625140]  ;;  %v8480_v27 = vor.u32 %v10889_v34, %v8477_v0 }
 0x51f   : > { %2896 = vst [vmem:[#allocation1] ss:$4 sm:$0xff] %v2840_v35  ;;  %v2946_v35 = vsel %vm1750_vm15, %v2944_v57, %v2945_v43  ;;  %v2906_v15 = vrot.slane %v13586_v22, 6  ;;  %v8640_v22 = vor.u32 %v10929_v40, %v8637_v14  ;;  %v8493_v43 = vld [vmem:[#allocation10 + $0xd0] sm:$0xf0] }
 0x520   : > { %2967 = vst [vmem:[#allocation1 + $0x22] ss:$4 sm:$0xff] %v2946_v35  ;;  %v11147_v57 = vld [vmem:[#allocation10 + $0x8ac] sm:$0xf0]  ;;  %v8496_v42 = vor.u32 %v10893_v25, %v8493_v43  ;;  %v9627_v35 = vld [vmem:[#allocation10 + $0x9a0] sm:$0xf] }
 0x521   : > { %v2933_v37 = vsel %vm1433_vm4, %v13584_v11, %v2906_v15  ;;  %v10925_v11 = vld [vmem:[#allocation10 + $0x1c4] sm:$0xf]  ;;  %v8605_v48 = vld [vmem:[#allocation10 + $0x1b0] sm:$0xf0]  ;;  %v9483_v41 = vld [vmem:[#allocation10 + $0x880] sm:$0xf]  ;;  %v9500_v17 = vor.u32 %v11147_v57, %v9499_v5  ;;  %v9628_v1 = vor.u32 %v11179_v12, %v9627_v35 }
 0x522   : > { %v8624_v46 = vor.u32 %v10925_v11, %v8621_v39  ;;  %v11143_v61 = vld [vmem:[#allocation10 + $0x88c] sm:$0xf0]  ;;  %v9611_v56 = vld [vmem:[#allocation10 + $0x980] sm:$0xf]  ;;  %v8608_v28 = vor.u32 %v10921_v54, %v8605_v48  ;;  %v10885_v19 = vld [vmem:[#allocation10 + $0x84] sm:$0xf] }
 0x523   : > { %v11175_v9 = vld [vmem:[#allocation10 + $0x98c] sm:$0xf0]  ;;  %v8589_v55 = vld [vmem:[#allocation10 + $0x190] sm:$0xf0]  ;;  %v9595_v63 = vld [vmem:[#allocation10 + $0x960] sm:$0xf]  ;;  %v9484_v58 = vor.u32 %v11143_v61, %v9483_v41 }
 0x524   : > { %v10881_v47 = vld [vmem:[#allocation10 + $0x64] sm:$0xf]  ;;  %v9612_v15 = vor.u32 %v11175_v9, %v9611_v56  ;;  %v8445_v36 = vld [vmem:[#allocation10 + $0x70] sm:$0xf0]  ;;  %v9451_v30 = vld [vmem:[#allocation10 + $0x840] sm:$0xf] }
 0x525   : > { %v10913_v52 = vld [vmem:[#allocation10 + $0x164] sm:$0xf]  ;;  %v8573_v6 = vld [vmem:[#allocation10 + $0x170] sm:$0xf0]  ;;  %v8448_v24 = vor.u32 %v10881_v47, %v8445_v36  ;;  %v11135_v10 = vld [vmem:[#allocation10 + $0x84c] sm:$0xf0] }
 0x526   : > { %v2897_v16 = vld.sshfl [vmem:[#allocation1] sm:$0xff pattern:$0x73625140]  ;;  %v2898_v49 = vld.sshfl [vmem:[#allocation1 + $0x8] sm:$0xff pattern:$0x73625140] }
 0x527   : > { %2955 = vst [vmem:[#allocation1] ss:$4 sm:$0xff] %v13376_v2  ;;  %v8509_v2 = vld [vmem:[#allocation10 + $0xf0] sm:$0xf0]  ;;  %v2920_v3 = vrot.slane %v2898_v49, 6 }
 0x528   : > { %2957 = vst [vmem:[#allocation1 + $0x1] ss:$4 sm:$0xff] %v2936_v23  ;;  %v8512_v26 = vor.u32 %v10897_v33, %v8509_v2  ;;  %v10917_v49 = vld [vmem:[#allocation10 + $0x184] sm:$0xf]  ;;  %v9467_v23 = vld [vmem:[#allocation10 + $0x860] sm:$0xf] }
 0x529   : > { %2959 = vst [vmem:[#allocation1 + $0x2] ss:$4 sm:$0xff] %v2943_v21  ;;  %v2947_v53 = vsel %vm1433_vm4, %v2897_v16, %v2920_v3  ;;  %v8461_v16 = vld [vmem:[#allocation10 + $0x90] sm:$0xf0]  ;;  %v11139_v21 = vld [vmem:[#allocation10 + $0x86c] sm:$0xf0]  ;;  %v8592_v2 = vor.u32 %v10917_v49, %v8589_v55 }
 0x52a   : > { %2961 = vst [vmem:[#allocation1 + $0x3] ss:$4 sm:$0xff] %v2950_v38  ;;  %v11171_v38 = vld [vmem:[#allocation10 + $0x96c] sm:$0xf0]  ;;  %v8464_v33 = vor.u32 %v10885_v19, %v8461_v16  ;;  %v10909_v25 = vld [vmem:[#allocation10 + $0x144] sm:$0xf] }
 0x52b   : > { %v2974_v3 = vld.sshfl [vmem:[#allocation1 + $0x20] sm:$0xff pattern:$0x73625140]  ;;  %v2975_v40 = vld.sshfl [vmem:[#allocation1 + $0x28] sm:$0xff pattern:$0x73625140] }
 0x52c   : > { %v2976_v14 = vld.sshfl [vmem:[#allocation1 + $0x30] sm:$0xff pattern:$0x73625140]  ;;  %v2977_v4 = vld.sshfl [vmem:[#allocation1 + $0x38] sm:$0xff pattern:$0x73625140] }
 0x52d   : > { %v13655_v29 = vpack.c.bf16 %v2976_v14, %v2976_v14  ;;  %v8557_v43 = vld [vmem:[#allocation10 + $0x150] sm:$0xf0]  ;;  %v9435_v39 = vld [vmem:[#allocation10 + $0x820] sm:$0xf]  ;;  %v11163_v57 = vld [vmem:[#allocation10 + $0x92c] sm:$0xf0] }
 0x52e   : > { %v9563_v5 = vld [vmem:[#allocation10 + $0x920] sm:$0xf]  ;;  %v10905_v35 = vld [vmem:[#allocation10 + $0x124] sm:$0xf]  ;;  %v8541_v12 = vld [vmem:[#allocation10 + $0x130] sm:$0xf0] }
 0x52f   : > { %v9419_v34 = vld [vmem:[#allocation10 + $0x800] sm:$0xf]  ;;  %v9564_v54 = vor.u32 %v11163_v57, %v9563_v5  ;;  %v11127_v48 = vld [vmem:[#allocation10 + $0x80c] sm:$0xf0]  ;;  %v8544_v61 = vor.u32 %v10905_v35, %v8541_v12  ;;  %v10869_v56 = vld [vmem:[#allocation10 + $0x4] sm:$0xf] }
 0x530   : > { %v9547_v41 = vld [vmem:[#allocation10 + $0x900] sm:$0xf]  ;;  %v8397_v9 = vld [vmem:[#allocation10 + $0x10] sm:$0xf0]  ;;  %v10961_v19 = vld [vmem:[#allocation10 + $0x2e4] sm:$0xf] }
 0x531   : > { %v2970_v32 = vld.sshfl [vmem:[#allocation1] sm:$0xff pattern:$0x73625140]  ;;  %v2971_v45 = vld.sshfl [vmem:[#allocation1 + $0x8] sm:$0xff pattern:$0x73625140] }
 0x532   : > { %v13636_v50 = vpack.c.bf16 %v2970_v32, %v2970_v32  ;;  %v13638_v44 = vpack.c.bf16 %v2971_v45, %v2971_v45  ;;  %v2972_v7 = vld.sshfl [vmem:[#allocation1 + $0x10] sm:$0xff pattern:$0x73625140]  ;;  %v2973_v59 = vld.sshfl [vmem:[#allocation1 + $0x18] sm:$0xff pattern:$0x73625140]  ;;  %v9596_v32 = vor.u32 %v11171_v38, %v9595_v63  ;;  %v13651_v45 = vpack.c.bf16 %v2974_v3, %v2974_v3 }
 0x533   : > { %v13640_v8 = vpack.c.bf16 %v2972_v7, %v2972_v7  ;;  %v13642_v18 = vpack.c.bf16 %v2973_v59, %v2973_v59  ;;  %2978 = vst [vmem:[#allocation1] ss:$4 sm:$0xff] %v2933_v37  ;;  %v13657_v37 = vpack.c.bf16 %v2977_v4, %v2977_v4  ;;  %v8576_v7 = vor.u32 %v10913_v52, %v8573_v6  ;;  %v9579_v59 = vld [vmem:[#allocation10 + $0x940] sm:$0xf]  ;;  %v8765_v16 = vld [vmem:[#allocation10 + $0x2f0] sm:$0xf0] }
 0x534   : > { %4942 = vmatmul.bf16.vlgmr.msrb.gmra.mxu2 %v13636_v50  ;;  %4955 = vmatmul.bf16.vlgmr.msrb.gmra.mxu0 %v13638_v44  ;;  %2979 = vst [vmem:[#allocation1 + $0x1] ss:$4 sm:$0xff] %v2940_v62  ;;  %v9468_v62 = vor.u32 %v11139_v21, %v9467_v23  ;;  %v10993_v49 = vld [vmem:[#allocation10 + $0x3e4] sm:$0xf]  ;;  %v8893_v55 = vld [vmem:[#allocation10 + $0x3f0] sm:$0xf0]  ;;  %v9420_v21 = vor.u32 %v11127_v48, %v9419_v34 }
 0x535   : > { %4968 = vmatmul.bf16.vlgmr.msra.gmra.mxu3 %v13640_v8  ;;  %4981 = vmatmul.bf16.vlgmr.msra.gmra.mxu1 %v13642_v18  ;;  %2980 = vst [vmem:[#allocation1 + $0x2] ss:$4 sm:$0xff] %v2947_v53  ;;  %v9452_v53 = vor.u32 %v11135_v10, %v9451_v30  ;;  %v11025_v23 = vld [vmem:[#allocation10 + $0x4e4] sm:$0xf]  ;;  %v9021_v38 = vld [vmem:[#allocation10 + $0x4f0] sm:$0xf0] }
 0x536   : > { %5038 = vmatpush.bf16.msrb.mxu2 %v9532_v31  ;;  %5051 = vmatpush.bf16.msrb.mxu0 %v9660_v60  ;;  %2981 = vst [vmem:[#allocation1 + $0x3] ss:$4 sm:$0xff] %v2954_v13  ;;  %v13653_v31 = vpack.c.bf16 %v2975_v40, %v2975_v40  ;;  %v11167_v60 = vld [vmem:[#allocation10 + $0x94c] sm:$0xf0]  ;;  %v11057_v47 = vld [vmem:[#allocation10 + $0x5e4] sm:$0xf]  ;;  %v9024_v4 = vor.u32 %v11025_v23, %v9021_v38 }
 0x537   : > { %5064 = vmatpush.bf16.msra.mxu3 %v8512_v26  ;;  %5077 = vmatpush.bf16.msra.mxu1 %v8640_v22  ;;  %v10877_v26 = vld [vmem:[#allocation10 + $0x44] sm:$0xf]  ;;  %v8429_v22 = vld [vmem:[#allocation10 + $0x50] sm:$0xf0]  ;;  %v9580_v11 = vor.u32 %v11167_v60, %v9579_v59  ;;  %v11131_v13 = vld [vmem:[#allocation10 + $0x82c] sm:$0xf0] }
 0x538   : > { %v9436_v0 = vor.u32 %v11131_v13, %v9435_v39  ;;  %v10957_v52 = vld [vmem:[#allocation10 + $0x2c4] sm:$0xf]  ;;  %v8749_v6 = vld [vmem:[#allocation10 + $0x2d0] sm:$0xf0] }
 0x539   : > { %v10989_v3 = vld [vmem:[#allocation10 + $0x3c4] sm:$0xf]  ;;  %v8877_v40 = vld [vmem:[#allocation10 + $0x3d0] sm:$0xf0]  ;;  %v8752_v59 = vor.u32 %v10957_v52, %v8749_v6 }
 0x53a   : > { %5039 = vmatpush.bf16.msrb.mxu2 %v9516_v20  ;;  %5052 = vmatpush.bf16.msrb.mxu0 %v9644_v51  ;;  %v8432_v20 = vor.u32 %v10877_v26, %v8429_v22  ;;  %v8560_v51 = vor.u32 %v10909_v25, %v8557_v43  ;;  %v11021_v14 = vld [vmem:[#allocation10 + $0x4c4] sm:$0xf]  ;;  %v9005_v30 = vld [vmem:[#allocation10 + $0x4d0] sm:$0xf0]  ;;  %v8880_v22 = vor.u32 %v10989_v3, %v8877_v40 }
 0x53b   : > { %5065 = vmatpush.bf16.msra.mxu3 %v8496_v42  ;;  %5078 = vmatpush.bf16.msra.mxu1 %v8624_v46  ;;  %v10873_v42 = vld [vmem:[#allocation10 + $0x24] sm:$0xf]  ;;  %v8413_v46 = vld [vmem:[#allocation10 + $0x30] sm:$0xf0] }
 0x53c   : > { %v11053_v10 = vld [vmem:[#allocation10 + $0x5c4] sm:$0xf]  ;;  %v8733_v43 = vld [vmem:[#allocation10 + $0x2b0] sm:$0xf0] }
 0x53d   : > { %v10953_v25 = vld [vmem:[#allocation10 + $0x2a4] sm:$0xf]  ;;  %v8861_v13 = vld [vmem:[#allocation10 + $0x3b0] sm:$0xf0] }
 0x53e   : > { %5040 = vmatpush.bf16.msrb.mxu2 %v9500_v17  ;;  %5053 = vmatpush.bf16.msrb.mxu0 %v9628_v1  ;;  %v11159_v17 = vld [vmem:[#allocation10 + $0x90c] sm:$0xf0]  ;;  %v8416_v1 = vor.u32 %v10873_v42, %v8413_v46  ;;  %v10985_v39 = vld [vmem:[#allocation10 + $0x3a4] sm:$0xf]  ;;  %v9117_v57 = vld [vmem:[#allocation10 + $0x5b0] sm:$0xf0]  ;;  %v8736_v42 = vor.u32 %v10953_v25, %v8733_v43 }
 0x53f   : > { %5066 = vmatpush.bf16.msra.mxu3 %v8480_v27  ;;  %5079 = vmatpush.bf16.msra.mxu1 %v8608_v28  ;;  %v10901_v27 = vld [vmem:[#allocation10 + $0x104] sm:$0xf]  ;;  %v8525_v28 = vld [vmem:[#allocation10 + $0x110] sm:$0xf0]  ;;  %v9548_v63 = vor.u32 %v11159_v17, %v9547_v41  ;;  %v8864_v46 = vor.u32 %v10985_v39, %v8861_v13 }
 0x540   : > { %v8528_v36 = vor.u32 %v10901_v27, %v8525_v28  ;;  %v11049_v5 = vld [vmem:[#allocation10 + $0x5a4] sm:$0xf]  ;;  %v8717_v12 = vld [vmem:[#allocation10 + $0x290] sm:$0xf0] }
 0x541   : > { %v10949_v35 = vld [vmem:[#allocation10 + $0x284] sm:$0xf]  ;;  %v8845_v48 = vld [vmem:[#allocation10 + $0x390] sm:$0xf0] }
 0x542   : > { %5041 = vmatpush.bf16.msrb.mxu2 %v9484_v58  ;;  %5054 = vmatpush.bf16.msrb.mxu0 %v9612_v15  ;;  %v9149_v58 = vld [vmem:[#allocation10 + $0x5f0] sm:$0xf0]  ;;  %v8400_v15 = vor.u32 %v10869_v56, %v8397_v9  ;;  %v11013_v41 = vld [vmem:[#allocation10 + $0x484] sm:$0xf]  ;;  %v8720_v56 = vor.u32 %v10949_v35, %v8717_v12 }
 0x543   : > { %5067 = vmatpush.bf16.msra.mxu3 %v8464_v33  ;;  %5080 = vmatpush.bf16.msra.mxu1 %v8592_v2  ;;  %v8768_v33 = vor.u32 %v10961_v19, %v8765_v16  ;;  %v8896_v2 = vor.u32 %v10993_v49, %v8893_v55  ;;  %v8973_v17 = vld [vmem:[#allocation10 + $0x490] sm:$0xf0]  ;;  %v10945_v27 = vld [vmem:[#allocation10 + $0x264] sm:$0xf] }
 0x544   : > { %4994 = vmatmul.bf16.vlgmr.msra.gmra.mxu2 %v13651_v45  ;;  %5007 = vmatmul.bf16.vlgmr.msra.gmra.mxu0 %v13653_v31  ;;  %v8701_v28 = vld [vmem:[#allocation10 + $0x270] sm:$0xf0]  ;;  %v8976_v19 = vor.u32 %v11013_v41, %v8973_v17  ;;  %v10977_v49 = vld [vmem:[#allocation10 + $0x364] sm:$0xf] }
 0x545   : > { %5020 = vmatmul.bf16.vlgmr.msrb.gmra.mxu3 %v13655_v29  ;;  %5033 = vmatmul.bf16.vlgmr.msrb.gmra.mxu1 %v13657_v37  ;;  %v8829_v55 = vld [vmem:[#allocation10 + $0x370] sm:$0xf0]  ;;  %v11009_v23 = vld [vmem:[#allocation10 + $0x464] sm:$0xf] }
 0x546   : > { %5042 = vmatpush.bf16.msrb.mxu2 %v9468_v62  ;;  %5055 = vmatpush.bf16.msrb.mxu0 %v9596_v32  ;;  %v9152_v62 = vor.u32 %v11057_v47, %v9149_v58  ;;  %v2982_v32 = vld.sshfl [vmem:[#allocation1] sm:$0xff pattern:$0x73625140]  ;;  %v9085_v38 = vld [vmem:[#allocation10 + $0x570] sm:$0xf0]  ;;  %v8704_v47 = vor.u32 %v10945_v27, %v8701_v28  ;;  %v8832_v58 = vor.u32 %v10977_v49, %v8829_v55 }
 0x547   : > { %5068 = vmatpush.bf16.msra.mxu3 %v8448_v24  ;;  %5081 = vmatpush.bf16.msra.mxu1 %v8576_v7  ;;  %v2983_v24 = vld.sshfl [vmem:[#allocation1 + $0x8] sm:$0xff pattern:$0x73625140]  ;;  %v9133_v7 = vld [vmem:[#allocation10 + $0x5d0] sm:$0xf0]  ;;  %v13663_v60 = vpack.c.bf16 %v2982_v32, %v2982_v32 }
 0x548   : > { %v13665_v26 = vpack.c.bf16 %v2983_v24, %v2983_v24  ;;  %v11005_v3 = vld [vmem:[#allocation10 + $0x444] sm:$0xf]  ;;  %v8941_v40 = vld [vmem:[#allocation10 + $0x450] sm:$0xf0] }
 0x549   : > { %v10937_v24 = vld [vmem:[#allocation10 + $0x224] sm:$0xf]  ;;  %v8925_v43 = vld [vmem:[#allocation10 + $0x430] sm:$0xf0] }
 0x54a   : > { %5043 = vmatpush.bf16.msrb.mxu2 %v9452_v53  ;;  %5056 = vmatpush.bf16.msrb.mxu0 %v9580_v11  ;;  %v9008_v53 = vor.u32 %v11021_v14, %v9005_v30  ;;  %v9136_v11 = vor.u32 %v11053_v10, %v9133_v7  ;;  %v11037_v14 = vld [vmem:[#allocation10 + $0x544] sm:$0xf]  ;;  %v8669_v30 = vld [vmem:[#allocation10 + $0x230] sm:$0xf0]  ;;  %v8944_v10 = vor.u32 %v11005_v3, %v8941_v40 }
 0x54b   : > { %5069 = vmatpush.bf16.msra.mxu3 %v8432_v20  ;;  %5082 = vmatpush.bf16.msra.mxu1 %v8560_v51  ;;  %v11017_v20 = vld [vmem:[#allocation10 + $0x4a4] sm:$0xf]  ;;  %v8989_v51 = vld [vmem:[#allocation10 + $0x4b0] sm:$0xf0]  ;;  %v8672_v13 = vor.u32 %v10937_v24, %v8669_v30 }
 0x54c   : > { %v8992_v34 = vor.u32 %v11017_v20, %v8989_v51  ;;  %v11001_v25 = vld [vmem:[#allocation10 + $0x424] sm:$0xf]  ;;  %v8653_v51 = vld [vmem:[#allocation10 + $0x210] sm:$0xf0] }
 0x54d   : > { %v10933_v39 = vld [vmem:[#allocation10 + $0x204] sm:$0xf]  ;;  %v8909_v12 = vld [vmem:[#allocation10 + $0x410] sm:$0xf0] }
 0x54e   : > { %5044 = vmatpush.bf16.msrb.mxu2 %v9436_v0  ;;  %5057 = vmatpush.bf16.msrb.mxu0 %v9564_v54  ;;  %v9120_v0 = vor.u32 %v11049_v5, %v9117_v57  ;;  %v10981_v54 = vld [vmem:[#allocation10 + $0x384] sm:$0xf]  ;;  %v8781_v57 = vld [vmem:[#allocation10 + $0x310] sm:$0xf0] }
 0x54f   : > { %5070 = vmatpush.bf16.msra.mxu3 %v8416_v1  ;;  %5083 = vmatpush.bf16.msra.mxu1 %v8544_v61  ;;  %v11045_v1 = vld [vmem:[#allocation10 + $0x584] sm:$0xf]  ;;  %v9101_v61 = vld [vmem:[#allocation10 + $0x590] sm:$0xf0]  ;;  %v8848_v9 = vor.u32 %v10981_v54, %v8845_v48 }
 0x550   : > { %v9104_v16 = vor.u32 %v11045_v1, %v9101_v61  ;;  %v10965_v5 = vld [vmem:[#allocation10 + $0x304] sm:$0xf]  ;;  %v9277_v48 = vld [vmem:[#allocation10 + $0x6f0] sm:$0xf0]  ;;  %v8656_v61 = vor.u32 %v10933_v39, %v8653_v51 }
 0x551   : > { %v10997_v35 = vld [vmem:[#allocation10 + $0x404] sm:$0xf]  ;;  %v9405_v17 = vld [vmem:[#allocation10 + $0x7f0] sm:$0xf0] }
 0x552   : > { %5045 = vmatpush.bf16.msrb.mxu2 %v9420_v21  ;;  %5058 = vmatpush.bf16.msrb.mxu0 %v9548_v63  ;;  %v8957_v21 = vld [vmem:[#allocation10 + $0x470] sm:$0xf0]  ;;  %v11041_v63 = vld [vmem:[#allocation10 + $0x564] sm:$0xf] }
 0x553   : > { %5071 = vmatpush.bf16.msra.mxu3 %v8400_v15  ;;  %5084 = vmatpush.bf16.msra.mxu1 %v8528_v36  ;;  %v10941_v15 = vld [vmem:[#allocation10 + $0x244] sm:$0xf]  ;;  %v8685_v36 = vld [vmem:[#allocation10 + $0x250] sm:$0xf0]  ;;  %v8960_v52 = vor.u32 %v11009_v23, %v8957_v21  ;;  %v9088_v6 = vor.u32 %v11041_v63, %v9085_v38 }
 0x554   : > { %v11089_v54 = vld [vmem:[#allocation10 + $0x6e4] sm:$0xf]  ;;  %v9661_v28 = vld [vmem:[#allocation10 + $0x9f0] sm:$0xf0] }
 0x555   : > { %5046 = vmatmul.bf16.vlgmr.msrb.gmra.mxu2 %v13663_v60  ;;  %5059 = vmatmul.bf16.vlgmr.msrb.gmra.mxu0 %v13665_v26  ;;  %v11121_v41 = vld [vmem:[#allocation10 + $0x7e4] sm:$0xf]  ;;  %v9280_v49 = vor.u32 %v11089_v54, %v9277_v48  ;;  %v9261_v21 = vld [vmem:[#allocation10 + $0x6d0] sm:$0xf0] }
 0x556   : > { %5090 = vmatpush.bf16.msra.mxu2 %v8768_v33  ;;  %5103 = vmatpush.bf16.msra.mxu0 %v8896_v2  ;;  %v10973_v33 = vld [vmem:[#allocation10 + $0x344] sm:$0xf]  ;;  %v8813_v2 = vld [vmem:[#allocation10 + $0x350] sm:$0xf0]  ;;  %v9408_v55 = vor.u32 %v11121_v41, %v9405_v17 }
 0x557   : > { %5116 = vmatpush.bf16.msrb.mxu3 %v9024_v4  ;;  %5129 = vmatpush.bf16.msrb.mxu1 %v9152_v62  ;;  %v9069_v4 = vld [vmem:[#allocation10 + $0x550] sm:$0xf0]  ;;  %v8688_v62 = vor.u32 %v10941_v15, %v8685_v36  ;;  %v8816_v32 = vor.u32 %v10973_v33, %v8813_v2  ;;  %v11153_v1 = vld [vmem:[#allocation10 + $0x8e4] sm:$0xf] }
 0x558   : > { %5072 = vmatmul.bf16.vlgmr.msra.gmra.mxu3 %v13636_v50  ;;  %5085 = vmatmul.bf16.vlgmr.msra.gmra.mxu1 %v13638_v44  ;;  %v9072_v7 = vor.u32 %v11037_v14, %v9069_v4  ;;  %v11185_v27 = vld [vmem:[#allocation10 + $0x9e4] sm:$0xf]  ;;  %v9517_v36 = vld [vmem:[#allocation10 + $0x8d0] sm:$0xf0] }
 0x559   : > { %v11085_v23 = vld [vmem:[#allocation10 + $0x6c4] sm:$0xf]  ;;  %v9664_v38 = vor.u32 %v11185_v27, %v9661_v28  ;;  %v9245_v40 = vld [vmem:[#allocation10 + $0x6b0] sm:$0xf0] }
 0x55a   : > { %5091 = vmatpush.bf16.msra.mxu2 %v8752_v59  ;;  %5104 = vmatpush.bf16.msra.mxu0 %v8880_v22  ;;  %v10969_v59 = vld [vmem:[#allocation10 + $0x324] sm:$0xf]  ;;  %v8797_v22 = vld [vmem:[#allocation10 + $0x330] sm:$0xf0]  ;;  %v9264_v33 = vor.u32 %v11085_v23, %v9261_v21 }
 0x55b   : > { %5117 = vmatpush.bf16.msrb.mxu3 %v9008_v53  ;;  %5130 = vmatpush.bf16.msrb.mxu1 %v9136_v11  ;;  %v11033_v53 = vld [vmem:[#allocation10 + $0x524] sm:$0xf]  ;;  %v9053_v11 = vld [vmem:[#allocation10 + $0x530] sm:$0xf0]  ;;  %v8800_v20 = vor.u32 %v10969_v59, %v8797_v22 }
 0x55c   : > { %v11149_v15 = vld [vmem:[#allocation10 + $0x8c4] sm:$0xf]  ;;  %v9501_v30 = vld [vmem:[#allocation10 + $0x8b0] sm:$0xf0] }
 0x55d   : > { %v11081_v3 = vld [vmem:[#allocation10 + $0x6a4] sm:$0xf]  ;;  %v9520_v14 = vor.u32 %v11149_v15, %v9517_v36  ;;  %v9485_v51 = vld [vmem:[#allocation10 + $0x890] sm:$0xf0] }
 0x55e   : > { %5092 = vmatpush.bf16.msra.mxu2 %v8736_v42  ;;  %5105 = vmatpush.bf16.msra.mxu0 %v8864_v46  ;;  %v8928_v42 = vor.u32 %v11001_v25, %v8925_v43  ;;  %v9056_v46 = vor.u32 %v11033_v53, %v9053_v11  ;;  %v11145_v24 = vld [vmem:[#allocation10 + $0x8a4] sm:$0xf]  ;;  %v9248_v59 = vor.u32 %v11081_v3, %v9245_v40  ;;  %v9229_v43 = vld [vmem:[#allocation10 + $0x690] sm:$0xf0] }
 0x55f   : > { %5118 = vmatpush.bf16.msrb.mxu3 %v8992_v34  ;;  %5131 = vmatpush.bf16.msrb.mxu1 %v9120_v0  ;;  %v11029_v34 = vld [vmem:[#allocation10 + $0x504] sm:$0xf]  ;;  %v9037_v0 = vld [vmem:[#allocation10 + $0x510] sm:$0xf0]  ;;  %v9504_v53 = vor.u32 %v11145_v24, %v9501_v30 }
 0x560   : > { %v11077_v25 = vld [vmem:[#allocation10 + $0x684] sm:$0xf]  ;;  %v9341_v48 = vld [vmem:[#allocation10 + $0x770] sm:$0xf0] }
 0x561   : > { %v11109_v39 = vld [vmem:[#allocation10 + $0x784] sm:$0xf]  ;;  %v9469_v17 = vld [vmem:[#allocation10 + $0x870] sm:$0xf0] }
 0x562   : > { %5093 = vmatpush.bf16.msra.mxu2 %v8720_v56  ;;  %5106 = vmatpush.bf16.msra.mxu0 %v8848_v9  ;;  %v8784_v56 = vor.u32 %v10965_v5, %v8781_v57  ;;  %v9533_v9 = vld [vmem:[#allocation10 + $0x8f0] sm:$0xf0]  ;;  %v11173_v5 = vld [vmem:[#allocation10 + $0x984] sm:$0xf] }
 0x563   : > { %5119 = vmatpush.bf16.msrb.mxu3 %v8976_v19  ;;  %5132 = vmatpush.bf16.msrb.mxu1 %v9104_v16  ;;  %v8912_v19 = vor.u32 %v10997_v35, %v8909_v12  ;;  %v9040_v16 = vor.u32 %v11029_v34, %v9037_v0  ;;  %v9536_v63 = vor.u32 %v11153_v1, %v9533_v9  ;;  %v9613_v57 = vld [vmem:[#allocation10 + $0x990] sm:$0xf0]  ;;  %v11073_v35 = vld [vmem:[#allocation10 + $0x664] sm:$0xf] }
 0x564   : > { %v9213_v12 = vld [vmem:[#allocation10 + $0x670] sm:$0xf0]  ;;  %v9616_v0 = vor.u32 %v11173_v5, %v9613_v57  ;;  %v11105_v54 = vld [vmem:[#allocation10 + $0x764] sm:$0xf]  ;;  %v8771_v5 = vld [vmem:[#allocation10 + $0x2e8] sm:$0xf] }
 0x565   : > { %v11137_v41 = vld [vmem:[#allocation10 + $0x864] sm:$0xf]  ;;  %v9344_v9 = vor.u32 %v11105_v54, %v9341_v48  ;;  %v9197_v28 = vld [vmem:[#allocation10 + $0x650] sm:$0xf0] }
 0x566   : > { %5094 = vmatpush.bf16.msra.mxu2 %v8704_v47  ;;  %5107 = vmatpush.bf16.msra.mxu0 %v8832_v58  ;;  %v11117_v47 = vld [vmem:[#allocation10 + $0x7c4] sm:$0xf]  ;;  %v9389_v58 = vld [vmem:[#allocation10 + $0x7d0] sm:$0xf0] }
 0x567   : > { %5120 = vmatpush.bf16.msrb.mxu3 %v8960_v52  ;;  %5133 = vmatpush.bf16.msrb.mxu1 %v9088_v6  ;;  %v11181_v52 = vld [vmem:[#allocation10 + $0x9c4] sm:$0xf]  ;;  %v9645_v6 = vld [vmem:[#allocation10 + $0x9d0] sm:$0xf0]  ;;  %v9392_v2 = vor.u32 %v11117_v47, %v9389_v58 }
 0x568   : > { %v9648_v4 = vor.u32 %v11181_v52, %v9645_v6  ;;  %v11169_v1 = vld [vmem:[#allocation10 + $0x964] sm:$0xf]  ;;  %v9453_v21 = vld [vmem:[#allocation10 + $0x850] sm:$0xf0] }
 0x569   : > { %v11069_v27 = vld [vmem:[#allocation10 + $0x644] sm:$0xf]  ;;  %v9181_v36 = vld [vmem:[#allocation10 + $0x630] sm:$0xf0] }
 0x56a   : > { %5095 = vmatpush.bf16.msra.mxu2 %v8688_v62  ;;  %5108 = vmatpush.bf16.msra.mxu0 %v8816_v32  ;;  %v11113_v62 = vld [vmem:[#allocation10 + $0x7a4] sm:$0xf]  ;;  %v9373_v32 = vld [vmem:[#allocation10 + $0x7b0] sm:$0xf0]  ;;  %v9200_v47 = vor.u32 %v11069_v27, %v9197_v28  ;;  %v8755_v27 = vld [vmem:[#allocation10 + $0x2c8] sm:$0xf] }
 0x56b   : > { %5121 = vmatpush.bf16.msrb.mxu3 %v8944_v10  ;;  %5134 = vmatpush.bf16.msrb.mxu1 %v9072_v7  ;;  %v11177_v10 = vld [vmem:[#allocation10 + $0x9a4] sm:$0xf]  ;;  %v9629_v7 = vld [vmem:[#allocation10 + $0x9b0] sm:$0xf0]  ;;  %v9376_v22 = vor.u32 %v11113_v62, %v9373_v32  ;;  %v10960_v28 = vld [vmem:[#allocation10 + $0x2d4] sm:$0xf0] }
 0x56c   : > { %v9632_v11 = vor.u32 %v11177_v10, %v9629_v7  ;;  %v11133_v23 = vld [vmem:[#allocation10 + $0x844] sm:$0xf]  ;;  %v9437_v40 = vld [vmem:[#allocation10 + $0x830] sm:$0xf0] }
 0x56d   : > { %v11065_v15 = vld [vmem:[#allocation10 + $0x624] sm:$0xf]  ;;  %v9456_v52 = vor.u32 %v11133_v23, %v9453_v21  ;;  %v9165_v30 = vld [vmem:[#allocation10 + $0x610] sm:$0xf0]  ;;  %v8483_v23 = vld [vmem:[#allocation10 + $0xa8] sm:$0xf] }
 0x56e   : > { %5096 = vmatpush.bf16.msra.mxu2 %v8672_v13  ;;  %5109 = vmatpush.bf16.msra.mxu0 %v8800_v20  ;;  %v9357_v13 = vld [vmem:[#allocation10 + $0x790] sm:$0xf0]  ;;  %v11141_v20 = vld [vmem:[#allocation10 + $0x884] sm:$0xf]  ;;  %v9184_v32 = vor.u32 %v11065_v15, %v9181_v36  ;;  %v10892_v21 = vld [vmem:[#allocation10 + $0xb4] sm:$0xf0] }
 0x56f   : > { %5122 = vmatpush.bf16.msrb.mxu3 %v8928_v42  ;;  %5135 = vmatpush.bf16.msrb.mxu1 %v9056_v46  ;;  %v9232_v42 = vor.u32 %v11077_v25, %v9229_v43  ;;  %v9360_v46 = vor.u32 %v11109_v39, %v9357_v13  ;;  %v9488_v34 = vor.u32 %v11141_v20, %v9485_v51  ;;  %v11129_v3 = vld [vmem:[#allocation10 + $0x824] sm:$0xf]  ;;  %v9293_v7 = vld [vmem:[#allocation10 + $0x710] sm:$0xf0]  ;;  %v8515_v39 = vld [vmem:[#allocation10 + $0xe8] sm:$0xf] }
 0x570   : > { %v11061_v62 = vld [vmem:[#allocation10 + $0x604] sm:$0xf]  ;;  %v9421_v43 = vld [vmem:[#allocation10 + $0x810] sm:$0xf0]  ;;  %v10900_v13 = vld [vmem:[#allocation10 + $0xf4] sm:$0xf0] }
 0x571   : > { %v11093_v10 = vld [vmem:[#allocation10 + $0x704] sm:$0xf]  ;;  %v8643_v20 = vld [vmem:[#allocation10 + $0x1e8] sm:$0xf]  ;;  %v10932_v51 = vld [vmem:[#allocation10 + $0x1f4] sm:$0xf0]  ;;  %v9168_v57 = vor.u32 %v11061_v62, %v9165_v30  ;;  %v8516_v54 = vor.u32 %v10900_v13, %v8515_v39 }
 0x572   : > { %5097 = vmatpush.bf16.msra.mxu2 %v8656_v61  ;;  %5110 = vmatpush.bf16.msra.mxu0 %v8784_v56  ;;  %v9597_v61 = vld [vmem:[#allocation10 + $0x970] sm:$0xf0]  ;;  %v9216_v56 = vor.u32 %v11073_v35, %v9213_v12  ;;  %v11125_v25 = vld [vmem:[#allocation10 + $0x804] sm:$0xf]  ;;  %v8899_v35 = vld [vmem:[#allocation10 + $0x3e8] sm:$0xf]  ;;  %v8644_v48 = vor.u32 %v10932_v51, %v8643_v20 }
 0x573   : > { %5123 = vmatpush.bf16.msrb.mxu3 %v8912_v19  ;;  %5136 = vmatpush.bf16.msrb.mxu1 %v9040_v16  ;;  %v9472_v19 = vor.u32 %v11137_v41, %v9469_v17  ;;  %v9600_v16 = vor.u32 %v11169_v1, %v9597_v61  ;;  %v10996_v12 = vld [vmem:[#allocation10 + $0x3f4] sm:$0xf0]  ;;  %v8499_v41 = vld [vmem:[#allocation10 + $0xc8] sm:$0xf] }
 0x574   : > { %v10896_v17 = vld [vmem:[#allocation10 + $0xd4] sm:$0xf0]  ;;  %v8900_v61 = vor.u32 %v10996_v12, %v8899_v35  ;;  %v8739_v15 = vld [vmem:[#allocation10 + $0x2a8] sm:$0xf] }
 0x575   : > { %5098 = vmatmul.bf16.vlgmr.msra.gmra.mxu2 %v13640_v8  ;;  %5111 = vmatmul.bf16.vlgmr.msra.gmra.mxu0 %v13642_v18  ;;  %v10956_v36 = vld [vmem:[#allocation10 + $0x2b4] sm:$0xf0]  ;;  %v8595_v62 = vld [vmem:[#allocation10 + $0x188] sm:$0xf] }
 0x576   : > { %5142 = vmatpush.bf16.msrb.mxu2 %v9280_v49  ;;  %5155 = vmatpush.bf16.msrb.mxu0 %v9408_v55  ;;  %v11101_v49 = vld [vmem:[#allocation10 + $0x744] sm:$0xf]  ;;  %v9325_v55 = vld [vmem:[#allocation10 + $0x750] sm:$0xf0]  ;;  %v10952_v30 = vld [vmem:[#allocation10 + $0x294] sm:$0xf0] }
 0x577   : > { %5168 = vmatpush.bf16.msra.mxu3 %v9536_v63  ;;  %5181 = vmatpush.bf16.msra.mxu1 %v9664_v38  ;;  %v11165_v63 = vld [vmem:[#allocation10 + $0x944] sm:$0xf]  ;;  %v9581_v38 = vld [vmem:[#allocation10 + $0x950] sm:$0xf0]  ;;  %v9328_v58 = vor.u32 %v11101_v49, %v9325_v55  ;;  %v8500_v49 = vor.u32 %v10896_v17, %v8499_v41  ;;  %v8579_v39 = vld [vmem:[#allocation10 + $0x168] sm:$0xf] }
 0x578   : > { %5124 = vmatmul.bf16.vlgmr.msrb.gmra.mxu3 %v13651_v45  ;;  %5137 = vmatmul.bf16.vlgmr.msrb.gmra.mxu1 %v13653_v31  ;;  %v9584_v6 = vor.u32 %v11165_v63, %v9581_v38  ;;  %v8756_v63 = vor.u32 %v10960_v28, %v8755_v27  ;;  %v10916_v13 = vld [vmem:[#allocation10 + $0x174] sm:$0xf0]  ;;  %v8707_v20 = vld [vmem:[#allocation10 + $0x268] sm:$0xf] }
 0x579   : > { %v10948_v51 = vld [vmem:[#allocation10 + $0x274] sm:$0xf0]  ;;  %v8435_v35 = vld [vmem:[#allocation10 + $0x48] sm:$0xf] }
 0x57a   : > { %5143 = vmatpush.bf16.msrb.mxu2 %v9264_v33  ;;  %5156 = vmatpush.bf16.msrb.mxu0 %v9392_v2  ;;  %v11097_v33 = vld [vmem:[#allocation10 + $0x724] sm:$0xf]  ;;  %v9309_v2 = vld [vmem:[#allocation10 + $0x730] sm:$0xf0]  ;;  %v10880_v12 = vld [vmem:[#allocation10 + $0x54] sm:$0xf0] }
 0x57b   : > { %5169 = vmatpush.bf16.msra.mxu3 %v9520_v14  ;;  %5182 = vmatpush.bf16.msra.mxu1 %v9648_v4  ;;  %v11161_v14 = vld [vmem:[#allocation10 + $0x924] sm:$0xf]  ;;  %v9565_v4 = vld [vmem:[#allocation10 + $0x930] sm:$0xf0]  ;;  %v9312_v24 = vor.u32 %v11097_v33, %v9309_v2  ;;  %v8484_v33 = vor.u32 %v10892_v21, %v8483_v23  ;;  %v8691_v41 = vld [vmem:[#allocation10 + $0x248] sm:$0xf] }
 0x57c   : > { %v10944_v17 = vld [vmem:[#allocation10 + $0x254] sm:$0xf0]  ;;  %v8419_v27 = vld [vmem:[#allocation10 + $0x28] sm:$0xf] }
 0x57d   : > { %v10876_v28 = vld [vmem:[#allocation10 + $0x34] sm:$0xf0]  ;;  %v8675_v23 = vld [vmem:[#allocation10 + $0x228] sm:$0xf] }
 0x57e   : > { %5144 = vmatpush.bf16.msrb.mxu2 %v9248_v59  ;;  %5157 = vmatpush.bf16.msrb.mxu0 %v9376_v22  ;;  %v9440_v59 = vor.u32 %v11129_v3, %v9437_v40  ;;  %v9568_v22 = vor.u32 %v11161_v14, %v9565_v4  ;;  %v8467_v3 = vld [vmem:[#allocation10 + $0x88] sm:$0xf]  ;;  %v10888_v40 = vld [vmem:[#allocation10 + $0x94] sm:$0xf0]  ;;  %v8740_v14 = vor.u32 %v10956_v36, %v8739_v15 }
 0x57f   : > { %5170 = vmatpush.bf16.msra.mxu3 %v9504_v53  ;;  %5183 = vmatpush.bf16.msra.mxu1 %v9632_v11  ;;  %v11157_v53 = vld [vmem:[#allocation10 + $0x904] sm:$0xf]  ;;  %v9549_v11 = vld [vmem:[#allocation10 + $0x910] sm:$0xf0]  ;;  %v10940_v21 = vld [vmem:[#allocation10 + $0x234] sm:$0xf0] }
 0x580   : > { %v10872_v36 = vld [vmem:[#allocation10 + $0x14] sm:$0xf0] }
 0x582   : > { %5145 = vmatpush.bf16.msrb.mxu2 %v9232_v42  ;;  %5158 = vmatpush.bf16.msrb.mxu0 %v9360_v46  ;;  %v9296_v42 = vor.u32 %v11093_v10, %v9293_v7  ;;  %v10964_v46 = vld [vmem:[#allocation10 + $0x2f4] sm:$0xf0]  ;;  %v8851_v10 = vld [vmem:[#allocation10 + $0x388] sm:$0xf] }
 0x583   : > { %5171 = vmatpush.bf16.msra.mxu3 %v9488_v34  ;;  %5184 = vmatpush.bf16.msra.mxu1 %v9616_v0  ;;  %v9424_v34 = vor.u32 %v11125_v25, %v9421_v43  ;;  %v9552_v0 = vor.u32 %v11157_v53, %v9549_v11  ;;  %v8772_v1 = vor.u32 %v10964_v46, %v8771_v5  ;;  %v10984_v7 = vld [vmem:[#allocation10 + $0x394] sm:$0xf0]  ;;  %v8451_v25 = vld [vmem:[#allocation10 + $0x68] sm:$0xf] }
 0x584   : > { %v10884_v43 = vld [vmem:[#allocation10 + $0x74] sm:$0xf0]  ;;  %v8852_v11 = vor.u32 %v10984_v7, %v8851_v10  ;;  %v8835_v5 = vld [vmem:[#allocation10 + $0x368] sm:$0xf]  ;;  %v8580_v46 = vor.u32 %v10916_v13, %v8579_v39 }
 0x585   : > { %v9283_v10 = vld [vmem:[#allocation10 + $0x6e8] sm:$0xf] }
 0x586   : > { %5146 = vmatpush.bf16.msrb.mxu2 %v9216_v56  ;;  %5159 = vmatpush.bf16.msrb.mxu0 %v9344_v9  ;;  %v8627_v56 = vld [vmem:[#allocation10 + $0x1c8] sm:$0xf]  ;;  %v10928_v9 = vld [vmem:[#allocation10 + $0x1d4] sm:$0xf0] }
 0x587   : > { %5172 = vmatpush.bf16.msra.mxu3 %v9472_v19  ;;  %5185 = vmatpush.bf16.msra.mxu1 %v9600_v16  ;;  %v8883_v19 = vld [vmem:[#allocation10 + $0x3c8] sm:$0xf]  ;;  %v10992_v16 = vld [vmem:[#allocation10 + $0x3d4] sm:$0xf0]  ;;  %v8628_v55 = vor.u32 %v10928_v9, %v8627_v56  ;;  %v8436_v56 = vor.u32 %v10880_v12, %v8435_v35 }
 0x588   : > { %v8884_v38 = vor.u32 %v10992_v16, %v8883_v19  ;;  %v8692_v19 = vor.u32 %v10944_v17, %v8691_v41  ;;  %v9267_v35 = vld [vmem:[#allocation10 + $0x6c8] sm:$0xf]  ;;  %v11088_v12 = vld [vmem:[#allocation10 + $0x6d4] sm:$0xf0] }
 0x589   : > { %v8995_v41 = vld [vmem:[#allocation10 + $0x4a8] sm:$0xf]  ;;  %v11020_v17 = vld [vmem:[#allocation10 + $0x4b4] sm:$0xf0] }
 0x58a   : > { %5147 = vmatpush.bf16.msrb.mxu2 %v9200_v47  ;;  %5160 = vmatpush.bf16.msrb.mxu0 %v9328_v58  ;;  %v8611_v47 = vld [vmem:[#allocation10 + $0x1a8] sm:$0xf]  ;;  %v10924_v58 = vld [vmem:[#allocation10 + $0x1b4] sm:$0xf0] }
 0x58b   : > { %5173 = vmatpush.bf16.msra.mxu3 %v9456_v52  ;;  %5186 = vmatpush.bf16.msra.mxu1 %v9584_v6  ;;  %v8867_v52 = vld [vmem:[#allocation10 + $0x3a8] sm:$0xf]  ;;  %v10988_v6 = vld [vmem:[#allocation10 + $0x3b4] sm:$0xf0]  ;;  %v8612_v2 = vor.u32 %v10924_v58, %v8611_v47  ;;  %v8420_v58 = vor.u32 %v10876_v28, %v8419_v27 }
 0x58c   : > { %v8868_v4 = vor.u32 %v10988_v6, %v8867_v52  ;;  %v8403_v47 = vld [vmem:[#allocation10 + $0x8] sm:$0xf]  ;;  %v10904_v6 = vld [vmem:[#allocation10 + $0x114] sm:$0xf0] }
 0x58d   : > { %v8531_v52 = vld [vmem:[#allocation10 + $0x108] sm:$0xf]  ;;  %v8404_v7 = vor.u32 %v10872_v36, %v8403_v47  ;;  %v11084_v28 = vld [vmem:[#allocation10 + $0x6b4] sm:$0xf0] }
 0x58e   : > { %5148 = vmatpush.bf16.msrb.mxu2 %v9184_v32  ;;  %5161 = vmatpush.bf16.msrb.mxu0 %v9312_v24  ;;  %v10920_v32 = vld [vmem:[#allocation10 + $0x194] sm:$0xf0]  ;;  %v8723_v24 = vld [vmem:[#allocation10 + $0x288] sm:$0xf] }
 0x58f   : > { %5174 = vmatpush.bf16.msra.mxu3 %v9440_v59  ;;  %5187 = vmatpush.bf16.msra.mxu1 %v9568_v22  ;;  %v8468_v59 = vor.u32 %v10888_v40, %v8467_v3  ;;  %v8596_v22 = vor.u32 %v10920_v32, %v8595_v62  ;;  %v8724_v53 = vor.u32 %v10952_v30, %v8723_v24  ;;  %v8659_v3 = vld [vmem:[#allocation10 + $0x208] sm:$0xf]  ;;  %v10936_v40 = vld [vmem:[#allocation10 + $0x214] sm:$0xf0] }
 0x590   : > { %v9027_v62 = vld [vmem:[#allocation10 + $0x4e8] sm:$0xf]  ;;  %v11028_v32 = vld [vmem:[#allocation10 + $0x4f4] sm:$0xf0] }
 0x591   : > { %v9155_v24 = vld [vmem:[#allocation10 + $0x5e8] sm:$0xf]  ;;  %v11060_v30 = vld [vmem:[#allocation10 + $0x5f4] sm:$0xf0]  ;;  %v9028_v39 = vor.u32 %v11028_v32, %v9027_v62 }
 0x592   : > { %5149 = vmatpush.bf16.msrb.mxu2 %v9168_v57  ;;  %5162 = vmatpush.bf16.msrb.mxu0 %v9296_v42  ;;  %v10980_v57 = vld [vmem:[#allocation10 + $0x374] sm:$0xf0]  ;;  %v8452_v42 = vor.u32 %v10884_v43, %v8451_v25  ;;  %v9411_v25 = vld [vmem:[#allocation10 + $0x7e8] sm:$0xf]  ;;  %v9156_v13 = vor.u32 %v11060_v30, %v9155_v24 }
 0x593   : > { %5175 = vmatpush.bf16.msra.mxu3 %v9424_v34  ;;  %5188 = vmatpush.bf16.msra.mxu1 %v9552_v0  ;;  %v8708_v34 = vor.u32 %v10948_v51, %v8707_v20  ;;  %v8836_v0 = vor.u32 %v10980_v57, %v8835_v5  ;;  %v11124_v43 = vld [vmem:[#allocation10 + $0x7f4] sm:$0xf0]  ;;  %v9011_v20 = vld [vmem:[#allocation10 + $0x4c8] sm:$0xf] }
 0x594   : > { %v11024_v51 = vld [vmem:[#allocation10 + $0x4d4] sm:$0xf0]  ;;  %v9412_v57 = vor.u32 %v11124_v43, %v9411_v25  ;;  %v9251_v27 = vld [vmem:[#allocation10 + $0x6a8] sm:$0xf] }
 0x595   : > { %5150 = vmatmul.bf16.vlgmr.msrb.gmra.mxu2 %v13655_v29  ;;  %5163 = vmatmul.bf16.vlgmr.msrb.gmra.mxu0 %v13657_v37  ;;  %v11016_v47 = vld [vmem:[#allocation10 + $0x494] sm:$0xf0]  ;;  %v8963_v62 = vld [vmem:[#allocation10 + $0x468] sm:$0xf] }
 0x596   : > { %5194 = vmatpush.bf16.msra.mxu2 %v8516_v54  ;;  %5207 = vmatpush.bf16.msra.mxu0 %v8644_v48  ;;  %v8563_v54 = vld [vmem:[#allocation10 + $0x148] sm:$0xf]  ;;  %v10912_v48 = vld [vmem:[#allocation10 + $0x154] sm:$0xf0] }
 0x597   : > { %5220 = vmatpush.bf16.msrb.mxu3 %v8772_v1  ;;  %5233 = vmatpush.bf16.msrb.mxu1 %v8900_v61  ;;  %v8819_v1 = vld [vmem:[#allocation10 + $0x348] sm:$0xf]  ;;  %v10976_v61 = vld [vmem:[#allocation10 + $0x354] sm:$0xf0]  ;;  %v8564_v9 = vor.u32 %v10912_v48, %v8563_v54  ;;  %v9012_v54 = vor.u32 %v11024_v51, %v9011_v20 }
 0x598   : > { %5176 = vmatmul.bf16.vlgmr.msra.gmra.mxu3 %v13663_v60  ;;  %5189 = vmatmul.bf16.vlgmr.msra.gmra.mxu1 %v13665_v26  ;;  %v8820_v16 = vor.u32 %v10976_v61, %v8819_v1  ;;  %v9268_v1 = vor.u32 %v11088_v12, %v9267_v35  ;;  %v11012_v32 = vld [vmem:[#allocation10 + $0x474] sm:$0xf0] }
 0x599   : > { %v8964_v51 = vor.u32 %v11012_v32, %v8963_v62  ;;  %v9171_v32 = vld [vmem:[#allocation10 + $0x608] sm:$0xf] }
 0x59a   : > { %5195 = vmatpush.bf16.msra.mxu2 %v8500_v49  ;;  %5208 = vmatpush.bf16.msra.mxu0 %v8628_v55  ;;  %v8547_v49 = vld [vmem:[#allocation10 + $0x128] sm:$0xf]  ;;  %v10908_v55 = vld [vmem:[#allocation10 + $0x134] sm:$0xf0] }
 0x59b   : > { %5221 = vmatpush.bf16.msrb.mxu3 %v8756_v63  ;;  %5234 = vmatpush.bf16.msrb.mxu1 %v8884_v38  ;;  %v8803_v63 = vld [vmem:[#allocation10 + $0x328] sm:$0xf]  ;;  %v10972_v38 = vld [vmem:[#allocation10 + $0x334] sm:$0xf0]  ;;  %v8548_v15 = vor.u32 %v10908_v55, %v8547_v49 }
 0x59c   : > { %v13683_v55 = vld [vmem:[#allocation16] sm:$0xf] }
 0x59e   : > { %5196 = vmatpush.bf16.msra.mxu2 %v8484_v33  ;;  %5209 = vmatpush.bf16.msra.mxu0 %v8612_v2  ;;  %v8676_v33 = vor.u32 %v10940_v21, %v8675_v23  ;;  %v8804_v2 = vor.u32 %v10972_v38, %v8803_v63  ;;  %v8996_v23 = vor.u32 %v11020_v17, %v8995_v41  ;;  %v8979_v38 = vld [vmem:[#allocation10 + $0x488] sm:$0xf]  ;;  %v11072_v41 = vld [vmem:[#allocation10 + $0x654] sm:$0xf0] }
 0x59f   : > { %5222 = vmatpush.bf16.msrb.mxu3 %v8740_v14  ;;  %5235 = vmatpush.bf16.msrb.mxu1 %v8868_v4  ;;  %v8787_v14 = vld [vmem:[#allocation10 + $0x308] sm:$0xf]  ;;  %v10968_v4 = vld [vmem:[#allocation10 + $0x314] sm:$0xf0] }
 0x5a0   : > { %v9331_v17 = vld [vmem:[#allocation10 + $0x748] sm:$0xf] }
 0x5a2   : > { %5197 = vmatpush.bf16.msra.mxu2 %v8468_v59  ;;  %5210 = vmatpush.bf16.msra.mxu0 %v8596_v22  ;;  %v8532_v59 = vor.u32 %v10904_v6, %v8531_v52  ;;  %v11092_v22 = vld [vmem:[#allocation10 + $0x6f4] sm:$0xf0]  ;;  %v9235_v6 = vld [vmem:[#allocation10 + $0x688] sm:$0xf] }
 0x5a3   : > { %5223 = vmatpush.bf16.msrb.mxu3 %v8724_v53  ;;  %5236 = vmatpush.bf16.msrb.mxu1 %v8852_v11  ;;  %v8660_v53 = vor.u32 %v10936_v40, %v8659_v3  ;;  %v8788_v11 = vor.u32 %v10968_v4, %v8787_v14  ;;  %v9284_v5 = vor.u32 %v11092_v22, %v9283_v10  ;;  %v11048_v52 = vld [vmem:[#allocation10 + $0x594] sm:$0xf0]  ;;  %v3326_v40 = vperm.slane %v13683_v55, 0  ;;  %v9219_v22 = vld [vmem:[#allocation10 + $0x668] sm:$0xf] }
 0x5a4   : > { %v11112_v3 = vld [vmem:[#allocation10 + $0x794] sm:$0xf0]  ;;  %v8980_v14 = vor.u32 %v11016_v47, %v8979_v38  ;;  %v9187_v38 = vld [vmem:[#allocation10 + $0x628] sm:$0xf] }
 0x5a6   : > { %5198 = vmatpush.bf16.msra.mxu2 %v8452_v42  ;;  %5211 = vmatpush.bf16.msra.mxu0 %v8580_v46  ;;  %v9139_v42 = vld [vmem:[#allocation10 + $0x5c8] sm:$0xf]  ;;  %v11056_v46 = vld [vmem:[#allocation10 + $0x5d4] sm:$0xf0] }
 0x5a7   : > { %5224 = vmatpush.bf16.msrb.mxu3 %v8708_v34  ;;  %5237 = vmatpush.bf16.msrb.mxu1 %v8836_v0  ;;  %v9395_v34 = vld [vmem:[#allocation10 + $0x7c8] sm:$0xf]  ;;  %v11120_v0 = vld [vmem:[#allocation10 + $0x7d4] sm:$0xf0]  ;;  %v9140_v48 = vor.u32 %v11056_v46, %v9139_v42 }
 0x5a8   : > { %v9396_v61 = vor.u32 %v11120_v0, %v9395_v34  ;;  %v8947_v42 = vld [vmem:[#allocation10 + $0x448] sm:$0xf]  ;;  %v11008_v46 = vld [vmem:[#allocation10 + $0x454] sm:$0xf0] }
 0x5a9   : > { %v9075_v34 = vld [vmem:[#allocation10 + $0x548] sm:$0xf]  ;;  %v11040_v0 = vld [vmem:[#allocation10 + $0x554] sm:$0xf0] }
 0x5aa   : > { %5199 = vmatpush.bf16.msra.mxu2 %v8436_v56  ;;  %5212 = vmatpush.bf16.msra.mxu0 %v8564_v9  ;;  %v9123_v56 = vld [vmem:[#allocation10 + $0x5a8] sm:$0xf]  ;;  %v11052_v9 = vld [vmem:[#allocation10 + $0x5b4] sm:$0xf0] }
 0x5ab   : > { %5225 = vmatpush.bf16.msrb.mxu3 %v8692_v19  ;;  %5238 = vmatpush.bf16.msrb.mxu1 %v8820_v16  ;;  %v9379_v19 = vld [vmem:[#allocation10 + $0x7a8] sm:$0xf]  ;;  %v11116_v16 = vld [vmem:[#allocation10 + $0x7b4] sm:$0xf0]  ;;  %v9124_v21 = vor.u32 %v11052_v9, %v9123_v56  ;;  %v9076_v56 = vor.u32 %v11040_v0, %v9075_v34 }
 0x5ac   : > { %v9380_v36 = vor.u32 %v11116_v16, %v9379_v19  ;;  %v8931_v9 = vld [vmem:[#allocation10 + $0x428] sm:$0xf]  ;;  %v11152_v0 = vld [vmem:[#allocation10 + $0x8d4] sm:$0xf0] }
 0x5ad   : > { %v9523_v34 = vld [vmem:[#allocation10 + $0x8c8] sm:$0xf] }
 0x5ae   : > { %5200 = vmatpush.bf16.msra.mxu2 %v8420_v58  ;;  %5213 = vmatpush.bf16.msra.mxu0 %v8548_v15  ;;  %v9107_v58 = vld [vmem:[#allocation10 + $0x588] sm:$0xf]  ;;  %v9252_v15 = vor.u32 %v11084_v28, %v9251_v27  ;;  %v11004_v27 = vld [vmem:[#allocation10 + $0x434] sm:$0xf0] }
 0x5af   : > { %5226 = vmatpush.bf16.msrb.mxu3 %v8676_v33  ;;  %5239 = vmatpush.bf16.msrb.mxu1 %v8804_v2  ;;  %v11080_v33 = vld [vmem:[#allocation10 + $0x694] sm:$0xf0]  ;;  %v9363_v2 = vld [vmem:[#allocation10 + $0x788] sm:$0xf]  ;;  %v9108_v4 = vor.u32 %v11048_v52, %v9107_v58 }
 0x5b0   : > { %v9236_v24 = vor.u32 %v11080_v33, %v9235_v6  ;;  %v9364_v30 = vor.u32 %v11112_v3, %v9363_v2  ;;  %v11068_v58 = vld [vmem:[#allocation10 + $0x634] sm:$0xf0]  ;;  %v8915_v6 = vld [vmem:[#allocation10 + $0x408] sm:$0xf]  ;;  %v8932_v33 = vor.u32 %v11004_v27, %v8931_v9  ;;  %v8501_v27 = vld [vmem:[#allocation10 + $0xd8] sm:$0xf0] }
 0x5b1   : > { %v4956_v49 = vpop.f32.mrf.mxu0 }
 0x5b2   : > { %5201 = vmatpush.bf16.msra.mxu2 %v8404_v7  ;;  %5214 = vmatpush.bf16.msra.mxu0 %v8532_v59  ;;  %v4982_v63 = vpop.f32.mrf.mxu1  ;;  %v9091_v7 = vld [vmem:[#allocation10 + $0x568] sm:$0xf]  ;;  %v11044_v59 = vld [vmem:[#allocation10 + $0x574] sm:$0xf0] }
 0x5b3   : > { %5227 = vmatpush.bf16.msrb.mxu3 %v8660_v53  ;;  %5240 = vmatpush.bf16.msrb.mxu1 %v8788_v11  ;;  %v11076_v53 = vld [vmem:[#allocation10 + $0x674] sm:$0xf0]  ;;  %v9347_v11 = vld [vmem:[#allocation10 + $0x768] sm:$0xf] }
 0x5b4   : > { %v9220_v35 = vor.u32 %v11076_v53, %v9219_v22  ;;  %v9667_v22 = vld [vmem:[#allocation10 + $0x9e8] sm:$0xf] }
 0x5b5   : > { %5202 = vmatmul.bf16.vlgmr.msra.gmra.mxu2 %v13636_v50  ;;  %5215 = vmatmul.bf16.vlgmr.msra.gmra.mxu0 %v13638_v44 }
 0x5b6   : > { %5246 = vmatpush.bf16.msrb.mxu2 %v9028_v39  ;;  %5259 = vmatpush.bf16.msrb.mxu0 %v9156_v13  ;;  %v11108_v39 = vld [vmem:[#allocation10 + $0x774] sm:$0xf0] }
 0x5b7   : > { %5272 = vmatpush.bf16.msra.mxu3 %v9284_v5  ;;  %5285 = vmatpush.bf16.msra.mxu1 %v9412_v57  ;;  %v4943_v10 = vpop.f32.mrf.mxu2  ;;  %v9092_v5 = vor.u32 %v11044_v59, %v9091_v7  ;;  %v9348_v12 = vor.u32 %v11108_v39, %v9347_v11  ;;  %v9539_v7 = vld [vmem:[#allocation10 + $0x8e8] sm:$0xf]  ;;  %v11156_v59 = vld [vmem:[#allocation10 + $0x8f4] sm:$0xf0]  ;;  %v8517_v39 = vld [vmem:[#allocation10 + $0xf8] sm:$0xf0] }
 0x5b8   : > { %5228 = vmatmul.bf16.vlgmr.msrb.gmra.mxu3 %v13640_v8  ;;  %5241 = vmatmul.bf16.vlgmr.msrb.gmra.mxu1 %v13642_v18  ;;  %v4944_v25 = vadd.f32 %v4943_v10, %v3326_v40  ;;  %v4969_v43 = vpop.f32.mrf.mxu3  ;;  %v9043_v40 = vld [vmem:[#allocation10 + $0x508] sm:$0xf]  ;;  %v11096_v10 = vld [vmem:[#allocation10 + $0x714] sm:$0xf0] }
 0x5b9   : > { %v4958_v13 = vpop.f32.mrf.mxu0 }
 0x5ba   : > { %5247 = vmatpush.bf16.msrb.mxu2 %v9012_v54  ;;  %5260 = vmatpush.bf16.msrb.mxu0 %v9140_v48  ;;  %v4957_v20 = vadd.f32 %v4956_v49, %v4944_v25  ;;  %v4984_v57 = vpop.f32.mrf.mxu1  ;;  %v9203_v54 = vld [vmem:[#allocation10 + $0x648] sm:$0xf]  ;;  %v11188_v25 = vld [vmem:[#allocation10 + $0x9f4] sm:$0xf0]  ;;  %v10930_v13 = vld [vmem:[#allocation10 + $0x1ec] sm:$0xf] }
 0x5bb   : > { %5273 = vmatpush.bf16.msra.mxu3 %v9268_v1  ;;  %5286 = vmatpush.bf16.msra.mxu1 %v9396_v61  ;;  %v11104_v1 = vld [vmem:[#allocation10 + $0x754] sm:$0xf0]  ;;  %v8948_v61 = vor.u32 %v11008_v46, %v8947_v42  ;;  %v9204_v19 = vor.u32 %v11072_v41, %v9203_v54  ;;  %v9540_v42 = vor.u32 %v11156_v59, %v9539_v7  ;;  %v9619_v7 = vld [vmem:[#allocation10 + $0x988] sm:$0xf] }
 0x5bc   : > { %v4970_v48 = vadd.f32 %v4969_v43, %v4957_v20  ;;  %v9332_v16 = vor.u32 %v11104_v1, %v9331_v17  ;;  %v10898_v43 = vld [vmem:[#allocation10 + $0xec] sm:$0xf]  ;;  %v8645_v20 = vld [vmem:[#allocation10 + $0x1f8] sm:$0xf0]  ;;  %v9668_v46 = vor.u32 %v11188_v25, %v9667_v22  ;;  %v9651_v17 = vld [vmem:[#allocation10 + $0x9c8] sm:$0xf] }
 0x5bd   : > { %v8520_v54 = vor.u32 %v10898_v43, %v8517_v39  ;;  %v11184_v1 = vld [vmem:[#allocation10 + $0x9d4] sm:$0xf0]  ;;  %v10886_v22 = vld [vmem:[#allocation10 + $0x8c] sm:$0xf]  ;;  %v8597_v43 = vld [vmem:[#allocation10 + $0x198] sm:$0xf0] }
 0x5be   : > { %5248 = vmatpush.bf16.msrb.mxu2 %v8996_v23  ;;  %5261 = vmatpush.bf16.msrb.mxu0 %v9124_v21  ;;  %v4983_v28 = vadd.f32 %v4982_v63, %v4970_v48  ;;  %v9059_v23 = vld [vmem:[#allocation10 + $0x528] sm:$0xf]  ;;  %v11036_v21 = vld [vmem:[#allocation10 + $0x534] sm:$0xf0]  ;;  %v8648_v48 = vor.u32 %v10930_v13, %v8645_v20  ;;  %v10918_v25 = vld [vmem:[#allocation10 + $0x18c] sm:$0xf] }
 0x5bf   : > { %5274 = vmatpush.bf16.msra.mxu3 %v9252_v15  ;;  %5287 = vmatpush.bf16.msra.mxu1 %v9380_v36  ;;  %v4945_v49 = vpop.f32.mrf.mxu2  ;;  %v9315_v15 = vld [vmem:[#allocation10 + $0x728] sm:$0xf]  ;;  %v11100_v36 = vld [vmem:[#allocation10 + $0x734] sm:$0xf0]  ;;  %v9060_v2 = vor.u32 %v11036_v21, %v9059_v23  ;;  %v9652_v23 = vor.u32 %v11184_v1, %v9651_v17 }
 0x5c0   : > { %v4971_v47 = vpop.f32.mrf.mxu3  ;;  %v11000_v63 = vld [vmem:[#allocation10 + $0x414] sm:$0xf0]  ;;  %v9316_v62 = vor.u32 %v11100_v36, %v9315_v15  ;;  %v9524_v49 = vor.u32 %v11152_v0, %v9523_v34  ;;  %v9507_v21 = vld [vmem:[#allocation10 + $0x8a8] sm:$0xf]  ;;  %v10914_v34 = vld [vmem:[#allocation10 + $0x16c] sm:$0xf] }
 0x5c1   : > { %v5008_v52 = vpop.f32.mrf.mxu0  ;;  %v8916_v53 = vor.u32 %v11000_v63, %v8915_v6  ;;  %v9635_v15 = vld [vmem:[#allocation10 + $0x9a8] sm:$0xf]  ;;  %v11180_v36 = vld [vmem:[#allocation10 + $0x9b4] sm:$0xf0]  ;;  %v8485_v6 = vld [vmem:[#allocation10 + $0xb8] sm:$0xf0] }
 0x5c2   : > { %5249 = vmatpush.bf16.msrb.mxu2 %v8980_v14  ;;  %5262 = vmatpush.bf16.msrb.mxu0 %v9108_v4  ;;  %v13686_v3 = vpop.f32.mrf.mxu1  ;;  %v11032_v14 = vld [vmem:[#allocation10 + $0x514] sm:$0xf0]  ;;  %v9188_v4 = vor.u32 %v11068_v58, %v9187_v38  ;;  %v9475_v20 = vld [vmem:[#allocation10 + $0x868] sm:$0xf]  ;;  %v8581_v0 = vld [vmem:[#allocation10 + $0x178] sm:$0xf0] }
 0x5c3   : > { %5275 = vmatpush.bf16.msra.mxu3 %v9236_v24  ;;  %5288 = vmatpush.bf16.msra.mxu1 %v9364_v30  ;;  %v11064_v24 = vld [vmem:[#allocation10 + $0x614] sm:$0xf0]  ;;  %v9299_v30 = vld [vmem:[#allocation10 + $0x708] sm:$0xf]  ;;  %v9044_v11 = vor.u32 %v11032_v14, %v9043_v40 }
 0x5c4   : > { %v11148_v38 = vld [vmem:[#allocation10 + $0x8b4] sm:$0xf0]  ;;  %v9459_v17 = vld [vmem:[#allocation10 + $0x848] sm:$0xf] }
 0x5c5   : > { %v9508_v14 = vor.u32 %v11148_v38, %v9507_v21  ;;  %v11176_v59 = vld [vmem:[#allocation10 + $0x994] sm:$0xf0]  ;;  %v10910_v21 = vld [vmem:[#allocation10 + $0x14c] sm:$0xf]  ;;  %v8565_v38 = vld [vmem:[#allocation10 + $0x158] sm:$0xf0] }
 0x5c6   : > { %5250 = vmatpush.bf16.msrb.mxu2 %v8964_v51  ;;  %5263 = vmatpush.bf16.msrb.mxu0 %v9092_v5  ;;  %v9172_v51 = vor.u32 %v11064_v24, %v9171_v32  ;;  %v9300_v5 = vor.u32 %v11096_v10, %v9299_v30  ;;  %v9491_v32 = vld [vmem:[#allocation10 + $0x888] sm:$0xf]  ;;  %v11144_v24 = vld [vmem:[#allocation10 + $0x894] sm:$0xf0]  ;;  %v9620_v13 = vor.u32 %v11176_v59, %v9619_v7 }
 0x5c7   : > { %5276 = vmatpush.bf16.msra.mxu3 %v9220_v35  ;;  %5289 = vmatpush.bf16.msra.mxu1 %v9348_v12  ;;  %v4995_v57 = vpop.f32.mrf.mxu2  ;;  %v9492_v39 = vor.u32 %v11144_v24, %v9491_v32  ;;  %v11136_v1 = vld [vmem:[#allocation10 + $0x854] sm:$0xf0]  ;;  %v8421_v32 = vld [vmem:[#allocation10 + $0x38] sm:$0xf0]  ;;  %v10906_v24 = vld [vmem:[#allocation10 + $0x12c] sm:$0xf] }
 0x5c8   : > { %v4996_v35 = vadd.f32 %v4995_v57, %v4983_v28  ;;  %v5021_v12 = vpop.f32.mrf.mxu3  ;;  %v8600_v57 = vor.u32 %v10918_v25, %v8597_v43  ;;  %v11160_v25 = vld [vmem:[#allocation10 + $0x914] sm:$0xf0] }
 0x5c9   : > { %v5010_v41 = vpop.f32.mrf.mxu0 }
 0x5ca   : > { %5251 = vmatpush.bf16.msrb.mxu2 %v8948_v61  ;;  %5264 = vmatpush.bf16.msrb.mxu0 %v9076_v56  ;;  %v10894_v61 = vld [vmem:[#allocation10 + $0xcc] sm:$0xf]  ;;  %v5009_v56 = vadd.f32 %v5008_v52, %v4996_v35  ;;  %v5036_v9 = vpop.f32.mrf.mxu1 }
 0x5cb   : > { %5277 = vmatpush.bf16.msra.mxu3 %v9204_v19  ;;  %5290 = vmatpush.bf16.msra.mxu1 %v9332_v16  ;;  %v10926_v19 = vld [vmem:[#allocation10 + $0x1cc] sm:$0xf]  ;;  %v8629_v16 = vld [vmem:[#allocation10 + $0x1d8] sm:$0xf0]  ;;  %v8504_v47 = vor.u32 %v10894_v61, %v8501_v27  ;;  %v9587_v27 = vld [vmem:[#allocation10 + $0x948] sm:$0xf] }
 0x5cc   : > { %v5022_v28 = vadd.f32 %v5021_v12, %v5009_v56  ;;  %v8632_v58 = vor.u32 %v10926_v19, %v8629_v16  ;;  %v10890_v52 = vld [vmem:[#allocation10 + $0xac] sm:$0xf]  ;;  %v8453_v12 = vld [vmem:[#allocation10 + $0x78] sm:$0xf0]  ;;  %v8584_v56 = vor.u32 %v10914_v34, %v8581_v0  ;;  %v11168_v19 = vld [vmem:[#allocation10 + $0x954] sm:$0xf0] }
 0x5cd   : > { %v8488_v30 = vor.u32 %v10890_v52, %v8485_v6  ;;  %v10882_v35 = vld [vmem:[#allocation10 + $0x6c] sm:$0xf]  ;;  %v9588_v52 = vor.u32 %v11168_v19, %v9587_v27  ;;  %v9443_v6 = vld [vmem:[#allocation10 + $0x828] sm:$0xf]  ;;  %v8757_v27 = vld [vmem:[#allocation10 + $0x2d8] sm:$0xf0] }
 0x5ce   : > { %5252 = vmatpush.bf16.msrb.mxu2 %v8932_v33  ;;  %5265 = vmatpush.bf16.msrb.mxu0 %v9060_v2  ;;  %v10922_v33 = vld [vmem:[#allocation10 + $0x1ac] sm:$0xf]  ;;  %v8613_v2 = vld [vmem:[#allocation10 + $0x1b8] sm:$0xf0]  ;;  %v5035_v63 = vadd.f32 %v13686_v3, %v5022_v28  ;;  %v8456_v61 = vor.u32 %v10882_v35, %v8453_v12 }
 0x5cf   : > { %5278 = vmatpush.bf16.msra.mxu3 %v9188_v4  ;;  %5291 = vmatpush.bf16.msra.mxu1 %v9316_v62  ;;  %v4997_v40 = vpop.f32.mrf.mxu2  ;;  %v9636_v4 = vor.u32 %v11180_v36, %v9635_v15  ;;  %v8616_v10 = vor.u32 %v10922_v33, %v8613_v2  ;;  %v8469_v3 = vld [vmem:[#allocation10 + $0x98] sm:$0xf0]  ;;  %v10878_v16 = vld [vmem:[#allocation10 + $0x4c] sm:$0xf]  ;;  %v9460_v36 = vor.u32 %v11136_v1, %v9459_v17  ;;  %v11132_v33 = vld [vmem:[#allocation10 + $0x834] sm:$0xf0] }
 0x5d0   : > { %v5023_v62 = vpop.f32.mrf.mxu3  ;;  %v8568_v40 = vor.u32 %v10910_v21, %v8565_v38  ;;  %v9444_v7 = vor.u32 %v11132_v33, %v9443_v6  ;;  %v8901_v35 = vld [vmem:[#allocation10 + $0x3f8] sm:$0xf0]  ;;  %v11026_v12 = vld [vmem:[#allocation10 + $0x4ec] sm:$0xf] }
 0x5d1   : > { %v9013_v21 = vld [vmem:[#allocation10 + $0x4d8] sm:$0xf0]  ;;  %v11054_v38 = vld [vmem:[#allocation10 + $0x5cc] sm:$0xf] }
 0x5d2   : > { %5253 = vmatpush.bf16.msrb.mxu2 %v8916_v53  ;;  %5266 = vmatpush.bf16.msrb.mxu0 %v9044_v11  ;;  %v5060_v53 = vpop.f32.mrf.mxu0 }
 0x5d3   : > { %5279 = vmatpush.bf16.msra.mxu3 %v9172_v51  ;;  %5292 = vmatpush.bf16.msra.mxu1 %v9300_v5  ;;  %v11140_v51 = vld [vmem:[#allocation10 + $0x874] sm:$0xf0]  ;;  %v8472_v5 = vor.u32 %v10886_v22, %v8469_v3  ;;  %v9555_v3 = vld [vmem:[#allocation10 + $0x908] sm:$0xf] }
 0x5d4   : > { %v11128_v22 = vld [vmem:[#allocation10 + $0x814] sm:$0xf0]  ;;  %v9556_v0 = vor.u32 %v11160_v25, %v9555_v3  ;;  %v10982_v3 = vld [vmem:[#allocation10 + $0x38c] sm:$0xf]  ;;  %v8853_v25 = vld [vmem:[#allocation10 + $0x398] sm:$0xf0] }
 0x5d5   : > { %5254 = vmatmul.bf16.vlgmr.msrb.gmra.mxu2 %v13651_v45  ;;  %5267 = vmatmul.bf16.vlgmr.msrb.gmra.mxu0 %v13653_v31  ;;  %v5086_v11 = vpop.f32.mrf.mxu1 }
 0x5d6   : > { %5298 = vmatpush.bf16.msra.mxu2 %v9540_v42  ;;  %5311 = vmatpush.bf16.msra.mxu0 %v9668_v46  ;;  %v9603_v42 = vld [vmem:[#allocation10 + $0x968] sm:$0xf]  ;;  %v11172_v46 = vld [vmem:[#allocation10 + $0x974] sm:$0xf0] }
 0x5d7   : > { %5324 = vmatpush.bf16.msrb.mxu3 %v8520_v54  ;;  %5337 = vmatpush.bf16.msrb.mxu1 %v8648_v48  ;;  %v3327_v54 = vperm.slane %v13683_v55, 1  ;;  %v9476_v48 = vor.u32 %v11140_v51, %v9475_v20  ;;  %v9604_v41 = vor.u32 %v11172_v46, %v9603_v42  ;;  %v8405_v20 = vld [vmem:[#allocation10 + $0x18] sm:$0xf0]  ;;  %v10994_v46 = vld [vmem:[#allocation10 + $0x3ec] sm:$0xf] }
 0x5d8   : > { %5280 = vmatmul.bf16.vlgmr.msra.gmra.mxu3 %v13655_v29  ;;  %5293 = vmatmul.bf16.vlgmr.msra.gmra.mxu1 %v13657_v37  ;;  %v5047_v9 = vpop.f32.mrf.mxu2  ;;  %v8773_v42 = vld [vmem:[#allocation10 + $0x2f8] sm:$0xf0] }
 0x5d9   : > { %v5048_v28 = vadd.f32 %v5047_v9, %v5035_v63  ;;  %v9571_v63 = vld [vmem:[#allocation10 + $0x928] sm:$0xf]  ;;  %v10958_v9 = vld [vmem:[#allocation10 + $0x2cc] sm:$0xf] }
 0x5da   : > { %5299 = vmatpush.bf16.msra.mxu2 %v9524_v49  ;;  %5312 = vmatpush.bf16.msra.mxu0 %v9652_v23  ;;  %v8437_v23 = vld [vmem:[#allocation10 + $0x58] sm:$0xf0] }
 0x5db   : > { %5325 = vmatpush.bf16.msrb.mxu3 %v8504_v47  ;;  %5338 = vmatpush.bf16.msrb.mxu1 %v8632_v58  ;;  %v5073_v49 = vpop.f32.mrf.mxu3  ;;  %v5062_v47 = vpop.f32.mrf.mxu0  ;;  %v13694_v58 = vadd.f32 %v5060_v53, %v5048_v28  ;;  %v8440_v2 = vor.u32 %v10878_v16, %v8437_v23  ;;  %v10990_v28 = vld [vmem:[#allocation10 + $0x3cc] sm:$0xf] }
 0x5dc   : > { %v5074_v55 = vadd.f32 %v5073_v49, %v3327_v54  ;;  %v9029_v54 = vld [vmem:[#allocation10 + $0x4f8] sm:$0xf0]  ;;  %v11022_v23 = vld [vmem:[#allocation10 + $0x4cc] sm:$0xf]  ;;  %v8760_v47 = vor.u32 %v10958_v9, %v8757_v27 }
 0x5dd   : > { %v5088_v15 = vpop.f32.mrf.mxu1  ;;  %v9032_v19 = vor.u32 %v11026_v12, %v9029_v54  ;;  %v8885_v49 = vld [vmem:[#allocation10 + $0x3d8] sm:$0xf0]  ;;  %v9016_v6 = vor.u32 %v11022_v23, %v9013_v21  ;;  %v11010_v12 = vld [vmem:[#allocation10 + $0x46c] sm:$0xf]  ;;  %vm5454_vm13 = vcmp.ge.f32.partialorder %v13694_v58, 0.0 }
 0x5de   : > { %5300 = vmatpush.bf16.msra.mxu2 %v9508_v14  ;;  %5313 = vmatpush.bf16.msra.mxu0 %v9636_v4  ;;  %v11164_v14 = vld [vmem:[#allocation10 + $0x934] sm:$0xf0]  ;;  %v10874_v4 = vld [vmem:[#allocation10 + $0x2c] sm:$0xf]  ;;  %v13696_v62 = vadd.f32 %v5086_v11, %v5074_v55  ;;  %v9141_v55 = vld [vmem:[#allocation10 + $0x5d8] sm:$0xf0]  ;;  %v8888_v15 = vor.u32 %v10990_v28, %v8885_v49 }
 0x5df   : > { %5326 = vmatpush.bf16.msrb.mxu3 %v8488_v30  ;;  %5339 = vmatpush.bf16.msrb.mxu1 %v8616_v10  ;;  %v8549_v30 = vld [vmem:[#allocation10 + $0x138] sm:$0xf0]  ;;  %v9427_v10 = vld [vmem:[#allocation10 + $0x808] sm:$0xf]  ;;  %v9572_v59 = vor.u32 %v11164_v14, %v9571_v63  ;;  %v8424_v43 = vor.u32 %v10874_v4, %v8421_v32  ;;  %v10902_v11 = vld [vmem:[#allocation10 + $0x10c] sm:$0xf]  ;;  %v9144_v33 = vor.u32 %v11054_v38, %v9141_v55 }
 0x5e0   : > { %v8552_v53 = vor.u32 %v10906_v24, %v8549_v30  ;;  %v9428_v34 = vor.u32 %v11128_v22, %v9427_v10  ;;  %v11018_v63 = vld [vmem:[#allocation10 + $0x4ac] sm:$0xf]  ;;  %v8997_v14 = vld [vmem:[#allocation10 + $0x4b8] sm:$0xf0] }
 0x5e1   : > { %v11050_v4 = vld [vmem:[#allocation10 + $0x5ac] sm:$0xf]  ;;  %v9125_v32 = vld [vmem:[#allocation10 + $0x5b8] sm:$0xf0] }
 0x5e2   : > { %5301 = vmatpush.bf16.msra.mxu2 %v9492_v39  ;;  %5314 = vmatpush.bf16.msra.mxu0 %v9620_v13  ;;  %v5049_v39 = vpop.f32.mrf.mxu2  ;;  %v10870_v13 = vld [vmem:[#allocation10 + $0xc] sm:$0xf]  ;;  %v9128_v22 = vor.u32 %v11050_v4, %v9125_v32  ;;  %v9093_v54 = vld [vmem:[#allocation10 + $0x578] sm:$0xf0] }
 0x5e3   : > { %5327 = vmatpush.bf16.msrb.mxu3 %v8472_v5  ;;  %5340 = vmatpush.bf16.msrb.mxu1 %v8600_v57  ;;  %v5075_v51 = vpop.f32.mrf.mxu3  ;;  %v8533_v5 = vld [vmem:[#allocation10 + $0x118] sm:$0xf0]  ;;  %v10962_v57 = vld [vmem:[#allocation10 + $0x2ec] sm:$0xf]  ;;  %v8408_v17 = vor.u32 %v10870_v13, %v8405_v20 }
 0x5e4   : > { %v8536_v1 = vor.u32 %v10902_v11, %v8533_v5  ;;  %v10950_v10 = vld [vmem:[#allocation10 + $0x28c] sm:$0xf]  ;;  %v9109_v13 = vld [vmem:[#allocation10 + $0x598] sm:$0xf0]  ;;  %v8856_v11 = vor.u32 %v10982_v3, %v8853_v25 }
 0x5e5   : > { %v11046_v39 = vld [vmem:[#allocation10 + $0x58c] sm:$0xf]  ;;  %v8709_v5 = vld [vmem:[#allocation10 + $0x278] sm:$0xf0] }
 0x5e6   : > { %5302 = vmatpush.bf16.msra.mxu2 %v9476_v48  ;;  %5315 = vmatpush.bf16.msra.mxu0 %v9604_v41  ;;  %v11058_v48 = vld [vmem:[#allocation10 + $0x5ec] sm:$0xf]  ;;  %v9157_v41 = vld [vmem:[#allocation10 + $0x5f8] sm:$0xf0] }
 0x5e7   : > { %5328 = vmatpush.bf16.msrb.mxu3 %v8456_v61  ;;  %5341 = vmatpush.bf16.msrb.mxu1 %v8584_v56  ;;  %v8776_v61 = vor.u32 %v10962_v57, %v8773_v42  ;;  %v8904_v56 = vor.u32 %v10994_v46, %v8901_v35  ;;  %v9160_v16 = vor.u32 %v11058_v48, %v9157_v41  ;;  %v10946_v51 = vld [vmem:[#allocation10 + $0x26c] sm:$0xf]  ;;  %v8837_v35 = vld [vmem:[#allocation10 + $0x378] sm:$0xf0] }
 0x5e8   : > { %v9112_v42 = vor.u32 %v11046_v39, %v9109_v13  ;;  %v10978_v46 = vld [vmem:[#allocation10 + $0x36c] sm:$0xf]  ;;  %v8712_v48 = vor.u32 %v10946_v51, %v8709_v5  ;;  %v8949_v23 = vld [vmem:[#allocation10 + $0x458] sm:$0xf0] }
 0x5e9   : > { %v8840_v41 = vor.u32 %v10978_v46, %v8837_v35  ;;  %v10974_v27 = vld [vmem:[#allocation10 + $0x34c] sm:$0xf]  ;;  %v9077_v38 = vld [vmem:[#allocation10 + $0x558] sm:$0xf0] }
 0x5ea   : > { %5303 = vmatpush.bf16.msra.mxu2 %v9460_v36  ;;  %5316 = vmatpush.bf16.msra.mxu0 %v9588_v52  ;;  %v10954_v36 = vld [vmem:[#allocation10 + $0x2ac] sm:$0xf]  ;;  %v8741_v52 = vld [vmem:[#allocation10 + $0x2b8] sm:$0xf0] }
 0x5eb   : > { %5329 = vmatpush.bf16.msrb.mxu3 %v8440_v2  ;;  %5342 = vmatpush.bf16.msrb.mxu1 %v8568_v40  ;;  %v10986_v2 = vld [vmem:[#allocation10 + $0x3ac] sm:$0xf]  ;;  %v8869_v40 = vld [vmem:[#allocation10 + $0x3b8] sm:$0xf0]  ;;  %v8744_v24 = vor.u32 %v10954_v36, %v8741_v52 }
 0x5ec   : > { %v8872_v30 = vor.u32 %v10986_v2, %v8869_v40  ;;  %v11038_v21 = vld [vmem:[#allocation10 + $0x54c] sm:$0xf]  ;;  %v8933_v32 = vld [vmem:[#allocation10 + $0x438] sm:$0xf0] }
 0x5ed   : > { %v9080_v40 = vor.u32 %v11038_v21, %v9077_v38  ;;  %v10966_v3 = vld [vmem:[#allocation10 + $0x30c] sm:$0xf]  ;;  %v8789_v25 = vld [vmem:[#allocation10 + $0x318] sm:$0xf0] }
 0x5ee   : > { %5304 = vmatpush.bf16.msra.mxu2 %v9444_v7  ;;  %5317 = vmatpush.bf16.msra.mxu0 %v9572_v59  ;;  %v8725_v7 = vld [vmem:[#allocation10 + $0x298] sm:$0xf0]  ;;  %v9000_v59 = vor.u32 %v11018_v63, %v8997_v14  ;;  %v10970_v63 = vld [vmem:[#allocation10 + $0x32c] sm:$0xf] }
 0x5ef   : > { %5330 = vmatpush.bf16.msrb.mxu3 %v8424_v43  ;;  %5343 = vmatpush.bf16.msrb.mxu1 %v8552_v53  ;;  %v11014_v43 = vld [vmem:[#allocation10 + $0x48c] sm:$0xf]  ;;  %v8981_v53 = vld [vmem:[#allocation10 + $0x498] sm:$0xf0] }
 0x5f0   : > { %v8984_v57 = vor.u32 %v11014_v43, %v8981_v53  ;;  %v8805_v14 = vld [vmem:[#allocation10 + $0x338] sm:$0xf0]  ;;  %v11122_v46 = vld [vmem:[#allocation10 + $0x7ec] sm:$0xf] }
 0x5f1   : > { %v9045_v5 = vld [vmem:[#allocation10 + $0x518] sm:$0xf0]  ;;  %v11182_v21 = vld [vmem:[#allocation10 + $0x9cc] sm:$0xf] }
 0x5f2   : > { %5305 = vmatpush.bf16.msra.mxu2 %v9428_v34  ;;  %5318 = vmatpush.bf16.msra.mxu0 %v9556_v0  ;;  %v5112_v20 = vpop.f32.mrf.mxu0  ;;  %v8965_v34 = vld [vmem:[#allocation10 + $0x478] sm:$0xf0]  ;;  %v11042_v0 = vld [vmem:[#allocation10 + $0x56c] sm:$0xf] }
 0x5f3   : > { %5331 = vmatpush.bf16.msrb.mxu3 %v8408_v17  ;;  %5344 = vmatpush.bf16.msrb.mxu1 %v8536_v1  ;;  %v10942_v17 = vld [vmem:[#allocation10 + $0x24c] sm:$0xf]  ;;  %v8693_v1 = vld [vmem:[#allocation10 + $0x258] sm:$0xf0] }
 0x5f4   : > { %v8696_v36 = vor.u32 %v10942_v17, %v8693_v1  ;;  %v9413_v35 = vld [vmem:[#allocation10 + $0x7f8] sm:$0xf0] }
 0x5f5   : > { %5306 = vmatmul.bf16.vlgmr.msra.gmra.mxu2 %v13663_v60  ;;  %5319 = vmatmul.bf16.vlgmr.msra.gmra.mxu0 %v13665_v26  ;;  %v9653_v38 = vld [vmem:[#allocation10 + $0x9d8] sm:$0xf0] }
 0x5f6   : > { %5350 = vmatpush.bf16.msrb.mxu2 %v8776_v61  ;;  %5363 = vmatpush.bf16.msrb.mxu0 %v8904_v56  ;;  %v8968_v61 = vor.u32 %v11010_v12, %v8965_v34  ;;  %v9096_v56 = vor.u32 %v11042_v0, %v9093_v54  ;;  %v11154_v12 = vld [vmem:[#allocation10 + $0x8ec] sm:$0xf]  ;;  %v9541_v0 = vld [vmem:[#allocation10 + $0x8f8] sm:$0xf0] }
 0x5f7   : > { %5376 = vmatpush.bf16.msra.mxu3 %v9032_v19  ;;  %5389 = vmatpush.bf16.msra.mxu1 %v9160_v16  ;;  %v8821_v19 = vld [vmem:[#allocation10 + $0x358] sm:$0xf0]  ;;  %v11006_v16 = vld [vmem:[#allocation10 + $0x44c] sm:$0xf] }
 0x5f8   : > { %5332 = vmatmul.bf16.vlgmr.msrb.gmra.mxu3 %v13636_v50  ;;  %5345 = vmatmul.bf16.vlgmr.msrb.gmra.mxu1 %v13638_v44  ;;  %v5138_v50 = vpop.f32.mrf.mxu1  ;;  %v8728_v44 = vor.u32 %v10950_v10, %v8725_v7  ;;  %v5099_v9 = vpop.f32.mrf.mxu2  ;;  %v8824_v52 = vor.u32 %v10974_v27, %v8821_v19  ;;  %v8952_v2 = vor.u32 %v11006_v16, %v8949_v23  ;;  %v10934_v10 = vld [vmem:[#allocation10 + $0x20c] sm:$0xf]  ;;  %v9525_v23 = vld [vmem:[#allocation10 + $0x8d8] sm:$0xf0] }
 0x5f9   : > { %v5100_v28 = vadd.f32 %v5099_v9, %v13696_v62  ;;  %v11002_v62 = vld [vmem:[#allocation10 + $0x42c] sm:$0xf]  ;;  %v9269_v9 = vld [vmem:[#allocation10 + $0x6d8] sm:$0xf0]  ;;  %v9544_v27 = vor.u32 %v11154_v12, %v9541_v0 }
 0x5fa   : > { %5351 = vmatpush.bf16.msrb.mxu2 %v8760_v47  ;;  %5364 = vmatpush.bf16.msrb.mxu0 %v8888_v15  ;;  %v5114_v55 = vpop.f32.mrf.mxu0  ;;  %v8936_v53 = vor.u32 %v11002_v62, %v8933_v32  ;;  %v11186_v54 = vld [vmem:[#allocation10 + $0x9ec] sm:$0xf]  ;;  %v9637_v62 = vld [vmem:[#allocation10 + $0x9b8] sm:$0xf0] }
 0x5fb   : > { %5377 = vmatpush.bf16.msra.mxu3 %v9016_v6  ;;  %5390 = vmatpush.bf16.msra.mxu1 %v9144_v33  ;;  %v5125_v49 = vpop.f32.mrf.mxu3  ;;  %v5113_v47 = vadd.f32 %v5112_v20, %v5100_v28  ;;  %v10938_v6 = vld [vmem:[#allocation10 + $0x22c] sm:$0xf]  ;;  %v8677_v33 = vld [vmem:[#allocation10 + $0x238] sm:$0xf0] }
 0x5fc   : > { %v8680_v7 = vor.u32 %v10938_v6, %v8677_v33  ;;  %v10998_v20 = vld [vmem:[#allocation10 + $0x40c] sm:$0xf]  ;;  %v9397_v28 = vld [vmem:[#allocation10 + $0x7d8] sm:$0xf0]  ;;  %v9656_v6 = vor.u32 %v11182_v21, %v9653_v38 }
 0x5fd   : > { %v5126_v4 = vadd.f32 %v5125_v49, %v5113_v47  ;;  %v11118_v16 = vld [vmem:[#allocation10 + $0x7cc] sm:$0xf]  ;;  %v9205_v0 = vld [vmem:[#allocation10 + $0x658] sm:$0xf0] }
 0x5fe   : > { %5352 = vmatpush.bf16.msrb.mxu2 %v8744_v24  ;;  %5365 = vmatpush.bf16.msrb.mxu0 %v8872_v30  ;;  %v11034_v24 = vld [vmem:[#allocation10 + $0x52c] sm:$0xf]  ;;  %v9061_v30 = vld [vmem:[#allocation10 + $0x538] sm:$0xf0]  ;;  %v9400_v47 = vor.u32 %v11118_v16, %v9397_v28 }
 0x5ff   : > { %5378 = vmatpush.bf16.msra.mxu3 %v9000_v59  ;;  %5391 = vmatpush.bf16.msra.mxu1 %v9128_v22  ;;  %v8808_v59 = vor.u32 %v10970_v63, %v8805_v14  ;;  %v8661_v22 = vld [vmem:[#allocation10 + $0x218] sm:$0xf0]  ;;  %v13703_v43 = vadd.f32 %v5138_v50, %v5126_v4  ;;  %v9064_v39 = vor.u32 %v11034_v24, %v9061_v30  ;;  %v11150_v49 = vld [vmem:[#allocation10 + $0x8cc] sm:$0xf] }
 0x600   : > { %v5140_v15 = vpop.f32.mrf.mxu1  ;;  %v5101_v13 = vpop.f32.mrf.mxu2  ;;  %v8664_v34 = vor.u32 %v10934_v10, %v8661_v22  ;;  %v8792_v50 = vor.u32 %v10966_v3, %v8789_v25  ;;  %v11114_v33 = vld [vmem:[#allocation10 + $0x7ac] sm:$0xf]  ;;  %v9509_v63 = vld [vmem:[#allocation10 + $0x8b8] sm:$0xf0] }
 0x601   : > { %v11082_v15 = vld [vmem:[#allocation10 + $0x6ac] sm:$0xf]  ;;  %v9237_v30 = vld [vmem:[#allocation10 + $0x698] sm:$0xf0] }
 0x602   : > { %5353 = vmatpush.bf16.msrb.mxu2 %v8728_v44  ;;  %5366 = vmatpush.bf16.msrb.mxu0 %v8856_v11  ;;  %v8917_v44 = vld [vmem:[#allocation10 + $0x418] sm:$0xf0]  ;;  %v11030_v11 = vld [vmem:[#allocation10 + $0x50c] sm:$0xf] }
 0x603   : > { %5379 = vmatpush.bf16.msra.mxu3 %v8984_v57  ;;  %5392 = vmatpush.bf16.msra.mxu1 %v9112_v42  ;;  %v5127_v51 = vpop.f32.mrf.mxu3  ;;  %v11090_v57 = vld [vmem:[#allocation10 + $0x6ec] sm:$0xf]  ;;  %v9285_v42 = vld [vmem:[#allocation10 + $0x6f8] sm:$0xf0]  ;;  %v9048_v17 = vor.u32 %v11030_v11, %v9045_v5 }
 0x604   : > { %v9288_v1 = vor.u32 %v11090_v57, %v9285_v42  ;;  %v11178_v14 = vld [vmem:[#allocation10 + $0x9ac] sm:$0xf]  ;;  %v9493_v22 = vld [vmem:[#allocation10 + $0x898] sm:$0xf0] }
 0x605   : > { %v11078_v24 = vld [vmem:[#allocation10 + $0x68c] sm:$0xf]  ;;  %v9621_v25 = vld [vmem:[#allocation10 + $0x998] sm:$0xf0] }
 0x606   : > { %5354 = vmatpush.bf16.msrb.mxu2 %v8712_v48  ;;  %5367 = vmatpush.bf16.msrb.mxu0 %v8840_v41  ;;  %v9669_v48 = vld [vmem:[#allocation10 + $0x9f8] sm:$0xf0]  ;;  %v8920_v41 = vor.u32 %v10998_v20, %v8917_v44  ;;  %v11174_v3 = vld [vmem:[#allocation10 + $0x98c] sm:$0xf] }
 0x607   : > { %5380 = vmatpush.bf16.msra.mxu3 %v8968_v61  ;;  %5393 = vmatpush.bf16.msra.mxu1 %v9096_v56  ;;  %v9416_v61 = vor.u32 %v11122_v46, %v9413_v35  ;;  %v11086_v56 = vld [vmem:[#allocation10 + $0x6cc] sm:$0xf]  ;;  %v9672_v19 = vor.u32 %v11186_v54, %v9669_v48  ;;  %v9221_v20 = vld [vmem:[#allocation10 + $0x678] sm:$0xf0]  ;;  %v9624_v11 = vor.u32 %v11174_v3, %v9621_v25 }
 0x608   : > { %v9272_v55 = vor.u32 %v11086_v56, %v9269_v9  ;;  %v11074_v13 = vld [vmem:[#allocation10 + $0x66c] sm:$0xf]  ;;  %v9349_v5 = vld [vmem:[#allocation10 + $0x778] sm:$0xf0] }
 0x609   : > { %v11106_v51 = vld [vmem:[#allocation10 + $0x76c] sm:$0xf]  ;;  %v9477_v42 = vld [vmem:[#allocation10 + $0x878] sm:$0xf0]  ;;  %v9224_v12 = vor.u32 %v11074_v13, %v9221_v20 }
 0x60a   : > { %5355 = vmatpush.bf16.msrb.mxu2 %v8696_v36  ;;  %5368 = vmatpush.bf16.msrb.mxu0 %v8824_v52  ;;  %v9253_v36 = vld [vmem:[#allocation10 + $0x6b8] sm:$0xf0]  ;;  %v9528_v52 = vor.u32 %v11150_v49, %v9525_v23  ;;  %v11138_v57 = vld [vmem:[#allocation10 + $0x86c] sm:$0xf] }
 0x60b   : > { %5381 = vmatpush.bf16.msra.mxu3 %v8952_v2  ;;  %5394 = vmatpush.bf16.msra.mxu1 %v9080_v40  ;;  %v9381_v2 = vld [vmem:[#allocation10 + $0x7b8] sm:$0xf0]  ;;  %v11146_v40 = vld [vmem:[#allocation10 + $0x8ac] sm:$0xf]  ;;  %v9256_v4 = vor.u32 %v11082_v15, %v9253_v36  ;;  %v9480_v54 = vor.u32 %v11138_v57, %v9477_v42 }
 0x60c   : > { %v9384_v32 = vor.u32 %v11114_v33, %v9381_v2  ;;  %v9512_v10 = vor.u32 %v11146_v40, %v9509_v63  ;;  %v11170_v46 = vld [vmem:[#allocation10 + $0x96c] sm:$0xf]  ;;  %v9605_v35 = vld [vmem:[#allocation10 + $0x978] sm:$0xf0] }
 0x60d   : > { %v9608_v48 = vor.u32 %v11170_v46, %v9605_v35  ;;  %v9589_v16 = vld [vmem:[#allocation10 + $0x958] sm:$0xf0]  ;;  %v11162_v40 = vld [vmem:[#allocation10 + $0x92c] sm:$0xf] }
 0x60e   : > { %5356 = vmatpush.bf16.msrb.mxu2 %v8680_v7  ;;  %5369 = vmatpush.bf16.msrb.mxu0 %v8808_v59  ;;  %v9640_v7 = vor.u32 %v11178_v14, %v9637_v62  ;;  %v9365_v59 = vld [vmem:[#allocation10 + $0x798] sm:$0xf0]  ;;  %v5458_v14 = vmul.f32 0.01, %v13694_v58  ;;  %v11062_v62 = vld [vmem:[#allocation10 + $0x60c] sm:$0xf] }
 0x60f   : > { %5382 = vmatpush.bf16.msra.mxu3 %v8936_v53  ;;  %5395 = vmatpush.bf16.msra.mxu1 %v9064_v39  ;;  %v9445_v2 = vld [vmem:[#allocation10 + $0x838] sm:$0xf0]  ;;  %v11158_v25 = vld [vmem:[#allocation10 + $0x90c] sm:$0xf] }
 0x610   : > { %v9573_v63 = vld [vmem:[#allocation10 + $0x938] sm:$0xf0] }
 0x611   : > { %v9429_v3 = vld [vmem:[#allocation10 + $0x818] sm:$0xf0] }
 0x612   : > { %5357 = vmatpush.bf16.msrb.mxu2 %v8664_v34  ;;  %5370 = vmatpush.bf16.msrb.mxu0 %v8792_v50  ;;  %v5164_v53 = vpop.f32.mrf.mxu0  ;;  %v9352_v34 = vor.u32 %v11106_v51, %v9349_v5  ;;  %v11070_v50 = vld [vmem:[#allocation10 + $0x64c] sm:$0xf]  ;;  %v5462_v5 = vsel %vm5454_vm13, %v13694_v58, %v5458_v14 }
 0x613   : > { %5383 = vmatpush.bf16.msra.mxu3 %v8920_v41  ;;  %5396 = vmatpush.bf16.msra.mxu1 %v9048_v17  ;;  %v11102_v17 = vld [vmem:[#allocation10 + $0x74c] sm:$0xf]  ;;  %v9208_v21 = vor.u32 %v11070_v50, %v9205_v0 }
 0x615   : > { %5358 = vmatmul.bf16.vlgmr.msrb.gmra.mxu2 %v13640_v8  ;;  %5371 = vmatmul.bf16.vlgmr.msrb.gmra.mxu0 %v13642_v18  ;;  %v11110_v8 = vld [vmem:[#allocation10 + $0x78c] sm:$0xf] }
 0x616   : > { %5402 = vmatpush.bf16.msra.mxu2 %v9288_v1  ;;  %5415 = vmatpush.bf16.msra.mxu0 %v9416_v61  ;;  %v11142_v18 = vld [vmem:[#allocation10 + $0x88c] sm:$0xf]  ;;  %v9368_v39 = vor.u32 %v11110_v8, %v9365_v59  ;;  %v9333_v1 = vld [vmem:[#allocation10 + $0x758] sm:$0xf0]  ;;  %v9576_v59 = vor.u32 %v11162_v40, %v9573_v63 }
 0x617   : > { %5428 = vmatpush.bf16.msrb.mxu3 %v9544_v27  ;;  %5441 = vmatpush.bf16.msrb.mxu1 %v9672_v19  ;;  %v9496_v44 = vor.u32 %v11142_v18, %v9493_v22  ;;  %v11134_v61 = vld [vmem:[#allocation10 + $0x84c] sm:$0xf]  ;;  %v9461_v27 = vld [vmem:[#allocation10 + $0x858] sm:$0xf0]  ;;  %v9336_v38 = vor.u32 %v11102_v17, %v9333_v1 }
 0x618   : > { %5384 = vmatmul.bf16.vlgmr.msra.gmra.mxu3 %v13651_v45  ;;  %5397 = vmatmul.bf16.vlgmr.msra.gmra.mxu1 %v13653_v31  ;;  %v5190_v45 = vpop.f32.mrf.mxu1  ;;  %v9240_v31 = vor.u32 %v11078_v24, %v9237_v30  ;;  %v5151_v41 = vpop.f32.mrf.mxu2  ;;  %v11166_v19 = vld [vmem:[#allocation10 + $0x94c] sm:$0xf]  ;;  %v9464_v15 = vor.u32 %v11134_v61, %v9461_v27  ;;  %v9173_v30 = vld [vmem:[#allocation10 + $0x618] sm:$0xf0] }
 0x619   : > { %v5152_v56 = vadd.f32 %v5151_v41, %v13703_v43  ;;  %v9592_v36 = vor.u32 %v11166_v19, %v9589_v16  ;;  %v11130_v43 = vld [vmem:[#allocation10 + $0x82c] sm:$0xf]  ;;  %v9176_v13 = vor.u32 %v11062_v62, %v9173_v30 }
 0x61a   : > { %5403 = vmatpush.bf16.msra.mxu2 %v9272_v55  ;;  %5416 = vmatpush.bf16.msra.mxu0 %v9400_v47  ;;  %v5166_v28 = vpop.f32.mrf.mxu0  ;;  %v11066_v55 = vld [vmem:[#allocation10 + $0x62c] sm:$0xf]  ;;  %v9189_v47 = vld [vmem:[#allocation10 + $0x638] sm:$0xf0]  ;;  %v9448_v8 = vor.u32 %v11130_v43, %v9445_v2 }
 0x61b   : > { %5429 = vmatpush.bf16.msrb.mxu3 %v9528_v52  ;;  %5442 = vmatpush.bf16.msrb.mxu1 %v9656_v6  ;;  %v5177_v9 = vpop.f32.mrf.mxu3  ;;  %v5165_v49 = vadd.f32 %v5164_v53, %v5152_v56  ;;  %v11098_v52 = vld [vmem:[#allocation10 + $0x72c] sm:$0xf]  ;;  %v9317_v6 = vld [vmem:[#allocation10 + $0x738] sm:$0xf0] }
 0x61c   : > { %v9320_v24 = vor.u32 %v11098_v52, %v9317_v6  ;;  %v11126_v22 = vld [vmem:[#allocation10 + $0x80c] sm:$0xf] }
 0x61d   : > { %v5178_v33 = vadd.f32 %v5177_v9, %v5165_v49 }
 0x61e   : > { %5404 = vmatpush.bf16.msra.mxu2 %v9256_v4  ;;  %5417 = vmatpush.bf16.msra.mxu0 %v9384_v32  ;;  %v9192_v32 = vor.u32 %v11066_v55, %v9189_v47 }
 0x61f   : > { %5430 = vmatpush.bf16.msrb.mxu3 %v9512_v10  ;;  %5443 = vmatpush.bf16.msrb.mxu1 %v9640_v7  ;;  %v5191_v4 = vadd.f32 %v5190_v45, %v5178_v33  ;;  %v11094_v10 = vld [vmem:[#allocation10 + $0x70c] sm:$0xf]  ;;  %v9301_v7 = vld [vmem:[#allocation10 + $0x718] sm:$0xf0] }
 0x620   : > { %v5192_v23 = vpop.f32.mrf.mxu1  ;;  %v5153_v18 = vpop.f32.mrf.mxu2  ;;  %v9304_v20 = vor.u32 %v11094_v10, %v9301_v7 }
 0x621   : > { %vm5455_vm12 = vcmp.ge.f32.partialorder %v5191_v4, 0.0  ;;  %v5459_v53 = vmul.f32 0.01, %v5191_v4 }
 0x622   : > { %5405 = vmatpush.bf16.msra.mxu2 %v9240_v31  ;;  %5418 = vmatpush.bf16.msra.mxu0 %v9368_v39  ;;  %v9557_v39 = vld [vmem:[#allocation10 + $0x918] sm:$0xf0] }
 0x623   : > { %5431 = vmatpush.bf16.msrb.mxu3 %v9496_v44  ;;  %5444 = vmatpush.bf16.msrb.mxu1 %v9624_v11  ;;  %v5179_v31 = vpop.f32.mrf.mxu3  ;;  %v5463_v45 = vsel %vm5455_vm12, %v5191_v4, %v5459_v53  ;;  %v9432_v11 = vor.u32 %v11126_v22, %v9429_v3  ;;  %v9560_v51 = vor.u32 %v11158_v25, %v9557_v39 }
 0x624   : > { %v5470_v44 = vrot.slane %v5463_v45, 6 }
 0x626   : > { %5406 = vmatpush.bf16.msra.mxu2 %v9224_v12  ;;  %5419 = vmatpush.bf16.msra.mxu0 %v9352_v34  ;;  %v13714_v57 = vsel %vm1433_vm4, %v5462_v5, %v5470_v44  ;;  %v13717_v42 = vsel %vm2828_vm8, %v5462_v5, %v5470_v44  ;;  %v13720_v46 = vsel %vm2111_vm0, %v5462_v5, %v5470_v44  ;;  %v11623_v34 = vld [vmem:[#allocation16] sm:$0xf] }
 0x627   : > { %5432 = vmatpush.bf16.msrb.mxu3 %v9480_v54  ;;  %5445 = vmatpush.bf16.msrb.mxu1 %v9608_v48  ;;  %v13723_v35 = vsel %vm2833_vm9, %v5470_v44, %v5462_v5  ;;  %v3328_v50 = vperm.slane %v11623_v34, 2  ;;  %v3329_v10 = vperm.slane %v11623_v34, 3 }
 0x62a   : > { %5407 = vmatpush.bf16.msra.mxu2 %v9208_v21  ;;  %5420 = vmatpush.bf16.msra.mxu0 %v9336_v38 }
 0x62b   : > { %5433 = vmatpush.bf16.msrb.mxu3 %v9464_v15  ;;  %5446 = vmatpush.bf16.msrb.mxu1 %v9592_v36 }
 0x62e   : > { %5408 = vmatpush.bf16.msra.mxu2 %v9192_v32  ;;  %5421 = vmatpush.bf16.msra.mxu0 %v9320_v24 }
 0x62f   : > { %5434 = vmatpush.bf16.msrb.mxu3 %v9448_v8  ;;  %5447 = vmatpush.bf16.msrb.mxu1 %v9576_v59 }
 0x632   : > { %5409 = vmatpush.bf16.msra.mxu2 %v9176_v13  ;;  %5422 = vmatpush.bf16.msra.mxu0 %v9304_v20  ;;  %v5216_v58 = vpop.f32.mrf.mxu0 }
 0x633   : > { %5435 = vmatpush.bf16.msrb.mxu3 %v9432_v11  ;;  %5448 = vmatpush.bf16.msrb.mxu1 %v9560_v51 }
 0x635   : > { %5410 = vmatmul.bf16.vlgmr.msra.gmra.mxu2 %v13655_v29  ;;  %5423 = vmatmul.bf16.vlgmr.msra.gmra.mxu0 %v13657_v37  ;;  %v5242_v12 = vpop.f32.mrf.mxu1 }
 0x636   : > { %5436 = vmatmul.bf16.vlgmr.msrb.gmra.mxu3 %v13663_v60  ;;  %5449 = vmatmul.bf16.vlgmr.msrb.gmra.mxu1 %v13665_v26 }
 0x638   : > { %v5203_v0 = vpop.f32.mrf.mxu2 }
 0x639   : > { %v5204_v54 = vadd.f32 %v5203_v0, %v3328_v50 }
 0x63a   : > { %v5218_v41 = vpop.f32.mrf.mxu0 }
 0x63b   : > { %v5229_v48 = vpop.f32.mrf.mxu3  ;;  %v5217_v17 = vadd.f32 %v5216_v58, %v5204_v54 }
 0x63d   : > { %v5244_v1 = vpop.f32.mrf.mxu1  ;;  %v5230_v61 = vadd.f32 %v5229_v48, %v5217_v17 }
 0x63f   : > { %v5243_v56 = vadd.f32 %v5242_v12, %v5230_v61 }
 0x640   : > { %v5205_v9 = vpop.f32.mrf.mxu2 }
 0x643   : > { %v5231_v29 = vpop.f32.mrf.mxu3 }
 0x652   : > { %v5268_v27 = vpop.f32.mrf.mxu0 }
 0x655   : > { %v5294_v37 = vpop.f32.mrf.mxu1 }
 0x658   : > { %v5255_v19 = vpop.f32.mrf.mxu2 }
 0x659   : > { %v5256_v60 = vadd.f32 %v5255_v19, %v5243_v56 }
 0x65a   : > { %v5270_v26 = vpop.f32.mrf.mxu0 }
 0x65b   : > { %v5281_v16 = vpop.f32.mrf.mxu3  ;;  %v5269_v28 = vadd.f32 %v5268_v27, %v5256_v60 }
 0x65d   : > { %v5296_v49 = vpop.f32.mrf.mxu1  ;;  %v5282_v23 = vadd.f32 %v5281_v16, %v5269_v28 }
 0x65f   : > { %v5295_v21 = vadd.f32 %v5294_v37, %v5282_v23 }
 0x660   : > { %v5257_v38 = vpop.f32.mrf.mxu2 }
 0x663   : > { %v5283_v55 = vpop.f32.mrf.mxu3 }
 0x672   : > { %v5320_v47 = vpop.f32.mrf.mxu0 }
 0x675   : > { %v5346_v15 = vpop.f32.mrf.mxu1 }
 0x678   : > { %v5307_v36 = vpop.f32.mrf.mxu2 }
 0x679   : > { %v5308_v52 = vadd.f32 %v5307_v36, %v5295_v21 }
 0x67a   : > { %v5322_v43 = vpop.f32.mrf.mxu0 }
 0x67b   : > { %v5333_v6 = vpop.f32.mrf.mxu3  ;;  %v5321_v33 = vadd.f32 %v5320_v47, %v5308_v52 }
 0x67c   : > { %v5334_v59 = vadd.f32 %v5333_v6, %v3329_v10 }
 0x67d   : > { %v5348_v2 = vpop.f32.mrf.mxu1  ;;  %v5460_v5 = vmul.f32 0.01, %v5321_v33  ;;  %vm5456_vm14 = vcmp.ge.f32.partialorder %v5321_v33, 0.0 }
 0x67e   : > { %v5347_v18 = vadd.f32 %v5346_v15, %v5334_v59 }
 0x67f   : > { %v5464_v50 = vsel %vm5456_vm14, %v5321_v33, %v5460_v5 }
 0x680   : > { %v5309_v40 = vpop.f32.mrf.mxu2  ;;  %v5471_v41 = vrot.slane %v5464_v50, 4 }
 0x683   : > { %v5335_v63 = vpop.f32.mrf.mxu3 }
 0x692   : > { %v5372_v14 = vpop.f32.mrf.mxu0 }
 0x695   : > { %v5398_v62 = vpop.f32.mrf.mxu1 }
 0x698   : > { %v5359_v4 = vpop.f32.mrf.mxu2 }
 0x699   : > { %v5360_v22 = vadd.f32 %v5359_v4, %v5347_v18 }
 0x69a   : > { %v5374_v24 = vpop.f32.mrf.mxu0 }
 0x69b   : > { %v5385_v32 = vpop.f32.mrf.mxu3  ;;  %v5373_v3 = vadd.f32 %v5372_v14, %v5360_v22 }
 0x69d   : > { %v5400_v30 = vpop.f32.mrf.mxu1  ;;  %v5386_v53 = vadd.f32 %v5385_v32, %v5373_v3 }
 0x69f   : > { %v5399_v39 = vadd.f32 %v5398_v62, %v5386_v53 }
 0x6a0   : > { %v5361_v7 = vpop.f32.mrf.mxu2 }
 0x6a3   : > { %v5387_v8 = vpop.f32.mrf.mxu3 }
 0x6b2   : > { %v5424_v25 = vpop.f32.mrf.mxu0 }
 0x6b3   : > { %v5450_v31 = vpop.f32.mrf.mxu1 }
 0x6b8   : > { %v5411_v45 = vpop.f32.mrf.mxu2 }
 0x6b9   : > { %v5412_v13 = vadd.f32 %v5411_v45, %v5399_v39  ;;  %v5437_v20 = vpop.f32.mrf.mxu3 }
 0x6ba   : > { %v5426_v44 = vpop.f32.mrf.mxu0 }
 0x6bb   : > { %v5425_v11 = vadd.f32 %v5424_v25, %v5412_v13  ;;  %v5452_v51 = vpop.f32.mrf.mxu1 }
 0x6bd   : > { %v5438_v58 = vadd.f32 %v5437_v20, %v5425_v11 }
 0x6bf   : > { %v5451_v12 = vadd.f32 %v5450_v31, %v5438_v58 }
 0x6c0   : > { %v5413_v34 = vpop.f32.mrf.mxu2 }
 0x6c1   : > { %vm5457_vm1 = vcmp.ge.f32.partialorder %v5451_v12, 0.0  ;;  %v5461_v0 = vmul.f32 0.01, %v5451_v12  ;;  %v5439_v54 = vpop.f32.mrf.mxu3 }
 0x6c3   : > { %v5465_v48 = vsel %vm5457_vm1, %v5451_v12, %v5461_v0 }
 0x6c4   : > { %v5472_v17 = vrot.slane %v5465_v48, 2 }
 0x6c6   : > { %v5474_v1 = vsel %vm2111_vm0, %v5471_v41, %v5472_v17  ;;  %v5477_v61 = vsel %vm2833_vm9, %v5472_v17, %v5471_v41  ;;  %v5482_v56 = vsel %vm1433_vm4, %v5471_v41, %v5472_v17  ;;  %v5486_v9 = vsel %vm2828_vm8, %v5471_v41, %v5472_v17 }
 0x6c7   : > { %v5475_v29 = vsel %vm1750_vm15, %v13714_v57, %v5474_v1  ;;  %v5479_v27 = vsel %vm5478_vm2, %v13717_v42, %v5477_v61  ;;  %v5483_v37 = vsel %vm1750_vm15, %v5482_v56, %v13720_v46  ;;  %v5487_v19 = vsel %vm5478_vm2, %v5486_v9, %v13723_v35 }
 0x6c8   : > { %5489 = vst [vmem:[#allocation1] ss:$4 sm:$0xff] %v5475_v29  ;;  %v5480_v60 = vrot.slane %v5479_v27, 2  ;;  %vm5505_vm0 = vcmask 1040384   ;;  %v5484_v47 = vrot.slane %v5483_v37, 4  ;;  %v5488_v32 = vrot.slane %v5487_v19, 6 }
 0x6cf   : > { %v5490_v16 = vld.sshfl [vmem:[#allocation1] sm:$0xff pattern:$0x73625140]  ;;  %v5491_v26 = vld.sshfl [vmem:[#allocation1 + $0x8] sm:$0xff pattern:$0x73625140] }
 0x6d0   : > { %v5492_v28 = vld.sshfl [vmem:[#allocation1 + $0x10] sm:$0xff pattern:$0x73625140]  ;;  %v5493_v49 = vld.sshfl [vmem:[#allocation1 + $0x18] sm:$0xff pattern:$0x73625140]  ;;  %v5498_v23 = vpack.c.bf16 %v5491_v26, %v5490_v16 }
 0x6d1   : > { %v5499_v21 = vpack.c.bf16 %v5493_v49, %v5492_v28  ;;  %5516 = vst [vmem:[#allocation1] ss:$4 sm:$0xff] %v5480_v60 }
 0x6d2   : > { %v5502_v38 = vrot.slane %v5498_v23, 3 }
 0x6d3   : > { %v5503_v57 = vrot.slane %v5499_v21, 6  ;;  %v5504_v55 = vrot.slane %v5499_v21, 1 }
 0x6d4   : > { %v5508_v42 = vsel %vm5505_vm0, %v5498_v23, %v5502_v38 }
 0x6d5   : > { %v5512_v46 = vsel %vm5509_vm3, %v5503_v57, %v5504_v55 }
 0x6d6   : > { %v5513_v35 = vsel %vm1433_vm4, %v5508_v42, %v5512_v46 }
 0x6d7   : > { %5515 = vst [vmem:[#allocation2] sm:$0xf] %v5513_v35 }
 0x6d8   : > { %v5517_v15 = vld.sshfl [vmem:[#allocation1] sm:$0xff pattern:$0x73625140]  ;;  %v5518_v36 = vld.sshfl [vmem:[#allocation1 + $0x8] sm:$0xff pattern:$0x73625140] }
 0x6d9   : > { %v5519_v52 = vld.sshfl [vmem:[#allocation1 + $0x10] sm:$0xff pattern:$0x73625140]  ;;  %v5520_v6 = vld.sshfl [vmem:[#allocation1 + $0x18] sm:$0xff pattern:$0x73625140]  ;;  %v5525_v43 = vpack.c.bf16 %v5518_v36, %v5517_v15 }
 0x6da   : > { %v5526_v33 = vpack.c.bf16 %v5520_v6, %v5519_v52  ;;  %5541 = vst [vmem:[#allocation1] ss:$4 sm:$0xff] %v5484_v47 }
 0x6db   : > { %v5529_v2 = vrot.slane %v5525_v43, 3 }
 0x6dc   : > { %v5530_v40 = vrot.slane %v5526_v33, 6  ;;  %v5531_v63 = vrot.slane %v5526_v33, 1 }
 0x6dd   : > { %v5534_v14 = vsel %vm5505_vm0, %v5525_v43, %v5529_v2 }
 0x6de   : > { %v5537_v62 = vsel %vm5509_vm3, %v5530_v40, %v5531_v63 }
 0x6df   : > { %v5538_v4 = vsel %vm1433_vm4, %v5534_v14, %v5537_v62 }
 0x6e0   : > { %5540 = vst [vmem:[#allocation2 + $0x4] sm:$0xf] %v5538_v4 }
 0x6e1   : > { %v5542_v24 = vld.sshfl [vmem:[#allocation1] sm:$0xff pattern:$0x73625140]  ;;  %v5543_v30 = vld.sshfl [vmem:[#allocation1 + $0x8] sm:$0xff pattern:$0x73625140] }
 0x6e2   : > { %v5544_v10 = vld.sshfl [vmem:[#allocation1 + $0x10] sm:$0xff pattern:$0x73625140]  ;;  %v5545_v7 = vld.sshfl [vmem:[#allocation1 + $0x18] sm:$0xff pattern:$0x73625140]  ;;  %v5550_v8 = vpack.c.bf16 %v5543_v30, %v5542_v24 }
 0x6e3   : > { %v5551_v59 = vpack.c.bf16 %v5545_v7, %v5544_v10  ;;  %5566 = vst [vmem:[#allocation1] ss:$4 sm:$0xff] %v5488_v32 }
 0x6e4   : > { %v5554_v18 = vrot.slane %v5550_v8, 3 }
 0x6e5   : > { %v5555_v22 = vrot.slane %v5551_v59, 6  ;;  %v5556_v3 = vrot.slane %v5551_v59, 1 }
 0x6e6   : > { %v5559_v25 = vsel %vm5505_vm0, %v5550_v8, %v5554_v18 }
 0x6e7   : > { %v5562_v53 = vsel %vm5509_vm3, %v5555_v22, %v5556_v3 }
 0x6e8   : > { %v5563_v31 = vsel %vm1433_vm4, %v5559_v25, %v5562_v53 }
 0x6e9   : > { %5565 = vst [vmem:[#allocation2 + $0x8] sm:$0xf] %v5563_v31 }
 0x6ea   : > { %v5567_v39 = vld.sshfl [vmem:[#allocation1] sm:$0xff pattern:$0x73625140]  ;;  %v5568_v45 = vld.sshfl [vmem:[#allocation1 + $0x8] sm:$0xff pattern:$0x73625140] }
 0x6eb   : > { %v5569_v13 = vld.sshfl [vmem:[#allocation1 + $0x10] sm:$0xff pattern:$0x73625140]  ;;  %v5570_v20 = vld.sshfl [vmem:[#allocation1 + $0x18] sm:$0xff pattern:$0x73625140]  ;;  %v5575_v44 = vpack.c.bf16 %v5568_v45, %v5567_v39 }
 0x6ec   : > { %v5576_v11 = vpack.c.bf16 %v5570_v20, %v5569_v13 }
 0x6ed   : > { %v5579_v51 = vrot.slane %v5575_v44, 3 }
 0x6ee   : > { %v5580_v5 = vrot.slane %v5576_v11, 6  ;;  %v5581_v58 = vrot.slane %v5576_v11, 1 }
 0x6ef   : > { %v5584_v12 = vsel %vm5505_vm0, %v5575_v44, %v5579_v51 }
 0x6f0   : > { %v5587_v34 = vsel %vm5509_vm3, %v5580_v5, %v5581_v58 }
 0x6f1   : > { %v5588_v50 = vsel %vm1433_vm4, %v5584_v12, %v5587_v34 }
 0x6f2   : > { %5590 = vst [vmem:[#allocation2 + $0xc] sm:$0xf] %v5588_v50 }
 0x6f3 PF: > { %v9731_v0 = vld [vmem:[%s12385_s29 + $0x70] sm:$0xf]  ;;  %v11204_v54 = vld [vmem:[%s12385_s29 + $0x74] sm:$0xf0]  ;;  %v9723_v37 = vld [vmem:[%s12385_s29 + $0x60] sm:$0xf] }
 0x6f4   : > { %v9795_v48 = vld [vmem:[%s12385_s29 + $0xf0] sm:$0xf]  ;;  %v9732_v41 = vor.u32 %v11204_v54, %v9731_v0  ;;  %v11220_v17 = vld [vmem:[%s12385_s29 + $0xf4] sm:$0xf0]  ;;  %v11202_v60 = vld [vmem:[%s12385_s29 + $0x64] sm:$0xf0] }
 0x6f5   : > { %v9859_v1 = vld [vmem:[%s12385_s29 + $0x170] sm:$0xf]  ;;  %v11236_v61 = vld [vmem:[%s12385_s29 + $0x174] sm:$0xf0]  ;;  %v9796_v56 = vor.u32 %v11220_v17, %v9795_v48  ;;  %v9787_v16 = vld [vmem:[%s12385_s29 + $0xe0] sm:$0xf]  ;;  %v9724_v28 = vor.u32 %v11202_v60, %v9723_v37 }
 0x6f6   : > { %v9860_v9 = vor.u32 %v11236_v61, %v9859_v1  ;;  %v9923_v29 = vld [vmem:[%s12385_s29 + $0x1f0] sm:$0xf]  ;;  %v11252_v27 = vld [vmem:[%s12385_s29 + $0x1f4] sm:$0xf0]  ;;  %7172 = vmatpush.bf16.msra.mxu0 %v9732_v41  ;;  %v11218_v26 = vld [vmem:[%s12385_s29 + $0xe4] sm:$0xf0] }
 0x6f7   : > { %v9924_v19 = vor.u32 %v11252_v27, %v9923_v29  ;;  %7185 = vmatpush.bf16.msra.mxu1 %v9796_v56  ;;  %v9788_v49 = vor.u32 %v11218_v26, %v9787_v16  ;;  %v9851_v23 = vld [vmem:[%s12385_s29 + $0x160] sm:$0xf]  ;;  %v11234_v21 = vld [vmem:[%s12385_s29 + $0x164] sm:$0xf0]  ;;  %v9715_v42 = vld [vmem:[%s12385_s29 + $0x50] sm:$0xf] }
 0x6f8   : > { %7198 = vmatpush.bf16.msra.mxu2 %v9860_v9  ;;  %v9915_v38 = vld [vmem:[%s12385_s29 + $0x1e0] sm:$0xf]  ;;  %v9852_v57 = vor.u32 %v11234_v21, %v9851_v23  ;;  %v11250_v55 = vld [vmem:[%s12385_s29 + $0x1e4] sm:$0xf0]  ;;  %v11200_v46 = vld [vmem:[%s12385_s29 + $0x54] sm:$0xf0] }
 0x6f9   : > { %7211 = vmatpush.bf16.msra.mxu3 %v9924_v19  ;;  %v9916_v35 = vor.u32 %v11250_v55, %v9915_v38  ;;  %v9779_v47 = vld [vmem:[%s12385_s29 + $0xd0] sm:$0xf]  ;;  %v11216_v15 = vld [vmem:[%s12385_s29 + $0xd4] sm:$0xf0]  ;;  %v9716_v52 = vor.u32 %v11200_v46, %v9715_v42  ;;  %v9707_v63 = vld [vmem:[%s12385_s29 + $0x40] sm:$0xf] }
 0x6fa   : > { %v9843_v36 = vld [vmem:[%s12385_s29 + $0x150] sm:$0xf]  ;;  %7173 = vmatpush.bf16.msra.mxu0 %v9724_v28  ;;  %v11232_v6 = vld [vmem:[%s12385_s29 + $0x154] sm:$0xf0]  ;;  %v9780_v2 = vor.u32 %v11216_v15, %v9779_v47  ;;  %v11198_v14 = vld [vmem:[%s12385_s29 + $0x44] sm:$0xf0] }
 0x6fb   : > { %v9907_v43 = vld [vmem:[%s12385_s29 + $0x1d0] sm:$0xf]  ;;  %v11248_v33 = vld [vmem:[%s12385_s29 + $0x1d4] sm:$0xf0]  ;;  %7186 = vmatpush.bf16.msra.mxu1 %v9788_v49  ;;  %v9844_v40 = vor.u32 %v11232_v6, %v9843_v36  ;;  %v9771_v62 = vld [vmem:[%s12385_s29 + $0xc0] sm:$0xf]  ;;  %v9708_v8 = vor.u32 %v11198_v14, %v9707_v63 }
 0x6fc   : > { %7199 = vmatpush.bf16.msra.mxu2 %v9852_v57  ;;  %v9908_v4 = vor.u32 %v11248_v33, %v9907_v43  ;;  %v11214_v32 = vld [vmem:[%s12385_s29 + $0xc4] sm:$0xf0]  ;;  %v9835_v24 = vld [vmem:[%s12385_s29 + $0x140] sm:$0xf]  ;;  %v9699_v22 = vld [vmem:[%s12385_s29 + $0x30] sm:$0xf] }
 0x6fd   : > { %7212 = vmatpush.bf16.msra.mxu3 %v9916_v35  ;;  %v11230_v30 = vld [vmem:[%s12385_s29 + $0x144] sm:$0xf0]  ;;  %v9899_v10 = vld [vmem:[%s12385_s29 + $0x1c0] sm:$0xf]  ;;  %v9772_v59 = vor.u32 %v11214_v32, %v9771_v62  ;;  %v11196_v3 = vld [vmem:[%s12385_s29 + $0x34] sm:$0xf0] }
 0x6fe   : > { %v11246_v7 = vld [vmem:[%s12385_s29 + $0x1c4] sm:$0xf0]  ;;  %7174 = vmatpush.bf16.msra.mxu0 %v9716_v52  ;;  %v9836_v18 = vor.u32 %v11230_v30, %v9835_v24  ;;  %v9763_v25 = vld [vmem:[%s12385_s29 + $0xb0] sm:$0xf]  ;;  %v11212_v31 = vld [vmem:[%s12385_s29 + $0xb4] sm:$0xf0]  ;;  %v9700_v44 = vor.u32 %v11196_v3, %v9699_v22 }
 0x6ff   : > { %7187 = vmatpush.bf16.msra.mxu1 %v9780_v2  ;;  %v9900_v53 = vor.u32 %v11246_v7, %v9899_v10  ;;  %v9827_v39 = vld [vmem:[%s12385_s29 + $0x130] sm:$0xf]  ;;  %v11228_v45 = vld [vmem:[%s12385_s29 + $0x134] sm:$0xf0]  ;;  %v9764_v11 = vor.u32 %v11212_v31, %v9763_v25  ;;  %v9691_v5 = vld [vmem:[%s12385_s29 + $0x20] sm:$0xf] }
 0x700   : > { %7200 = vmatpush.bf16.msra.mxu2 %v9844_v40  ;;  %v9891_v13 = vld [vmem:[%s12385_s29 + $0x1b0] sm:$0xf]  ;;  %v11244_v20 = vld [vmem:[%s12385_s29 + $0x1b4] sm:$0xf0]  ;;  %v9828_v51 = vor.u32 %v11228_v45, %v9827_v39  ;;  %v11194_v58 = vld [vmem:[%s12385_s29 + $0x24] sm:$0xf0] }
 0x701   : > { %7213 = vmatpush.bf16.msra.mxu3 %v9908_v4  ;;  %v9755_v12 = vld [vmem:[%s12385_s29 + $0xa0] sm:$0xf]  ;;  %v9892_v34 = vor.u32 %v11244_v20, %v9891_v13  ;;  %v11210_v50 = vld [vmem:[%s12385_s29 + $0xa4] sm:$0xf0]  ;;  %v9692_v17 = vor.u32 %v11194_v58, %v9691_v5  ;;  %v9683_v56 = vld [vmem:[%s12385_s29 + $0x10] sm:$0xf] }
 0x702   : > { %7175 = vmatpush.bf16.msra.mxu0 %v9708_v8  ;;  %v9819_v0 = vld [vmem:[%s12385_s29 + $0x120] sm:$0xf]  ;;  %v11226_v54 = vld [vmem:[%s12385_s29 + $0x124] sm:$0xf0]  ;;  %v9756_v1 = vor.u32 %v11210_v50, %v9755_v12  ;;  %v11192_v9 = vld [vmem:[%s12385_s29 + $0x14] sm:$0xf0] }
 0x703   : > { %7188 = vmatpush.bf16.msra.mxu1 %v9772_v59  ;;  %v9883_v48 = vld [vmem:[%s12385_s29 + $0x1a0] sm:$0xf]  ;;  %v11242_v41 = vld [vmem:[%s12385_s29 + $0x1a4] sm:$0xf0]  ;;  %v9820_v61 = vor.u32 %v11226_v54, %v9819_v0  ;;  %v9747_v29 = vld [vmem:[%s12385_s29 + $0x90] sm:$0xf]  ;;  %v9684_v28 = vor.u32 %v11192_v9, %v9683_v56 }
 0x704   : > { %7201 = vmatpush.bf16.msra.mxu2 %v9836_v18  ;;  %v9884_v27 = vor.u32 %v11242_v41, %v9883_v48  ;;  %v11208_v37 = vld [vmem:[%s12385_s29 + $0x94] sm:$0xf0]  ;;  %v9811_v19 = vld [vmem:[%s12385_s29 + $0x110] sm:$0xf]  ;;  %v9675_v49 = vld [vmem:[%s12385_s29] sm:$0xf] }
 0x705   : > { %7214 = vmatpush.bf16.msra.mxu3 %v9900_v53  ;;  %v11224_v60 = vld [vmem:[%s12385_s29 + $0x114] sm:$0xf0]  ;;  %v9875_v16 = vld [vmem:[%s12385_s29 + $0x190] sm:$0xf]  ;;  %v11190_v23 = vld [vmem:[%s12385_s29 + $0x4] sm:$0xf0]  ;;  %v9748_v21 = vor.u32 %v11208_v37, %v9747_v29 }
 0x706   : > { %7176 = vmatpush.bf16.msra.mxu0 %v9700_v44  ;;  %v11240_v26 = vld [vmem:[%s12385_s29 + $0x194] sm:$0xf0]  ;;  %v9812_v38 = vor.u32 %v11224_v60, %v9811_v19  ;;  %v9739_v57 = vld [vmem:[%s12385_s29 + $0x80] sm:$0xf]  ;;  %v11206_v55 = vld [vmem:[%s12385_s29 + $0x84] sm:$0xf0]  ;;  %v9676_v43 = vor.u32 %v11190_v23, %v9675_v49 }
 0x707   : > { %7189 = vmatpush.bf16.msra.mxu1 %v9764_v11  ;;  %v9803_v42 = vld [vmem:[%s12385_s29 + $0x100] sm:$0xf]  ;;  %v9876_v46 = vor.u32 %v11240_v26, %v9875_v16  ;;  %v11222_v35 = vld [vmem:[%s12385_s29 + $0x104] sm:$0xf0]  ;;  %v9987_v36 = vld [vmem:[%s12385_s29 + $0x270] sm:$0xf]  ;;  %v9740_v63 = vor.u32 %v11206_v55, %v9739_v57 }
 0x708   : > { %7202 = vmatpush.bf16.msra.mxu2 %v9828_v51  ;;  %v9867_v47 = vld [vmem:[%s12385_s29 + $0x180] sm:$0xf]  ;;  %v11238_v15 = vld [vmem:[%s12385_s29 + $0x184] sm:$0xf0]  ;;  %v11268_v52 = vld [vmem:[%s12385_s29 + $0x274] sm:$0xf0]  ;;  %v9804_v14 = vor.u32 %v11222_v35, %v9803_v42 }
 0x709   : > { %7215 = vmatpush.bf16.msra.mxu3 %v9892_v34  ;;  %v10051_v6 = vld [vmem:[%s12385_s29 + $0x2f0] sm:$0xf]  ;;  %v11284_v33 = vld [vmem:[%s12385_s29 + $0x2f4] sm:$0xf0]  ;;  %v9868_v32 = vor.u32 %v11238_v15, %v9867_v47  ;;  %v9988_v24 = vor.u32 %v11268_v52, %v9987_v36  ;;  %v9979_v7 = vld [vmem:[%s12385_s29 + $0x260] sm:$0xf] }
 0x70a   : > { %7177 = vmatpush.bf16.msra.mxu0 %v9692_v17  ;;  %v10115_v2 = vld [vmem:[%s12385_s29 + $0x370] sm:$0xf]  ;;  %v11300_v40 = vld [vmem:[%s12385_s29 + $0x374] sm:$0xf0]  ;;  %v10052_v30 = vor.u32 %v11284_v33, %v10051_v6  ;;  %v11266_v8 = vld [vmem:[%s12385_s29 + $0x264] sm:$0xf0] }
 0x70b   : > { %7190 = vmatpush.bf16.msra.mxu1 %v9756_v1  ;;  %v10179_v62 = vld [vmem:[%s12385_s29 + $0x3f0] sm:$0xf]  ;;  %v11316_v4 = vld [vmem:[%s12385_s29 + $0x3f4] sm:$0xf0]  ;;  %v10116_v10 = vor.u32 %v11300_v40, %v10115_v2  ;;  %v10043_v59 = vld [vmem:[%s12385_s29 + $0x2e0] sm:$0xf]  ;;  %v9980_v39 = vor.u32 %v11266_v8, %v9979_v7 }
 0x70c   : > { %7203 = vmatpush.bf16.msra.mxu2 %v9820_v61  ;;  %v10180_v18 = vor.u32 %v11316_v4, %v10179_v62  ;;  %v11282_v22 = vld [vmem:[%s12385_s29 + $0x2e4] sm:$0xf0]  ;;  %v10107_v3 = vld [vmem:[%s12385_s29 + $0x360] sm:$0xf]  ;;  %v9971_v20 = vld [vmem:[%s12385_s29 + $0x250] sm:$0xf] }
 0x70d   : > { %7216 = vmatpush.bf16.msra.mxu3 %v9884_v27  ;;  %v11298_v25 = vld [vmem:[%s12385_s29 + $0x364] sm:$0xf0]  ;;  %v10171_v53 = vld [vmem:[%s12385_s29 + $0x3e0] sm:$0xf]  ;;  %v10044_v45 = vor.u32 %v11282_v22, %v10043_v59  ;;  %v11264_v44 = vld [vmem:[%s12385_s29 + $0x254] sm:$0xf0] }
 0x70e   : > { %7178 = vmatpush.bf16.msra.mxu0 %v9684_v28  ;;  %v11314_v31 = vld [vmem:[%s12385_s29 + $0x3e4] sm:$0xf0]  ;;  %v10108_v13 = vor.u32 %v11298_v25, %v10107_v3  ;;  %v10035_v11 = vld [vmem:[%s12385_s29 + $0x2d0] sm:$0xf]  ;;  %v11280_v5 = vld [vmem:[%s12385_s29 + $0x2d4] sm:$0xf0]  ;;  %v9972_v0 = vor.u32 %v11264_v44, %v9971_v20 }
 0x70f   : > { %7191 = vmatpush.bf16.msra.mxu1 %v9748_v21  ;;  %v10172_v51 = vor.u32 %v11314_v31, %v10171_v53  ;;  %v10099_v58 = vld [vmem:[%s12385_s29 + $0x350] sm:$0xf]  ;;  %v11296_v12 = vld [vmem:[%s12385_s29 + $0x354] sm:$0xf0]  ;;  %v9963_v54 = vld [vmem:[%s12385_s29 + $0x240] sm:$0xf]  ;;  %v10036_v41 = vor.u32 %v11280_v5, %v10035_v11 }
 0x710   : > { %7204 = vmatpush.bf16.msra.mxu2 %v9812_v38  ;;  %v10163_v34 = vld [vmem:[%s12385_s29 + $0x3d0] sm:$0xf]  ;;  %v11312_v50 = vld [vmem:[%s12385_s29 + $0x3d4] sm:$0xf0]  ;;  %v10100_v17 = vor.u32 %v11296_v12, %v10099_v58  ;;  %v11262_v1 = vld [vmem:[%s12385_s29 + $0x244] sm:$0xf0] }
 0x711   : > { %7217 = vmatpush.bf16.msra.mxu3 %v9876_v46  ;;  %v5592_v48 = vld [vmem:[#allocation2] sm:$0xff]  ;;  %v10027_v61 = vld [vmem:[%s12385_s29 + $0x2c0] sm:$0xf]  ;;  %v10164_v56 = vor.u32 %v11312_v50, %v10163_v34  ;;  %v11278_v9 = vld [vmem:[%s12385_s29 + $0x2c4] sm:$0xf0]  ;;  %v9964_v60 = vor.u32 %v11262_v1, %v9963_v54  ;;  %p10761_p1 = scmp.ne.s32.totalorder %s12202_s15, 3 }
 0x712   : > { %7179 = vmatpush.bf16.msra.mxu0 %v9676_v43  ;;  %5857 = vst [vmem:[#allocation1] ss:$9 sm:$0xff] %v5592_v48  ;;  %v10091_v29 = vld [vmem:[%s12385_s29 + $0x340] sm:$0xf]  ;;  %v11294_v27 = vld [vmem:[%s12385_s29 + $0x344] sm:$0xf0]  ;;  %v10028_v16 = vor.u32 %v11278_v9, %v10027_v61 }
 0x713   : > { %7192 = vmatpush.bf16.msra.mxu1 %v9740_v63  ;;  %v10155_v37 = vld [vmem:[%s12385_s29 + $0x3c0] sm:$0xf]  ;;  %v11310_v19 = vld [vmem:[%s12385_s29 + $0x3c4] sm:$0xf0]  ;;  %v10092_v26 = vor.u32 %v11294_v27, %v10091_v29  ;;  %v9955_v28 = vld [vmem:[%s12385_s29 + $0x230] sm:$0xf] }
 0x714   : > { %7205 = vmatpush.bf16.msra.mxu2 %v9804_v14  ;;  %v11260_v49 = vld [vmem:[%s12385_s29 + $0x234] sm:$0xf0]  ;;  %v10019_v23 = vld [vmem:[%s12385_s29 + $0x2b0] sm:$0xf]  ;;  %v10156_v21 = vor.u32 %v11310_v19, %v10155_v37  ;;  %v9947_v35 = vld [vmem:[%s12385_s29 + $0x220] sm:$0xf] }
 0x715   : > { %7218 = vmatpush.bf16.msra.mxu3 %v9868_v32  ;;  %v11276_v38 = vld [vmem:[%s12385_s29 + $0x2b4] sm:$0xf0]  ;;  %v10083_v57 = vld [vmem:[%s12385_s29 + $0x330] sm:$0xf]  ;;  %v9956_v47 = vor.u32 %v11260_v49, %v9955_v28  ;;  %v11258_v33 = vld [vmem:[%s12385_s29 + $0x224] sm:$0xf0] }
 0x716   : > { %7224 = vmatpush.bf16.msrb.mxu0 %v9988_v24  ;;  %v11292_v55 = vld [vmem:[%s12385_s29 + $0x334] sm:$0xf0]  ;;  %v10147_v42 = vld [vmem:[%s12385_s29 + $0x3b0] sm:$0xf]  ;;  %v10020_v6 = vor.u32 %v11276_v38, %v10019_v23  ;;  %v10011_v2 = vld [vmem:[%s12385_s29 + $0x2a0] sm:$0xf] }
 0x717   : > { %7237 = vmatpush.bf16.msrb.mxu1 %v10052_v30  ;;  %v11308_v46 = vld [vmem:[%s12385_s29 + $0x3b4] sm:$0xf0]  ;;  %v10084_v43 = vor.u32 %v11292_v55, %v10083_v57  ;;  %v11274_v14 = vld [vmem:[%s12385_s29 + $0x2a4] sm:$0xf0]  ;;  %v10075_v62 = vld [vmem:[%s12385_s29 + $0x320] sm:$0xf]  ;;  %v9948_v30 = vor.u32 %v11258_v33, %v9947_v35 }
 0x718   : > { %7250 = vmatpush.bf16.msrb.mxu2 %v10116_v10  ;;  %v10148_v63 = vor.u32 %v11308_v46, %v10147_v42  ;;  %v11290_v4 = vld [vmem:[%s12385_s29 + $0x324] sm:$0xf0]  ;;  %v10139_v32 = vld [vmem:[%s12385_s29 + $0x3a0] sm:$0xf]  ;;  %v9939_v10 = vld [vmem:[%s12385_s29 + $0x210] sm:$0xf]  ;;  %v10012_v7 = vor.u32 %v11274_v14, %v10011_v2 }
 0x719   : > { %7263 = vmatpush.bf16.msrb.mxu3 %v10180_v18  ;;  %v13856_v15 = vld [vmem:[#allocation1 + $0x12] sm:$0xff]  ;;  %v13858_v36 = vld [vmem:[#allocation1] sm:$0xff]  ;;  %v13864_v40 = vld [vmem:[#allocation1 + $0x9] sm:$0xff]  ;;  %v10076_v8 = vor.u32 %v11290_v4, %v10075_v62 }
 0x71a   : > { %7225 = vmatpush.bf16.msrb.mxu0 %v9980_v39  ;;  %v13860_v52 = vld [vmem:[#allocation1 + $0x1b] sm:$0xff]  ;;  %7206 = vmatmul.bf16.vlgmr.msra.gmra.mxu2 %v13856_v15  ;;  %v11256_v59 = vld [vmem:[%s12385_s29 + $0x214] sm:$0xf0]  ;;  %v9995_v44 = vld [vmem:[%s12385_s29 + $0x280] sm:$0xf] }
 0x71b   : > { %7238 = vmatpush.bf16.msrb.mxu1 %v10044_v45  ;;  %v11306_v24 = vld [vmem:[%s12385_s29 + $0x3a4] sm:$0xf0]  ;;  %7180 = vmatmul.bf16.vlgmr.msra.gmra.mxu0 %v13858_v36  ;;  %v10003_v18 = vld [vmem:[%s12385_s29 + $0x290] sm:$0xf]  ;;  %v11272_v22 = vld [vmem:[%s12385_s29 + $0x294] sm:$0xf0]  ;;  %v9940_v20 = vor.u32 %v11256_v59, %v9939_v10 }
 0x71c   : > { %7251 = vmatpush.bf16.msrb.mxu2 %v10108_v13  ;;  %7219 = vmatmul.bf16.vlgmr.msra.gmra.mxu3 %v13860_v52  ;;  %v10140_v3 = vor.u32 %v11306_v24, %v10139_v32  ;;  %v10067_v25 = vld [vmem:[%s12385_s29 + $0x310] sm:$0xf]  ;;  %v11288_v53 = vld [vmem:[%s12385_s29 + $0x314] sm:$0xf0]  ;;  %v9931_v45 = vld [vmem:[%s12385_s29 + $0x200] sm:$0xf]  ;;  %v10004_v34 = vor.u32 %v11272_v22, %v10003_v18 }
 0x71d   : > { %7264 = vmatpush.bf16.msrb.mxu3 %v10172_v51  ;;  %7193 = vmatmul.bf16.vlgmr.msra.gmra.mxu1 %v13864_v40  ;;  %v10131_v31 = vld [vmem:[%s12385_s29 + $0x390] sm:$0xf]  ;;  %v11304_v39 = vld [vmem:[%s12385_s29 + $0x394] sm:$0xf0]  ;;  %v11254_v13 = vld [vmem:[%s12385_s29 + $0x204] sm:$0xf0]  ;;  %v10068_v50 = vor.u32 %v11288_v53, %v10067_v25 }
 0x71e   : > { %7226 = vmatpush.bf16.msrb.mxu0 %v9972_v0  ;;  %v11270_v11 = vld [vmem:[%s12385_s29 + $0x284] sm:$0xf0]  ;;  %v10059_v51 = vld [vmem:[%s12385_s29 + $0x300] sm:$0xf]  ;;  %v13891_v0 = vld [vmem:[#allocation1 + $0x24] sm:$0xff]  ;;  %v9932_v29 = vor.u32 %v11254_v13, %v9931_v45 }
 0x71f   : > { %7239 = vmatpush.bf16.msrb.mxu1 %v10036_v41  ;;  %v11286_v5 = vld [vmem:[%s12385_s29 + $0x304] sm:$0xf0]  ;;  %v5593_v12 = vld [vmem:[#allocation2 + $0x8] sm:$0xff]  ;;  %v13893_v54 = vld [vmem:[#allocation1 + $0x3f] sm:$0xff]  ;;  %v10132_v41 = vor.u32 %v11304_v39, %v10131_v31 }
 0x720   : > { %7252 = vmatpush.bf16.msrb.mxu2 %v10100_v17  ;;  %v13889_v58 = vld [vmem:[#allocation1 + $0x36] sm:$0xff]  ;;  %v13895_v48 = vld [vmem:[#allocation1 + $0x2d] sm:$0xff]  ;;  %v10243_v61 = vld [vmem:[%s12385_s29 + $0x470] sm:$0xf] }
 0x721   : > { %7265 = vmatpush.bf16.msrb.mxu3 %v10164_v56  ;;  %v10123_v17 = vld [vmem:[%s12385_s29 + $0x380] sm:$0xf]  ;;  %v11302_v1 = vld [vmem:[%s12385_s29 + $0x384] sm:$0xf0]  ;;  %5867 = vst [vmem:[#allocation1] ss:$9 sm:$0xff] %v5593_v12 }
 0x722   : > { %7227 = vmatpush.bf16.msrb.mxu0 %v9964_v60  ;;  %v11332_v56 = vld [vmem:[%s12385_s29 + $0x474] sm:$0xf0]  ;;  %v10307_v9 = vld [vmem:[%s12385_s29 + $0x4f0] sm:$0xf]  ;;  %v9996_v60 = vor.u32 %v11270_v11, %v9995_v44  ;;  %v10124_v49 = vor.u32 %v11302_v1, %v10123_v17  ;;  %v10235_v57 = vld [vmem:[%s12385_s29 + $0x460] sm:$0xf] }
 0x723   : > { %7240 = vmatpush.bf16.msrb.mxu1 %v10028_v16  ;;  %v11348_v27 = vld [vmem:[%s12385_s29 + $0x4f4] sm:$0xf0]  ;;  %v10371_v37 = vld [vmem:[%s12385_s29 + $0x570] sm:$0xf]  ;;  %v10060_v16 = vor.u32 %v11286_v5, %v10059_v51  ;;  %v10244_v23 = vor.u32 %v11332_v56, %v10243_v61  ;;  %v11330_v55 = vld [vmem:[%s12385_s29 + $0x464] sm:$0xf0] }
 0x724   : > { %7253 = vmatpush.bf16.msrb.mxu2 %v10092_v26  ;;  %v11364_v19 = vld [vmem:[%s12385_s29 + $0x574] sm:$0xf0]  ;;  %v10435_v26 = vld [vmem:[%s12385_s29 + $0x5f0] sm:$0xf]  ;;  %v10299_v42 = vld [vmem:[%s12385_s29 + $0x4e0] sm:$0xf]  ;;  %v10236_v2 = vor.u32 %v11330_v55, %v10235_v57 }
 0x725   : > { %7266 = vmatpush.bf16.msrb.mxu3 %v10156_v21  ;;  %v11380_v28 = vld [vmem:[%s12385_s29 + $0x5f4] sm:$0xf0]  ;;  %v10308_v21 = vor.u32 %v11348_v27, %v10307_v9  ;;  %v10372_v38 = vor.u32 %v11364_v19, %v10371_v37  ;;  %v11346_v35 = vld [vmem:[%s12385_s29 + $0x4e4] sm:$0xf0]  ;;  %v10227_v62 = vld [vmem:[%s12385_s29 + $0x450] sm:$0xf] }
 0x726   : > { %7228 = vmatpush.bf16.msrb.mxu0 %v9956_v47  ;;  %v10436_v46 = vor.u32 %v11380_v28, %v10435_v26  ;;  %v10363_v47 = vld [vmem:[%s12385_s29 + $0x560] sm:$0xf]  ;;  %v11378_v33 = vld [vmem:[%s12385_s29 + $0x5e4] sm:$0xf0]  ;;  %v11328_v4 = vld [vmem:[%s12385_s29 + $0x454] sm:$0xf0] }
 0x727   : > { %7241 = vmatpush.bf16.msrb.mxu1 %v10020_v6  ;;  %v11362_v6 = vld [vmem:[%s12385_s29 + $0x564] sm:$0xf0]  ;;  %v10291_v32 = vld [vmem:[%s12385_s29 + $0x4d0] sm:$0xf]  ;;  %v11376_v59 = vld [vmem:[%s12385_s29 + $0x5d4] sm:$0xf0]  ;;  %v10228_v18 = vor.u32 %v11328_v4, %v10227_v62 }
 0x728   : > { %7254 = vmatpush.bf16.msrb.mxu2 %v10084_v43  ;;  %v10427_v43 = vld [vmem:[%s12385_s29 + $0x5e0] sm:$0xf]  ;;  %v10364_v14 = vor.u32 %v11362_v6, %v10363_v47  ;;  %v10355_v10 = vld [vmem:[%s12385_s29 + $0x550] sm:$0xf]  ;;  %v11326_v53 = vld [vmem:[%s12385_s29 + $0x444] sm:$0xf0] }
 0x729   : > { %7267 = vmatpush.bf16.msrb.mxu3 %v10148_v63  ;;  %v10300_v63 = vor.u32 %v11346_v35, %v10299_v42  ;;  %v10428_v24 = vor.u32 %v11378_v33, %v10427_v43  ;;  %v10219_v25 = vld [vmem:[%s12385_s29 + $0x440] sm:$0xf]  ;;  %v11342_v45 = vld [vmem:[%s12385_s29 + $0x4c4] sm:$0xf0]  ;;  %v11340_v1 = vld [vmem:[%s12385_s29 + $0x4b4] sm:$0xf0] }
 0x72a   : > { %7229 = vmatpush.bf16.msrb.mxu0 %v9948_v30  ;;  %v11344_v30 = vld [vmem:[%s12385_s29 + $0x4d4] sm:$0xf0]  ;;  %v10283_v31 = vld [vmem:[%s12385_s29 + $0x4c0] sm:$0xf]  ;;  %v11374_v11 = vld [vmem:[%s12385_s29 + $0x5c4] sm:$0xf0]  ;;  %v10220_v51 = vor.u32 %v11326_v53, %v10219_v25 }
 0x72b   : > { %7242 = vmatpush.bf16.msrb.mxu1 %v10012_v7  ;;  %v11360_v7 = vld [vmem:[%s12385_s29 + $0x554] sm:$0xf0]  ;;  %v10292_v22 = vor.u32 %v11344_v30, %v10291_v32  ;;  %v10347_v13 = vld [vmem:[%s12385_s29 + $0x540] sm:$0xf]  ;;  %v10284_v5 = vor.u32 %v11342_v45, %v10283_v31  ;;  %v10339_v61 = vld [vmem:[%s12385_s29 + $0x530] sm:$0xf] }
 0x72c   : > { %7255 = vmatpush.bf16.msrb.mxu2 %v10076_v8  ;;  %v10419_v8 = vld [vmem:[%s12385_s29 + $0x5d0] sm:$0xf]  ;;  %v10411_v44 = vld [vmem:[%s12385_s29 + $0x5c0] sm:$0xf]  ;;  %v11356_v56 = vld [vmem:[%s12385_s29 + $0x534] sm:$0xf0] }
 0x72d   : > { %7268 = vmatpush.bf16.msrb.mxu3 %v10140_v3  ;;  %v10356_v3 = vor.u32 %v11360_v7, %v10355_v10  ;;  %v10420_v39 = vor.u32 %v11376_v59, %v10419_v8  ;;  %v10412_v17 = vor.u32 %v11374_v11, %v10411_v44  ;;  %v10403_v9 = vld [vmem:[%s12385_s29 + $0x5b0] sm:$0xf]  ;;  %v10340_v19 = vor.u32 %v11356_v56, %v10339_v61  ;;  %v10267_v26 = vld [vmem:[%s12385_s29 + $0x4a0] sm:$0xf]  ;;  %v11370_v57 = vld [vmem:[%s12385_s29 + $0x5a4] sm:$0xf0] }
 0x72e   : > { %7230 = vmatpush.bf16.msrb.mxu0 %v9940_v20  ;;  %v11358_v20 = vld [vmem:[%s12385_s29 + $0x544] sm:$0xf0]  ;;  %v10195_v35 = vld [vmem:[%s12385_s29 + $0x410] sm:$0xf]  ;;  %v11320_v47 = vld [vmem:[%s12385_s29 + $0x414] sm:$0xf0] }
 0x72f   : > { %7243 = vmatpush.bf16.msrb.mxu1 %v10004_v34  ;;  %v10348_v12 = vor.u32 %v11358_v20, %v10347_v13  ;;  %v10211_v34 = vld [vmem:[%s12385_s29 + $0x430] sm:$0xf]  ;;  %v11336_v33 = vld [vmem:[%s12385_s29 + $0x494] sm:$0xf0]  ;;  %v10196_v4 = vor.u32 %v11320_v47, %v10195_v35  ;;  %v10187_v32 = vld [vmem:[%s12385_s29 + $0x400] sm:$0xf] }
 0x730   : > { %7256 = vmatpush.bf16.msrb.mxu2 %v10068_v50  ;;  %v11324_v50 = vld [vmem:[%s12385_s29 + $0x434] sm:$0xf0]  ;;  %v10259_v6 = vld [vmem:[%s12385_s29 + $0x490] sm:$0xf]  ;;  %v10251_v7 = vld [vmem:[%s12385_s29 + $0x480] sm:$0xf] }
 0x731   : > { %7269 = vmatpush.bf16.msrb.mxu3 %v10132_v41  ;;  %v10275_v41 = vld [vmem:[%s12385_s29 + $0x4b0] sm:$0xf]  ;;  %v10212_v27 = vor.u32 %v11324_v50, %v10211_v34  ;;  %v11368_v62 = vld [vmem:[%s12385_s29 + $0x594] sm:$0xf0]  ;;  %v10260_v30 = vor.u32 %v11336_v33, %v10259_v6  ;;  %v11334_v8 = vld [vmem:[%s12385_s29 + $0x484] sm:$0xf0] }
 0x732   : > { %7231 = vmatpush.bf16.msrb.mxu0 %v9932_v29  ;;  %v11372_v29 = vld [vmem:[%s12385_s29 + $0x5b4] sm:$0xf0]  ;;  %v10276_v37 = vor.u32 %v11340_v1, %v10275_v41  ;;  %v10315_v59 = vld [vmem:[%s12385_s29 + $0x500] sm:$0xf]  ;;  %v11366_v25 = vld [vmem:[%s12385_s29 + $0x584] sm:$0xf0]  ;;  %v10252_v11 = vor.u32 %v11334_v8, %v10251_v7 }
 0x733   : > { %7244 = vmatpush.bf16.msrb.mxu1 %v9996_v60  ;;  %v10203_v60 = vld [vmem:[%s12385_s29 + $0x420] sm:$0xf]  ;;  %v10404_v28 = vor.u32 %v11372_v29, %v10403_v9  ;;  %v10499_v53 = vld [vmem:[%s12385_s29 + $0x670] sm:$0xf]  ;;  %v11396_v31 = vld [vmem:[%s12385_s29 + $0x674] sm:$0xf0] }
 0x734   : > { %7257 = vmatpush.bf16.msrb.mxu2 %v10060_v16  ;;  %v11322_v16 = vld [vmem:[%s12385_s29 + $0x424] sm:$0xf0]  ;;  %v11412_v13 = vld [vmem:[%s12385_s29 + $0x6f4] sm:$0xf0]  ;;  %v10627_v20 = vld [vmem:[%s12385_s29 + $0x770] sm:$0xf]  ;;  %v10500_v50 = vor.u32 %v11396_v31, %v10499_v53 }
 0x735   : > { %7270 = vmatpush.bf16.msrb.mxu3 %v10124_v49  ;;  %7232 = vmatmul.bf16.vlgmr.msrb.gmra.mxu0 %v13891_v0  ;;  %v11338_v49 = vld [vmem:[%s12385_s29 + $0x4a4] sm:$0xf0]  ;;  %v10204_v55 = vor.u32 %v11322_v16, %v10203_v60  ;;  %v11428_v44 = vld [vmem:[%s12385_s29 + $0x774] sm:$0xf0]  ;;  %v10491_v1 = vld [vmem:[%s12385_s29 + $0x660] sm:$0xf] }
 0x736   : > { %7276 = vmatpush.bf16.msra.mxu0 %v10244_v23  ;;  %7245 = vmatmul.bf16.vlgmr.msrb.gmra.mxu1 %v13895_v48  ;;  %v10331_v23 = vld [vmem:[%s12385_s29 + $0x520] sm:$0xf]  ;;  %v10268_v42 = vor.u32 %v11338_v49, %v10267_v26  ;;  %v11394_v61 = vld [vmem:[%s12385_s29 + $0x664] sm:$0xf0]  ;;  %v11408_v35 = vld [vmem:[%s12385_s29 + $0x6d4] sm:$0xf0] }
 0x737   : > { %7289 = vmatpush.bf16.msra.mxu1 %v10308_v21  ;;  %7258 = vmatmul.bf16.vlgmr.msrb.gmra.mxu2 %v13889_v58  ;;  %v11354_v21 = vld [vmem:[%s12385_s29 + $0x524] sm:$0xf0]  ;;  %v10555_v56 = vld [vmem:[%s12385_s29 + $0x6e0] sm:$0xf]  ;;  %v10611_v47 = vld [vmem:[%s12385_s29 + $0x750] sm:$0xf] }
 0x738   : > { %7302 = vmatpush.bf16.msra.mxu2 %v10372_v38  ;;  %7271 = vmatmul.bf16.vlgmr.msrb.gmra.mxu3 %v13893_v54  ;;  %v10395_v38 = vld [vmem:[%s12385_s29 + $0x5a0] sm:$0xf]  ;;  %v11410_v29 = vld [vmem:[%s12385_s29 + $0x6e4] sm:$0xf0]  ;;  %v11424_v6 = vld [vmem:[%s12385_s29 + $0x754] sm:$0xf0] }
 0x739   : > { %7315 = vmatpush.bf16.msra.mxu3 %v10436_v46  ;;  %v10332_v46 = vor.u32 %v11354_v21, %v10331_v23  ;;  %v10396_v43 = vor.u32 %v11370_v57, %v10395_v38  ;;  %v10683_v60 = vld [vmem:[%s12385_s29 + $0x7e0] sm:$0xf]  ;;  %v11442_v16 = vld [vmem:[%s12385_s29 + $0x7e4] sm:$0xf0]  ;;  %v10492_v23 = vor.u32 %v11394_v61, %v10491_v1  ;;  %v10556_v21 = vor.u32 %v11410_v29, %v10555_v56  ;;  %v10483_v57 = vld [vmem:[%s12385_s29 + $0x650] sm:$0xf] }
 0x73a   : > { %7277 = vmatpush.bf16.msra.mxu0 %v10236_v2  ;;  %v10323_v2 = vld [vmem:[%s12385_s29 + $0x510] sm:$0xf]  ;;  %v5870_v26 = vld [vmem:[#allocation1 + $0x12] sm:$0xff]  ;;  %v11440_v33 = vld [vmem:[%s12385_s29 + $0x7d4] sm:$0xf0] }
 0x73b   : > { %7290 = vmatpush.bf16.msra.mxu1 %v10300_v63  ;;  %v11352_v63 = vld [vmem:[%s12385_s29 + $0x514] sm:$0xf0]  ;;  %v5871_v49 = vld [vmem:[#allocation1 + $0x1b] sm:$0xff]  ;;  %v10667_v8 = vld [vmem:[%s12385_s29 + $0x7c0] sm:$0xf] }
 0x73c   : > { %7303 = vmatpush.bf16.msra.mxu2 %v10364_v14  ;;  %v10387_v14 = vld [vmem:[%s12385_s29 + $0x590] sm:$0xf]  ;;  %v10324_v10 = vor.u32 %v11352_v63, %v10323_v2  ;;  %v11422_v7 = vld [vmem:[%s12385_s29 + $0x744] sm:$0xf0]  ;;  %v11388_v53 = vld [vmem:[%s12385_s29 + $0x634] sm:$0xf0] }
 0x73d   : > { %7316 = vmatpush.bf16.msra.mxu3 %v10428_v24  ;;  %v11318_v24 = vld [vmem:[%s12385_s29 + $0x404] sm:$0xf0]  ;;  %v10531_v31 = vld [vmem:[%s12385_s29 + $0x6b0] sm:$0xf]  ;;  %v10587_v61 = vld [vmem:[%s12385_s29 + $0x720] sm:$0xf] }
 0x73e   : > { %7278 = vmatpush.bf16.msra.mxu0 %v10228_v18  ;;  %v10388_v18 = vor.u32 %v11368_v62, %v10387_v14  ;;  %v10188_v45 = vor.u32 %v11318_v24, %v10187_v32  ;;  %v10612_v14 = vor.u32 %v11424_v6, %v10611_v47  ;;  %v10475_v62 = vld [vmem:[%s12385_s29 + $0x640] sm:$0xf]  ;;  %v11402_v1 = vld [vmem:[%s12385_s29 + $0x6a4] sm:$0xf0] }
 0x73f   : > { %7291 = vmatpush.bf16.msra.mxu1 %v10292_v22  ;;  %v11350_v22 = vld [vmem:[%s12385_s29 + $0x504] sm:$0xf0]  ;;  %v10539_v32 = vld [vmem:[%s12385_s29 + $0x6c0] sm:$0xf] }
 0x740   : > { %7304 = vmatpush.bf16.msra.mxu2 %v10356_v3  ;;  %v10379_v3 = vld [vmem:[%s12385_s29 + $0x580] sm:$0xf]  ;;  %v11418_v56 = vld [vmem:[%s12385_s29 + $0x724] sm:$0xf0] }
 0x741   : > { %7317 = vmatpush.bf16.msra.mxu3 %v10420_v39  ;;  %v10563_v39 = vld [vmem:[%s12385_s29 + $0x6f0] sm:$0xf]  ;;  %v10380_v34 = vor.u32 %v11366_v25, %v10379_v3  ;;  %v11434_v29 = vld [vmem:[%s12385_s29 + $0x7a4] sm:$0xf0]  ;;  %v10507_v6 = vld [vmem:[%s12385_s29 + $0x680] sm:$0xf] }
 0x742   : > { %7279 = vmatpush.bf16.msra.mxu0 %v10220_v51  ;;  %v10316_v51 = vor.u32 %v11350_v22, %v10315_v59  ;;  %v10564_v41 = vor.u32 %v11412_v13, %v10563_v39  ;;  %v11438_v59 = vld [vmem:[%s12385_s29 + $0x7c4] sm:$0xf0]  ;;  %v10467_v25 = vld [vmem:[%s12385_s29 + $0x630] sm:$0xf] }
 0x743   : > { %7292 = vmatpush.bf16.msra.mxu1 %v10284_v5  ;;  %v10691_v5 = vld [vmem:[%s12385_s29 + $0x7f0] sm:$0xf]  ;;  %v10668_v39 = vor.u32 %v11438_v59, %v10667_v8  ;;  %v9861_v8 = vld [vmem:[%s12385_s29 + $0x178] sm:$0xf0] }
 0x744   : > { %7305 = vmatpush.bf16.msra.mxu2 %v10348_v12  ;;  %v11444_v12 = vld [vmem:[%s12385_s29 + $0x7f4] sm:$0xf0]  ;;  %v10595_v13 = vld [vmem:[%s12385_s29 + $0x730] sm:$0xf] }
 0x745   : > { %7318 = vmatpush.bf16.msra.mxu3 %v10412_v17  ;;  %v10628_v17 = vor.u32 %v11428_v44, %v10627_v20  ;;  %v10692_v9 = vor.u32 %v11444_v12, %v10691_v5  ;;  %v11420_v20 = vld [vmem:[%s12385_s29 + $0x734] sm:$0xf0]  ;;  %v10659_v44 = vld [vmem:[%s12385_s29 + $0x7b0] sm:$0xf] }
 0x746   : > { %7280 = vmatpush.bf16.msra.mxu0 %v10212_v27  ;;  %v10619_v27 = vld [vmem:[%s12385_s29 + $0x760] sm:$0xf]  ;;  %v10596_v12 = vor.u32 %v11420_v20, %v10595_v13  ;;  %v9725_v13 = vld [vmem:[%s12385_s29 + $0x68] sm:$0xf0]  ;;  %v11217_v20 = vld [vmem:[%s12385_s29 + $0xe4] sm:$0xf] }
 0x747   : > { %7293 = vmatpush.bf16.msra.mxu1 %v10276_v37  ;;  %v11426_v37 = vld [vmem:[%s12385_s29 + $0x764] sm:$0xf0] }
 0x748   : > { %7306 = vmatpush.bf16.msra.mxu2 %v10340_v19  ;;  %v5868_v19 = vld [vmem:[#allocation1] sm:$0xff]  ;;  %v10620_v38 = vor.u32 %v11426_v37, %v10619_v27 }
 0x749   : > { %7319 = vmatpush.bf16.msra.mxu3 %v10404_v28  ;;  %v5869_v28 = vld [vmem:[#allocation1 + $0x9] sm:$0xff] }
 0x74a   : > { %7281 = vmatpush.bf16.msra.mxu0 %v10204_v55  ;;  %v11392_v55 = vld [vmem:[%s12385_s29 + $0x654] sm:$0xf0] }
 0x74b   : > { %7294 = vmatpush.bf16.msra.mxu1 %v10268_v42  ;;  %v10547_v42 = vld [vmem:[%s12385_s29 + $0x6d0] sm:$0xf]  ;;  %v10484_v2 = vor.u32 %v11392_v55, %v10483_v57  ;;  %v11432_v57 = vld [vmem:[%s12385_s29 + $0x794] sm:$0xf0] }
 0x74c   : > { %7307 = vmatpush.bf16.msra.mxu2 %v10332_v46  ;;  %v10684_v46 = vor.u32 %v11442_v16, %v10683_v60  ;;  %v10548_v63 = vor.u32 %v11408_v35, %v10547_v42  ;;  %v10451_v60 = vld [vmem:[%s12385_s29 + $0x610] sm:$0xf]  ;;  %v11384_v16 = vld [vmem:[%s12385_s29 + $0x614] sm:$0xf0]  ;;  %v10443_v42 = vld [vmem:[%s12385_s29 + $0x600] sm:$0xf] }
 0x74d   : > { %7320 = vmatpush.bf16.msra.mxu3 %v10396_v43  ;;  %v10675_v43 = vld [vmem:[%s12385_s29 + $0x7d0] sm:$0xf]  ;;  %v10452_v55 = vor.u32 %v11384_v16, %v10451_v60  ;;  %v9781_v60 = vld [vmem:[%s12385_s29 + $0xd8] sm:$0xf0]  ;;  %v11231_v16 = vld [vmem:[%s12385_s29 + $0x154] sm:$0xf] }
 0x74e   : > { %7282 = vmatpush.bf16.msra.mxu0 %v10196_v4  ;;  %v11390_v4 = vld [vmem:[%s12385_s29 + $0x644] sm:$0xf0]  ;;  %v10676_v24 = vor.u32 %v11440_v33, %v10675_v43  ;;  %v10571_v33 = vld [vmem:[%s12385_s29 + $0x700] sm:$0xf] }
 0x74f   : > { %7295 = vmatpush.bf16.msra.mxu1 %v10260_v30  ;;  %v11406_v30 = vld [vmem:[%s12385_s29 + $0x6c4] sm:$0xf0] }
 0x750   : > { %7308 = vmatpush.bf16.msra.mxu2 %v10324_v10  ;;  %v10603_v10 = vld [vmem:[%s12385_s29 + $0x740] sm:$0xf]  ;;  %v10540_v22 = vor.u32 %v11406_v30, %v10539_v32  ;;  %v11398_v43 = vld [vmem:[%s12385_s29 + $0x684] sm:$0xf0]  ;;  %v9733_v32 = vld [vmem:[%s12385_s29 + $0x78] sm:$0xf0] }
 0x751   : > { %7321 = vmatpush.bf16.msra.mxu3 %v10388_v18  ;;  %v10476_v18 = vor.u32 %v11390_v4, %v10475_v62  ;;  %v10604_v3 = vor.u32 %v11422_v7, %v10603_v10  ;;  %v11430_v62 = vld [vmem:[%s12385_s29 + $0x784] sm:$0xf0]  ;;  %v11203_v4 = vld [vmem:[%s12385_s29 + $0x74] sm:$0xf]  ;;  %v9797_v10 = vld [vmem:[%s12385_s29 + $0xf8] sm:$0xf0]  ;;  %v10508_v59 = vor.u32 %v11398_v43, %v10507_v6 }
 0x752   : > { %7283 = vmatpush.bf16.msra.mxu0 %v10188_v45  ;;  %v11404_v45 = vld [vmem:[%s12385_s29 + $0x6b4] sm:$0xf0]  ;;  %v11235_v7 = vld [vmem:[%s12385_s29 + $0x174] sm:$0xf]  ;;  %v9837_v6 = vld [vmem:[%s12385_s29 + $0x148] sm:$0xf0] }
 0x753   : > { %7296 = vmatpush.bf16.msra.mxu1 %v10252_v11  ;;  %v11436_v11 = vld [vmem:[%s12385_s29 + $0x7b4] sm:$0xf0]  ;;  %v10532_v5 = vor.u32 %v11404_v45, %v10531_v31  ;;  %v11201_v45 = vld [vmem:[%s12385_s29 + $0x64] sm:$0xf] }
 0x754   : > { %7309 = vmatpush.bf16.msra.mxu2 %v10316_v51  ;;  %v10468_v51 = vor.u32 %v11388_v53, %v10467_v25  ;;  %v9736_v53 = vor.u32 %v11203_v4, %v9733_v32  ;;  %v11245_v43 = vld [vmem:[%s12385_s29 + $0x1c4] sm:$0xf]  ;;  %v9701_v4 = vld [vmem:[%s12385_s29 + $0x38] sm:$0xf0]  ;;  %v11211_v32 = vld [vmem:[%s12385_s29 + $0xb4] sm:$0xf] }
 0x755   : > { %7322 = vmatpush.bf16.msra.mxu3 %v10380_v34  ;;  %7284 = vmatmul.bf16.vlgmr.msra.gmra.mxu0 %v5868_v19  ;;  %v10459_v34 = vld [vmem:[%s12385_s29 + $0x620] sm:$0xf]  ;;  %v10588_v19 = vor.u32 %v11418_v56, %v10587_v61  ;;  %v9728_v61 = vor.u32 %v11201_v45, %v9725_v13  ;;  %v9757_v45 = vld [vmem:[%s12385_s29 + $0xa8] sm:$0xf0]  ;;  %v11225_v13 = vld [vmem:[%s12385_s29 + $0x124] sm:$0xf] }
 0x756   : > { %7328 = vmatpush.bf16.msrb.mxu0 %v10500_v50  ;;  %7297 = vmatmul.bf16.vlgmr.msra.gmra.mxu1 %v5869_v28  ;;  %v11386_v50 = vld [vmem:[%s12385_s29 + $0x624] sm:$0xf0] }
 0x757   : > { %7341 = vmatpush.bf16.msrb.mxu1 %v10564_v41  ;;  %7310 = vmatmul.bf16.vlgmr.msra.gmra.mxu2 %v5870_v26  ;;  %v10523_v41 = vld [vmem:[%s12385_s29 + $0x6a0] sm:$0xf]  ;;  %v10460_v27 = vor.u32 %v11386_v50, %v10459_v34  ;;  %v10515_v26 = vld [vmem:[%s12385_s29 + $0x690] sm:$0xf]  ;;  %v11249_v34 = vld [vmem:[%s12385_s29 + $0x1e4] sm:$0xf] }
 0x758   : > { %7354 = vmatpush.bf16.msrb.mxu2 %v10628_v17  ;;  %7323 = vmatmul.bf16.vlgmr.msra.gmra.mxu3 %v5871_v49  ;;  %v10660_v17 = vor.u32 %v11436_v11, %v10659_v44  ;;  %v10524_v37 = vor.u32 %v11402_v1, %v10523_v41  ;;  %v11400_v49 = vld [vmem:[%s12385_s29 + $0x694] sm:$0xf0]  ;;  %v9789_v11 = vld [vmem:[%s12385_s29 + $0xe8] sm:$0xf0] }
 0x759   : > { %7367 = vmatpush.bf16.msrb.mxu3 %v10692_v9  ;;  %v10651_v9 = vld [vmem:[%s12385_s29 + $0x7a0] sm:$0xf]  ;;  %v10516_v35 = vor.u32 %v11400_v49, %v10515_v26  ;;  %v9917_v50 = vld [vmem:[%s12385_s29 + $0x1e8] sm:$0xf0]  ;;  %v9792_v56 = vor.u32 %v11217_v20, %v9789_v11  ;;  %v9845_v26 = vld [vmem:[%s12385_s29 + $0x158] sm:$0xf0] }
 0x75a   : > { %7329 = vmatpush.bf16.msrb.mxu0 %v10492_v23  ;;  %v10652_v28 = vor.u32 %v11434_v29, %v10651_v9  ;;  %v10579_v23 = vld [vmem:[%s12385_s29 + $0x710] sm:$0xf]  ;;  %v5874_v41 = vld [vmem:[#allocation1 + $0x36] sm:$0xff]  ;;  %v11199_v29 = vld [vmem:[%s12385_s29 + $0x54] sm:$0xf] }
 0x75b   : > { %7342 = vmatpush.bf16.msrb.mxu1 %v10556_v21  ;;  %v11416_v21 = vld [vmem:[%s12385_s29 + $0x714] sm:$0xf0]  ;;  %v5875_v1 = vld [vmem:[#allocation1 + $0x3f] sm:$0xff]  ;;  %v9909_v49 = vld [vmem:[%s12385_s29 + $0x1d8] sm:$0xf0] }
 0x75c   : > { %7355 = vmatpush.bf16.msrb.mxu2 %v10620_v38  ;;  %v10643_v38 = vld [vmem:[%s12385_s29 + $0x790] sm:$0xf]  ;;  %v10580_v47 = vor.u32 %v11416_v21, %v10579_v23  ;;  %v9821_v20 = vld [vmem:[%s12385_s29 + $0x128] sm:$0xf0] }
 0x75d   : > { %7368 = vmatpush.bf16.msrb.mxu3 %v10684_v46  ;;  %v11382_v46 = vld [vmem:[%s12385_s29 + $0x604] sm:$0xf0]  ;;  %v9885_v11 = vld [vmem:[%s12385_s29 + $0x1a8] sm:$0xf0] }
 0x75e   : > { %7330 = vmatpush.bf16.msrb.mxu0 %v10484_v2  ;;  %v10644_v2 = vor.u32 %v11432_v57, %v10643_v38  ;;  %v10444_v30 = vor.u32 %v11382_v46, %v10443_v42  ;;  %v9848_v38 = vor.u32 %v11231_v16, %v9845_v26  ;;  %v11197_v57 = vld [vmem:[%s12385_s29 + $0x44] sm:$0xf] }
 0x75f   : > { %7343 = vmatpush.bf16.msrb.mxu1 %v10548_v63  ;;  %v11414_v63 = vld [vmem:[%s12385_s29 + $0x704] sm:$0xf0]  ;;  %v11213_v42 = vld [vmem:[%s12385_s29 + $0xc4] sm:$0xf] }
 0x760   : > { %7356 = vmatpush.bf16.msrb.mxu2 %v10612_v14  ;;  %v10635_v14 = vld [vmem:[%s12385_s29 + $0x780] sm:$0xf]  ;;  %v11205_v26 = vld [vmem:[%s12385_s29 + $0x84] sm:$0xf] }
 0x761   : > { %7369 = vmatpush.bf16.msrb.mxu3 %v10676_v24  ;;  %v11219_v24 = vld [vmem:[%s12385_s29 + $0xf4] sm:$0xf]  ;;  %v10636_v25 = vor.u32 %v11430_v62, %v10635_v14 }
 0x762   : > { %7331 = vmatpush.bf16.msrb.mxu0 %v10476_v18  ;;  %v10572_v18 = vor.u32 %v11414_v63, %v10571_v33  ;;  %v9800_v31 = vor.u32 %v11219_v24, %v9797_v10  ;;  %v9901_v33 = vld [vmem:[%s12385_s29 + $0x1c8] sm:$0xf0]  ;;  %v11195_v62 = vld [vmem:[%s12385_s29 + $0x34] sm:$0xf] }
 0x763   : > { %7344 = vmatpush.bf16.msrb.mxu1 %v10540_v22  ;;  %v11251_v22 = vld [vmem:[%s12385_s29 + $0x1f4] sm:$0xf]  ;;  %v9904_v24 = vor.u32 %v11245_v43, %v9901_v33  ;;  %v10117_v43 = vld [vmem:[%s12385_s29 + $0x378] sm:$0xf0] }
 0x764   : > { %7357 = vmatpush.bf16.msrb.mxu2 %v10604_v3  ;;  %v9925_v3 = vld [vmem:[%s12385_s29 + $0x1f8] sm:$0xf0]  ;;  %v11227_v10 = vld [vmem:[%s12385_s29 + $0x134] sm:$0xf] }
 0x765   : > { %7370 = vmatpush.bf16.msrb.mxu3 %v10668_v39  ;;  %v9864_v39 = vor.u32 %v11235_v7, %v9861_v8  ;;  %v9928_v44 = vor.u32 %v11251_v22, %v9925_v3  ;;  %v9829_v7 = vld [vmem:[%s12385_s29 + $0x138] sm:$0xf0]  ;;  %v11243_v8 = vld [vmem:[%s12385_s29 + $0x1b4] sm:$0xf] }
 0x766   : > { %7332 = vmatpush.bf16.msrb.mxu0 %v10468_v51  ;;  %v11233_v51 = vld [vmem:[%s12385_s29 + $0x164] sm:$0xf]  ;;  %v9832_v3 = vor.u32 %v11227_v10, %v9829_v7  ;;  %v9981_v10 = vld [vmem:[%s12385_s29 + $0x268] sm:$0xf0] }
 0x767   : > { %7345 = vmatpush.bf16.msrb.mxu1 %v10532_v5  ;;  %v9853_v5 = vld [vmem:[%s12385_s29 + $0x168] sm:$0xf0]  ;;  %v11281_v7 = vld [vmem:[%s12385_s29 + $0x2e4] sm:$0xf] }
 0x768   : > { %7358 = vmatpush.bf16.msrb.mxu2 %v10596_v12  ;;  %v5872_v12 = vld [vmem:[#allocation1 + $0x24] sm:$0xff]  ;;  %v9856_v9 = vor.u32 %v11233_v51, %v9853_v5 }
 0x769   : > { %7371 = vmatpush.bf16.msrb.mxu3 %v10660_v17  ;;  %v5873_v17 = vld [vmem:[#allocation1 + $0x2d] sm:$0xff] }
 0x76a   : > { %7333 = vmatpush.bf16.msrb.mxu0 %v10460_v27  ;;  %v9717_v27 = vld [vmem:[%s12385_s29 + $0x58] sm:$0xf0] }
 0x76b   : > { %7346 = vmatpush.bf16.msrb.mxu1 %v10524_v37  ;;  %v11215_v37 = vld [vmem:[%s12385_s29 + $0xd4] sm:$0xf]  ;;  %v9720_v23 = vor.u32 %v11199_v29, %v9717_v27  ;;  %v9877_v29 = vld [vmem:[%s12385_s29 + $0x198] sm:$0xf0] }
 0x76c   : > { %7359 = vmatpush.bf16.msrb.mxu2 %v10588_v19  ;;  %v9920_v19 = vor.u32 %v11249_v34, %v9917_v50  ;;  %v9784_v21 = vor.u32 %v11215_v37, %v9781_v60  ;;  %v11191_v34 = vld [vmem:[%s12385_s29 + $0x14] sm:$0xf]  ;;  %v9685_v50 = vld [vmem:[%s12385_s29 + $0x18] sm:$0xf0]  ;;  %v11189_v37 = vld [vmem:[%s12385_s29 + $0x4] sm:$0xf] }
 0x76d   : > { %7372 = vmatpush.bf16.msrb.mxu3 %v10652_v28  ;;  %v11247_v28 = vld [vmem:[%s12385_s29 + $0x1d4] sm:$0xf]  ;;  %v9688_v27 = vor.u32 %v11191_v34, %v9685_v50  ;;  %v10165_v34 = vld [vmem:[%s12385_s29 + $0x3d8] sm:$0xf0] }
 0x76e   : > { %7334 = vmatpush.bf16.msrb.mxu0 %v10452_v55  ;;  %v9709_v55 = vld [vmem:[%s12385_s29 + $0x48] sm:$0xf0]  ;;  %v9912_v46 = vor.u32 %v11247_v28, %v9909_v49  ;;  %v11221_v49 = vld [vmem:[%s12385_s29 + $0x104] sm:$0xf] }
 0x76f   : > { %7347 = vmatpush.bf16.msrb.mxu1 %v10516_v35  ;;  %v9773_v35 = vld [vmem:[%s12385_s29 + $0xc8] sm:$0xf0] }
 0x770   : > { %7360 = vmatpush.bf16.msrb.mxu2 %v10580_v47  ;;  %v11229_v47 = vld [vmem:[%s12385_s29 + $0x144] sm:$0xf]  ;;  %v9776_v63 = vor.u32 %v11213_v42, %v9773_v35  ;;  %v9741_v28 = vld [vmem:[%s12385_s29 + $0x88] sm:$0xf0]  ;;  %v9989_v42 = vld [vmem:[%s12385_s29 + $0x278] sm:$0xf0] }
 0x771   : > { %7373 = vmatpush.bf16.msrb.mxu3 %v10644_v2  ;;  %v9712_v2 = vor.u32 %v11197_v57, %v9709_v55  ;;  %v9840_v14 = vor.u32 %v11229_v47, %v9837_v6  ;;  %v9869_v57 = vld [vmem:[%s12385_s29 + $0x188] sm:$0xf0]  ;;  %v11267_v55 = vld [vmem:[%s12385_s29 + $0x274] sm:$0xf]  ;;  %v10053_v47 = vld [vmem:[%s12385_s29 + $0x2f8] sm:$0xf0]  ;;  %v9744_v33 = vor.u32 %v11205_v26, %v9741_v28 }
 0x772   : > { %7335 = vmatpush.bf16.msrb.mxu0 %v10444_v30  ;;  %v9765_v30 = vld [vmem:[%s12385_s29 + $0xb8] sm:$0xf0]  ;;  %v11299_v6 = vld [vmem:[%s12385_s29 + $0x374] sm:$0xf] }
 0x773   : > { %7348 = vmatpush.bf16.msrb.mxu1 %v10508_v59  ;;  %v9893_v59 = vld [vmem:[%s12385_s29 + $0x1b8] sm:$0xf0]  ;;  %v9768_v22 = vor.u32 %v11211_v32, %v9765_v30  ;;  %v11265_v30 = vld [vmem:[%s12385_s29 + $0x264] sm:$0xf]  ;;  %v11275_v26 = vld [vmem:[%s12385_s29 + $0x2b4] sm:$0xf] }
 0x774   : > { %7361 = vmatpush.bf16.msrb.mxu2 %v10572_v18  ;;  %v9704_v18 = vor.u32 %v11195_v62, %v9701_v4  ;;  %v9992_v4 = vor.u32 %v11267_v55, %v9989_v42 }
 0x775   : > { %7374 = vmatpush.bf16.msrb.mxu3 %v10636_v25  ;;  %7336 = vmatmul.bf16.vlgmr.msrb.gmra.mxu0 %v5872_v12  ;;  %v11193_v25 = vld [vmem:[%s12385_s29 + $0x24] sm:$0xf]  ;;  %v9824_v12 = vor.u32 %v11225_v13, %v9821_v20  ;;  %v9973_v13 = vld [vmem:[%s12385_s29 + $0x258] sm:$0xf0]  ;;  %v11279_v20 = vld [vmem:[%s12385_s29 + $0x2d4] sm:$0xf] }
 0x776   : > { %7380 = vmatpush.bf16.msra.mxu0 %v9736_v53  ;;  %7349 = vmatmul.bf16.vlgmr.msrb.gmra.mxu1 %v5873_v17  ;;  %v9693_v53 = vld [vmem:[%s12385_s29 + $0x28] sm:$0xf0] }
 0x777   : > { %7393 = vmatpush.bf16.msra.mxu1 %v9800_v31  ;;  %7362 = vmatmul.bf16.vlgmr.msrb.gmra.mxu2 %v5874_v41  ;;  %v11209_v31 = vld [vmem:[%s12385_s29 + $0xa4] sm:$0xf]  ;;  %v9696_v51 = vor.u32 %v11193_v25, %v9693_v53  ;;  %v11207_v41 = vld [vmem:[%s12385_s29 + $0x94] sm:$0xf]  ;;  %v10173_v25 = vld [vmem:[%s12385_s29 + $0x3e8] sm:$0xf0]  ;;  %v9984_v53 = vor.u32 %v11265_v30, %v9981_v10 }
 0x778   : > { %7406 = vmatpush.bf16.msra.mxu2 %v9864_v39  ;;  %7375 = vmatmul.bf16.vlgmr.msrb.gmra.mxu3 %v5875_v1  ;;  %v9896_v39 = vor.u32 %v11243_v8, %v9893_v59  ;;  %v9760_v5 = vor.u32 %v11209_v31, %v9757_v45  ;;  %v9749_v1 = vld [vmem:[%s12385_s29 + $0x98] sm:$0xf0]  ;;  %v10045_v59 = vld [vmem:[%s12385_s29 + $0x2e8] sm:$0xf0]  ;;  %v11263_v45 = vld [vmem:[%s12385_s29 + $0x254] sm:$0xf] }
 0x779   : > { %7419 = vmatpush.bf16.msra.mxu3 %v9928_v44  ;;  %v11241_v44 = vld [vmem:[%s12385_s29 + $0x1a4] sm:$0xf]  ;;  %v9752_v60 = vor.u32 %v11207_v41, %v9749_v1  ;;  %v10048_v31 = vor.u32 %v11281_v7, %v10045_v59  ;;  %v9976_v50 = vor.u32 %v11263_v45, %v9973_v13  ;;  %v9965_v1 = vld [vmem:[%s12385_s29 + $0x248] sm:$0xf0]  ;;  %v11255_v30 = vld [vmem:[%s12385_s29 + $0x214] sm:$0xf] }
 0x77a   : > { %7381 = vmatpush.bf16.msra.mxu0 %v9728_v61  ;;  %v9888_v17 = vor.u32 %v11241_v44, %v9885_v11  ;;  %v11223_v61 = vld [vmem:[%s12385_s29 + $0x114] sm:$0xf]  ;;  %v10037_v11 = vld [vmem:[%s12385_s29 + $0x2d8] sm:$0xf0] }
 0x77b   : > { %7394 = vmatpush.bf16.msra.mxu1 %v9792_v56  ;;  %v9813_v56 = vld [vmem:[%s12385_s29 + $0x118] sm:$0xf0]  ;;  %v10040_v41 = vor.u32 %v11279_v20, %v10037_v11  ;;  %v11271_v7 = vld [vmem:[%s12385_s29 + $0x294] sm:$0xf]  ;;  %v9997_v11 = vld [vmem:[%s12385_s29 + $0x288] sm:$0xf0] }
 0x77c   : > { %7407 = vmatpush.bf16.msra.mxu2 %v9856_v9  ;;  %v11239_v9 = vld [vmem:[%s12385_s29 + $0x194] sm:$0xf]  ;;  %v9816_v16 = vor.u32 %v11223_v61, %v9813_v56  ;;  %v11277_v61 = vld [vmem:[%s12385_s29 + $0x2c4] sm:$0xf]  ;;  %v10029_v56 = vld [vmem:[%s12385_s29 + $0x2c8] sm:$0xf0] }
 0x77d   : > { %7420 = vmatpush.bf16.msra.mxu3 %v9920_v19  ;;  %v9677_v19 = vld [vmem:[%s12385_s29 + $0x8] sm:$0xf0]  ;;  %v9941_v10 = vld [vmem:[%s12385_s29 + $0x218] sm:$0xf0] }
 0x77e   : > { %7382 = vmatpush.bf16.msra.mxu0 %v9720_v23  ;;  %v9880_v23 = vor.u32 %v11239_v9, %v9877_v29  ;;  %v9680_v35 = vor.u32 %v11189_v37, %v9677_v19  ;;  %v10093_v9 = vld [vmem:[%s12385_s29 + $0x348] sm:$0xf0]  ;;  %v11309_v29 = vld [vmem:[%s12385_s29 + $0x3c4] sm:$0xf]  ;;  %v10032_v37 = vor.u32 %v11277_v61, %v10029_v56  ;;  %v10005_v59 = vld [vmem:[%s12385_s29 + $0x298] sm:$0xf0] }
 0x77f   : > { %7395 = vmatpush.bf16.msra.mxu1 %v9784_v21  ;;  %v9805_v21 = vld [vmem:[%s12385_s29 + $0x108] sm:$0xf0]  ;;  %v10008_v13 = vor.u32 %v11271_v7, %v10005_v59  ;;  %v11363_v56 = vld [vmem:[%s12385_s29 + $0x574] sm:$0xf]  ;;  %v10421_v7 = vld [vmem:[%s12385_s29 + $0x5d8] sm:$0xf0] }
 0x780   : > { %7408 = vmatpush.bf16.msra.mxu2 %v9848_v38  ;;  %v11237_v38 = vld [vmem:[%s12385_s29 + $0x184] sm:$0xf] }
 0x781   : > { %7421 = vmatpush.bf16.msra.mxu3 %v9912_v46  ;;  %v11283_v46 = vld [vmem:[%s12385_s29 + $0x2f4] sm:$0xf]  ;;  %v9872_v62 = vor.u32 %v11237_v38, %v9869_v57  ;;  %v10149_v57 = vld [vmem:[%s12385_s29 + $0x3b8] sm:$0xf0] }
 0x782   : > { %7383 = vmatpush.bf16.msra.mxu0 %v9712_v2  ;;  %v9808_v2 = vor.u32 %v11221_v49, %v9805_v21  ;;  %v10056_v32 = vor.u32 %v11283_v46, %v10053_v47  ;;  %v10021_v49 = vld [vmem:[%s12385_s29 + $0x2b8] sm:$0xf0]  ;;  %v11307_v38 = vld [vmem:[%s12385_s29 + $0x3b4] sm:$0xf]  ;;  %v9949_v47 = vld [vmem:[%s12385_s29 + $0x228] sm:$0xf0] }
 0x783   : > { %7396 = vmatpush.bf16.msra.mxu1 %v9776_v63  ;;  %v11315_v63 = vld [vmem:[%s12385_s29 + $0x3f4] sm:$0xf]  ;;  %v10085_v21 = vld [vmem:[%s12385_s29 + $0x338] sm:$0xf0]  ;;  %v10024_v42 = vor.u32 %v11275_v26, %v10021_v49  ;;  %v11329_v49 = vld [vmem:[%s12385_s29 + $0x464] sm:$0xf] }
 0x784   : > { %7409 = vmatpush.bf16.msra.mxu2 %v9840_v14  ;;  %v10181_v14 = vld [vmem:[%s12385_s29 + $0x3f8] sm:$0xf0] }
 0x785   : > { %7422 = vmatpush.bf16.msra.mxu3 %v9904_v24  ;;  %v10120_v24 = vor.u32 %v11299_v6, %v10117_v43  ;;  %v10184_v8 = vor.u32 %v11315_v63, %v10181_v14  ;;  %v11273_v6 = vld [vmem:[%s12385_s29 + $0x2a4] sm:$0xf]  ;;  %v10152_v43 = vor.u32 %v11307_v38, %v10149_v57  ;;  %v10077_v63 = vld [vmem:[%s12385_s29 + $0x328] sm:$0xf0] }
 0x786   : > { %7384 = vmatpush.bf16.msra.mxu0 %v9704_v18  ;;  %v11297_v18 = vld [vmem:[%s12385_s29 + $0x364] sm:$0xf]  ;;  %v10301_v57 = vld [vmem:[%s12385_s29 + $0x4e8] sm:$0xf0] }
 0x787   : > { %7397 = vmatpush.bf16.msra.mxu1 %v9768_v22  ;;  %v10109_v22 = vld [vmem:[%s12385_s29 + $0x368] sm:$0xf0]  ;;  %v11305_v14 = vld [vmem:[%s12385_s29 + $0x3a4] sm:$0xf] }
 0x788   : > { %7410 = vmatpush.bf16.msra.mxu2 %v9832_v3  ;;  %v11313_v3 = vld [vmem:[%s12385_s29 + $0x3e4] sm:$0xf] }
 0x789   : > { %7423 = vmatpush.bf16.msra.mxu3 %v9896_v39  ;;  %v10112_v39 = vor.u32 %v11297_v18, %v10109_v22  ;;  %v10176_v44 = vor.u32 %v11313_v3, %v10173_v25  ;;  %v11287_v18 = vld [vmem:[%s12385_s29 + $0x314] sm:$0xf]  ;;  %v10069_v22 = vld [vmem:[%s12385_s29 + $0x318] sm:$0xf0] }
 0x78a   : > { %7385 = vmatpush.bf16.msra.mxu0 %v9696_v51  ;;  %v11295_v51 = vld [vmem:[%s12385_s29 + $0x354] sm:$0xf]  ;;  %v10133_v25 = vld [vmem:[%s12385_s29 + $0x398] sm:$0xf0]  ;;  %v10072_v20 = vor.u32 %v11287_v18, %v10069_v22 }
 0x78b   : > { %7398 = vmatpush.bf16.msra.mxu1 %v9760_v5  ;;  %v10101_v5 = vld [vmem:[%s12385_s29 + $0x358] sm:$0xf0]  ;;  %v11303_v3 = vld [vmem:[%s12385_s29 + $0x394] sm:$0xf] }
 0x78c   : > { %7411 = vmatpush.bf16.msra.mxu2 %v9824_v12  ;;  %v11311_v12 = vld [vmem:[%s12385_s29 + $0x3d4] sm:$0xf] }
 0x78d   : > { %7424 = vmatpush.bf16.msra.mxu3 %v9888_v17  ;;  %v10104_v17 = vor.u32 %v11295_v51, %v10101_v5  ;;  %v11285_v51 = vld [vmem:[%s12385_s29 + $0x304] sm:$0xf] }
 0x78e   : > { %7386 = vmatpush.bf16.msra.mxu0 %v9688_v27 }
 0x78f   : > { %7399 = vmatpush.bf16.msra.mxu1 %v9752_v60  ;;  %v11259_v60 = vld [vmem:[%s12385_s29 + $0x234] sm:$0xf] }
 0x790   : > { %7412 = vmatpush.bf16.msra.mxu2 %v9816_v16  ;;  %v9957_v16 = vld [vmem:[%s12385_s29 + $0x238] sm:$0xf0] }
 0x791   : > { %7425 = vmatpush.bf16.msra.mxu3 %v9880_v23  ;;  %v11291_v23 = vld [vmem:[%s12385_s29 + $0x334] sm:$0xf]  ;;  %v9960_v55 = vor.u32 %v11259_v60, %v9957_v16 }
 0x792   : > { %7387 = vmatpush.bf16.msra.mxu0 %v9680_v35  ;;  %v10088_v46 = vor.u32 %v11291_v23, %v10085_v21  ;;  %v11257_v35 = vld [vmem:[%s12385_s29 + $0x224] sm:$0xf]  ;;  %v10237_v23 = vld [vmem:[%s12385_s29 + $0x468] sm:$0xf0] }
 0x793   : > { %7400 = vmatpush.bf16.msra.mxu1 %v9744_v33  ;;  %v10013_v33 = vld [vmem:[%s12385_s29 + $0x2a8] sm:$0xf0]  ;;  %v11345_v21 = vld [vmem:[%s12385_s29 + $0x4e4] sm:$0xf] }
 0x794   : > { %7413 = vmatpush.bf16.msra.mxu2 %v9808_v2  ;;  %v11289_v2 = vld [vmem:[%s12385_s29 + $0x324] sm:$0xf] }
 0x795   : > { %7426 = vmatpush.bf16.msra.mxu3 %v9872_v62  ;;  %7388 = vmatmul.bf16.vlgmr.msra.gmra.mxu0 %v13858_v36  ;;  %v10168_v36 = vor.u32 %v11311_v12, %v10165_v34  ;;  %v10141_v62 = vld [vmem:[%s12385_s29 + $0x3a8] sm:$0xf0]  ;;  %v10136_v12 = vor.u32 %v11303_v3, %v10133_v25  ;;  %v11325_v3 = vld [vmem:[%s12385_s29 + $0x444] sm:$0xf] }
 0x796   : > { %7432 = vmatpush.bf16.msrb.mxu0 %v9992_v4  ;;  %7401 = vmatmul.bf16.vlgmr.msra.gmra.mxu1 %v13864_v40  ;;  %v10157_v40 = vld [vmem:[%s12385_s29 + $0x3c8] sm:$0xf0]  ;;  %v9952_v4 = vor.u32 %v11257_v35, %v9949_v47  ;;  %v11377_v35 = vld [vmem:[%s12385_s29 + $0x5e4] sm:$0xf] }
 0x797   : > { %7445 = vmatpush.bf16.msrb.mxu1 %v10056_v32  ;;  %7414 = vmatmul.bf16.vlgmr.msra.gmra.mxu2 %v13856_v15  ;;  %v11261_v15 = vld [vmem:[%s12385_s29 + $0x244] sm:$0xf]  ;;  %v10160_v28 = vor.u32 %v11309_v29, %v10157_v40  ;;  %v10016_v32 = vor.u32 %v11273_v6, %v10013_v33  ;;  %v10061_v34 = vld [vmem:[%s12385_s29 + $0x308] sm:$0xf0]  ;;  %v11379_v40 = vld [vmem:[%s12385_s29 + $0x5f4] sm:$0xf]  ;;  %v10304_v33 = vor.u32 %v11345_v21, %v10301_v57 }
 0x798   : > { %7458 = vmatpush.bf16.msrb.mxu2 %v10120_v24  ;;  %7427 = vmatmul.bf16.vlgmr.msra.gmra.mxu3 %v13860_v52  ;;  %v11293_v52 = vld [vmem:[%s12385_s29 + $0x344] sm:$0xf]  ;;  %v9968_v27 = vor.u32 %v11261_v15, %v9965_v1  ;;  %v10080_v24 = vor.u32 %v11289_v2, %v10077_v63  ;;  %v14157_v45 = vpop.f32.mrf.mxu0  ;;  %v10245_v15 = vld [vmem:[%s12385_s29 + $0x478] sm:$0xf0]  ;;  %v11347_v1 = vld [vmem:[%s12385_s29 + $0x4f4] sm:$0xf]  ;;  %v10064_v29 = vor.u32 %v11285_v51, %v10061_v34 }
 0x799   : > { %7471 = vmatpush.bf16.msrb.mxu3 %v10184_v8  ;;  %v10096_v19 = vor.u32 %v11293_v52, %v10093_v9  ;;  %v10144_v8 = vor.u32 %v11305_v14, %v10141_v62  ;;  %v10373_v52 = vld [vmem:[%s12385_s29 + $0x578] sm:$0xf0]  ;;  %v10429_v47 = vld [vmem:[%s12385_s29 + $0x5e8] sm:$0xf0]  ;;  %v11327_v63 = vld [vmem:[%s12385_s29 + $0x454] sm:$0xf] }
 0x79a   : > { %7433 = vmatpush.bf16.msrb.mxu0 %v9984_v53  ;;  %v9944_v53 = vor.u32 %v11255_v30, %v9941_v10  ;;  %v14162_v5 = vpop.f32.mrf.mxu1  ;;  %v10229_v14 = vld [vmem:[%s12385_s29 + $0x458] sm:$0xf0]  ;;  %v11343_v62 = vld [vmem:[%s12385_s29 + $0x4d4] sm:$0xf]  ;;  %v10221_v25 = vld [vmem:[%s12385_s29 + $0x448] sm:$0xf0] }
 0x79b   : > { %7446 = vmatpush.bf16.msrb.mxu1 %v10048_v31  ;;  %v11253_v31 = vld [vmem:[%s12385_s29 + $0x204] sm:$0xf]  ;;  %v10357_v30 = vld [vmem:[%s12385_s29 + $0x558] sm:$0xf0]  ;;  %v11375_v10 = vld [vmem:[%s12385_s29 + $0x5d4] sm:$0xf]  ;;  %v10232_v59 = vor.u32 %v11327_v63, %v10229_v14 }
 0x79c   : > { %7459 = vmatpush.bf16.msrb.mxu2 %v10112_v39  ;;  %v9933_v39 = vld [vmem:[%s12385_s29 + $0x208] sm:$0xf0]  ;;  %v10213_v34 = vld [vmem:[%s12385_s29 + $0x438] sm:$0xf0] }
 0x79d   : > { %7472 = vmatpush.bf16.msrb.mxu3 %v10176_v44  ;;  %v11269_v44 = vld [vmem:[%s12385_s29 + $0x284] sm:$0xf]  ;;  %v9936_v61 = vor.u32 %v11253_v31, %v9933_v39  ;;  %v10349_v39 = vld [vmem:[%s12385_s29 + $0x548] sm:$0xf0]  ;;  %v10261_v14 = vld [vmem:[%s12385_s29 + $0x498] sm:$0xf0] }
 0x79e   : > { %7434 = vmatpush.bf16.msrb.mxu0 %v9976_v50  ;;  %v11301_v50 = vld [vmem:[%s12385_s29 + $0x384] sm:$0xf]  ;;  %v10000_v9 = vor.u32 %v11269_v44, %v9997_v11  ;;  %v10397_v57 = vld [vmem:[%s12385_s29 + $0x5a8] sm:$0xf0] }
 0x79f   : > { %7447 = vmatpush.bf16.msrb.mxu1 %v10040_v41  ;;  %v10125_v41 = vld [vmem:[%s12385_s29 + $0x388] sm:$0xf0]  ;;  %v14177_v16 = vpop.f32.mrf.mxu3  ;;  %v11357_v31 = vld [vmem:[%s12385_s29 + $0x544] sm:$0xf] }
 0x7a0   : > { %7460 = vmatpush.bf16.msrb.mxu2 %v10104_v17  ;;  %v11331_v17 = vld [vmem:[%s12385_s29 + $0x474] sm:$0xf]  ;;  %v10352_v51 = vor.u32 %v11357_v31, %v10349_v39  ;;  %v10381_v31 = vld [vmem:[%s12385_s29 + $0x588] sm:$0xf0] }
 0x7a1   : > { %7473 = vmatpush.bf16.msrb.mxu3 %v10168_v36  ;;  %v10309_v36 = vld [vmem:[%s12385_s29 + $0x4f8] sm:$0xf0]  ;;  %v10248_v60 = vor.u32 %v11331_v17, %v10245_v15 }
 0x7a2   : > { %7435 = vmatpush.bf16.msrb.mxu0 %v9968_v27  ;;  %v10437_v27 = vld [vmem:[%s12385_s29 + $0x5f8] sm:$0xf0]  ;;  %v10312_v26 = vor.u32 %v11347_v1, %v10309_v36  ;;  %v7196_v6 = vpop.f32.mrf.mxu1  ;;  %v11355_v1 = vld [vmem:[%s12385_s29 + $0x534] sm:$0xf] }
 0x7a3   : > { %7448 = vmatpush.bf16.msrb.mxu1 %v10032_v37  ;;  %v14175_v37 = vpop.f32.mrf.mxu2  ;;  %v10440_v38 = vor.u32 %v11379_v40, %v10437_v27  ;;  %v10277_v15 = vld [vmem:[%s12385_s29 + $0x4b8] sm:$0xf0]  ;;  %v11371_v36 = vld [vmem:[%s12385_s29 + $0x5b4] sm:$0xf]  ;;  %v11321_v40 = vld [vmem:[%s12385_s29 + $0x424] sm:$0xf] }
 0x7a4   : > { %7461 = vmatpush.bf16.msrb.mxu2 %v10096_v19  ;;  %v10128_v19 = vor.u32 %v11301_v50, %v10125_v41  ;;  %v11339_v50 = vld [vmem:[%s12385_s29 + $0x4b4] sm:$0xf]  ;;  %v10205_v27 = vld [vmem:[%s12385_s29 + $0x428] sm:$0xf0] }
 0x7a5   : > { %7474 = vmatpush.bf16.msrb.mxu3 %v10160_v28  ;;  %v10376_v28 = vor.u32 %v11363_v56, %v10373_v52  ;;  %v10405_v56 = vld [vmem:[%s12385_s29 + $0x5b8] sm:$0xf0]  ;;  %v11319_v6 = vld [vmem:[%s12385_s29 + $0x414] sm:$0xf] }
 0x7a6   : > { %7436 = vmatpush.bf16.msrb.mxu0 %v9960_v55  ;;  %v11361_v55 = vld [vmem:[%s12385_s29 + $0x564] sm:$0xf] }
 0x7a7   : > { %7449 = vmatpush.bf16.msrb.mxu1 %v10024_v42  ;;  %v10365_v42 = vld [vmem:[%s12385_s29 + $0x568] sm:$0xf0] }
 0x7a8   : > { %7462 = vmatpush.bf16.msrb.mxu2 %v10088_v46  ;;  %v7183_v46 = vpop.f32.mrf.mxu0  ;;  %v10368_v2 = vor.u32 %v11361_v55, %v10365_v42  ;;  %v14232_v55 = vld [vmem:[%s12391_s27] sm:$0x3]  ;;  %v10208_v42 = vor.u32 %v11321_v40, %v10205_v27  ;;  %v10493_v40 = vld [vmem:[%s12385_s29 + $0x668] sm:$0xf0]  ;;  %v11409_v27 = vld [vmem:[%s12385_s29 + $0x6e4] sm:$0xf] }
 0x7a9   : > { %7475 = vmatpush.bf16.msrb.mxu3 %v10152_v43  ;;  %v10240_v43 = vor.u32 %v11329_v49, %v10237_v23  ;;  %v11353_v49 = vld [vmem:[%s12385_s29 + $0x524] sm:$0xf]  ;;  %v10333_v23 = vld [vmem:[%s12385_s29 + $0x528] sm:$0xf0] }
 0x7aa   : > { %7437 = vmatpush.bf16.msrb.mxu0 %v9952_v4  ;;  %v10432_v4 = vor.u32 %v11377_v35, %v10429_v47  ;;  %v10336_v47 = vor.u32 %v11353_v49, %v10333_v23  ;;  %v10621_v49 = vld [vmem:[%s12385_s29 + $0x768] sm:$0xf0]  ;;  %v11441_v23 = vld [vmem:[%s12385_s29 + $0x7e4] sm:$0xf] }
 0x7ab   : > { %7450 = vmatpush.bf16.msrb.mxu1 %v10016_v32  ;;  %v10293_v32 = vld [vmem:[%s12385_s29 + $0x4d8] sm:$0xf0] }
 0x7ac   : > { %7463 = vmatpush.bf16.msrb.mxu2 %v10080_v24  ;;  %v11359_v24 = vld [vmem:[%s12385_s29 + $0x554] sm:$0xf]  ;;  %v10296_v18 = vor.u32 %v11343_v62, %v10293_v32 }
 0x7ad   : > { %7476 = vmatpush.bf16.msrb.mxu3 %v10144_v8  ;;  %v7209_v8 = vpop.f32.mrf.mxu2  ;;  %v10360_v22 = vor.u32 %v11359_v24, %v10357_v30  ;;  %v11351_v62 = vld [vmem:[%s12385_s29 + $0x514] sm:$0xf]  ;;  %v10389_v24 = vld [vmem:[%s12385_s29 + $0x598] sm:$0xf0]  ;;  %v5852_v30 = vperm.slane %v14232_v55, 0 }
 0x7ae   : > { %7438 = vmatpush.bf16.msrb.mxu0 %v9944_v53  ;;  %v10285_v53 = vld [vmem:[%s12385_s29 + $0x4c8] sm:$0xf0]  ;;  %v11367_v32 = vld [vmem:[%s12385_s29 + $0x594] sm:$0xf] }
 0x7af   : > { %7451 = vmatpush.bf16.msrb.mxu1 %v10008_v13  ;;  %v11373_v13 = vld [vmem:[%s12385_s29 + $0x5c4] sm:$0xf]  ;;  %v10189_v8 = vld [vmem:[%s12385_s29 + $0x408] sm:$0xf0] }
 0x7b0   : > { %7464 = vmatpush.bf16.msrb.mxu2 %v10072_v20  ;;  %v10224_v20 = vor.u32 %v11325_v3, %v10221_v25  ;;  %v11349_v3 = vld [vmem:[%s12385_s29 + $0x504] sm:$0xf] }
 0x7b1   : > { %7477 = vmatpush.bf16.msrb.mxu3 %v10136_v12  ;;  %v11323_v12 = vld [vmem:[%s12385_s29 + $0x434] sm:$0xf] }
 0x7b2   : > { %7439 = vmatpush.bf16.msrb.mxu0 %v9936_v61  ;;  %v14207_v44 = vpop.f32.mrf.mxu0  ;;  %v10341_v61 = vld [vmem:[%s12385_s29 + $0x538] sm:$0xf0]  ;;  %v10216_v52 = vor.u32 %v11323_v12, %v10213_v34  ;;  %v11427_v12 = vld [vmem:[%s12385_s29 + $0x774] sm:$0xf] }
 0x7b3   : > { %7452 = vmatpush.bf16.msrb.mxu1 %v10000_v9  ;;  %v14212_v41 = vpop.f32.mrf.mxu1  ;;  %v10280_v9 = vor.u32 %v11339_v50, %v10277_v15  ;;  %v10629_v34 = vld [vmem:[%s12385_s29 + $0x778] sm:$0xf0]  ;;  %v11443_v15 = vld [vmem:[%s12385_s29 + $0x7f4] sm:$0xf] }
 0x7b4   : > { %7465 = vmatpush.bf16.msrb.mxu2 %v10064_v29  ;;  %v10344_v29 = vor.u32 %v11355_v1, %v10341_v61  ;;  %v10693_v1 = vld [vmem:[%s12385_s29 + $0x7f8] sm:$0xf0] }
 0x7b5   : > { %7478 = vmatpush.bf16.msrb.mxu3 %v10128_v19  ;;  %7440 = vmatmul.bf16.vlgmr.msrb.gmra.mxu0 %v13891_v0  ;;  %v11341_v0 = vld [vmem:[%s12385_s29 + $0x4c4] sm:$0xf] }
 0x7b6   : > { %7484 = vmatpush.bf16.msra.mxu0 %v10248_v60  ;;  %7453 = vmatmul.bf16.vlgmr.msrb.gmra.mxu1 %v13895_v48  ;;  %v10413_v48 = vld [vmem:[%s12385_s29 + $0x5c8] sm:$0xf0]  ;;  %v10288_v11 = vor.u32 %v11341_v0, %v10285_v53  ;;  %v11337_v19 = vld [vmem:[%s12385_s29 + $0x4a4] sm:$0xf]  ;;  %v10392_v0 = vor.u32 %v11367_v32, %v10389_v24  ;;  %v10677_v32 = vld [vmem:[%s12385_s29 + $0x7d8] sm:$0xf0] }
 0x7b7   : > { %7497 = vmatpush.bf16.msra.mxu1 %v10312_v26  ;;  %7466 = vmatmul.bf16.vlgmr.msrb.gmra.mxu2 %v13889_v58  ;;  %v7222_v58 = vpop.f32.mrf.mxu3  ;;  %v10416_v17 = vor.u32 %v11373_v13, %v10413_v48  ;;  %v10408_v26 = vor.u32 %v11371_v36, %v10405_v56  ;;  %v11365_v53 = vld [vmem:[%s12385_s29 + $0x584] sm:$0xf]  ;;  %v11395_v13 = vld [vmem:[%s12385_s29 + $0x674] sm:$0xf]  ;;  %v10501_v48 = vld [vmem:[%s12385_s29 + $0x678] sm:$0xf0]  ;;  %v7182_v56 = vadd.f32 %v14157_v45, %v5852_v30 }
 0x7b8   : > { %7510 = vmatpush.bf16.msra.mxu2 %v10376_v28  ;;  %7479 = vmatmul.bf16.vlgmr.msrb.gmra.mxu3 %v13893_v54  ;;  %v10424_v54 = vor.u32 %v11375_v10, %v10421_v7  ;;  %v10269_v28 = vld [vmem:[%s12385_s29 + $0x4a8] sm:$0xf0]  ;;  %v11317_v7 = vld [vmem:[%s12385_s29 + $0x404] sm:$0xf]  ;;  %v10384_v61 = vor.u32 %v11365_v53, %v10381_v31  ;;  %v10504_v36 = vor.u32 %v11395_v13, %v10501_v48 }
 0x7b9   : > { %7523 = vmatpush.bf16.msra.mxu3 %v10440_v38  ;;  %v11369_v38 = vld [vmem:[%s12385_s29 + $0x5a4] sm:$0xf]  ;;  %v10272_v35 = vor.u32 %v11337_v19, %v10269_v28  ;;  %v10696_v19 = vor.u32 %v11443_v15, %v10693_v1  ;;  %v11627_v24 = vld [vmem:[#allocation1 + $0x1b] sm:$0xff]  ;;  %v10597_v15 = vld [vmem:[%s12385_s29 + $0x738] sm:$0xf0] }
 0x7ba   : > { %7485 = vmatpush.bf16.msra.mxu0 %v10240_v43  ;;  %v14222_v60 = vpop.f32.mrf.mxu2  ;;  %v7235_v46 = vpop.f32.mrf.mxu0  ;;  %v10197_v43 = vld [vmem:[%s12385_s29 + $0x418] sm:$0xf0]  ;;  %v10400_v63 = vor.u32 %v11369_v38, %v10397_v57  ;;  %v11425_v28 = vld [vmem:[%s12385_s29 + $0x764] sm:$0xf]  ;;  %v10685_v38 = vld [vmem:[%s12385_s29 + $0x7e8] sm:$0xf0]  ;;  %v7195_v57 = vadd.f32 %v14162_v5, %v7182_v56 }
 0x7bb   : > { %7498 = vmatpush.bf16.msra.mxu1 %v10304_v33  ;;  %v11335_v33 = vld [vmem:[%s12385_s29 + $0x494] sm:$0xf]  ;;  %v10200_v10 = vor.u32 %v11319_v6, %v10197_v43  ;;  %v10624_v46 = vor.u32 %v11425_v28, %v10621_v49  ;;  %v11626_v5 = vld [vmem:[#allocation1 + $0x9] sm:$0xff]  ;;  %v11437_v53 = vld [vmem:[%s12385_s29 + $0x7c4] sm:$0xf] }
 0x7bc   : > { %7511 = vmatpush.bf16.msra.mxu2 %v10368_v2  ;;  %v7248_v2 = vpop.f32.mrf.mxu1  ;;  %v11407_v6 = vld [vmem:[%s12385_s29 + $0x6d4] sm:$0xf]  ;;  %v11417_v28 = vld [vmem:[%s12385_s29 + $0x724] sm:$0xf]  ;;  %v10589_v49 = vld [vmem:[%s12385_s29 + $0x728] sm:$0xf0] }
 0x7bd   : > { %7524 = vmatpush.bf16.msra.mxu3 %v10432_v4  ;;  %v10325_v4 = vld [vmem:[%s12385_s29 + $0x518] sm:$0xf0]  ;;  %v11624_v43 = vld [vmem:[#allocation1] sm:$0xff] }
 0x7be   : > { %7486 = vmatpush.bf16.msra.mxu0 %v10232_v59  ;;  %v10264_v59 = vor.u32 %v11335_v33, %v10261_v14  ;;  %v10328_v58 = vor.u32 %v11351_v62, %v10325_v4  ;;  %v10688_v33 = vor.u32 %v11441_v23, %v10685_v38  ;;  %v10549_v2 = vld [vmem:[%s12385_s29 + $0x6d8] sm:$0xf0]  ;;  %v11625_v62 = vld [vmem:[#allocation1 + $0x12] sm:$0xff]  ;;  %v11439_v4 = vld [vmem:[%s12385_s29 + $0x7d4] sm:$0xf] }
 0x7bf   : > { %7499 = vmatpush.bf16.msra.mxu1 %v10296_v18  ;;  %v14227_v21 = vpop.f32.mrf.mxu3  ;;  %v11333_v18 = vld [vmem:[%s12385_s29 + $0x484] sm:$0xf]  ;;  %v10613_v14 = vld [vmem:[%s12385_s29 + $0x758] sm:$0xf0]  ;;  %v11435_v1 = vld [vmem:[%s12385_s29 + $0x7b4] sm:$0xf] }
 0x7c0   : > { %7512 = vmatpush.bf16.msra.mxu2 %v10360_v22  ;;  %v10253_v22 = vld [vmem:[%s12385_s29 + $0x488] sm:$0xf0] }
 0x7c1   : > { %7525 = vmatpush.bf16.msra.mxu3 %v10424_v54  ;;  %v10317_v54 = vld [vmem:[%s12385_s29 + $0x508] sm:$0xf0]  ;;  %v10256_v50 = vor.u32 %v11333_v18, %v10253_v22  ;;  %v11405_v18 = vld [vmem:[%s12385_s29 + $0x6c4] sm:$0xf]  ;;  %v10680_v22 = vor.u32 %v11439_v4, %v10677_v32 }
 0x7c2   : > { %7487 = vmatpush.bf16.msra.mxu0 %v10224_v20  ;;  %v7261_v25 = vpop.f32.mrf.mxu2  ;;  %v11411_v20 = vld [vmem:[%s12385_s29 + $0x6f4] sm:$0xf]  ;;  %v10653_v38 = vld [vmem:[%s12385_s29 + $0x7a8] sm:$0xf0] }
 0x7c3   : > { %7500 = vmatpush.bf16.msra.mxu1 %v10288_v11  ;;  %v10192_v11 = vor.u32 %v11317_v7, %v10189_v8  ;;  %v10552_v7 = vor.u32 %v11407_v6, %v10549_v2  ;;  %v11421_v25 = vld [vmem:[%s12385_s29 + $0x744] sm:$0xf]  ;;  %v11383_v6 = vld [vmem:[%s12385_s29 + $0x614] sm:$0xf] }
 0x7c4   : > { %7513 = vmatpush.bf16.msra.mxu2 %v10352_v51  ;;  %v10565_v51 = vld [vmem:[%s12385_s29 + $0x6f8] sm:$0xf0] }
 0x7c5   : > { %7526 = vmatpush.bf16.msra.mxu3 %v10416_v17  ;;  %v10320_v17 = vor.u32 %v11349_v3, %v10317_v54  ;;  %v10541_v3 = vld [vmem:[%s12385_s29 + $0x6c8] sm:$0xf0] }
 0x7c6   : > { %7488 = vmatpush.bf16.msra.mxu0 %v10216_v52  ;;  %v10568_v52 = vor.u32 %v11411_v20, %v10565_v51  ;;  %v10544_v48 = vor.u32 %v11405_v18, %v10541_v3  ;;  %v10469_v51 = vld [vmem:[%s12385_s29 + $0x638] sm:$0xf0]  ;;  %v11413_v18 = vld [vmem:[%s12385_s29 + $0x704] sm:$0xf] }
 0x7c7   : > { %7501 = vmatpush.bf16.msra.mxu1 %v10280_v9  ;;  %v7274_v39 = vpop.f32.mrf.mxu3  ;;  %v10632_v9 = vor.u32 %v11427_v12, %v10629_v34  ;;  %v11403_v12 = vld [vmem:[%s12385_s29 + $0x6b4] sm:$0xf] }
 0x7c8   : > { %7514 = vmatpush.bf16.msra.mxu2 %v10344_v29  ;;  %v11393_v29 = vld [vmem:[%s12385_s29 + $0x664] sm:$0xf] }
 0x7c9   : > { %7527 = vmatpush.bf16.msra.mxu3 %v10408_v26  ;;  %v10557_v26 = vld [vmem:[%s12385_s29 + $0x6e8] sm:$0xf0]  ;;  %v10496_v45 = vor.u32 %v11393_v29, %v10493_v40  ;;  %v11401_v40 = vld [vmem:[%s12385_s29 + $0x6a4] sm:$0xf] }
 0x7ca   : > { %7489 = vmatpush.bf16.msra.mxu0 %v10208_v42  ;;  %v10560_v42 = vor.u32 %v11409_v27, %v10557_v26  ;;  %v10461_v29 = vld [vmem:[%s12385_s29 + $0x628] sm:$0xf0] }
 0x7cb   : > { %7502 = vmatpush.bf16.msra.mxu1 %v10272_v35  ;;  %v11391_v35 = vld [vmem:[%s12385_s29 + $0x654] sm:$0xf]  ;;  %v10525_v26 = vld [vmem:[%s12385_s29 + $0x6a8] sm:$0xf0] }
 0x7cc   : > { %7515 = vmatpush.bf16.msra.mxu2 %v10336_v47  ;;  %v10485_v47 = vld [vmem:[%s12385_s29 + $0x658] sm:$0xf0] }
 0x7cd   : > { %7528 = vmatpush.bf16.msra.mxu3 %v10400_v63  ;;  %v11423_v63 = vld [vmem:[%s12385_s29 + $0x754] sm:$0xf]  ;;  %v10488_v30 = vor.u32 %v11391_v35, %v10485_v47  ;;  %v10528_v35 = vor.u32 %v11401_v40, %v10525_v26  ;;  %v10592_v47 = vor.u32 %v11417_v28, %v10589_v49  ;;  %v11446_v49 = vld [vmem:[%s12393_s2 + $0x8] sm:$0xff] }
 0x7ce   : > { %7490 = vmatpush.bf16.msra.mxu0 %v10200_v10  ;;  %v7208_v10 = vadd.f32 %v14175_v37, %v7195_v57  ;;  %v10616_v8 = vor.u32 %v11423_v63, %v10613_v14  ;;  %v10669_v37 = vld [vmem:[%s12385_s29 + $0x7c8] sm:$0xf0]  ;;  %v10517_v63 = vld [vmem:[%s12385_s29 + $0x698] sm:$0xf0]  ;;  %v11415_v14 = vld [vmem:[%s12385_s29 + $0x714] sm:$0xf] }
 0x7cf   : > { %7503 = vmatpush.bf16.msra.mxu1 %v10264_v59  ;;  %v11389_v59 = vld [vmem:[%s12385_s29 + $0x644] sm:$0xf]  ;;  %v10672_v34 = vor.u32 %v11437_v53, %v10669_v37 }
 0x7d0   : > { %7516 = vmatpush.bf16.msra.mxu2 %v10328_v58  ;;  %v10477_v58 = vld [vmem:[%s12385_s29 + $0x648] sm:$0xf0]  ;;  %v7221_v13 = vadd.f32 %v14177_v16, %v7208_v10  ;;  %v11381_v10 = vld [vmem:[%s12385_s29 + $0x604] sm:$0xf] }
 0x7d1   : > { %7529 = vmatpush.bf16.msra.mxu3 %v10392_v0  ;;  %v10605_v0 = vld [vmem:[%s12385_s29 + $0x748] sm:$0xf0]  ;;  %v10480_v31 = vor.u32 %v11389_v59, %v10477_v58 }
 0x7d2   : > { %7491 = vmatpush.bf16.msra.mxu0 %v10192_v11  ;;  %v14284_v54 = vpop.f32.mrf.mxu0  ;;  %v10608_v20 = vor.u32 %v11421_v25, %v10605_v0  ;;  %v11387_v11 = vld [vmem:[%s12385_s29 + $0x634] sm:$0xf]  ;;  %v10509_v58 = vld [vmem:[%s12385_s29 + $0x688] sm:$0xf0]  ;;  %v11429_v25 = vld [vmem:[%s12385_s29 + $0x784] sm:$0xf] }
 0x7d3   : > { %7504 = vmatpush.bf16.msra.mxu1 %v10256_v50  ;;  %v14288_v39 = vpop.f32.mrf.mxu1  ;;  %v10533_v50 = vld [vmem:[%s12385_s29 + $0x6b8] sm:$0xf0]  ;;  %v10472_v16 = vor.u32 %v11387_v11, %v10469_v51  ;;  %v10637_v0 = vld [vmem:[%s12385_s29 + $0x788] sm:$0xf0]  ;;  %v11451_v51 = vld [vmem:[%s12393_s2 + $0x30] sm:$0xff] }
 0x7d4   : > { %7517 = vmatpush.bf16.msra.mxu2 %v10320_v17  ;;  %v11419_v17 = vld [vmem:[%s12385_s29 + $0x734] sm:$0xf]  ;;  %v10536_v56 = vor.u32 %v11403_v12, %v10533_v50  ;;  %v11630_v50 = vld [vmem:[#allocation1 + $0x36] sm:$0xff] }
 0x7d5   : > { %7530 = vmatpush.bf16.msra.mxu3 %v10384_v61  ;;  %7492 = vmatmul.bf16.vlgmr.msra.gmra.mxu0 %v11624_v43  ;;  %v10661_v61 = vld [vmem:[%s12385_s29 + $0x7b8] sm:$0xf0] }
 0x7d6   : > { %7536 = vmatpush.bf16.msrb.mxu0 %v10504_v36  ;;  %7505 = vmatmul.bf16.vlgmr.msra.gmra.mxu1 %v11626_v5  ;;  %v7234_v36 = vadd.f32 %v14207_v44, %v7221_v13  ;;  %v10664_v27 = vor.u32 %v11435_v1, %v10661_v61  ;;  %v11433_v44 = vld [vmem:[%s12385_s29 + $0x7a4] sm:$0xf]  ;;  %v10453_v43 = vld [vmem:[%s12385_s29 + $0x618] sm:$0xf0]  ;;  %v11431_v5 = vld [vmem:[%s12385_s29 + $0x794] sm:$0xf] }
 0x7d7   : > { %7549 = vmatpush.bf16.msrb.mxu1 %v10568_v52  ;;  %7518 = vmatmul.bf16.vlgmr.msra.gmra.mxu2 %v11625_v62  ;;  %v10600_v52 = vor.u32 %v11419_v17, %v10597_v15  ;;  %v10656_v2 = vor.u32 %v11433_v44, %v10653_v38  ;;  %v10581_v62 = vld [vmem:[%s12385_s29 + $0x718] sm:$0xf0]  ;;  %v10456_v4 = vor.u32 %v11383_v6, %v10453_v43  ;;  %v11450_v15 = vld [vmem:[%s12393_s2 + $0x28] sm:$0xff] }
 0x7d8   : > { %7562 = vmatpush.bf16.msrb.mxu2 %v10632_v9  ;;  %7531 = vmatmul.bf16.vlgmr.msra.gmra.mxu3 %v11627_v24  ;;  %v11385_v9 = vld [vmem:[%s12385_s29 + $0x624] sm:$0xf] }
 0x7d9   : > { %7575 = vmatpush.bf16.msrb.mxu3 %v10696_v19  ;;  %v10464_v57 = vor.u32 %v11385_v9, %v10461_v29 }
 0x7da   : > { %7537 = vmatpush.bf16.msrb.mxu0 %v10496_v45  ;;  %v14303_v19 = vpop.f32.mrf.mxu2  ;;  %v7287_v45 = vpop.f32.mrf.mxu0 }
 0x7db   : > { %7550 = vmatpush.bf16.msrb.mxu1 %v10560_v42  ;;  %v14308_v23 = vpop.f32.mrf.mxu3  ;;  %v7300_v42 = vpop.f32.mrf.mxu1  ;;  %v11445_v45 = vld [vmem:[%s12393_s2] sm:$0xff] }
 0x7dc   : > { %7563 = vmatpush.bf16.msrb.mxu2 %v10624_v46  ;;  %v7247_v46 = vadd.f32 %v14212_v41, %v7234_v36  ;;  %v10645_v41 = vld [vmem:[%s12385_s29 + $0x798] sm:$0xf0] }
 0x7dd   : > { %7576 = vmatpush.bf16.msrb.mxu3 %v10688_v33  ;;  %v11399_v33 = vld [vmem:[%s12385_s29 + $0x694] sm:$0xf]  ;;  %v10648_v59 = vor.u32 %v11431_v5, %v10645_v41 }
 0x7de   : > { %7538 = vmatpush.bf16.msrb.mxu0 %v10488_v30  ;;  %v7260_v32 = vadd.f32 %v14222_v60, %v7247_v46  ;;  %v10520_v24 = vor.u32 %v11399_v33, %v10517_v63  ;;  %v10584_v30 = vor.u32 %v11415_v14, %v10581_v62  ;;  %v5853_v46 = vperm.slane %v14232_v55, 1 }
 0x7df   : > { %7551 = vmatpush.bf16.msrb.mxu1 %v10552_v7  ;;  %v10445_v7 = vld [vmem:[%s12385_s29 + $0x608] sm:$0xf0] }
 0x7e0   : > { %7564 = vmatpush.bf16.msrb.mxu2 %v10616_v8  ;;  %v11397_v8 = vld [vmem:[%s12385_s29 + $0x684] sm:$0xf]  ;;  %v10448_v60 = vor.u32 %v11381_v10, %v10445_v7  ;;  %v7273_v37 = vadd.f32 %v14227_v21, %v7260_v32  ;;  %v11628_v21 = vld [vmem:[#allocation1 + $0x24] sm:$0xff]  ;;  %v11460_v10 = vld [vmem:[%s12393_s2 + $0x78] sm:$0xff] }
 0x7e1   : > { %7577 = vmatpush.bf16.msrb.mxu3 %v10680_v22  ;;  %v10573_v22 = vld [vmem:[%s12385_s29 + $0x708] sm:$0xf0] }
 0x7e2   : > { %7539 = vmatpush.bf16.msrb.mxu0 %v10480_v31  ;;  %v7313_v3 = vpop.f32.mrf.mxu2  ;;  %v10512_v31 = vor.u32 %v11397_v8, %v10509_v58  ;;  %v10576_v13 = vor.u32 %v11413_v18, %v10573_v22  ;;  %v7286_v11 = vadd.f32 %v14284_v54, %v7273_v37  ;;  %v11631_v54 = vld [vmem:[#allocation1 + $0x3f] sm:$0xff] }
 0x7e3   : > { %7552 = vmatpush.bf16.msrb.mxu1 %v10544_v48  ;;  %v7326_v53 = vpop.f32.mrf.mxu3  ;;  %v10640_v48 = vor.u32 %v11429_v25, %v10637_v0  ;;  %v11458_v18 = vld [vmem:[%s12393_s2 + $0x68] sm:$0xff]  ;;  %v11457_v3 = vld [vmem:[%s12393_s2 + $0x60] sm:$0xff]  ;;  %v11456_v25 = vld [vmem:[%s12393_s2 + $0x58] sm:$0xff] }
 0x7e4   : > { %7565 = vmatpush.bf16.msrb.mxu2 %v10608_v20  ;;  %v11452_v20 = vld [vmem:[%s12393_s2 + $0x38] sm:$0xff]  ;;  %v7299_v12 = vadd.f32 %v14288_v39, %v7286_v11  ;;  %v11449_v39 = vld [vmem:[%s12393_s2 + $0x20] sm:$0xff]  ;;  %v11455_v53 = vld [vmem:[%s12393_s2 + $0x50] sm:$0xff] }
 0x7e5   : > { %7578 = vmatpush.bf16.msrb.mxu3 %v10672_v34  ;;  %v11629_v34 = vld [vmem:[#allocation1 + $0x2d] sm:$0xff] }
 0x7e6   : > { %7540 = vmatpush.bf16.msrb.mxu0 %v10472_v16  ;;  %v7312_v17 = vadd.f32 %v14303_v19, %v7299_v12  ;;  %v11447_v19 = vld [vmem:[%s12393_s2 + $0x10] sm:$0xff]  ;;  %v11453_v12 = vld [vmem:[%s12393_s2 + $0x40] sm:$0xff] }
 0x7e7   : > { %7553 = vmatpush.bf16.msrb.mxu1 %v10536_v56  ;;  %v11448_v56 = vld [vmem:[%s12393_s2 + $0x18] sm:$0xff] }
 0x7e8   : > { %7566 = vmatpush.bf16.msrb.mxu2 %v10600_v52  ;;  %v7325_v1 = vadd.f32 %v14308_v23, %v7312_v17 }
 0x7e9   : > { %7579 = vmatpush.bf16.msrb.mxu3 %v10664_v27 }
 0x7ea   : > { %7541 = vmatpush.bf16.msrb.mxu0 %v10464_v57 }
 0x7eb   : > { %7554 = vmatpush.bf16.msrb.mxu1 %v10528_v35 }
 0x7ec   : > { %7567 = vmatpush.bf16.msrb.mxu2 %v10592_v47 }
 0x7ed   : > { %7580 = vmatpush.bf16.msrb.mxu3 %v10656_v2 }
 0x7ee   : > { %7542 = vmatpush.bf16.msrb.mxu0 %v10456_v4 }
 0x7ef   : > { %7555 = vmatpush.bf16.msrb.mxu1 %v10520_v24 }
 0x7f0   : > { %7568 = vmatpush.bf16.msrb.mxu2 %v10584_v30 }
 0x7f1   : > { %7581 = vmatpush.bf16.msrb.mxu3 %v10648_v59  ;;  %v11459_v59 = vld [vmem:[%s12393_s2 + $0x70] sm:$0xff] }
 0x7f2   : > { %7543 = vmatpush.bf16.msrb.mxu0 %v10448_v60  ;;  %v7337_v61 = vpop.f32.mrf.mxu0 }
 0x7f3   : > { %7556 = vmatpush.bf16.msrb.mxu1 %v10512_v31  ;;  %v7350_v16 = vpop.f32.mrf.mxu1  ;;  %v7338_v36 = vadd.f32 %v7337_v61, %v7325_v1  ;;  %v11454_v31 = vld [vmem:[%s12393_s2 + $0x48] sm:$0xff] }
 0x7f4   : > { %7569 = vmatpush.bf16.msrb.mxu2 %v10576_v13 }
 0x7f5   : > { %7582 = vmatpush.bf16.msrb.mxu3 %v10640_v48  ;;  %7544 = vmatmul.bf16.vlgmr.msrb.gmra.mxu0 %v11628_v21  ;;  %v7351_v52 = vadd.f32 %v7350_v16, %v7338_v36 }
 0x7f6   : > { %7725 = vmatpush.bf16.msra.mxu0 %v11452_v20  ;;  %7557 = vmatmul.bf16.vlgmr.msrb.gmra.mxu1 %v11629_v34 }
 0x7f7   : > { %7570 = vmatmul.bf16.vlgmr.msrb.gmra.mxu2 %v11630_v50  ;;  %7738 = vmatpush.bf16.msra.mxu1 %v11460_v10 }
 0x7f8   : > { %7583 = vmatmul.bf16.vlgmr.msrb.gmra.mxu3 %v11631_v54 }
 0x7fa   : > { %7726 = vmatpush.bf16.msra.mxu0 %v11451_v51  ;;  %v7363_v9 = vpop.f32.mrf.mxu2  ;;  %v7339_v27 = vpop.f32.mrf.mxu0 }
 0x7fb   : > { %v7364_v29 = vadd.f32 %v7363_v9, %v7351_v52  ;;  %v7376_v40 = vpop.f32.mrf.mxu3  ;;  %v7352_v26 = vpop.f32.mrf.mxu1  ;;  %7739 = vmatpush.bf16.msra.mxu1 %v11459_v59 }
 0x7fd   : > { %v7377_v28 = vadd.f32 %v7376_v40, %v7364_v29 }
 0x7fe   : > { %7727 = vmatpush.bf16.msra.mxu0 %v11450_v15 }
 0x7ff   : > { %v7590_v23 = vmul.f32 0.01, %v7377_v28  ;;  %vm7588_vm4 = vcmp.ge.f32.partialorder %v7377_v28, 0.0  ;;  %7740 = vmatpush.bf16.msra.mxu1 %v11458_v18 }
 0x801   : > { %v7592_v57 = vsel %vm7588_vm4, %v7377_v28, %v7590_v23 }
 0x802   : > { %7728 = vmatpush.bf16.msra.mxu0 %v11449_v39  ;;  %v7365_v44 = vpop.f32.mrf.mxu2  ;;  %v7594_v42 = vpack.c.bf16 %v7592_v57, %v7592_v57  ;;  %v7596_v57 = vld [vmem:[#allocation3] sm:$0x3] }
 0x803   : > { %v7378_v38 = vpop.f32.mrf.mxu3  ;;  %7741 = vmatpush.bf16.msra.mxu1 %v11457_v3 }
 0x806   : > { %7729 = vmatpush.bf16.msra.mxu0 %v11448_v56 }
 0x807   : > { %7742 = vmatpush.bf16.msra.mxu1 %v11456_v25 }
 0x80a   : > { %7730 = vmatpush.bf16.msra.mxu0 %v11447_v19 }
 0x80b   : > { %7743 = vmatpush.bf16.msra.mxu1 %v11455_v53 }
 0x80e   : > { %7731 = vmatpush.bf16.msra.mxu0 %v11446_v49 }
 0x80f   : > { %7744 = vmatpush.bf16.msra.mxu1 %v11454_v31 }
 0x812   : > { %7732 = vmatpush.bf16.msra.mxu0 %v11445_v45  ;;  %v7389_v35 = vpop.f32.mrf.mxu0 }
 0x813   : > { %v7390_v47 = vadd.f32 %v7389_v35, %v5853_v46  ;;  %v7402_v6 = vpop.f32.mrf.mxu1  ;;  %7745 = vmatpush.bf16.msra.mxu1 %v11453_v12 }
 0x815   : > { %7733 = vmatmul.bf16.vlgmr.msra.gmra.mxu0 %v7594_v42  ;;  %v7403_v43 = vadd.f32 %v7402_v6, %v7390_v47 }
 0x81a   : > { %v7415_v33 = vpop.f32.mrf.mxu2  ;;  %v7391_v62 = vpop.f32.mrf.mxu0 }
 0x81b   : > { %v7416_v2 = vadd.f32 %v7415_v33, %v7403_v43  ;;  %v7428_v63 = vpop.f32.mrf.mxu3  ;;  %v7404_v5 = vpop.f32.mrf.mxu1 }
 0x81d   : > { %v7429_v14 = vadd.f32 %v7428_v63, %v7416_v2 }
 0x822   : > { %v7417_v41 = vpop.f32.mrf.mxu2 }
 0x823   : > { %v7430_v4 = vpop.f32.mrf.mxu3 }
 0x832   : > { %v7441_v32 = vpop.f32.mrf.mxu0 }
 0x833   : > { %v7454_v24 = vpop.f32.mrf.mxu1  ;;  %v7442_v37 = vadd.f32 %v7441_v32, %v7429_v14 }
 0x835   : > { %v7455_v11 = vadd.f32 %v7454_v24, %v7442_v37 }
 0x83a   : > { %v7467_v55 = vpop.f32.mrf.mxu2  ;;  %v7443_v7 = vpop.f32.mrf.mxu0 }
 0x83b   : > { %v7480_v30 = vpop.f32.mrf.mxu3  ;;  %v7456_v8 = vpop.f32.mrf.mxu1  ;;  %v7468_v21 = vadd.f32 %v7467_v55, %v7455_v11 }
 0x83d   : > { %v7481_v17 = vadd.f32 %v7480_v30, %v7468_v21 }
 0x842   : > { %v7469_v58 = vpop.f32.mrf.mxu2 }
 0x843   : > { %v7482_v22 = vpop.f32.mrf.mxu3 }
 0x852   : > { %v7493_v0 = vpop.f32.mrf.mxu0 }
 0x853   : > { %v7506_v60 = vpop.f32.mrf.mxu1  ;;  %v7494_v54 = vadd.f32 %v7493_v0, %v7481_v17 }
 0x855   : > { %v7507_v15 = vadd.f32 %v7506_v60, %v7494_v54 }
 0x85a   : > { %v7519_v13 = vpop.f32.mrf.mxu2  ;;  %v7495_v20 = vpop.f32.mrf.mxu0 }
 0x85b   : > { %v7532_v48 = vpop.f32.mrf.mxu3  ;;  %v7508_v51 = vpop.f32.mrf.mxu1  ;;  %v7520_v1 = vadd.f32 %v7519_v13, %v7507_v15 }
 0x85d   : > { %v7533_v61 = vadd.f32 %v7532_v48, %v7520_v1 }
 0x862   : > { %v7521_v34 = vpop.f32.mrf.mxu2 }
 0x863   : > { %v7534_v50 = vpop.f32.mrf.mxu3 }
 0x872   : > { %v7545_v39 = vpop.f32.mrf.mxu0 }
 0x873   : > { %v7558_v16 = vpop.f32.mrf.mxu1  ;;  %v7546_v36 = vadd.f32 %v7545_v39, %v7533_v61 }
 0x875   : > { %v7559_v56 = vadd.f32 %v7558_v16, %v7546_v36 }
 0x87a   : > { %v7571_v52 = vpop.f32.mrf.mxu2  ;;  %v7547_v40 = vpop.f32.mrf.mxu0 }
 0x87b   : > { %v7572_v9 = vadd.f32 %v7571_v52, %v7559_v56  ;;  %v7584_v29 = vpop.f32.mrf.mxu3  ;;  %v7560_v27 = vpop.f32.mrf.mxu1 }
 0x87d   : > { %v7585_v19 = vadd.f32 %v7584_v29, %v7572_v9 }
 0x87f   : > { %vm7589_vm15 = vcmp.ge.f32.partialorder %v7585_v19, 0.0  ;;  %v7591_v26 = vmul.f32 0.01, %v7585_v19 }
 0x881   : > { %v7593_v28 = vsel %vm7589_vm15, %v7585_v19, %v7591_v26 }
 0x882   : > { %v7595_v49 = vpack.c.bf16 %v7593_v28, %v7593_v28  ;;  %v7573_v23 = vpop.f32.mrf.mxu2 }
 0x883   : > { %v7586_v44 = vpop.f32.mrf.mxu3 }
 0x884   : > { %7746 = vmatmul.bf16.vlgmr.msra.gmra.mxu1 %v7595_v49 }
 0x892   : > { %v7734_v38 = vpop.f32.mrf.mxu0 }
 0x89a   : > { %v7736_v45 = vpop.f32.mrf.mxu0 }
 0x901   : > { %v7747_v42 = vpop.f32.mrf.mxu1 }
 0x902   : > { %v7748_v46 = vadd.f32 %v7747_v42, %v7734_v38 }
 0x904   : > { %v7751_v35 = vadd.f32 %v7748_v46, %v7596_v57 }
 0x905   : > { %7756 = sbr.rel (%p10761_p1) target bundleno = 2321 (0x911), region = 128 }
 0x906   : > { %7752 = vst [vmem:[#allocation3] sm:$0x3] %v7751_v35 }
 0x909   : > { %v7749_v47 = vpop.f32.mrf.mxu1 }
 0x90a   : > { %v11632_v43 = vld [vmem:[#allocation21] ss:$0 sm:$0xff] }
 0x90d   : > { %v7757_v6 = vld [vmem:[#allocation3] sm:$0x3] }
 0x90e   : > { %v7762_v33 = vadd.f32 %v11632_v43, %v7757_v6 }
 0x910   : > { %7763 = vst [vmem:[#allocation22] sm:$0x3] %v7762_v33 }
 0x911 PF: > { %p11564_p3 = scmp.eq.s32.totalorder %s12202_s15, 3  ;;  %s12107_s29 = smov [#allocation22]  }
 0x912   : > { %s7770_s27 = sshll.u32 %s12107_s29, 4  ;;  %s14418_s23 = sld [smem:[#allocation41_spill]]  ;;  %s7771_s27 = int_to_ptr.vmem [resolvable:$true] %s7770_s27 }
 0x918   : > { %s7772_s20 = sshll.u32 %s14418_s23, 4  ;;  %s7773_s20 = int_to_ptr.hbm [resolvable:$true] %s7772_s20 }
 0x919   : > { %11504 = dma.vmem_to_hbm [thread:$0]  (%p11564_p3), %s7771_s27, 32, %s7773_s20, [#allocation6]  }
 0x91a   : > { %12066 = dma.done.wait (%p11564_p3), [#allocation6], 32  }
 0x91b   : > { %12068 = vsyncadd (%p11564_p3), [#allocation6], 4294967264 }
 0x91c PF: > { %s14419_s28 = sld [smem:[#allocation33_spill]] }
 0x91d   : > { %s14420_s25 = sld [smem:[#allocation31_spill]] }
 0x91e   : > { %s14421_s26 = sld [smem:[#allocation32_spill]] }
 0x91f   : > { %s14422_s27 = sld [smem:[#allocation34_spill]] }
 0x922   : > { %p26_p4 = scmp.ge.s32.totalorder %s14419_s28, 6  }
 0x924   :  { %28 = sbr.rel (!%p26_p4) target bundleno = 14 (0xe), region = 208 }
 0x929   :  { %7786 = vsyncpa [#allocation5], 1 }
 0x92a   :  { %7788 = vsyncpa [#allocation5 + $0x1], 1 }
 0x92b   :  { %7789 = vsyncpa [#allocation8], 1 }
 0x92c   :  { %7790 = vsyncpa [#allocation11], 1 }
 0x92d   :  { %7791 = vsyncpa [#allocation14], 1 }
 0x92e   :  { %7792 = vsyncpa [#allocation17], 1 }
 0x92f   :  { %7793 = vsyncpa [#allocation6], 1 }
 0x930   :  { %7795 = vsyncpa [#allocation6 + $0x1], 1 }

</bundles_post_ra>
